<compile_context>
chip_gen: v7x
topology: tpu7x:2x2x1
jax: 0.10.0
libtpu: 0.0.40
codegen_flags: <defaults>
</compile_context>

<pallas_src>
import functools

import jax
import jax.numpy as jnp
from jax.experimental import pallas as pl
from jax.experimental.pallas import tpu as pltpu


def _round_up(x, m):
    return ((x + m - 1) // m) * m


def _model2d_kernel(x_ref, wc_ref, bc_ref, pool_ref, wcls_ref, bcls_ref,
                    pred_ref, feat_ref, *, shift_bases):
    # x_ref:    (TB*R_pad, C)    padded NHWC image, spatial rows flattened
    # wc_ref:   (9, C, F_pad)    conv weight, one (C, F_pad) slab per 3x3 tap
    # bc_ref:   (1, F_pad)       conv bias (zero-padded)
    # pool_ref: (TB, L)          pooling matrix (masks invalid rows, /HW)
    # wcls_ref: (F_pad, NC_pad)  classifier weight (zero-padded)
    # bcls_ref: (1, NC_pad)      classifier bias (zero-padded)
    # pred_ref: (TB, NC_pad)     logits (lane-dense, padded)
    # feat_ref: (TB, F_pad)      pooled features (lane-dense, padded)
    L = pool_ref.shape[1]
    f_pad = wc_ref.shape[2]

    # 3x3 conv as 9 statically-shifted matmuls accumulated in f32
    # (bf16 MXU inputs, f32 accumulation).
    acc = jnp.zeros((L, f_pad), jnp.float32)
    for tap, base in enumerate(shift_bases):
        xs = x_ref[pl.ds(base, L), :].astype(jnp.bfloat16)          # (L, C)
        acc = acc + jnp.dot(xs, wc_ref[tap],
                            preferred_element_type=jnp.float32)      # (L, F_pad)

    conv = jnp.maximum(acc + bc_ref[...], 0.0)                        # bias + ReLU

    # Global average pool over the valid H*W positions of each batch element:
    # the pooling matrix zeroes padded / out-of-image rows and divides by HW.
    feat = jnp.dot(pool_ref[...], conv,
                   preferred_element_type=jnp.float32)                # (TB, F_pad)
    feat_ref[...] = feat.astype(feat_ref.dtype)

    # Batched classifier.
    pred = jnp.dot(feat, wcls_ref[...],
                   preferred_element_type=jnp.float32) + bcls_ref[...]
    pred_ref[...] = pred.astype(pred_ref.dtype)


@functools.partial(jax.jit, static_argnames=("get_features", "block_batch"))
def model2d_forward(x_nchw, params, get_features=False, block_batch=None):
    """Forward pass of Model2D.

    x_nchw: (B, C, H, W) float32, PyTorch NCHW convention.
    params: dict with conv_w (3,3,C,F), conv_b (F,), cls_w (F,NC), cls_b (NC,)
    """
    B, C, H, W = x_nchw.shape
    F = params["conv_w"].shape[-1]
    NC = params["cls_w"].shape[-1]

    F_pad = _round_up(F, 128)          # lane-dense features
    NC_pad = _round_up(NC, 128)        # lane-dense logits

    Hp, Wp = H + 2, W + 2
    R = Hp * Wp                        # flattened padded-spatial rows / image
    R_pad = _round_up(R, 8)            # keep block rows sublane-aligned

    # Batch tile: big enough to amortize per-step overhead and give the conv
    # matmul a large M; larger B yields multiple grid steps (megacore-able).
    TB = max(1, min(block_batch if block_batch is not None else 8, B))
    B_pad = _round_up(B, TB)
    n_blocks = B_pad // TB

    # --- glue: NCHW -> NHWC, zero-pad spatial (3x3 / pad=1), flatten rows ---
    x = jnp.transpose(x_nchw, (0, 2, 3, 1)).astype(jnp.float32)     # (B,H,W,C)
    x = jnp.pad(x, ((0, B_pad - B), (1, 1), (1, 1), (0, 0)))        # (B_pad,Hp,Wp,C)
    x = x.reshape(B_pad, R, C)
    x = jnp.pad(x, ((0, 0), (0, R_pad - R), (0, 0)))
    x = x.reshape(B_pad * R_pad, C)                                  # (B_pad*R_pad, C)

    # --- parameters: zero-pad feature / class dims to full 128-lane width ---
    wc = params["conv_w"].reshape(9, C, F).astype(jnp.float32)
    wc = jnp.pad(wc, ((0, 0), (0, 0), (0, F_pad - F))).astype(jnp.bfloat16)
    bc = jnp.pad(params["conv_b"].astype(jnp.float32),
                 (0, F_pad - F)).reshape(1, F_pad)
    wcls = jnp.pad(params["cls_w"].astype(jnp.float32),
                   ((0, F_pad - F), (0, NC_pad - NC)))
    bcls = jnp.pad(params["cls_b"].astype(jnp.float32),
                   (0, NC_pad - NC)).reshape(1, NC_pad)

    # --- shifted-matmul conv bookkeeping ------------------------------------
    # For tap (di, dj), block row `base + s` holds the padded pixel feeding
    # flat output position s; valid outputs are s = t*R_pad + h*Wp + w with
    # h < H, w < W (everything else is masked by the pooling matrix).
    shift_bases = tuple(di * Wp + dj for di in range(3) for dj in range(3))
    L = (TB - 1) * R_pad + (H - 1) * Wp + W      # covers all valid outputs

    s = jnp.arange(L, dtype=jnp.int32)
    r = s % R_pad
    valid = (r < R) & ((r // Wp) < H) & ((r % Wp) < W)
    owner = s // R_pad
    pool = ((owner[None, :] == jnp.arange(TB, dtype=jnp.int32)[:, None])
            & valid[None, :]).astype(jnp.float32) / float(H * W)     # (TB, L)

    kernel = functools.partial(_model2d_kernel, shift_bases=shift_bases)

    pred_p, feat_p = pl.pallas_call(
        kernel,
        out_shape=(jax.ShapeDtypeStruct((B_pad, NC_pad), jnp.float32),
                   jax.ShapeDtypeStruct((B_pad, F_pad), jnp.float32)),
        grid_spec=pltpu.PrefetchScalarGridSpec(
            num_scalar_prefetch=0,
            grid=(n_blocks,),
            in_specs=[
                pl.BlockSpec((TB * R_pad, C), lambda b: (b, 0)),
                pl.BlockSpec((9, C, F_pad),   lambda b: (0, 0, 0)),
                pl.BlockSpec((1, F_pad),      lambda b: (0, 0)),
                pl.BlockSpec((TB, L),         lambda b: (0, 0)),
                pl.BlockSpec((F_pad, NC_pad), lambda b: (0, 0)),
                pl.BlockSpec((1, NC_pad),     lambda b: (0, 0)),
            ],
            out_specs=[
                pl.BlockSpec((TB, NC_pad), lambda b: (b, 0)),
                pl.BlockSpec((TB, F_pad),  lambda b: (b, 0)),
            ],
        ),
        compiler_params=pltpu.CompilerParams(
            dimension_semantics=("parallel",)),
    )(x, wc, bc, pool, wcls, bcls)

    pred = pred_p[:B, :NC]
    feat = feat_p[:B, :F]
    if get_features:
        return pred, feat
    return pred


def model2d_reference(x_nchw, params):
    """Pure-JAX reference (conv inputs rounded to bf16, like the kernel)."""
    x = jnp.transpose(x_nchw, (0, 2, 3, 1)).astype(jnp.float32)
    x = x.astype(jnp.bfloat16).astype(jnp.float32)
    w = params["conv_w"].astype(jnp.bfloat16).astype(jnp.float32)
    conv = jax.lax.conv_general_dilated(
        x, w, window_strides=(1, 1), padding="SAME",
        dimension_numbers=("NHWC", "HWIO", "NHWC"))
    conv = jnp.maximum(conv + params["conv_b"], 0.0)
    feat = conv.mean(axis=(1, 2))
    pred = feat @ params["cls_w"] + params["cls_b"]
    return pred, feat


def init_params(key, in_channels, feature_dim, num_class):
    k1, k2, k3, k4 = jax.random.split(key, 4)
    return {
        "conv_w": 0.1 * jax.random.normal(k1, (3, 3, in_channels, feature_dim),
                                          jnp.float32),
        "conv_b": 0.1 * jax.random.normal(k2, (feature_dim,), jnp.float32),
        "cls_w": 0.1 * jax.random.normal(k3, (feature_dim, num_class),
                                         jnp.float32),
        "cls_b": 0.1 * jax.random.normal(k4, (num_class,), jnp.float32),
    }


if __name__ == "__main__":
    B, C, H, W = 2, 4, 16, 16
    FEATURE_DIM, NUM_CLASS = 32, 1

    key = jax.random.PRNGKey(0)
    kx, kp = jax.random.split(key)
    x = jax.random.normal(kx, (B, C, H, W), jnp.float32)      # NCHW input
    params = init_params(kp, C, FEATURE_DIM, NUM_CLASS)

    pred, feat = model2d_forward(x, params, get_features=True)
    jax.block_until_ready((pred, feat))
    assert pred.shape == (B, NUM_CLASS) and feat.shape == (B, FEATURE_DIM)

    pred_ref, feat_ref = model2d_reference(x, params)
    assert jnp.allclose(pred, pred_ref, atol=1e-2, rtol=1e-2), "pred mismatch"
    assert jnp.allclose(feat, feat_ref, atol=1e-2, rtol=1e-2), "feat mismatch"
    print("KERNEL_OK")
</pallas_src>

<mosaic_0001>
module attributes {stable_mosaic.version = 11 : i64} {
  func.func @_model2d_kernel(%arg0: i32, %arg1: memref<656x4xf32, #tpu.memory_space<vmem>>, %arg2: memref<9x4x128xbf16, #tpu.memory_space<vmem>>, %arg3: memref<1x128xf32, #tpu.memory_space<vmem>>, %arg4: memref<2x614xf32, #tpu.memory_space<vmem>>, %arg5: memref<128x128xf32, #tpu.memory_space<vmem>>, %arg6: memref<1x128xf32, #tpu.memory_space<vmem>>, %arg7: memref<2x128xf32, #tpu.memory_space<vmem>>, %arg8: memref<2x128xf32, #tpu.memory_space<vmem>>) attributes {dimension_semantics = [#tpu.dimension_semantics<parallel>], iteration_bounds = array<i64: 1>, scalar_prefetch = 0 : i64, scratch_operands = 0 : i64, tpu.core_type = #tpu.core_type<tc>, window_params = [{transform_indices = @transform_0, window_bounds = array<i64: 656, 4>}, {pipeline_mode = #tpu.pipeline_mode<synchronous>, transform_indices = @transform_1, window_bounds = array<i64: 9, 4, 128>}, {pipeline_mode = #tpu.pipeline_mode<synchronous>, transform_indices = @transform_2, window_bounds = array<i64: 1, 128>}, {pipeline_mode = #tpu.pipeline_mode<synchronous>, transform_indices = @transform_3, window_bounds = array<i64: 2, 614>}, {pipeline_mode = #tpu.pipeline_mode<synchronous>, transform_indices = @transform_4, window_bounds = array<i64: 128, 128>}, {pipeline_mode = #tpu.pipeline_mode<synchronous>, transform_indices = @transform_5, window_bounds = array<i64: 1, 128>}, {transform_indices = @transform_6, window_bounds = array<i64: 2, 128>}, {transform_indices = @transform_7, window_bounds = array<i64: 2, 128>}]} {
    %cst = arith.constant 0.000000e+00 : f32
    %0 = vector.broadcast %cst : f32 to vector<614x128xf32>
    %c0 = arith.constant 0 : index
    %c0_0 = arith.constant 0 : index
    %1 = vector.load %arg1[%c0, %c0_0] : memref<656x4xf32, #tpu.memory_space<vmem>>, vector<614x4xf32>
    %2 = arith.truncf %1 : vector<614x4xf32> to vector<614x4xbf16>
    %c0_1 = arith.constant 0 : index
    %c0_2 = arith.constant 0 : index
    %c0_3 = arith.constant 0 : index
    %3 = vector.load %arg2[%c0_1, %c0_2, %c0_3] : memref<9x4x128xbf16, #tpu.memory_space<vmem>>, vector<1x4x128xbf16>
    %4 = vector.shape_cast %3 : vector<1x4x128xbf16> to vector<4x128xbf16>
    %cst_4 = arith.constant dense<0.000000e+00> : vector<614x128xf32>
    %5 = tpu.matmul %2, %4, %cst_4 {dimension_numbers = #tpu.dot_dimension_numbers<[1], [0], [0], [1], [0, 0, 1, 1], [], []>} : vector<614x4xbf16>, vector<4x128xbf16>, vector<614x128xf32> -> vector<614x128xf32>
    %6 = arith.addf %0, %5 : vector<614x128xf32>
    %c1 = arith.constant 1 : index
    %c0_5 = arith.constant 0 : index
    %7 = vector.load %arg1[%c1, %c0_5] : memref<656x4xf32, #tpu.memory_space<vmem>>, vector<614x4xf32>
    %8 = arith.truncf %7 : vector<614x4xf32> to vector<614x4xbf16>
    %c1_6 = arith.constant 1 : index
    %c0_7 = arith.constant 0 : index
    %c0_8 = arith.constant 0 : index
    %9 = vector.load %arg2[%c1_6, %c0_7, %c0_8] : memref<9x4x128xbf16, #tpu.memory_space<vmem>>, vector<1x4x128xbf16>
    %10 = vector.shape_cast %9 : vector<1x4x128xbf16> to vector<4x128xbf16>
    %cst_9 = arith.constant dense<0.000000e+00> : vector<614x128xf32>
    %11 = tpu.matmul %8, %10, %cst_9 {dimension_numbers = #tpu.dot_dimension_numbers<[1], [0], [0], [1], [0, 0, 1, 1], [], []>} : vector<614x4xbf16>, vector<4x128xbf16>, vector<614x128xf32> -> vector<614x128xf32>
    %12 = arith.addf %6, %11 : vector<614x128xf32>
    %c2 = arith.constant 2 : index
    %c0_10 = arith.constant 0 : index
    %13 = vector.load %arg1[%c2, %c0_10] : memref<656x4xf32, #tpu.memory_space<vmem>>, vector<614x4xf32>
    %14 = arith.truncf %13 : vector<614x4xf32> to vector<614x4xbf16>
    %c2_11 = arith.constant 2 : index
    %c0_12 = arith.constant 0 : index
    %c0_13 = arith.constant 0 : index
    %15 = vector.load %arg2[%c2_11, %c0_12, %c0_13] : memref<9x4x128xbf16, #tpu.memory_space<vmem>>, vector<1x4x128xbf16>
    %16 = vector.shape_cast %15 : vector<1x4x128xbf16> to vector<4x128xbf16>
    %cst_14 = arith.constant dense<0.000000e+00> : vector<614x128xf32>
    %17 = tpu.matmul %14, %16, %cst_14 {dimension_numbers = #tpu.dot_dimension_numbers<[1], [0], [0], [1], [0, 0, 1, 1], [], []>} : vector<614x4xbf16>, vector<4x128xbf16>, vector<614x128xf32> -> vector<614x128xf32>
    %18 = arith.addf %12, %17 : vector<614x128xf32>
    %c18 = arith.constant 18 : index
    %c0_15 = arith.constant 0 : index
    %19 = vector.load %arg1[%c18, %c0_15] : memref<656x4xf32, #tpu.memory_space<vmem>>, vector<614x4xf32>
    %20 = arith.truncf %19 : vector<614x4xf32> to vector<614x4xbf16>
    %c3 = arith.constant 3 : index
    %c0_16 = arith.constant 0 : index
    %c0_17 = arith.constant 0 : index
    %21 = vector.load %arg2[%c3, %c0_16, %c0_17] : memref<9x4x128xbf16, #tpu.memory_space<vmem>>, vector<1x4x128xbf16>
    %22 = vector.shape_cast %21 : vector<1x4x128xbf16> to vector<4x128xbf16>
    %cst_18 = arith.constant dense<0.000000e+00> : vector<614x128xf32>
    %23 = tpu.matmul %20, %22, %cst_18 {dimension_numbers = #tpu.dot_dimension_numbers<[1], [0], [0], [1], [0, 0, 1, 1], [], []>} : vector<614x4xbf16>, vector<4x128xbf16>, vector<614x128xf32> -> vector<614x128xf32>
    %24 = arith.addf %18, %23 : vector<614x128xf32>
    %c19 = arith.constant 19 : index
    %c0_19 = arith.constant 0 : index
    %25 = vector.load %arg1[%c19, %c0_19] : memref<656x4xf32, #tpu.memory_space<vmem>>, vector<614x4xf32>
    %26 = arith.truncf %25 : vector<614x4xf32> to vector<614x4xbf16>
    %c4 = arith.constant 4 : index
    %c0_20 = arith.constant 0 : index
    %c0_21 = arith.constant 0 : index
    %27 = vector.load %arg2[%c4, %c0_20, %c0_21] : memref<9x4x128xbf16, #tpu.memory_space<vmem>>, vector<1x4x128xbf16>
    %28 = vector.shape_cast %27 : vector<1x4x128xbf16> to vector<4x128xbf16>
    %cst_22 = arith.constant dense<0.000000e+00> : vector<614x128xf32>
    %29 = tpu.matmul %26, %28, %cst_22 {dimension_numbers = #tpu.dot_dimension_numbers<[1], [0], [0], [1], [0, 0, 1, 1], [], []>} : vector<614x4xbf16>, vector<4x128xbf16>, vector<614x128xf32> -> vector<614x128xf32>
    %30 = arith.addf %24, %29 : vector<614x128xf32>
    %c20 = arith.constant 20 : index
    %c0_23 = arith.constant 0 : index
    %31 = vector.load %arg1[%c20, %c0_23] : memref<656x4xf32, #tpu.memory_space<vmem>>, vector<614x4xf32>
    %32 = arith.truncf %31 : vector<614x4xf32> to vector<614x4xbf16>
    %c5 = arith.constant 5 : index
    %c0_24 = arith.constant 0 : index
    %c0_25 = arith.constant 0 : index
    %33 = vector.load %arg2[%c5, %c0_24, %c0_25] : memref<9x4x128xbf16, #tpu.memory_space<vmem>>, vector<1x4x128xbf16>
    %34 = vector.shape_cast %33 : vector<1x4x128xbf16> to vector<4x128xbf16>
    %cst_26 = arith.constant dense<0.000000e+00> : vector<614x128xf32>
    %35 = tpu.matmul %32, %34, %cst_26 {dimension_numbers = #tpu.dot_dimension_numbers<[1], [0], [0], [1], [0, 0, 1, 1], [], []>} : vector<614x4xbf16>, vector<4x128xbf16>, vector<614x128xf32> -> vector<614x128xf32>
    %36 = arith.addf %30, %35 : vector<614x128xf32>
    %c36 = arith.constant 36 : index
    %c0_27 = arith.constant 0 : index
    %37 = vector.load %arg1[%c36, %c0_27] : memref<656x4xf32, #tpu.memory_space<vmem>>, vector<614x4xf32>
    %38 = arith.truncf %37 : vector<614x4xf32> to vector<614x4xbf16>
    %c6 = arith.constant 6 : index
    %c0_28 = arith.constant 0 : index
    %c0_29 = arith.constant 0 : index
    %39 = vector.load %arg2[%c6, %c0_28, %c0_29] : memref<9x4x128xbf16, #tpu.memory_space<vmem>>, vector<1x4x128xbf16>
    %40 = vector.shape_cast %39 : vector<1x4x128xbf16> to vector<4x128xbf16>
    %cst_30 = arith.constant dense<0.000000e+00> : vector<614x128xf32>
    %41 = tpu.matmul %38, %40, %cst_30 {dimension_numbers = #tpu.dot_dimension_numbers<[1], [0], [0], [1], [0, 0, 1, 1], [], []>} : vector<614x4xbf16>, vector<4x128xbf16>, vector<614x128xf32> -> vector<614x128xf32>
    %42 = arith.addf %36, %41 : vector<614x128xf32>
    %c37 = arith.constant 37 : index
    %c0_31 = arith.constant 0 : index
    %43 = vector.load %arg1[%c37, %c0_31] : memref<656x4xf32, #tpu.memory_space<vmem>>, vector<614x4xf32>
    %44 = arith.truncf %43 : vector<614x4xf32> to vector<614x4xbf16>
    %c7 = arith.constant 7 : index
    %c0_32 = arith.constant 0 : index
    %c0_33 = arith.constant 0 : index
    %45 = vector.load %arg2[%c7, %c0_32, %c0_33] : memref<9x4x128xbf16, #tpu.memory_space<vmem>>, vector<1x4x128xbf16>
    %46 = vector.shape_cast %45 : vector<1x4x128xbf16> to vector<4x128xbf16>
    %cst_34 = arith.constant dense<0.000000e+00> : vector<614x128xf32>
    %47 = tpu.matmul %44, %46, %cst_34 {dimension_numbers = #tpu.dot_dimension_numbers<[1], [0], [0], [1], [0, 0, 1, 1], [], []>} : vector<614x4xbf16>, vector<4x128xbf16>, vector<614x128xf32> -> vector<614x128xf32>
    %48 = arith.addf %42, %47 : vector<614x128xf32>
    %c38 = arith.constant 38 : index
    %c0_35 = arith.constant 0 : index
    %49 = vector.load %arg1[%c38, %c0_35] : memref<656x4xf32, #tpu.memory_space<vmem>>, vector<614x4xf32>
    %50 = arith.truncf %49 : vector<614x4xf32> to vector<614x4xbf16>
    %c8 = arith.constant 8 : index
    %c0_36 = arith.constant 0 : index
    %c0_37 = arith.constant 0 : index
    %51 = vector.load %arg2[%c8, %c0_36, %c0_37] : memref<9x4x128xbf16, #tpu.memory_space<vmem>>, vector<1x4x128xbf16>
    %52 = vector.shape_cast %51 : vector<1x4x128xbf16> to vector<4x128xbf16>
    %cst_38 = arith.constant dense<0.000000e+00> : vector<614x128xf32>
    %53 = tpu.matmul %50, %52, %cst_38 {dimension_numbers = #tpu.dot_dimension_numbers<[1], [0], [0], [1], [0, 0, 1, 1], [], []>} : vector<614x4xbf16>, vector<4x128xbf16>, vector<614x128xf32> -> vector<614x128xf32>
    %54 = arith.addf %48, %53 : vector<614x128xf32>
    %c0_39 = arith.constant 0 : index
    %c0_40 = arith.constant 0 : index
    %55 = vector.load %arg3[%c0_39, %c0_40] : memref<1x128xf32, #tpu.memory_space<vmem>>, vector<1x128xf32>
    %56 = vector.broadcast %55 : vector<1x128xf32> to vector<614x128xf32>
    %57 = arith.addf %54, %56 : vector<614x128xf32>
    %cst_41 = arith.constant 0.000000e+00 : f32
    %58 = vector.broadcast %cst_41 : f32 to vector<614x128xf32>
    %59 = arith.maximumf %57, %58 : vector<614x128xf32>
    %c0_42 = arith.constant 0 : index
    %c0_43 = arith.constant 0 : index
    %60 = vector.load %arg4[%c0_42, %c0_43] : memref<2x614xf32, #tpu.memory_space<vmem>>, vector<2x614xf32>
    %cst_44 = arith.constant dense<0.000000e+00> : vector<2x128xf32>
    %61 = tpu.matmul %60, %59, %cst_44 {dimension_numbers = #tpu.dot_dimension_numbers<[1], [0], [0], [1], [0, 0, 1, 1], [], []>} : vector<2x614xf32>, vector<614x128xf32>, vector<2x128xf32> -> vector<2x128xf32>
    %c0_45 = arith.constant 0 : index
    %c0_46 = arith.constant 0 : index
    %62 = vector.load %arg8[%c0_45, %c0_46] : memref<2x128xf32, #tpu.memory_space<vmem>>, vector<2x128xf32>
    tpu.vector_store %arg8[%c0_45, %c0_46], %61 {strides = array<i32>} : memref<2x128xf32, #tpu.memory_space<vmem>>, vector<2x128xf32>,
    %c0_47 = arith.constant 0 : index
    %c0_48 = arith.constant 0 : index
    %63 = vector.load %arg5[%c0_47, %c0_48] : memref<128x128xf32, #tpu.memory_space<vmem>>, vector<128x128xf32>
    %cst_49 = arith.constant dense<0.000000e+00> : vector<2x128xf32>
    %64 = tpu.matmul %61, %63, %cst_49 {dimension_numbers = #tpu.dot_dimension_numbers<[1], [0], [0], [1], [0, 0, 1, 1], [], []>} : vector<2x128xf32>, vector<128x128xf32>, vector<2x128xf32> -> vector<2x128xf32>
    %c0_50 = arith.constant 0 : index
    %c0_51 = arith.constant 0 : index
    %65 = vector.load %arg6[%c0_50, %c0_51] : memref<1x128xf32, #tpu.memory_space<vmem>>, vector<1x128xf32>
    %66 = vector.broadcast %65 : vector<1x128xf32> to vector<2x128xf32>
    %67 = arith.addf %64, %66 : vector<2x128xf32>
    %c0_52 = arith.constant 0 : index
    %c0_53 = arith.constant 0 : index
    %68 = vector.load %arg7[%c0_52, %c0_53] : memref<2x128xf32, #tpu.memory_space<vmem>>, vector<2x128xf32>
    tpu.vector_store %arg7[%c0_52, %c0_53], %67 {strides = array<i32>} : memref<2x128xf32, #tpu.memory_space<vmem>>, vector<2x128xf32>,
    return
  }
  func.func @transform_0(%arg0: i32) -> (i32, i32) {
    %c0_i32 = arith.constant 0 : i32
    %c0_i32_0 = arith.constant 0 : i32
    return %arg0, %c0_i32 : i32, i32
  }
  func.func @transform_1(%arg0: i32) -> (i32, i32, i32) {
    %c0_i32 = arith.constant 0 : i32
    %c0_i32_0 = arith.constant 0 : i32
    %c0_i32_1 = arith.constant 0 : i32
    %c0_i32_2 = arith.constant 0 : i32
    return %c0_i32, %c0_i32_0, %c0_i32_1 : i32, i32, i32
  }
  func.func @transform_2(%arg0: i32) -> (i32, i32) {
    %c0_i32 = arith.constant 0 : i32
    %c0_i32_0 = arith.constant 0 : i32
    %c0_i32_1 = arith.constant 0 : i32
    return %c0_i32, %c0_i32_0 : i32, i32
  }
  func.func @transform_3(%arg0: i32) -> (i32, i32) {
    %c0_i32 = arith.constant 0 : i32
    %c0_i32_0 = arith.constant 0 : i32
    %c0_i32_1 = arith.constant 0 : i32
    return %c0_i32, %c0_i32_0 : i32, i32
  }
  func.func @transform_4(%arg0: i32) -> (i32, i32) {
    %c0_i32 = arith.constant 0 : i32
    %c0_i32_0 = arith.constant 0 : i32
    %c0_i32_1 = arith.constant 0 : i32
    return %c0_i32, %c0_i32_0 : i32, i32
  }
  func.func @transform_5(%arg0: i32) -> (i32, i32) {
    %c0_i32 = arith.constant 0 : i32
    %c0_i32_0 = arith.constant 0 : i32
    %c0_i32_1 = arith.constant 0 : i32
    return %c0_i32, %c0_i32_0 : i32, i32
  }
  func.func @transform_6(%arg0: i32) -> (i32, i32) {
    %c0_i32 = arith.constant 0 : i32
    %c0_i32_0 = arith.constant 0 : i32
    return %arg0, %c0_i32 : i32, i32
  }
  func.func @transform_7(%arg0: i32) -> (i32, i32) {
    %c0_i32 = arith.constant 0 : i32
    %c0_i32_0 = arith.constant 0 : i32
    return %arg0, %c0_i32 : i32, i32
  }
}

</mosaic_0001>

<bundles_post_ra>
// kernel: model2d_forward.1
= control target key start
LH: loop header
LB: loop body
LE: loop exit
PB: predicated region body
PF: predicated region fallthrough
CT: control target
= control target key end

     0   :  { %vm380_vm0 = vcmask 1041408   ;;  %v14020_v2 = vmov 0.0   ;;  %vm262_vm1 = vcmask 31744   ;;  %vm8779_vm2 = vmmov 0   ;;  %s14012_s0 = inlined_call_operand.vmem [shape: f32[656,4], index: 0, kind: input, shape index: {}]   ;;  %s14013_s1 = inlined_call_operand.vmem [shape: bf16[9,4,128], index: 1, kind: input, shape index: {}]   ;;  %s14014_s2 = inlined_call_operand.vmem [shape: f32[1,128], index: 2, kind: input, shape index: {}]   ;;  %s14015_s3 = inlined_call_operand.vmem [shape: f32[2,614], index: 3, kind: input, shape index: {}]   ;;  %s14016_s4 = inlined_call_operand.vmem [shape: f32[128,128], index: 4, kind: input, shape index: {}]   ;;  %s14017_s5 = inlined_call_operand.vmem [shape: f32[1,128], index: 5, kind: input, shape index: {}]   ;;  %s14018_s6 = inlined_call_operand.vmem [shape: f32[2,128], index: 6, kind: output, shape index: {0}]   ;;  %s14019_s7 = inlined_call_operand.hbm [shape: f32[2,128], index: 7, kind: output, shape index: {1}]  }
   0x1   :  { %v6328_v0 = vld [vmem:[%s14013_s1 + $0x2] sm:$0x3]  ;;  %7153 = vmatprep.subr.bf16.mxu0 %v14020_v2  ;;  %8745 = vmatprep.subr.bf16.mxu1 %v14020_v2  ;;  %v145_v4 = vld [vmem:[%s14012_s0 + $0x9] sm:$0xff]  ;;  %v146_v9 = vld [vmem:[%s14012_s0 + $0x11] sm:$0xff] }
   0x2   :  { %v144_v1 = vld [vmem:[%s14012_s0 + $0x1] sm:$0xff]  ;;  %v382_v3 = vsel %vm380_vm0, %v6328_v0, 0  ;;  %v197_v6 = vld [vmem:[%s14012_s0 + $0x1a9] sm:$0xff]  ;;  %7155 = vmatprep.mubr.msk.bf16.mxu0 %vm8779_vm2, %v14020_v2  ;;  %7259 = vmatprep.mubr.msk.bf16.mxu1 %vm8779_vm2, %v14020_v2  ;;  %v147_v10 = vld [vmem:[%s14012_s0 + $0x19] sm:$0xff] }
   0x3   :  { %v196_v5 = vld [vmem:[%s14012_s0 + $0x1a1] sm:$0xff]  ;;  %7154 = vmatpush3.bf16.msra.mxu0 %v382_v3  ;;  %8746 = vmatpush3.bf16.msra.mxu1 %v382_v3  ;;  %v221_v7 = vpack.c.bf16 %v145_v4, %v144_v1  ;;  %v198_v11 = vld [vmem:[%s14012_s0 + $0x1b1] sm:$0xff]  ;;  %v199_v12 = vld [vmem:[%s14012_s0 + $0x1b9] sm:$0xff]  ;;  %v222_v13 = vpack.c.bf16 %v147_v10, %v146_v9 }
   0x4   :  { %v247_v8 = vpack.c.bf16 %v197_v6, %v196_v5  ;;  %7311 = vmatprep.subr.bf16.mxu1 %v14020_v2  ;;  %7469 = vmatprep.subr.bf16.mxu0 %v14020_v2  ;;  %v248_v14 = vpack.c.bf16 %v199_v12, %v198_v11  ;;  %v148_v15 = vld [vmem:[%s14012_s0 + $0x21] sm:$0xff]  ;;  %v149_v16 = vld [vmem:[%s14012_s0 + $0x29] sm:$0xff]  ;;  %v150_v23 = vld [vmem:[%s14012_s0 + $0x31] sm:$0xff] }
   0x5   :  { %v200_v17 = vld [vmem:[%s14012_s0 + $0x1c1] sm:$0xff]  ;;  %v201_v18 = vld [vmem:[%s14012_s0 + $0x1c9] sm:$0xff]  ;;  %v223_v19 = vpack.c.bf16 %v149_v16, %v148_v15  ;;  %v151_v24 = vld [vmem:[%s14012_s0 + $0x39] sm:$0xff] }
   0x6   :  { %7156 = vmatmul.mubr.msk.bf16.vlgmr.msra.gmra.mrb[0].mxu0 %vm262_vm1, %v221_v7  ;;  %7260 = vmatmul.mubr.msk.bf16.vlgmr.msra.gmra.mrb[0].mxu1 %vm262_vm1, %v247_v8  ;;  %v249_v20 = vpack.c.bf16 %v201_v18, %v200_v17  ;;  %v143_v21 = vld [vmem:[%s14013_s1] sm:$0x3]  ;;  %v202_v25 = vld [vmem:[%s14012_s0 + $0x1d1] sm:$0xff]  ;;  %v6407_v27 = vld [vmem:[%s14013_s1 + $0x4] sm:$0x3]  ;;  %v224_v29 = vpack.c.bf16 %v151_v24, %v150_v23 }
   0x7   :  { %7159 = vmatprep.mubr.msk.bf16.mxu0 %vm8779_vm2, %v14020_v2  ;;  %7263 = vmatprep.mubr.msk.bf16.mxu1 %vm8779_vm2, %v14020_v2  ;;  %v846_v22 = vsel %vm380_vm0, %v143_v21, 0  ;;  %v203_v26 = vld [vmem:[%s14012_s0 + $0x1d9] sm:$0xff]  ;;  %v1428_v28 = vsel %vm380_vm0, %v6407_v27, 0 }
   0x8   :  { %7312 = vmatpush3.bf16.msra.mxu1 %v846_v22  ;;  %v250_v30 = vpack.c.bf16 %v203_v26, %v202_v25  ;;  %7470 = vmatpush3.bf16.msra.mxu0 %v1428_v28 }
   0x9   :  { %7627 = vmatprep.subr.bf16.mxu1 %v14020_v2  ;;  %7785 = vmatprep.subr.bf16.mxu0 %v14020_v2 }
   0xe   :  { %7160 = vmatmul.mubr.msk.bf16.gmra.mrb[4].mxu0 %vm262_vm1, %v222_v13  ;;  %7264 = vmatmul.mubr.msk.bf16.gmra.mrb[4].mxu1 %vm262_vm1, %v248_v14 }
   0xf   :  { %7163 = vmatprep.mubr.msk.bf16.mxu0 %vm8779_vm2, %v14020_v2  ;;  %7267 = vmatprep.mubr.msk.bf16.mxu1 %vm8779_vm2, %v14020_v2 }
  0x16   :  { %7164 = vmatmul.mubr.msk.bf16.gmra.mrb[8].mxu0 %vm262_vm1, %v223_v19  ;;  %7268 = vmatmul.mubr.msk.bf16.gmra.mrb[8].mxu1 %vm262_vm1, %v249_v20 }
  0x17   :  { %7167 = vmatprep.mubr.msk.bf16.mxu0 %vm8779_vm2, %v14020_v2  ;;  %7271 = vmatprep.mubr.msk.bf16.mxu1 %vm8779_vm2, %v14020_v2 }
  0x18   :  { %13 = vsyncpa [#allocation3], 0  ;;  %v152_v31 = vld [vmem:[%s14012_s0 + $0x41] sm:$0xff]  ;;  %v153_v32 = vld [vmem:[%s14012_s0 + $0x49] sm:$0xff]  ;;  %vm6001_vm3 = vcmask 1045504   ;;  %vm5998_vm4 = vcmask 834560  }
  0x19   :  { %v204_v33 = vld [vmem:[%s14012_s0 + $0x1e1] sm:$0xff]  ;;  %v205_v34 = vld [vmem:[%s14012_s0 + $0x1e9] sm:$0xff]  ;;  %v225_v35 = vpack.c.bf16 %v153_v32, %v152_v31  ;;  %v154_v37 = vld [vmem:[%s14012_s0 + $0x51] sm:$0xff]  ;;  %s8782_s15 = smov [#allocation2]  }
  0x1a   :  { %v251_v36 = vpack.c.bf16 %v205_v34, %v204_v33  ;;  %v155_v38 = vld [vmem:[%s14012_s0 + $0x59] sm:$0xff]  ;;  %v206_v39 = vld [vmem:[%s14012_s0 + $0x1f1] sm:$0xff]  ;;  %v156_v43 = vld [vmem:[%s14012_s0 + $0x61] sm:$0xff]  ;;  %s6318_s16 = sshll.u32 %s8782_s15, 4  ;;  %s6319_s16 = int_to_ptr.vmem [resolvable:$true] %s6318_s16 }
  0x1b   :  { %v207_v40 = vld [vmem:[%s14012_s0 + $0x1f9] sm:$0xff]  ;;  %v226_v41 = vpack.c.bf16 %v155_v38, %v154_v37  ;;  %v157_v44 = vld [vmem:[%s14012_s0 + $0x69] sm:$0xff]  ;;  %v208_v45 = vld [vmem:[%s14012_s0 + $0x201] sm:$0xff]  ;;  %s8754_s17 = scalar_lea.vmem %s6319_s16, 32  ;;  %p8759_p1 = scmp.lt.s32.totalorder %s6319_s16, %s6319_s16 }
  0x1c   :  { %v252_v42 = vpack.c.bf16 %v207_v40, %v206_v39  ;;  %v209_v46 = vld [vmem:[%s14012_s0 + $0x209] sm:$0xff]  ;;  %v227_v47 = vpack.c.bf16 %v157_v44, %v156_v43  ;;  %v158_v49 = vld [vmem:[%s14012_s0 + $0x71] sm:$0xff]  ;;  %v159_v50 = vld [vmem:[%s14012_s0 + $0x79] sm:$0xff]  ;;  %p8755_p0 = scmp.ne.s32.totalorder %s6319_s16, %s8754_s17  ;;  %p8760_p2 = scmp.lt.s32.totalorder %s8754_s17, %s8754_s17 }
  0x1d   :  { %v253_v48 = vpack.c.bf16 %v209_v46, %v208_v45  ;;  %v210_v51 = vld [vmem:[%s14012_s0 + $0x211] sm:$0xff]  ;;  %v211_v52 = vld [vmem:[%s14012_s0 + $0x219] sm:$0xff]  ;;  %v228_v53 = vpack.c.bf16 %v159_v50, %v158_v49  ;;  %v160_v55 = vld [vmem:[%s14012_s0 + $0x81] sm:$0xff] }
  0x1e   :  { %7168 = vmatmul.mubr.msk.bf16.gmra.mrb[12].mxu0 %vm262_vm1, %v224_v29  ;;  %7272 = vmatmul.mubr.msk.bf16.gmra.mrb[12].mxu1 %vm262_vm1, %v250_v30  ;;  %v254_v54 = vpack.c.bf16 %v211_v52, %v210_v51  ;;  %v161_v56 = vld [vmem:[%s14012_s0 + $0x89] sm:$0xff]  ;;  %v212_v57 = vld [vmem:[%s14012_s0 + $0x221] sm:$0xff]  ;;  %v162_v61 = vld [vmem:[%s14012_s0 + $0x91] sm:$0xff]  ;;  %p8761_p3 = por %p8760_p2, %p8759_p1 }
  0x1f   :  { %7171 = vmatprep.mubr.msk.bf16.mxu0 %vm8779_vm2, %v14020_v2  ;;  %7275 = vmatprep.mubr.msk.bf16.mxu1 %vm8779_vm2, %v14020_v2  ;;  %v213_v58 = vld [vmem:[%s14012_s0 + $0x229] sm:$0xff]  ;;  %v229_v59 = vpack.c.bf16 %v161_v56, %v160_v55  ;;  %v163_v62 = vld [vmem:[%s14012_s0 + $0x99] sm:$0xff]  ;;  %v214_v63 = vld [vmem:[%s14012_s0 + $0x231] sm:$0xff] }
  0x20   :  { %v255_v60 = vpack.c.bf16 %v213_v58, %v212_v57  ;;  %v215_v0 = vld [vmem:[%s14012_s0 + $0x239] sm:$0xff]  ;;  %v230_v1 = vpack.c.bf16 %v163_v62, %v162_v61  ;;  %v164_v4 = vld [vmem:[%s14012_s0 + $0xa1] sm:$0xff]  ;;  %v165_v5 = vld [vmem:[%s14012_s0 + $0xa9] sm:$0xff]  ;;  %p8762_p4 = pnand %p8761_p3, %p8755_p0 }
  0x21   :  { %v256_v3 = vpack.c.bf16 %v215_v0, %v214_v63  ;;  %v216_v6 = vld [vmem:[%s14012_s0 + $0x241] sm:$0xff]  ;;  %v217_v7 = vld [vmem:[%s14012_s0 + $0x249] sm:$0xff]  ;;  %v231_v8 = vpack.c.bf16 %v165_v5, %v164_v4  ;;  %v166_v10 = vld [vmem:[%s14012_s0 + $0xb1] sm:$0xff] }
  0x22   :  { %v257_v9 = vpack.c.bf16 %v217_v7, %v216_v6  ;;  %v167_v11 = vld [vmem:[%s14012_s0 + $0xb9] sm:$0xff]  ;;  %v218_v12 = vld [vmem:[%s14012_s0 + $0x251] sm:$0xff]  ;;  %v168_v16 = vld [vmem:[%s14012_s0 + $0xc1] sm:$0xff] }
  0x23   :  { %v219_v13 = vld [vmem:[%s14012_s0 + $0x259] sm:$0xff]  ;;  %v232_v14 = vpack.c.bf16 %v167_v11, %v166_v10  ;;  %v169_v17 = vld [vmem:[%s14012_s0 + $0xc9] sm:$0xff]  ;;  %v220_v18 = vld [vmem:[%s14012_s0 + $0x261] sm:$0x3f] }
  0x24   :  { %v258_v15 = vpack.c.bf16 %v219_v13, %v218_v12  ;;  %v233_v19 = vpack.c.bf16 %v169_v17, %v168_v16  ;;  %v259_v20 = vpack.c.bf16 %v220_v18, %v220_v18  ;;  %v170_v21 = vld [vmem:[%s14012_s0 + $0xd1] sm:$0xff]  ;;  %v171_v22 = vld [vmem:[%s14012_s0 + $0xd9] sm:$0xff]  ;;  %v28_v24 = vld [vmem:[%s14012_s0 + $0x8] sm:$0xff] }
  0x25   :  { %v27_v23 = vld [vmem:[%s14012_s0] sm:$0xff]  ;;  %v234_v25 = vpack.c.bf16 %v171_v22, %v170_v21  ;;  %v173_v28 = vld [vmem:[%s14012_s0 + $0xe9] sm:$0xff]  ;;  %v30_v30 = vld [vmem:[%s14012_s0 + $0x18] sm:$0xff] }
  0x26   :  { %7172 = vmatmul.mubr.msk.bf16.gmra.mrb[16].mxu0 %vm262_vm1, %v225_v35  ;;  %7276 = vmatmul.mubr.msk.bf16.gmra.mrb[16].mxu1 %vm262_vm1, %v251_v36  ;;  %v104_v26 = vpack.c.bf16 %v28_v24, %v27_v23  ;;  %v172_v27 = vld [vmem:[%s14012_s0 + $0xe1] sm:$0xff]  ;;  %v29_v29 = vld [vmem:[%s14012_s0 + $0x10] sm:$0xff]  ;;  %v175_v34 = vld [vmem:[%s14012_s0 + $0xf9] sm:$0xff] }
  0x27   :  { %7175 = vmatprep.mubr.msk.bf16.mxu0 %vm8779_vm2, %v14020_v2  ;;  %7279 = vmatprep.mubr.msk.bf16.mxu1 %vm8779_vm2, %v14020_v2  ;;  %v235_v31 = vpack.c.bf16 %v173_v28, %v172_v27  ;;  %v105_v32 = vpack.c.bf16 %v30_v30, %v29_v29  ;;  %v174_v33 = vld [vmem:[%s14012_s0 + $0xf1] sm:$0xff]  ;;  %v31_v35 = vld [vmem:[%s14012_s0 + $0x20] sm:$0xff]  ;;  %v32_v36 = vld [vmem:[%s14012_s0 + $0x28] sm:$0xff] }
  0x28   :  { %v236_v37 = vpack.c.bf16 %v175_v34, %v174_v33  ;;  %v106_v38 = vpack.c.bf16 %v32_v36, %v31_v35  ;;  %v176_v39 = vld [vmem:[%s14012_s0 + $0x101] sm:$0xff]  ;;  %v177_v40 = vld [vmem:[%s14012_s0 + $0x109] sm:$0xff]  ;;  %v178_v45 = vld [vmem:[%s14012_s0 + $0x111] sm:$0xff] }
  0x29   :  { %v237_v43 = vpack.c.bf16 %v177_v40, %v176_v39  ;;  %v179_v46 = vld [vmem:[%s14012_s0 + $0x119] sm:$0xff]  ;;  %v180_v51 = vld [vmem:[%s14012_s0 + $0x121] sm:$0xff]  ;;  %v181_v52 = vld [vmem:[%s14012_s0 + $0x129] sm:$0xff] }
  0x2a   :  { %v238_v49 = vpack.c.bf16 %v179_v46, %v178_v45  ;;  %v239_v55 = vpack.c.bf16 %v181_v52, %v180_v51  ;;  %v182_v57 = vld [vmem:[%s14012_s0 + $0x131] sm:$0xff]  ;;  %v183_v58 = vld [vmem:[%s14012_s0 + $0x139] sm:$0xff]  ;;  %v184_v63 = vld [vmem:[%s14012_s0 + $0x141] sm:$0xff] }
  0x2b   :  { %v240_v61 = vpack.c.bf16 %v183_v58, %v182_v57  ;;  %v185_v0 = vld [vmem:[%s14012_s0 + $0x149] sm:$0xff]  ;;  %v186_v6 = vld [vmem:[%s14012_s0 + $0x151] sm:$0xff]  ;;  %v187_v7 = vld [vmem:[%s14012_s0 + $0x159] sm:$0xff] }
  0x2c   :  { %v241_v4 = vpack.c.bf16 %v185_v0, %v184_v63  ;;  %v242_v10 = vpack.c.bf16 %v187_v7, %v186_v6  ;;  %v188_v12 = vld [vmem:[%s14012_s0 + $0x161] sm:$0xff]  ;;  %v189_v13 = vld [vmem:[%s14012_s0 + $0x169] sm:$0xff]  ;;  %v190_v18 = vld [vmem:[%s14012_s0 + $0x171] sm:$0xff] }
  0x2d   :  { %v243_v16 = vpack.c.bf16 %v189_v13, %v188_v12  ;;  %v48_v21 = vld [vmem:[%s14012_s0 + $0xa8] sm:$0xff]  ;;  %v50_v27 = vld [vmem:[%s14012_s0 + $0xb8] sm:$0xff]  ;;  %v53_v36 = vld [vmem:[%s14012_s0 + $0xd0] sm:$0xff] }
  0x2e   :  { %7176 = vmatmul.mubr.msk.bf16.gmra.mrb[20].mxu0 %vm262_vm1, %v226_v41  ;;  %7280 = vmatmul.mubr.msk.bf16.gmra.mrb[20].mxu1 %vm262_vm1, %v252_v42  ;;  %v33_v41 = vld [vmem:[%s14012_s0 + $0x30] sm:$0xff]  ;;  %v34_v42 = vld [vmem:[%s14012_s0 + $0x38] sm:$0xff]  ;;  %v192_v24 = vld [vmem:[%s14012_s0 + $0x181] sm:$0xff] }
  0x2f   :  { %7179 = vmatprep.mubr.msk.bf16.mxu0 %vm8779_vm2, %v14020_v2  ;;  %7283 = vmatprep.mubr.msk.bf16.mxu1 %vm8779_vm2, %v14020_v2  ;;  %v107_v44 = vpack.c.bf16 %v34_v42, %v33_v41  ;;  %v194_v30 = vld [vmem:[%s14012_s0 + $0x191] sm:$0xff]  ;;  %v52_v33 = vld [vmem:[%s14012_s0 + $0xc8] sm:$0xff]  ;;  %v55_v42 = vld [vmem:[%s14012_s0 + $0xe0] sm:$0xff] }
  0x30   :  { %v1193_v39 = vld [vmem:[%s14012_s0 + $0xa] sm:$0xff]  ;;  %v1195_v45 = vld [vmem:[%s14012_s0 + $0x1a] sm:$0xff]  ;;  %v6447_v52 = vld [vmem:[%s14013_s1 + $0x6] sm:$0x3] }
  0x31   :  { %v6487_v58 = vld [vmem:[%s14013_s1 + $0x8] sm:$0x3]  ;;  %v1197_v63 = vld [vmem:[%s14012_s0 + $0x2a] sm:$0xff]  ;;  %v1198_v13 = vld [vmem:[%s14012_s0 + $0x32] sm:$0xff] }
  0x32   :  { %v60_v12 = vld [vmem:[%s14012_s0 + $0x108] sm:$0xff] }
  0x36   :  { %7180 = vmatmul.mubr.msk.bf16.gmra.mrb[24].mxu0 %vm262_vm1, %v227_v47  ;;  %7284 = vmatmul.mubr.msk.bf16.gmra.mrb[24].mxu1 %vm262_vm1, %v253_v48  ;;  %v35_v47 = vld [vmem:[%s14012_s0 + $0x40] sm:$0xff]  ;;  %v36_v48 = vld [vmem:[%s14012_s0 + $0x48] sm:$0xff] }
  0x37   :  { %7183 = vmatprep.mubr.msk.bf16.mxu0 %vm8779_vm2, %v14020_v2  ;;  %7287 = vmatprep.mubr.msk.bf16.mxu1 %vm8779_vm2, %v14020_v2  ;;  %v108_v50 = vpack.c.bf16 %v36_v48, %v35_v47 }
  0x3e   :  { %7184 = vmatmul.mubr.msk.bf16.gmra.mrb[28].mxu0 %vm262_vm1, %v228_v53  ;;  %7288 = vmatmul.mubr.msk.bf16.gmra.mrb[28].mxu1 %vm262_vm1, %v254_v54  ;;  %v37_v53 = vld [vmem:[%s14012_s0 + $0x50] sm:$0xff]  ;;  %v38_v54 = vld [vmem:[%s14012_s0 + $0x58] sm:$0xff] }
  0x3f   :  { %7187 = vmatprep.mubr.msk.bf16.mxu0 %vm8779_vm2, %v14020_v2  ;;  %7291 = vmatprep.mubr.msk.bf16.mxu1 %vm8779_vm2, %v14020_v2  ;;  %v109_v56 = vpack.c.bf16 %v38_v54, %v37_v53 }
  0x46   :  { %7188 = vmatmul.mubr.msk.bf16.gmra.mrb[32].mxu0 %vm262_vm1, %v229_v59  ;;  %7292 = vmatmul.mubr.msk.bf16.gmra.mrb[32].mxu1 %vm262_vm1, %v255_v60  ;;  %v39_v59 = vld [vmem:[%s14012_s0 + $0x60] sm:$0xff]  ;;  %v40_v60 = vld [vmem:[%s14012_s0 + $0x68] sm:$0xff] }
  0x47   :  { %7191 = vmatprep.mubr.msk.bf16.mxu0 %vm8779_vm2, %v14020_v2  ;;  %7295 = vmatprep.mubr.msk.bf16.mxu1 %vm8779_vm2, %v14020_v2  ;;  %v110_v62 = vpack.c.bf16 %v40_v60, %v39_v59  ;;  %v2746_v59 = vsel %vm380_vm0, %v6487_v58, 0  ;;  %v57_v60 = vld [vmem:[%s14012_s0 + $0xf0] sm:$0xff] }
  0x48   :  { %v65_v58 = vld [vmem:[%s14012_s0 + $0x130] sm:$0xff] }
  0x4e   :  { %7192 = vmatmul.mubr.msk.bf16.gmra.mrb[36].mxu0 %vm262_vm1, %v230_v1  ;;  %7296 = vmatmul.mubr.msk.bf16.gmra.mrb[36].mxu1 %vm262_vm1, %v256_v3  ;;  %v41_v1 = vld [vmem:[%s14012_s0 + $0x70] sm:$0xff]  ;;  %v42_v3 = vld [vmem:[%s14012_s0 + $0x78] sm:$0xff] }
  0x4f   :  { %7195 = vmatprep.mubr.msk.bf16.mxu0 %vm8779_vm2, %v14020_v2  ;;  %7299 = vmatprep.mubr.msk.bf16.mxu1 %vm8779_vm2, %v14020_v2  ;;  %v111_v5 = vpack.c.bf16 %v42_v3, %v41_v1 }
  0x56   :  { %7196 = vmatmul.mubr.msk.bf16.gmra.mrb[40].mxu0 %vm262_vm1, %v231_v8  ;;  %7300 = vmatmul.mubr.msk.bf16.gmra.mrb[40].mxu1 %vm262_vm1, %v257_v9  ;;  %v43_v8 = vld [vmem:[%s14012_s0 + $0x80] sm:$0xff]  ;;  %v44_v9 = vld [vmem:[%s14012_s0 + $0x88] sm:$0xff] }
  0x57   :  { %7199 = vmatprep.mubr.msk.bf16.mxu0 %vm8779_vm2, %v14020_v2  ;;  %7303 = vmatprep.mubr.msk.bf16.mxu1 %vm8779_vm2, %v14020_v2  ;;  %v112_v11 = vpack.c.bf16 %v44_v9, %v43_v8 }
  0x5e   :  { %7200 = vmatmul.mubr.msk.bf16.gmra.mrb[44].mxu0 %vm262_vm1, %v232_v14  ;;  %7304 = vmatmul.mubr.msk.bf16.gmra.mrb[44].mxu1 %vm262_vm1, %v258_v15  ;;  %v45_v14 = vld [vmem:[%s14012_s0 + $0x90] sm:$0xff]  ;;  %v46_v15 = vld [vmem:[%s14012_s0 + $0x98] sm:$0xff] }
  0x5f   :  { %7203 = vmatprep.mubr.msk.bf16.mxu0 %vm8779_vm2, %v14020_v2  ;;  %7307 = vmatprep.mubr.msk.bf16.mxu1 %vm8779_vm2, %v14020_v2  ;;  %v113_v17 = vpack.c.bf16 %v46_v15, %v45_v14  ;;  %v1199_v14 = vld [vmem:[%s14012_s0 + $0x3a] sm:$0xff] }
  0x66   :  { %7204 = vmatmul.mubr.msk.bf16.gmra.mrb[48].mxu0 %vm262_vm1, %v233_v19  ;;  %7308 = vmatmul.mubr.msk.bf16.gmra.mrb[48].mxu1 %vm262_vm1, %v259_v20  ;;  %v191_v19 = vld [vmem:[%s14012_s0 + $0x179] sm:$0xff] }
  0x67   :  { %7207 = vmatprep.mubr.msk.bf16.mxu0 %vm8779_vm2, %v14020_v2  ;;  %7313 = vmatprep.mubr.msk.bf16.mxu1 %vm8779_vm2, %v14020_v2  ;;  %v47_v20 = vld [vmem:[%s14012_s0 + $0xa0] sm:$0xff]  ;;  %v244_v22 = vpack.c.bf16 %v191_v19, %v190_v18  ;;  %v9412_v19 = vpack.c.bf16 %v1199_v14, %v1198_v13 }
  0x68   :  { %v114_v23 = vpack.c.bf16 %v48_v21, %v47_v20  ;;  %v67_v14 = vld [vmem:[%s14012_s0 + $0x140] sm:$0xff] }
  0x6e   :  { %7208 = vmatmul.mubr.msk.bf16.gmra.mrb[52].mxu0 %vm262_vm1, %v234_v25  ;;  %7314 = vmatmul.mubr.msk.bf16.vlgmr.msra.gmra.mrb[52].mxu1 %vm262_vm1, %v104_v26  ;;  %v193_v25 = vld [vmem:[%s14012_s0 + $0x189] sm:$0xff] }
  0x6f   :  { %7211 = vmatprep.mubr.msk.bf16.mxu0 %vm8779_vm2, %v14020_v2  ;;  %7317 = vmatprep.mubr.msk.bf16.mxu1 %vm8779_vm2, %v14020_v2  ;;  %v49_v26 = vld [vmem:[%s14012_s0 + $0xb0] sm:$0xff]  ;;  %v245_v28 = vpack.c.bf16 %v193_v25, %v192_v24 }
  0x70   :  { %v115_v29 = vpack.c.bf16 %v50_v27, %v49_v26  ;;  %v61_v25 = vld [vmem:[%s14012_s0 + $0x110] sm:$0xff]  ;;  %v62_v26 = vld [vmem:[%s14012_s0 + $0x118] sm:$0xff]  ;;  %v1200_v27 = vld [vmem:[%s14012_s0 + $0x42] sm:$0xff] }
  0x76   :  { %7212 = vmatmul.mubr.msk.bf16.gmra.mrb[56].mxu0 %vm262_vm1, %v235_v31  ;;  %7318 = vmatmul.mubr.msk.bf16.gmra.mrb[56].mxu1 %vm262_vm1, %v105_v32  ;;  %v195_v31 = vld [vmem:[%s14012_s0 + $0x199] sm:$0xff] }
  0x77   :  { %7215 = vmatprep.mubr.msk.bf16.mxu0 %vm8779_vm2, %v14020_v2  ;;  %7321 = vmatprep.mubr.msk.bf16.mxu1 %vm8779_vm2, %v14020_v2  ;;  %v51_v32 = vld [vmem:[%s14012_s0 + $0xc0] sm:$0xff]  ;;  %v246_v34 = vpack.c.bf16 %v195_v31, %v194_v30 }
  0x78   :  { %v116_v35 = vpack.c.bf16 %v52_v33, %v51_v32  ;;  %v121_v32 = vpack.c.bf16 %v62_v26, %v61_v25 }
  0x7e   :  { %7216 = vmatmul.mubr.msk.bf16.gmra.mrb[60].mxu0 %vm262_vm1, %v236_v37  ;;  %7322 = vmatmul.mubr.msk.bf16.gmra.mrb[60].mxu1 %vm262_vm1, %v106_v38  ;;  %v54_v37 = vld [vmem:[%s14012_s0 + $0xd8] sm:$0xff]  ;;  %v1192_v38 = vld [vmem:[%s14012_s0 + $0x2] sm:$0xff] }
  0x7f   :  { %7219 = vmatprep.mubr.msk.bf16.mxu0 %vm8779_vm2, %v14020_v2  ;;  %7325 = vmatprep.mubr.msk.bf16.mxu1 %vm8779_vm2, %v14020_v2  ;;  %v117_v40 = vpack.c.bf16 %v54_v37, %v53_v36  ;;  %v1269_v41 = vpack.c.bf16 %v1193_v39, %v1192_v38  ;;  %v63_v39 = vld [vmem:[%s14012_s0 + $0x120] sm:$0xff] }
  0x86   :  { %7220 = vmatmul.mubr.msk.bf16.gmra.mrb[64].mxu0 %vm262_vm1, %v237_v43  ;;  %7326 = vmatmul.mubr.msk.bf16.gmra.mrb[64].mxu1 %vm262_vm1, %v107_v44  ;;  %v56_v43 = vld [vmem:[%s14012_s0 + $0xe8] sm:$0xff]  ;;  %v1194_v44 = vld [vmem:[%s14012_s0 + $0x12] sm:$0xff] }
  0x87   :  { %7223 = vmatprep.mubr.msk.bf16.mxu0 %vm8779_vm2, %v14020_v2  ;;  %7329 = vmatprep.mubr.msk.bf16.mxu1 %vm8779_vm2, %v14020_v2 }
  0x8e   :  { %7224 = vmatmul.mubr.msk.bf16.gmra.mrb[68].mxu0 %vm262_vm1, %v238_v49  ;;  %7330 = vmatmul.mubr.msk.bf16.gmra.mrb[68].mxu1 %vm262_vm1, %v108_v50  ;;  %v118_v49 = vpack.c.bf16 %v56_v43, %v55_v42  ;;  %v9344_v50 = vpack.c.bf16 %v1195_v45, %v1194_v44  ;;  %v1203_v42 = vld [vmem:[%s14012_s0 + $0x5a] sm:$0xff] }
  0x8f   :  { %7227 = vmatprep.mubr.msk.bf16.mxu0 %vm8779_vm2, %v14020_v2  ;;  %7333 = vmatprep.mubr.msk.bf16.mxu1 %vm8779_vm2, %v14020_v2 }
  0x96   :  { %7228 = vmatmul.mubr.msk.bf16.gmra.mrb[72].mxu0 %vm262_vm1, %v239_v55  ;;  %7334 = vmatmul.mubr.msk.bf16.gmra.mrb[72].mxu1 %vm262_vm1, %v109_v56  ;;  %v2087_v55 = vsel %vm380_vm0, %v6447_v52, 0 }
  0x97   :  { %7231 = vmatprep.mubr.msk.bf16.mxu0 %vm8779_vm2, %v14020_v2  ;;  %7337 = vmatprep.mubr.msk.bf16.mxu1 %vm8779_vm2, %v14020_v2 }
  0x98   :  { %7628 = vmatpush3.bf16.msra.mxu1 %v2087_v55 }
  0x99   :  { %7943 = vmatprep.subr.bf16.mxu1 %v14020_v2 }
  0x9e   :  { %7232 = vmatmul.mubr.msk.bf16.gmra.mrb[76].mxu0 %vm262_vm1, %v240_v61  ;;  %7338 = vmatmul.mubr.msk.bf16.gmra.mrb[76].mxu1 %vm262_vm1, %v110_v62  ;;  %v58_v61 = vld [vmem:[%s14012_s0 + $0xf8] sm:$0xff]  ;;  %v1196_v62 = vld [vmem:[%s14012_s0 + $0x22] sm:$0xff] }
  0x9f   :  { %7235 = vmatprep.mubr.msk.bf16.mxu0 %vm8779_vm2, %v14020_v2  ;;  %7341 = vmatprep.mubr.msk.bf16.mxu1 %vm8779_vm2, %v14020_v2 }
  0xa6   :  { %7236 = vmatmul.mubr.msk.bf16.gmra.mrb[80].mxu0 %vm262_vm1, %v241_v4  ;;  %7342 = vmatmul.mubr.msk.bf16.gmra.mrb[80].mxu1 %vm262_vm1, %v111_v5  ;;  %v119_v4 = vpack.c.bf16 %v58_v61, %v57_v60  ;;  %v9383_v5 = vpack.c.bf16 %v1197_v63, %v1196_v62  ;;  %v1204_v60 = vld [vmem:[%s14012_s0 + $0x62] sm:$0xff]  ;;  %v1205_v61 = vld [vmem:[%s14012_s0 + $0x6a] sm:$0xff] }
  0xa7   :  { %7239 = vmatprep.mubr.msk.bf16.mxu0 %vm8779_vm2, %v14020_v2  ;;  %7345 = vmatprep.mubr.msk.bf16.mxu1 %vm8779_vm2, %v14020_v2 }
  0xae   :  { %7240 = vmatmul.mubr.msk.bf16.gmra.mrb[84].mxu0 %vm262_vm1, %v242_v10  ;;  %7346 = vmatmul.mubr.msk.bf16.gmra.mrb[84].mxu1 %vm262_vm1, %v112_v11  ;;  %v59_v11 = vld [vmem:[%s14012_s0 + $0x100] sm:$0xff] }
  0xaf   :  { %7243 = vmatprep.mubr.msk.bf16.mxu0 %vm8779_vm2, %v14020_v2  ;;  %7349 = vmatprep.mubr.msk.bf16.mxu1 %vm8779_vm2, %v14020_v2  ;;  %v120_v18 = vpack.c.bf16 %v60_v12, %v59_v11 }
  0xb6   :  { %7244 = vmatmul.mubr.msk.bf16.gmra.mrb[88].mxu0 %vm262_vm1, %v243_v16  ;;  %7350 = vmatmul.mubr.msk.bf16.gmra.mrb[88].mxu1 %vm262_vm1, %v113_v17 }
  0xb7   :  { %7247 = vmatprep.mubr.msk.bf16.mxu0 %vm8779_vm2, %v14020_v2  ;;  %7353 = vmatprep.mubr.msk.bf16.mxu1 %vm8779_vm2, %v14020_v2 }
  0xbe   :  { %7248 = vmatmul.mubr.msk.bf16.gmra.mrb[92].mxu0 %vm262_vm1, %v244_v22  ;;  %7354 = vmatmul.mubr.msk.bf16.gmra.mrb[92].mxu1 %vm262_vm1, %v114_v23 }
  0xbf   :  { %7251 = vmatprep.mubr.msk.bf16.mxu0 %vm8779_vm2, %v14020_v2  ;;  %7357 = vmatprep.mubr.msk.bf16.mxu1 %vm8779_vm2, %v14020_v2 }
  0xc6   :  { %7252 = vmatmul.mubr.msk.bf16.gmra.mrb[96].mxu0 %vm262_vm1, %v245_v28  ;;  %7358 = vmatmul.mubr.msk.bf16.gmra.mrb[96].mxu1 %vm262_vm1, %v115_v29  ;;  %v1201_v28 = vld [vmem:[%s14012_s0 + $0x4a] sm:$0xff] }
  0xc7   :  { %7255 = vmatprep.mubr.msk.bf16.mxu0 %vm8779_vm2, %v14020_v2  ;;  %7361 = vmatprep.mubr.msk.bf16.mxu1 %vm8779_vm2, %v14020_v2  ;;  %v9441_v33 = vpack.c.bf16 %v1201_v28, %v1200_v27 }
  0xce   :  { %7256 = vmatmul.mubr.msk.bf16.gmra.mrb[100].mxu0 %vm262_vm1, %v246_v34  ;;  %7362 = vmatmul.mubr.msk.bf16.gmra.mrb[100].mxu1 %vm262_vm1, %v116_v35 }
  0xcf   :  { %7365 = vmatprep.mubr.msk.bf16.mxu1 %vm8779_vm2, %v14020_v2  ;;  %7471 = vmatprep.mubr.msk.bf16.mxu0 %vm8779_vm2, %v14020_v2 }
  0xd6   :  { %7366 = vmatmul.mubr.msk.bf16.gmra.mrb[104].mxu1 %vm262_vm1, %v117_v40  ;;  %7472 = vmatmul.mubr.msk.bf16.vlgmr.msra.gmra.mrb[104].mxu0 %vm262_vm1, %v1269_v41  ;;  %v64_v40 = vld [vmem:[%s14012_s0 + $0x128] sm:$0xff]  ;;  %v1202_v41 = vld [vmem:[%s14012_s0 + $0x52] sm:$0xff] }
  0xd7   :  { %7369 = vmatprep.mubr.msk.bf16.mxu1 %vm8779_vm2, %v14020_v2  ;;  %7475 = vmatprep.mubr.msk.bf16.mxu0 %vm8779_vm2, %v14020_v2 }
  0xd8   :  { %7786 = vmatpush3.bf16.msra.mxu0 %v2746_v59  ;;  %v66_v59 = vld [vmem:[%s14012_s0 + $0x138] sm:$0xff] }
  0xd9   :  { %v9340_v46 = vpop.f32.mrb[0].mxu0  ;;  %v9342_v47 = vpop.f32.mrb[0].mxu1  ;;  %8101 = vmatprep.subr.bf16.mxu0 %v14020_v2 }
  0xda   :  { %14022 = vst [vmem:[#allocation5_spill] sm:$0xff] %v9342_v47  ;;  %v7157_v48 = vpop.f32.mrb[1].mxu0  ;;  %v7261_v51 = vpop.f32.mrb[1].mxu1 }
  0xdb   :  { %v9349_v53 = vpop.f32.mrb[2].mxu0  ;;  %v9351_v54 = vpop.f32.mrb[2].mxu1  ;;  %v122_v48 = vpack.c.bf16 %v64_v40, %v63_v39  ;;  %v70_v39 = vld [vmem:[%s14012_s0 + $0x158] sm:$0xff]  ;;  %v1208_v40 = vld [vmem:[%s14012_s0 + $0x82] sm:$0xff] }
  0xdc   :  { %14023 = vst [vmem:[#allocation6_spill] sm:$0xff] %v9351_v54  ;;  %v7158_v56 = vpop.f32.mrb[3].mxu0  ;;  %v7262_v57 = vpop.f32.mrb[3].mxu1 }
  0xde   :  { %7370 = vmatmul.mubr.msk.bf16.gmra.mrb[108].mxu1 %vm262_vm1, %v118_v49  ;;  %7476 = vmatmul.mubr.msk.bf16.gmra.mrb[108].mxu0 %vm262_vm1, %v9344_v50  ;;  %v1274_v49 = vpack.c.bf16 %v1203_v42, %v1202_v41  ;;  %v1209_v41 = vld [vmem:[%s14012_s0 + $0x8a] sm:$0xff] }
  0xdf   :  { %7373 = vmatprep.mubr.msk.bf16.mxu1 %vm8779_vm2, %v14020_v2  ;;  %7479 = vmatprep.mubr.msk.bf16.mxu0 %vm8779_vm2, %v14020_v2 }
  0xe1   :  { %v9378_v0 = vpop.f32.mrb[4].mxu0  ;;  %v9380_v1 = vpop.f32.mrb[4].mxu1 }
  0xe2   :  { %14024 = vst [vmem:[#allocation7_spill] sm:$0xff] %v9380_v1  ;;  %v7161_v3 = vpop.f32.mrb[5].mxu0  ;;  %v7265_v6 = vpop.f32.mrb[5].mxu1 }
  0xe3   :  { %v9385_v7 = vpop.f32.mrb[6].mxu0  ;;  %v9387_v8 = vpop.f32.mrb[6].mxu1  ;;  %v1275_v6 = vpack.c.bf16 %v1205_v61, %v1204_v60  ;;  %v71_v61 = vld [vmem:[%s14012_s0 + $0x160] sm:$0xff] }
  0xe4   :  { %14025 = vst [vmem:[#allocation8_spill] sm:$0xff] %v9387_v8  ;;  %v7162_v9 = vpop.f32.mrb[7].mxu0  ;;  %v7266_v10 = vpop.f32.mrb[7].mxu1 }
  0xe6   :  { %7374 = vmatmul.mubr.msk.bf16.gmra.mrb[112].mxu1 %vm262_vm1, %v119_v4  ;;  %7480 = vmatmul.mubr.msk.bf16.gmra.mrb[112].mxu0 %vm262_vm1, %v9383_v5  ;;  %v123_v4 = vpack.c.bf16 %v66_v59, %v65_v58 }
  0xe7   :  { %7377 = vmatprep.mubr.msk.bf16.mxu1 %vm8779_vm2, %v14020_v2  ;;  %7483 = vmatprep.mubr.msk.bf16.mxu0 %vm8779_vm2, %v14020_v2 }
  0xe9   :  { %v9408_v15 = vpop.f32.mrb[8].mxu0  ;;  %v9410_v16 = vpop.f32.mrb[8].mxu1 }
  0xea   :  { %14026 = vst [vmem:[#allocation9_spill] sm:$0xff] %v9410_v16  ;;  %v7165_v17 = vpop.f32.mrb[9].mxu0  ;;  %v7269_v20 = vpop.f32.mrb[9].mxu1 }
  0xeb   :  { %v9414_v21 = vpop.f32.mrb[10].mxu0  ;;  %v9416_v22 = vpop.f32.mrb[10].mxu1  ;;  %v68_v17 = vld [vmem:[%s14012_s0 + $0x148] sm:$0xff]  ;;  %v1207_v20 = vld [vmem:[%s14012_s0 + $0x7a] sm:$0xff] }
  0xec   :  { %14027 = vst [vmem:[#allocation10_spill] sm:$0xff] %v9416_v22  ;;  %v7166_v23 = vpop.f32.mrb[11].mxu0  ;;  %v7270_v24 = vpop.f32.mrb[11].mxu1  ;;  %v124_v26 = vpack.c.bf16 %v68_v17, %v67_v14 }
  0xee   :  { %7378 = vmatmul.mubr.msk.bf16.gmra.mrb[116].mxu1 %vm262_vm1, %v120_v18  ;;  %7484 = vmatmul.mubr.msk.bf16.gmra.mrb[116].mxu0 %vm262_vm1, %v9412_v19  ;;  %v1206_v18 = vld [vmem:[%s14012_s0 + $0x72] sm:$0xff] }
  0xef   :  { %7381 = vmatprep.mubr.msk.bf16.mxu1 %vm8779_vm2, %v14020_v2  ;;  %7487 = vmatprep.mubr.msk.bf16.mxu0 %vm8779_vm2, %v14020_v2  ;;  %v1276_v27 = vpack.c.bf16 %v1207_v20, %v1206_v18 }
  0xf1   :  { %v9437_v29 = vpop.f32.mrb[12].mxu0  ;;  %v9439_v30 = vpop.f32.mrb[12].mxu1 }
  0xf2   :  { %14028 = vst [vmem:[#allocation11_spill] sm:$0xff] %v9439_v30  ;;  %v7169_v31 = vpop.f32.mrb[13].mxu0  ;;  %v7273_v34 = vpop.f32.mrb[13].mxu1 }
  0xf3   :  { %v9443_v35 = vpop.f32.mrb[14].mxu0  ;;  %v9445_v36 = vpop.f32.mrb[14].mxu1 }
  0xf4   :  { %14029 = vst [vmem:[#allocation12_spill] sm:$0xff] %v9445_v36  ;;  %v7170_v37 = vpop.f32.mrb[15].mxu0  ;;  %v7274_v38 = vpop.f32.mrb[15].mxu1 }
  0xf5   :  { %v69_v38 = vld [vmem:[%s14012_s0 + $0x150] sm:$0xff] }
  0xf6   :  { %7382 = vmatmul.mubr.msk.bf16.gmra.mrb[120].mxu1 %vm262_vm1, %v121_v32  ;;  %7488 = vmatmul.mubr.msk.bf16.gmra.mrb[120].mxu0 %vm262_vm1, %v9441_v33 }
  0xf7   :  { %7385 = vmatprep.mubr.msk.bf16.mxu1 %vm8779_vm2, %v14020_v2  ;;  %7491 = vmatprep.mubr.msk.bf16.mxu0 %vm8779_vm2, %v14020_v2 }
  0xf9   :  { %v9466_v43 = vpop.f32.mrb[16].mxu0  ;;  %v9468_v44 = vpop.f32.mrb[16].mxu1 }
  0xfa   :  { %14030 = vst [vmem:[#allocation13_spill] sm:$0xff] %v9468_v44  ;;  %v7173_v45 = vpop.f32.mrb[17].mxu0  ;;  %v7277_v51 = vpop.f32.mrb[17].mxu1 }
  0xfb   :  { %v9470_v52 = vpop.f32.mrb[18].mxu0  ;;  %v9472_v55 = vpop.f32.mrb[18].mxu1  ;;  %v1277_v51 = vpack.c.bf16 %v1209_v41, %v1208_v40 }
  0xfc   :  { %14031 = vst [vmem:[#allocation14_spill] sm:$0xff] %v9472_v55  ;;  %v7174_v56 = vpop.f32.mrb[19].mxu0  ;;  %v7278_v57 = vpop.f32.mrb[19].mxu1 }
  0xfe   :  { %7386 = vmatmul.mubr.msk.bf16.gmra.mrb[124].mxu1 %vm262_vm1, %v122_v48  ;;  %7492 = vmatmul.mubr.msk.bf16.gmra.mrb[124].mxu0 %vm262_vm1, %v1274_v49  ;;  %v125_v49 = vpack.c.bf16 %v70_v39, %v69_v38  ;;  %v1213_v38 = vld [vmem:[%s14012_s0 + $0xaa] sm:$0xff] }
  0xff   :  { %7389 = vmatprep.mubr.msk.bf16.mxu1 %vm8779_vm2, %v14020_v2  ;;  %7495 = vmatprep.mubr.msk.bf16.mxu0 %vm8779_vm2, %v14020_v2 }
 0x101   :  { %v9492_v62 = vpop.f32.mrb[20].mxu0  ;;  %v9494_v63 = vpop.f32.mrb[20].mxu1 }
 0x102   :  { %14032 = vst [vmem:[#allocation15_spill] sm:$0xff] %v9494_v63  ;;  %v7177_v3 = vpop.f32.mrb[21].mxu0  ;;  %v7281_v9 = vpop.f32.mrb[21].mxu1 }
 0x103   :  { %v9496_v10 = vpop.f32.mrb[22].mxu0  ;;  %v9498_v11 = vpop.f32.mrb[22].mxu1  ;;  %v72_v3 = vld [vmem:[%s14012_s0 + $0x168] sm:$0xff] }
 0x104   :  { %14033 = vst [vmem:[#allocation16_spill] sm:$0xff] %v9498_v11  ;;  %v7178_v12 = vpop.f32.mrb[23].mxu0  ;;  %v7282_v13 = vpop.f32.mrb[23].mxu1  ;;  %v126_v14 = vpack.c.bf16 %v72_v3, %v71_v61  ;;  %v75_v3 = vld [vmem:[%s14012_s0 + $0x180] sm:$0xff] }
 0x106   :  { %7390 = vmatmul.mubr.msk.bf16.gmra.mrb[128].mxu1 %vm262_vm1, %v123_v4  ;;  %7496 = vmatmul.mubr.msk.bf16.gmra.mrb[128].mxu0 %vm262_vm1, %v1275_v6  ;;  %v1210_v4 = vld [vmem:[%s14012_s0 + $0x92] sm:$0xff]  ;;  %v1211_v6 = vld [vmem:[%s14012_s0 + $0x9a] sm:$0xff] }
 0x107   :  { %7393 = vmatprep.mubr.msk.bf16.mxu1 %vm8779_vm2, %v14020_v2  ;;  %7499 = vmatprep.mubr.msk.bf16.mxu0 %vm8779_vm2, %v14020_v2  ;;  %v1278_v17 = vpack.c.bf16 %v1211_v6, %v1210_v4  ;;  %v76_v4 = vld [vmem:[%s14012_s0 + $0x188] sm:$0xff]  ;;  %v1214_v6 = vld [vmem:[%s14012_s0 + $0xb2] sm:$0xff] }
 0x109   :  { %v9518_v23 = vpop.f32.mrb[24].mxu0  ;;  %v9520_v24 = vpop.f32.mrb[24].mxu1 }
 0x10a   :  { %14034 = vst [vmem:[#allocation17_spill] sm:$0xff] %v9520_v24  ;;  %v7181_v25 = vpop.f32.mrb[25].mxu0  ;;  %v7285_v28 = vpop.f32.mrb[25].mxu1 }
 0x10b   :  { %v9522_v31 = vpop.f32.mrb[26].mxu0  ;;  %v9524_v32 = vpop.f32.mrb[26].mxu1  ;;  %v73_v28 = vld [vmem:[%s14012_s0 + $0x170] sm:$0xff] }
 0x10c   :  { %14035 = vst [vmem:[#allocation18_spill] sm:$0xff] %v9524_v32  ;;  %v7182_v34 = vpop.f32.mrb[27].mxu0  ;;  %v7286_v37 = vpop.f32.mrb[27].mxu1 }
 0x10d   :  { %v74_v34 = vld [vmem:[%s14012_s0 + $0x178] sm:$0xff]  ;;  %v1212_v37 = vld [vmem:[%s14012_s0 + $0xa2] sm:$0xff] }
 0x10e   :  { %7394 = vmatmul.mubr.msk.bf16.gmra.mrb[132].mxu1 %vm262_vm1, %v124_v26  ;;  %7500 = vmatmul.mubr.msk.bf16.gmra.mrb[132].mxu0 %vm262_vm1, %v1276_v27 }
 0x10f   :  { %7397 = vmatprep.mubr.msk.bf16.mxu1 %vm8779_vm2, %v14020_v2  ;;  %7503 = vmatprep.mubr.msk.bf16.mxu0 %vm8779_vm2, %v14020_v2 }
 0x111   :  { %v9544_v42 = vpop.f32.mrb[28].mxu0  ;;  %v9546_v45 = vpop.f32.mrb[28].mxu1 }
 0x112   :  { %14036 = vst [vmem:[#allocation19_spill] sm:$0xff] %v9546_v45  ;;  %v7185_v48 = vpop.f32.mrb[29].mxu0  ;;  %v7289_v56 = vpop.f32.mrb[29].mxu1 }
 0x113   :  { %v9548_v57 = vpop.f32.mrb[30].mxu0  ;;  %v9550_v58 = vpop.f32.mrb[30].mxu1  ;;  %v127_v48 = vpack.c.bf16 %v74_v34, %v73_v28 }
 0x114   :  { %14037 = vst [vmem:[#allocation20_spill] sm:$0xff] %v9550_v58  ;;  %v7186_v59 = vpop.f32.mrb[31].mxu0  ;;  %v7290_v60 = vpop.f32.mrb[31].mxu1 }
 0x116   :  { %7398 = vmatmul.mubr.msk.bf16.gmra.mrb[136].mxu1 %vm262_vm1, %v125_v49  ;;  %7504 = vmatmul.mubr.msk.bf16.gmra.mrb[136].mxu0 %vm262_vm1, %v1277_v51  ;;  %v1279_v49 = vpack.c.bf16 %v1213_v38, %v1212_v37 }
 0x117   :  { %7401 = vmatprep.mubr.msk.bf16.mxu1 %vm8779_vm2, %v14020_v2  ;;  %7507 = vmatprep.mubr.msk.bf16.mxu0 %vm8779_vm2, %v14020_v2 }
 0x119   :  { %v9570_v9 = vpop.f32.mrb[32].mxu0  ;;  %v9572_v12 = vpop.f32.mrb[32].mxu1 }
 0x11a   :  { %14038 = vst [vmem:[#allocation21_spill] sm:$0xff] %v9572_v12  ;;  %v7189_v13 = vpop.f32.mrb[33].mxu0  ;;  %v7293_v18 = vpop.f32.mrb[33].mxu1 }
 0x11b   :  { %v9574_v20 = vpop.f32.mrb[34].mxu0  ;;  %v9576_v25 = vpop.f32.mrb[34].mxu1  ;;  %v1215_v13 = vld [vmem:[%s14012_s0 + $0xba] sm:$0xff] }
 0x11c   :  { %14039 = vst [vmem:[#allocation22_spill] sm:$0xff] %v9576_v25  ;;  %v7190_v26 = vpop.f32.mrb[35].mxu0  ;;  %v7294_v27 = vpop.f32.mrb[35].mxu1 }
 0x11d   :  { %v128_v26 = vpack.c.bf16 %v76_v4, %v75_v3  ;;  %v1280_v27 = vpack.c.bf16 %v1215_v13, %v1214_v6 }
 0x11e   :  { %7402 = vmatmul.mubr.msk.bf16.gmra.mrb[140].mxu1 %vm262_vm1, %v126_v14  ;;  %7508 = vmatmul.mubr.msk.bf16.gmra.mrb[140].mxu0 %vm262_vm1, %v1278_v17 }
 0x11f   :  { %7405 = vmatprep.mubr.msk.bf16.mxu1 %vm8779_vm2, %v14020_v2  ;;  %7511 = vmatprep.mubr.msk.bf16.mxu0 %vm8779_vm2, %v14020_v2 }
 0x121   :  { %v9596_v39 = vpop.f32.mrb[36].mxu0  ;;  %v9598_v40 = vpop.f32.mrb[36].mxu1 }
 0x122   :  { %14040 = vst [vmem:[#allocation23_spill] sm:$0xff] %v9598_v40  ;;  %v7193_v41 = vpop.f32.mrb[37].mxu0  ;;  %v7297_v51 = vpop.f32.mrb[37].mxu1 }
 0x123   :  { %v9600_v56 = vpop.f32.mrb[38].mxu0  ;;  %v9602_v59 = vpop.f32.mrb[38].mxu1  ;;  %v1216_v51 = vld [vmem:[%s14012_s0 + $0xc2] sm:$0xff] }
 0x124   :  { %14041 = vst [vmem:[#allocation24_spill] sm:$0xff] %v9602_v59  ;;  %v7194_v60 = vpop.f32.mrb[39].mxu0  ;;  %v7298_v61 = vpop.f32.mrb[39].mxu1 }
 0x125   :  { %v1217_v60 = vld [vmem:[%s14012_s0 + $0xca] sm:$0xff] }
 0x126   :  { %7406 = vmatmul.mubr.msk.bf16.gmra.mrb[144].mxu1 %vm262_vm1, %v127_v48  ;;  %7512 = vmatmul.mubr.msk.bf16.gmra.mrb[144].mxu0 %vm262_vm1, %v1279_v49  ;;  %v77_v48 = vld [vmem:[%s14012_s0 + $0x190] sm:$0xff]  ;;  %v78_v49 = vld [vmem:[%s14012_s0 + $0x198] sm:$0xff]  ;;  %v1281_v13 = vpack.c.bf16 %v1217_v60, %v1216_v51 }
 0x127   :  { %7409 = vmatprep.mubr.msk.bf16.mxu1 %vm8779_vm2, %v14020_v2  ;;  %7515 = vmatprep.mubr.msk.bf16.mxu0 %vm8779_vm2, %v14020_v2  ;;  %v129_v6 = vpack.c.bf16 %v78_v49, %v77_v48  ;;  %v80_v48 = vld [vmem:[%s14012_s0 + $0x1a8] sm:$0xff]  ;;  %v1218_v49 = vld [vmem:[%s14012_s0 + $0xd2] sm:$0xff]  ;;  %v1219_v51 = vld [vmem:[%s14012_s0 + $0xda] sm:$0xff] }
 0x129   :  { %v9622_v14 = vpop.f32.mrb[40].mxu0  ;;  %v9624_v17 = vpop.f32.mrb[40].mxu1 }
 0x12a   :  { %14042 = vst [vmem:[#allocation25_spill] sm:$0xff] %v9624_v17  ;;  %v7197_v18 = vpop.f32.mrb[41].mxu0  ;;  %v7301_v28 = vpop.f32.mrb[41].mxu1  ;;  %v14047_v17 = vmov 0.0  }
 0x12b   :  { %v9626_v34 = vpop.f32.mrb[42].mxu0  ;;  %v9628_v37 = vpop.f32.mrb[42].mxu1 }
 0x12c   :  { %14043 = vst [vmem:[#allocation26_spill] sm:$0xff] %v9628_v37  ;;  %v7198_v38 = vpop.f32.mrb[43].mxu0  ;;  %v7302_v41 = vpop.f32.mrb[43].mxu1  ;;  %v81_v37 = vld [vmem:[%s14012_s0 + $0x1b0] sm:$0xff] }
 0x12d   :  { %v79_v41 = vld [vmem:[%s14012_s0 + $0x1a0] sm:$0xff] }
 0x12e   :  { %7410 = vmatmul.mubr.msk.bf16.gmra.mrb[148].mxu1 %vm262_vm1, %v128_v26  ;;  %7516 = vmatmul.mubr.msk.bf16.gmra.mrb[148].mxu0 %vm262_vm1, %v1280_v27 }
 0x12f   :  { %7413 = vmatprep.mubr.msk.bf16.mxu1 %vm8779_vm2, %v14020_v2  ;;  %7519 = vmatprep.mubr.msk.bf16.mxu0 %vm8779_vm2, %v14020_v2 }
 0x131   :  { %v9648_v61 = vpop.f32.mrb[44].mxu0  ;;  %v9650_v3 = vpop.f32.mrb[44].mxu1 }
 0x132   :  { %14044 = vst [vmem:[#allocation27_spill] sm:$0xff] %v9650_v3  ;;  %v7201_v4 = vpop.f32.mrb[45].mxu0  ;;  %v7305_v18 = vpop.f32.mrb[45].mxu1 }
 0x133   :  { %v9652_v26 = vpop.f32.mrb[46].mxu0  ;;  %v9654_v27 = vpop.f32.mrb[46].mxu1  ;;  %v130_v18 = vpack.c.bf16 %v80_v48, %v79_v41 }
 0x134   :  { %14045 = vst [vmem:[#allocation28_spill] sm:$0xff] %v9654_v27  ;;  %v7202_v28 = vpop.f32.mrb[47].mxu0  ;;  %v7306_v38 = vpop.f32.mrb[47].mxu1 }
 0x135   :  { %v1282_v28 = vpack.c.bf16 %v1219_v51, %v1218_v49 }
 0x136   :  { %7414 = vmatmul.mubr.msk.bf16.gmra.mrb[152].mxu1 %vm262_vm1, %v129_v6  ;;  %7520 = vmatmul.mubr.msk.bf16.gmra.mrb[152].mxu0 %vm262_vm1, %v1281_v13 }
 0x137   :  { %7417 = vmatprep.mubr.msk.bf16.mxu1 %vm8779_vm2, %v14020_v2  ;;  %7523 = vmatprep.mubr.msk.bf16.mxu0 %vm8779_vm2, %v14020_v2 }
 0x139   :  { %v9674_v60 = vpop.f32.mrb[48].mxu0  ;;  %v9676_v4 = vpop.f32.mrb[48].mxu1 }
 0x13a   :  { %14046 = vst [vmem:[#allocation29_spill] sm:$0xff] %v9676_v4  ;;  %v7205_v6 = vpop.f32.mrb[49].mxu0  ;;  %v7309_v13 = vpop.f32.mrb[49].mxu1 }
 0x13b   :  { %v9678_v38 = vpop.f32.mrb[50].mxu0  ;;  %v725_v2 = vpop.f32.mrb[50].mxu1 }
 0x13c   :  { %v7206_v27 = vpop.f32.mrb[51].mxu0  ;;  %v7310_v3 = vpop.f32.mrb[51].mxu1  ;;  %v82_v2 = vld [vmem:[%s14012_s0 + $0x1b8] sm:$0xff] }
 0x13d   :  { %v1220_v3 = vld [vmem:[%s14012_s0 + $0xe2] sm:$0xff]  ;;  %v1221_v27 = vld [vmem:[%s14012_s0 + $0xea] sm:$0xff]  ;;  %v131_v13 = vpack.c.bf16 %v82_v2, %v81_v37 }
 0x13e   :  { %7418 = vmatmul.mubr.msk.bf16.gmra.mrb[156].mxu1 %vm262_vm1, %v130_v18  ;;  %7524 = vmatmul.mubr.msk.bf16.gmra.mrb[156].mxu0 %vm262_vm1, %v1282_v28  ;;  %v1283_v18 = vpack.c.bf16 %v1221_v27, %v1220_v3 }
 0x13f   :  { %7421 = vmatprep.mubr.msk.bf16.mxu1 %vm8779_vm2, %v14047_v17  ;;  %7527 = vmatprep.mubr.msk.bf16.mxu0 %vm8779_vm2, %v14047_v17 }
 0x141   :  { %v9698_v41 = vpop.f32.mrb[52].mxu0  ;;  %v882_v48 = vpop.f32.mrb[52].mxu1 }
 0x142   :  { %v9701_v49 = vadd.f32 %v882_v48, %v9340_v46  ;;  %v7209_v51 = vpop.f32.mrb[53].mxu0  ;;  %v7315_v6 = vpop.f32.mrb[53].mxu1  ;;  %v83_v46 = vld [vmem:[%s14012_s0 + $0x1c0] sm:$0xff] }
 0x143   :  { %v9703_v28 = vpop.f32.mrb[54].mxu0  ;;  %v885_v4 = vpop.f32.mrb[54].mxu1 }
 0x144   :  { %v9706_v59 = vadd.f32 %v885_v4, %v9349_v53  ;;  %v7210_v40 = vpop.f32.mrb[55].mxu0  ;;  %v7316_v25 = vpop.f32.mrb[55].mxu1  ;;  %v84_v53 = vld [vmem:[%s14012_s0 + $0x1c8] sm:$0xff] }
 0x145   :  { %v1222_v25 = vld [vmem:[%s14012_s0 + $0xf2] sm:$0xff]  ;;  %v1223_v40 = vld [vmem:[%s14012_s0 + $0xfa] sm:$0xff]  ;;  %v132_v48 = vpack.c.bf16 %v84_v53, %v83_v46 }
 0x146   :  { %7422 = vmatmul.mubr.msk.bf16.gmra.mrb[160].mxu1 %vm262_vm1, %v131_v13  ;;  %7528 = vmatmul.mubr.msk.bf16.gmra.mrb[160].mxu0 %vm262_vm1, %v1283_v18  ;;  %v1284_v51 = vpack.c.bf16 %v1223_v40, %v1222_v25 }
 0x147   :  { %7425 = vmatprep.mubr.msk.bf16.mxu1 %vm8779_vm2, %v14047_v17  ;;  %7531 = vmatprep.mubr.msk.bf16.mxu0 %vm8779_vm2, %v14047_v17 }
 0x149   :  { %v9726_v37 = vpop.f32.mrb[56].mxu0  ;;  %v890_v4 = vpop.f32.mrb[56].mxu1 }
 0x14a   :  { %v9729_v2 = vadd.f32 %v890_v4, %v9378_v0  ;;  %v7213_v3 = vpop.f32.mrb[57].mxu0  ;;  %v7319_v27 = vpop.f32.mrb[57].mxu1  ;;  %v85_v0 = vld [vmem:[%s14012_s0 + $0x1d0] sm:$0xff] }
 0x14b   :  { %v9731_v6 = vpop.f32.mrb[58].mxu0  ;;  %v893_v13 = vpop.f32.mrb[58].mxu1 }
 0x14c   :  { %v9734_v18 = vadd.f32 %v893_v13, %v9385_v7  ;;  %v7214_v12 = vpop.f32.mrb[59].mxu0  ;;  %v7320_v58 = vpop.f32.mrb[59].mxu1  ;;  %v86_v7 = vld [vmem:[%s14012_s0 + $0x1d8] sm:$0xff] }
 0x14d   :  { %v1224_v58 = vld [vmem:[%s14012_s0 + $0x102] sm:$0xff]  ;;  %v1225_v12 = vld [vmem:[%s14012_s0 + $0x10a] sm:$0xff]  ;;  %v133_v3 = vpack.c.bf16 %v86_v7, %v85_v0 }
 0x14e   :  { %7426 = vmatmul.mubr.msk.bf16.gmra.mrb[164].mxu1 %vm262_vm1, %v132_v48  ;;  %7532 = vmatmul.mubr.msk.bf16.gmra.mrb[164].mxu0 %vm262_vm1, %v1284_v51  ;;  %v1285_v27 = vpack.c.bf16 %v1225_v12, %v1224_v58 }
 0x14f   :  { %7429 = vmatprep.mubr.msk.bf16.mxu1 %vm8779_vm2, %v14047_v17  ;;  %7535 = vmatprep.mubr.msk.bf16.mxu0 %vm8779_vm2, %v14047_v17 }
 0x151   :  { %v9754_v46 = vpop.f32.mrb[60].mxu0  ;;  %v898_v53 = vpop.f32.mrb[60].mxu1 }
 0x152   :  { %v9757_v25 = vadd.f32 %v898_v53, %v9408_v15  ;;  %v7217_v40 = vpop.f32.mrb[61].mxu0  ;;  %v7323_v4 = vpop.f32.mrb[61].mxu1  ;;  %v87_v15 = vld [vmem:[%s14012_s0 + $0x1e0] sm:$0xff] }
 0x153   :  { %v9759_v48 = vpop.f32.mrb[62].mxu0  ;;  %v901_v51 = vpop.f32.mrb[62].mxu1 }
 0x154   :  { %v9762_v13 = vadd.f32 %v901_v51, %v9414_v21  ;;  %v7218_v45 = vpop.f32.mrb[63].mxu0  ;;  %v7324_v32 = vpop.f32.mrb[63].mxu1  ;;  %v88_v21 = vld [vmem:[%s14012_s0 + $0x1e8] sm:$0xff] }
 0x155   :  { %v1226_v32 = vld [vmem:[%s14012_s0 + $0x112] sm:$0xff]  ;;  %v1227_v45 = vld [vmem:[%s14012_s0 + $0x11a] sm:$0xff]  ;;  %v134_v40 = vpack.c.bf16 %v88_v21, %v87_v15 }
 0x156   :  { %7430 = vmatmul.mubr.msk.bf16.gmra.mrb[168].mxu1 %vm262_vm1, %v133_v3  ;;  %7536 = vmatmul.mubr.msk.bf16.gmra.mrb[168].mxu0 %vm262_vm1, %v1285_v27  ;;  %v1286_v4 = vpack.c.bf16 %v1227_v45, %v1226_v32 }
 0x157   :  { %7433 = vmatprep.mubr.msk.bf16.mxu1 %vm8779_vm2, %v14047_v17  ;;  %7539 = vmatprep.mubr.msk.bf16.mxu0 %vm8779_vm2, %v14047_v17 }
 0x159   :  { %v9782_v0 = vpop.f32.mrb[64].mxu0  ;;  %v906_v7 = vpop.f32.mrb[64].mxu1 }
 0x15a   :  { %v9785_v58 = vadd.f32 %v906_v7, %v9437_v29  ;;  %v7221_v12 = vpop.f32.mrb[65].mxu0  ;;  %v7327_v53 = vpop.f32.mrb[65].mxu1  ;;  %v89_v29 = vld [vmem:[%s14012_s0 + $0x1f0] sm:$0xff] }
 0x15b   :  { %v9787_v3 = vpop.f32.mrb[66].mxu0  ;;  %v909_v27 = vpop.f32.mrb[66].mxu1 }
 0x15c   :  { %v9790_v51 = vadd.f32 %v909_v27, %v9443_v35  ;;  %v7222_v24 = vpop.f32.mrb[67].mxu0  ;;  %v7328_v11 = vpop.f32.mrb[67].mxu1  ;;  %v90_v35 = vld [vmem:[%s14012_s0 + $0x1f8] sm:$0xff] }
 0x15d   :  { %v1228_v11 = vld [vmem:[%s14012_s0 + $0x122] sm:$0xff]  ;;  %v1229_v24 = vld [vmem:[%s14012_s0 + $0x12a] sm:$0xff]  ;;  %v135_v12 = vpack.c.bf16 %v90_v35, %v89_v29 }
 0x15e   :  { %7434 = vmatmul.mubr.msk.bf16.gmra.mrb[172].mxu1 %vm262_vm1, %v134_v40  ;;  %7540 = vmatmul.mubr.msk.bf16.gmra.mrb[172].mxu0 %vm262_vm1, %v1286_v4  ;;  %v1287_v53 = vpack.c.bf16 %v1229_v24, %v1228_v11 }
 0x15f   :  { %7437 = vmatprep.mubr.msk.bf16.mxu1 %vm8779_vm2, %v14047_v17  ;;  %7543 = vmatprep.mubr.msk.bf16.mxu0 %vm8779_vm2, %v14047_v17 }
 0x161   :  { %v9810_v15 = vpop.f32.mrb[68].mxu0  ;;  %v914_v21 = vpop.f32.mrb[68].mxu1 }
 0x162   :  { %v9813_v32 = vadd.f32 %v914_v21, %v9466_v43  ;;  %v7225_v45 = vpop.f32.mrb[69].mxu0  ;;  %v7331_v7 = vpop.f32.mrb[69].mxu1  ;;  %v91_v43 = vld [vmem:[%s14012_s0 + $0x200] sm:$0xff] }
 0x163   :  { %v9815_v40 = vpop.f32.mrb[70].mxu0  ;;  %v917_v4 = vpop.f32.mrb[70].mxu1 }
 0x164   :  { %v9818_v27 = vadd.f32 %v917_v4, %v9470_v52  ;;  %v7226_v63 = vpop.f32.mrb[71].mxu0  ;;  %v7332_v55 = vpop.f32.mrb[71].mxu1  ;;  %v92_v52 = vld [vmem:[%s14012_s0 + $0x208] sm:$0xff] }
 0x165   :  { %v1230_v55 = vld [vmem:[%s14012_s0 + $0x132] sm:$0xff]  ;;  %v1231_v63 = vld [vmem:[%s14012_s0 + $0x13a] sm:$0xff]  ;;  %v136_v45 = vpack.c.bf16 %v92_v52, %v91_v43 }
 0x166   :  { %7438 = vmatmul.mubr.msk.bf16.gmra.mrb[176].mxu1 %vm262_vm1, %v135_v12  ;;  %7544 = vmatmul.mubr.msk.bf16.gmra.mrb[176].mxu0 %vm262_vm1, %v1287_v53  ;;  %v1288_v7 = vpack.c.bf16 %v1231_v63, %v1230_v55 }
 0x167   :  { %7441 = vmatprep.mubr.msk.bf16.mxu1 %vm8779_vm2, %v14047_v17  ;;  %7547 = vmatprep.mubr.msk.bf16.mxu0 %vm8779_vm2, %v14047_v17 }
 0x169   :  { %v9838_v29 = vpop.f32.mrb[72].mxu0  ;;  %v922_v35 = vpop.f32.mrb[72].mxu1 }
 0x16a   :  { %v9841_v11 = vadd.f32 %v922_v35, %v9492_v62  ;;  %v7229_v24 = vpop.f32.mrb[73].mxu0  ;;  %v7335_v21 = vpop.f32.mrb[73].mxu1  ;;  %v93_v62 = vld [vmem:[%s14012_s0 + $0x210] sm:$0xff] }
 0x16b   :  { %v9843_v12 = vpop.f32.mrb[74].mxu0  ;;  %v925_v53 = vpop.f32.mrb[74].mxu1 }
 0x16c   :  { %v9846_v4 = vadd.f32 %v925_v53, %v9496_v10  ;;  %v7230_v44 = vpop.f32.mrb[75].mxu0  ;;  %v7336_v36 = vpop.f32.mrb[75].mxu1  ;;  %v94_v10 = vld [vmem:[%s14012_s0 + $0x218] sm:$0xff] }
 0x16d   :  { %v1232_v36 = vld [vmem:[%s14012_s0 + $0x142] sm:$0xff]  ;;  %v1233_v44 = vld [vmem:[%s14012_s0 + $0x14a] sm:$0xff]  ;;  %v137_v24 = vpack.c.bf16 %v94_v10, %v93_v62 }
 0x16e   :  { %7442 = vmatmul.mubr.msk.bf16.gmra.mrb[180].mxu1 %vm262_vm1, %v136_v45  ;;  %7548 = vmatmul.mubr.msk.bf16.gmra.mrb[180].mxu0 %vm262_vm1, %v1288_v7  ;;  %v1289_v21 = vpack.c.bf16 %v1233_v44, %v1232_v36 }
 0x16f   :  { %7445 = vmatprep.mubr.msk.bf16.mxu1 %vm8779_vm2, %v14047_v17  ;;  %7551 = vmatprep.mubr.msk.bf16.mxu0 %vm8779_vm2, %v14047_v17 }
 0x171   :  { %v9866_v43 = vpop.f32.mrb[76].mxu0  ;;  %v930_v52 = vpop.f32.mrb[76].mxu1 }
 0x172   :  { %v9869_v55 = vadd.f32 %v930_v52, %v9518_v23  ;;  %v7233_v63 = vpop.f32.mrb[77].mxu0  ;;  %v7339_v35 = vpop.f32.mrb[77].mxu1  ;;  %v95_v23 = vld [vmem:[%s14012_s0 + $0x220] sm:$0xff] }
 0x173   :  { %v9871_v45 = vpop.f32.mrb[78].mxu0  ;;  %v933_v7 = vpop.f32.mrb[78].mxu1 }
 0x174   :  { %v9874_v53 = vadd.f32 %v933_v7, %v9522_v31  ;;  %v7234_v30 = vpop.f32.mrb[79].mxu0  ;;  %v7340_v22 = vpop.f32.mrb[79].mxu1  ;;  %v96_v31 = vld [vmem:[%s14012_s0 + $0x228] sm:$0xff] }
 0x175   :  { %v1234_v22 = vld [vmem:[%s14012_s0 + $0x152] sm:$0xff]  ;;  %v1235_v30 = vld [vmem:[%s14012_s0 + $0x15a] sm:$0xff]  ;;  %v138_v63 = vpack.c.bf16 %v96_v31, %v95_v23 }
 0x176   :  { %7446 = vmatmul.mubr.msk.bf16.gmra.mrb[184].mxu1 %vm262_vm1, %v137_v24  ;;  %7552 = vmatmul.mubr.msk.bf16.gmra.mrb[184].mxu0 %vm262_vm1, %v1289_v21  ;;  %v1290_v35 = vpack.c.bf16 %v1235_v30, %v1234_v22 }
 0x177   :  { %7449 = vmatprep.mubr.msk.bf16.mxu1 %vm8779_vm2, %v14047_v17  ;;  %7555 = vmatprep.mubr.msk.bf16.mxu0 %vm8779_vm2, %v14047_v17 }
 0x179   :  { %v9894_v62 = vpop.f32.mrb[80].mxu0  ;;  %v938_v10 = vpop.f32.mrb[80].mxu1 }
 0x17a   :  { %v9897_v36 = vadd.f32 %v938_v10, %v9544_v42  ;;  %v7237_v44 = vpop.f32.mrb[81].mxu0  ;;  %v7343_v52 = vpop.f32.mrb[81].mxu1  ;;  %v97_v42 = vld [vmem:[%s14012_s0 + $0x230] sm:$0xff] }
 0x17b   :  { %v9899_v24 = vpop.f32.mrb[82].mxu0  ;;  %v941_v21 = vpop.f32.mrb[82].mxu1 }
 0x17c   :  { %v9902_v7 = vadd.f32 %v941_v21, %v9548_v57  ;;  %v7238_v16 = vpop.f32.mrb[83].mxu0  ;;  %v7344_v8 = vpop.f32.mrb[83].mxu1  ;;  %v98_v57 = vld [vmem:[%s14012_s0 + $0x238] sm:$0xff] }
 0x17d   :  { %v1236_v8 = vld [vmem:[%s14012_s0 + $0x162] sm:$0xff]  ;;  %v1237_v16 = vld [vmem:[%s14012_s0 + $0x16a] sm:$0xff]  ;;  %v139_v44 = vpack.c.bf16 %v98_v57, %v97_v42 }
 0x17e   :  { %7450 = vmatmul.mubr.msk.bf16.gmra.mrb[188].mxu1 %vm262_vm1, %v138_v63  ;;  %7556 = vmatmul.mubr.msk.bf16.gmra.mrb[188].mxu0 %vm262_vm1, %v1290_v35  ;;  %v1291_v52 = vpack.c.bf16 %v1237_v16, %v1236_v8 }
 0x17f   :  { %7453 = vmatprep.mubr.msk.bf16.mxu1 %vm8779_vm2, %v14047_v17  ;;  %7559 = vmatprep.mubr.msk.bf16.mxu0 %vm8779_vm2, %v14047_v17 }
 0x181   :  { %v9922_v23 = vpop.f32.mrb[84].mxu0  ;;  %v946_v31 = vpop.f32.mrb[84].mxu1 }
 0x182   :  { %v9925_v22 = vadd.f32 %v946_v31, %v9570_v9  ;;  %v7241_v30 = vpop.f32.mrb[85].mxu0  ;;  %v7347_v10 = vpop.f32.mrb[85].mxu1  ;;  %v99_v9 = vld [vmem:[%s14012_s0 + $0x240] sm:$0xff] }
 0x183   :  { %v9927_v63 = vpop.f32.mrb[86].mxu0  ;;  %v949_v35 = vpop.f32.mrb[86].mxu1 }
 0x184   :  { %v9930_v21 = vadd.f32 %v949_v35, %v9574_v20  ;;  %v7242_v1 = vpop.f32.mrb[87].mxu0  ;;  %v7348_v54 = vpop.f32.mrb[87].mxu1  ;;  %v100_v20 = vld [vmem:[%s14012_s0 + $0x248] sm:$0xff] }
 0x185   :  { %v1238_v54 = vld [vmem:[%s14012_s0 + $0x172] sm:$0xff]  ;;  %v1239_v1 = vld [vmem:[%s14012_s0 + $0x17a] sm:$0xff]  ;;  %v140_v30 = vpack.c.bf16 %v100_v20, %v99_v9 }
 0x186   :  { %14048 = vst [vmem:[#allocation30_spill] sm:$0xff] %v9930_v21  ;;  %7454 = vmatmul.mubr.msk.bf16.gmra.mrb[192].mxu1 %vm262_vm1, %v139_v44  ;;  %7560 = vmatmul.mubr.msk.bf16.gmra.mrb[192].mxu0 %vm262_vm1, %v1291_v52  ;;  %v1292_v10 = vpack.c.bf16 %v1239_v1, %v1238_v54 }
 0x187   :  { %7457 = vmatprep.mubr.msk.bf16.mxu1 %vm8779_vm2, %v14047_v17  ;;  %7563 = vmatprep.mubr.msk.bf16.mxu0 %vm8779_vm2, %v14047_v17 }
 0x189   :  { %v9950_v42 = vpop.f32.mrb[88].mxu0  ;;  %v954_v57 = vpop.f32.mrb[88].mxu1 }
 0x18a   :  { %v9953_v8 = vadd.f32 %v954_v57, %v9596_v39  ;;  %v7245_v16 = vpop.f32.mrb[89].mxu0  ;;  %v7351_v31 = vpop.f32.mrb[89].mxu1  ;;  %v101_v39 = vld [vmem:[%s14012_s0 + $0x250] sm:$0xff] }
 0x18b   :  { %v9955_v44 = vpop.f32.mrb[90].mxu0  ;;  %v957_v52 = vpop.f32.mrb[90].mxu1 }
 0x18c   :  { %14049 = vst [vmem:[#allocation31_spill] sm:$0xff] %v9955_v44  ;;  %v9958_v35 = vadd.f32 %v957_v52, %v9600_v56  ;;  %v7246_v47 = vpop.f32.mrb[91].mxu0  ;;  %v7352_v21 = vpop.f32.mrb[91].mxu1  ;;  %v102_v56 = vld [vmem:[%s14012_s0 + $0x258] sm:$0xff] }
 0x18d   :  { %v1240_v47 = vld [vmem:[%s14012_s0 + $0x182] sm:$0xff]  ;;  %v1241_v21 = vld [vmem:[%s14012_s0 + $0x18a] sm:$0xff]  ;;  %v141_v16 = vpack.c.bf16 %v102_v56, %v101_v39 }
 0x18e   :  { %14050 = vst [vmem:[#allocation32_spill] sm:$0xff] %v9958_v35  ;;  %7458 = vmatmul.mubr.msk.bf16.gmra.mrb[196].mxu1 %vm262_vm1, %v140_v30  ;;  %7564 = vmatmul.mubr.msk.bf16.gmra.mrb[196].mxu0 %vm262_vm1, %v1292_v10  ;;  %v1293_v31 = vpack.c.bf16 %v1241_v21, %v1240_v47 }
 0x18f   :  { %7461 = vmatprep.mubr.msk.bf16.mxu1 %vm8779_vm2, %v14047_v17  ;;  %7567 = vmatprep.mubr.msk.bf16.mxu0 %vm8779_vm2, %v14047_v17 }
 0x191   :  { %v9978_v9 = vpop.f32.mrb[92].mxu0  ;;  %v962_v20 = vpop.f32.mrb[92].mxu1 }
 0x192   :  { %v9981_v54 = vadd.f32 %v962_v20, %v9622_v14  ;;  %v7249_v1 = vpop.f32.mrb[93].mxu0  ;;  %v7355_v57 = vpop.f32.mrb[93].mxu1  ;;  %v103_v14 = vld [vmem:[%s14012_s0 + $0x260] sm:$0x3f] }
 0x193   :  { %v9983_v30 = vpop.f32.mrb[94].mxu0  ;;  %v965_v10 = vpop.f32.mrb[94].mxu1  ;;  %v142_v20 = vpack.c.bf16 %v103_v14, %v103_v14 }
 0x194   :  { %v9986_v52 = vadd.f32 %v965_v10, %v9626_v34  ;;  %v7250_v35 = vpop.f32.mrb[95].mxu0  ;;  %v7356_v44 = vpop.f32.mrb[95].mxu1  ;;  %v1242_v34 = vld [vmem:[%s14012_s0 + $0x192] sm:$0xff] }
 0x195   :  { %v1243_v44 = vld [vmem:[%s14012_s0 + $0x19a] sm:$0xff] }
 0x196   :  { %14051 = vst [vmem:[#allocation33_spill] sm:$0xff] %v9986_v52  ;;  %7462 = vmatmul.mubr.msk.bf16.gmra.mrb[200].mxu1 %vm262_vm1, %v141_v16  ;;  %7568 = vmatmul.mubr.msk.bf16.gmra.mrb[200].mxu0 %vm262_vm1, %v1293_v31  ;;  %v1294_v1 = vpack.c.bf16 %v1243_v44, %v1242_v34 }
 0x197   :  { %7465 = vmatprep.mubr.msk.bf16.mxu1 %vm8779_vm2, %v14047_v17  ;;  %7571 = vmatprep.mubr.msk.bf16.mxu0 %vm8779_vm2, %v14047_v17 }
 0x199   :  { %v10003_v35 = vpop.f32.mrb[96].mxu0  ;;  %v970_v39 = vpop.f32.mrb[96].mxu1 }
 0x19a   :  { %v10006_v56 = vadd.f32 %v970_v39, %v9648_v61  ;;  %v7253_v47 = vpop.f32.mrb[97].mxu0  ;;  %v7359_v21 = vpop.f32.mrb[97].mxu1  ;;  %v1244_v61 = vld [vmem:[%s14012_s0 + $0x1a2] sm:$0xff] }
 0x19b   :  { %v10008_v57 = vpop.f32.mrb[98].mxu0  ;;  %v973_v16 = vpop.f32.mrb[98].mxu1 }
 0x19c   :  { %v10011_v31 = vadd.f32 %v973_v16, %v9652_v26  ;;  %v7254_v10 = vpop.f32.mrb[99].mxu0  ;;  %v7360_v52 = vpop.f32.mrb[99].mxu1  ;;  %v1245_v26 = vld [vmem:[%s14012_s0 + $0x1aa] sm:$0xff] }
 0x19d   :  { %v1295_v47 = vpack.c.bf16 %v1245_v26, %v1244_v61 }
 0x19e   :  { %7466 = vmatmul.mubr.msk.bf16.gmra.mrb[204].mxu1 %vm262_vm1, %v142_v20  ;;  %7572 = vmatmul.mubr.msk.bf16.gmra.mrb[204].mxu0 %vm262_vm1, %v1294_v1 }
 0x19f   :  { %7575 = vmatprep.mubr.msk.bf16.mxu0 %vm8779_vm2, %v14047_v17  ;;  %7629 = vmatprep.mubr.msk.bf16.mxu1 %vm8779_vm2, %v14047_v17 }
 0x1a1   :  { %v10025_v14 = vpop.f32.mrb[100].mxu0  ;;  %v978_v52 = vpop.f32.mrb[100].mxu1 }
 0x1a2   :  { %v10028_v34 = vadd.f32 %v978_v52, %v9674_v60  ;;  %v7257_v44 = vpop.f32.mrb[101].mxu0  ;;  %v7363_v39 = vpop.f32.mrb[101].mxu1  ;;  %v1246_v60 = vld [vmem:[%s14012_s0 + $0x1b2] sm:$0xff] }
 0x1a3   :  { %v10030_v21 = vpop.f32.mrb[102].mxu0  ;;  %v981_v20 = vpop.f32.mrb[102].mxu1 }
 0x1a4   :  { %14052 = vst [vmem:[#allocation34_spill] sm:$0xff] %v10028_v34  ;;  %14053 = vst [vmem:[#allocation35_spill] sm:$0xff] %v10030_v21  ;;  %v10033_v1 = vadd.f32 %v981_v20, %v9678_v38  ;;  %v7258_v16 = vpop.f32.mrb[103].mxu0  ;;  %v7364_v10 = vpop.f32.mrb[103].mxu1  ;;  %v1247_v38 = vld [vmem:[%s14012_s0 + $0x1ba] sm:$0xff] }
 0x1a6   :  { %14054 = vst [vmem:[#allocation36_spill] sm:$0xff] %v10033_v1  ;;  %7576 = vmatmul.mubr.msk.bf16.gmra.mrb[208].mxu0 %vm262_vm1, %v1295_v47  ;;  %7630 = vmatmul.mubr.msk.bf16.vlgmr.msra.gmra.mrb[208].mxu1 %vm262_vm1, %v9344_v50  ;;  %v1296_v47 = vpack.c.bf16 %v1247_v38, %v1246_v60 }
 0x1a7   :  { %7579 = vmatprep.mubr.msk.bf16.mxu0 %vm8779_vm2, %v14047_v17  ;;  %7633 = vmatprep.mubr.msk.bf16.mxu1 %vm8779_vm2, %v14047_v17 }
 0x1a9   :  { %v986_v61 = vpop.f32.mrb[104].mxu1  ;;  %v1464_v26 = vpop.f32.mrb[104].mxu0 }
 0x1aa   :  { %v10049_v52 = vadd.f32 %v986_v61, %v9698_v41  ;;  %v10052_v50 = vadd.f32 %v1464_v26, %v9701_v49  ;;  %v7367_v44 = vpop.f32.mrb[105].mxu1  ;;  %v7473_v39 = vpop.f32.mrb[105].mxu0  ;;  %v1248_v41 = vld [vmem:[%s14012_s0 + $0x1c2] sm:$0xff] }
 0x1ab   :  { %v989_v20 = vpop.f32.mrb[106].mxu1  ;;  %v1467_v16 = vpop.f32.mrb[106].mxu0 }
 0x1ac   :  { %v10055_v10 = vadd.f32 %v989_v20, %v9703_v28  ;;  %v10058_v1 = vadd.f32 %v1467_v16, %v9706_v59  ;;  %v7474_v21 = vpop.f32.mrb[107].mxu0  ;;  %v7368_v34 = vpop.f32.mrb[107].mxu1  ;;  %v1249_v59 = vld [vmem:[%s14012_s0 + $0x1ca] sm:$0xff] }
 0x1ad   :  { %v1297_v38 = vpack.c.bf16 %v1249_v59, %v1248_v41 }
 0x1ae   :  { %7580 = vmatmul.mubr.msk.bf16.gmra.mrb[212].mxu0 %vm262_vm1, %v1296_v47  ;;  %7634 = vmatmul.mubr.msk.bf16.gmra.mrb[212].mxu1 %vm262_vm1, %v9383_v5 }
 0x1af   :  { %7583 = vmatprep.mubr.msk.bf16.mxu0 %vm8779_vm2, %v14047_v17  ;;  %7637 = vmatprep.mubr.msk.bf16.mxu1 %vm8779_vm2, %v14047_v17 }
 0x1b1   :  { %v994_v49 = vpop.f32.mrb[108].mxu1  ;;  %v1472_v28 = vpop.f32.mrb[108].mxu0 }
 0x1b2   :  { %v10074_v34 = vadd.f32 %v994_v49, %v9726_v37  ;;  %v10077_v5 = vadd.f32 %v1472_v28, %v9729_v2  ;;  %v7371_v21 = vpop.f32.mrb[109].mxu1  ;;  %v7477_v60 = vpop.f32.mrb[109].mxu0  ;;  %v1250_v37 = vld [vmem:[%s14012_s0 + $0x1d2] sm:$0xff]  ;;  %v1251_v2 = vld [vmem:[%s14012_s0 + $0x1da] sm:$0xff] }
 0x1b3   :  { %v997_v61 = vpop.f32.mrb[110].mxu1  ;;  %v1475_v26 = vpop.f32.mrb[110].mxu0  ;;  %v1298_v49 = vpack.c.bf16 %v1251_v2, %v1250_v37 }
 0x1b4   :  { %v10080_v44 = vadd.f32 %v997_v61, %v9731_v6  ;;  %v10083_v39 = vadd.f32 %v1475_v26, %v9734_v18  ;;  %v7478_v47 = vpop.f32.mrb[111].mxu0  ;;  %v7372_v20 = vpop.f32.mrb[111].mxu1 }
 0x1b6   :  { %7584 = vmatmul.mubr.msk.bf16.gmra.mrb[216].mxu0 %vm262_vm1, %v1297_v38  ;;  %7638 = vmatmul.mubr.msk.bf16.gmra.mrb[216].mxu1 %vm262_vm1, %v9412_v19 }
 0x1b7   :  { %7587 = vmatprep.mubr.msk.bf16.mxu0 %vm8779_vm2, %v14047_v17  ;;  %7641 = vmatprep.mubr.msk.bf16.mxu1 %vm8779_vm2, %v14047_v17 }
 0x1b9   :  { %v1002_v6 = vpop.f32.mrb[112].mxu1  ;;  %v1480_v18 = vpop.f32.mrb[112].mxu0 }
 0x1ba   :  { %v10099_v16 = vadd.f32 %v1002_v6, %v9754_v46  ;;  %v10102_v19 = vadd.f32 %v1480_v18, %v9757_v25  ;;  %v7375_v41 = vpop.f32.mrb[113].mxu1  ;;  %v7481_v59 = vpop.f32.mrb[113].mxu0  ;;  %v1252_v46 = vld [vmem:[%s14012_s0 + $0x1e2] sm:$0xff]  ;;  %v1253_v25 = vld [vmem:[%s14012_s0 + $0x1ea] sm:$0xff] }
 0x1bb   :  { %v1005_v28 = vpop.f32.mrb[114].mxu1  ;;  %v1483_v21 = vpop.f32.mrb[114].mxu0  ;;  %v1299_v18 = vpack.c.bf16 %v1253_v25, %v1252_v46 }
 0x1bc   :  { %v10105_v60 = vadd.f32 %v1005_v28, %v9759_v48  ;;  %v10108_v38 = vadd.f32 %v1483_v21, %v9762_v13  ;;  %v7482_v61 = vpop.f32.mrb[115].mxu0  ;;  %v7376_v26 = vpop.f32.mrb[115].mxu1  ;;  %v1859_v48 = vld [vmem:[%s14012_s0 + $0x52] sm:$0xff] }
 0x1be   :  { %7588 = vmatmul.mubr.msk.bf16.gmra.mrb[220].mxu0 %vm262_vm1, %v1298_v49  ;;  %7642 = vmatmul.mubr.msk.bf16.gmra.mrb[220].mxu1 %vm262_vm1, %v9441_v33  ;;  %v1860_v33 = vld [vmem:[%s14012_s0 + $0x5a] sm:$0xff] }
 0x1bf   :  { %7591 = vmatprep.mubr.msk.bf16.mxu0 %vm8779_vm2, %v14047_v17  ;;  %7645 = vmatprep.mubr.msk.bf16.mxu1 %vm8779_vm2, %v14047_v17  ;;  %v1932_v41 = vpack.c.bf16 %v1860_v33, %v1859_v48 }
 0x1c1   :  { %v1010_v13 = vpop.f32.mrb[116].mxu1  ;;  %v1488_v47 = vpop.f32.mrb[116].mxu0 }
 0x1c2   :  { %v10130_v20 = vadd.f32 %v1010_v13, %v9782_v0  ;;  %v10133_v37 = vadd.f32 %v1488_v47, %v9785_v58  ;;  %v7379_v2 = vpop.f32.mrb[117].mxu1  ;;  %v7485_v6 = vpop.f32.mrb[117].mxu0  ;;  %v1254_v0 = vld [vmem:[%s14012_s0 + $0x1f2] sm:$0xff]  ;;  %v1255_v58 = vld [vmem:[%s14012_s0 + $0x1fa] sm:$0xff] }
 0x1c3   :  { %v1013_v59 = vpop.f32.mrb[118].mxu1  ;;  %v1491_v49 = vpop.f32.mrb[118].mxu0  ;;  %v1300_v2 = vpack.c.bf16 %v1255_v58, %v1254_v0 }
 0x1c4   :  { %v10136_v28 = vadd.f32 %v1013_v59, %v9787_v3  ;;  %v10139_v21 = vadd.f32 %v1491_v49, %v9790_v51  ;;  %v7486_v61 = vpop.f32.mrb[119].mxu0  ;;  %v7380_v26 = vpop.f32.mrb[119].mxu1  ;;  %v1861_v3 = vld [vmem:[%s14012_s0 + $0x62] sm:$0xff]  ;;  %v1862_v51 = vld [vmem:[%s14012_s0 + $0x6a] sm:$0xff] }
 0x1c5   :  { %v1933_v6 = vpack.c.bf16 %v1862_v51, %v1861_v3 }
 0x1c6   :  { %7592 = vmatmul.mubr.msk.bf16.gmra.mrb[224].mxu0 %vm262_vm1, %v1299_v18  ;;  %7646 = vmatmul.mubr.msk.bf16.gmra.mrb[224].mxu1 %vm262_vm1, %v1932_v41 }
 0x1c7   :  { %7595 = vmatprep.mubr.msk.bf16.mxu0 %vm8779_vm2, %v14047_v17  ;;  %7649 = vmatprep.mubr.msk.bf16.mxu1 %vm8779_vm2, %v14047_v17 }
 0x1c9   :  { %v1018_v46 = vpop.f32.mrb[120].mxu1  ;;  %v1496_v25 = vpop.f32.mrb[120].mxu0 }
 0x1ca   :  { %v10160_v48 = vadd.f32 %v1018_v46, %v9810_v15  ;;  %v10163_v33 = vadd.f32 %v1496_v25, %v9813_v32  ;;  %v7383_v13 = vpop.f32.mrb[121].mxu1  ;;  %v7489_v47 = vpop.f32.mrb[121].mxu0  ;;  %v1256_v15 = vld [vmem:[%s14012_s0 + $0x202] sm:$0xff]  ;;  %v1257_v32 = vld [vmem:[%s14012_s0 + $0x20a] sm:$0xff] }
 0x1cb   :  { %v1021_v18 = vpop.f32.mrb[122].mxu1  ;;  %v1499_v41 = vpop.f32.mrb[122].mxu0  ;;  %v1301_v13 = vpack.c.bf16 %v1257_v32, %v1256_v15 }
 0x1cc   :  { %v10166_v59 = vadd.f32 %v1021_v18, %v9815_v40  ;;  %v10169_v49 = vadd.f32 %v1499_v41, %v9818_v27  ;;  %v7490_v61 = vpop.f32.mrb[123].mxu0  ;;  %v7384_v26 = vpop.f32.mrb[123].mxu1  ;;  %v1863_v40 = vld [vmem:[%s14012_s0 + $0x72] sm:$0xff]  ;;  %v1864_v27 = vld [vmem:[%s14012_s0 + $0x7a] sm:$0xff] }
 0x1cd   :  { %v1934_v47 = vpack.c.bf16 %v1864_v27, %v1863_v40 }
 0x1ce   :  { %7596 = vmatmul.mubr.msk.bf16.gmra.mrb[228].mxu0 %vm262_vm1, %v1300_v2  ;;  %7650 = vmatmul.mubr.msk.bf16.gmra.mrb[228].mxu1 %vm262_vm1, %v1933_v6 }
 0x1cf   :  { %7599 = vmatprep.mubr.msk.bf16.mxu0 %vm8779_vm2, %v14047_v17  ;;  %7653 = vmatprep.mubr.msk.bf16.mxu1 %vm8779_vm2, %v14047_v17 }
 0x1d1   :  { %v1026_v0 = vpop.f32.mrb[124].mxu1  ;;  %v1504_v58 = vpop.f32.mrb[124].mxu0 }
 0x1d2   :  { %v10190_v3 = vadd.f32 %v1026_v0, %v9838_v29  ;;  %v10193_v51 = vadd.f32 %v1504_v58, %v9841_v11  ;;  %v7387_v46 = vpop.f32.mrb[125].mxu1  ;;  %v7493_v25 = vpop.f32.mrb[125].mxu0  ;;  %v1258_v29 = vld [vmem:[%s14012_s0 + $0x212] sm:$0xff]  ;;  %v1259_v11 = vld [vmem:[%s14012_s0 + $0x21a] sm:$0xff] }
 0x1d3   :  { %v1029_v2 = vpop.f32.mrb[126].mxu1  ;;  %v1507_v6 = vpop.f32.mrb[126].mxu0  ;;  %v1302_v46 = vpack.c.bf16 %v1259_v11, %v1258_v29 }
 0x1d4   :  { %v10196_v18 = vadd.f32 %v1029_v2, %v9843_v12  ;;  %v10199_v41 = vadd.f32 %v1507_v6, %v9846_v4  ;;  %v7494_v61 = vpop.f32.mrb[127].mxu0  ;;  %v7388_v26 = vpop.f32.mrb[127].mxu1  ;;  %v1865_v12 = vld [vmem:[%s14012_s0 + $0x82] sm:$0xff]  ;;  %v1866_v4 = vld [vmem:[%s14012_s0 + $0x8a] sm:$0xff] }
 0x1d5   :  { %v1935_v25 = vpack.c.bf16 %v1866_v4, %v1865_v12 }
 0x1d6   :  { %7600 = vmatmul.mubr.msk.bf16.gmra.mrb[232].mxu0 %vm262_vm1, %v1301_v13  ;;  %7654 = vmatmul.mubr.msk.bf16.gmra.mrb[232].mxu1 %vm262_vm1, %v1934_v47 }
 0x1d7   :  { %7603 = vmatprep.mubr.msk.bf16.mxu0 %vm8779_vm2, %v14047_v17  ;;  %7657 = vmatprep.mubr.msk.bf16.mxu1 %vm8779_vm2, %v14047_v17 }
 0x1d9   :  { %v1034_v15 = vpop.f32.mrb[128].mxu1  ;;  %v1512_v32 = vpop.f32.mrb[128].mxu0 }
 0x1da   :  { %v10220_v40 = vadd.f32 %v1034_v15, %v9866_v43  ;;  %v10223_v27 = vadd.f32 %v1512_v32, %v9869_v55  ;;  %v7391_v0 = vpop.f32.mrb[129].mxu1  ;;  %v7497_v58 = vpop.f32.mrb[129].mxu0  ;;  %v1260_v43 = vld [vmem:[%s14012_s0 + $0x222] sm:$0xff]  ;;  %v1261_v55 = vld [vmem:[%s14012_s0 + $0x22a] sm:$0xff] }
 0x1db   :  { %v1037_v13 = vpop.f32.mrb[130].mxu1  ;;  %v1515_v47 = vpop.f32.mrb[130].mxu0  ;;  %v1303_v0 = vpack.c.bf16 %v1261_v55, %v1260_v43 }
 0x1dc   :  { %v10226_v2 = vadd.f32 %v1037_v13, %v9871_v45  ;;  %v10229_v6 = vadd.f32 %v1515_v47, %v9874_v53  ;;  %v7498_v61 = vpop.f32.mrb[131].mxu0  ;;  %v7392_v26 = vpop.f32.mrb[131].mxu1  ;;  %v1867_v45 = vld [vmem:[%s14012_s0 + $0x92] sm:$0xff]  ;;  %v1868_v53 = vld [vmem:[%s14012_s0 + $0x9a] sm:$0xff] }
 0x1dd   :  { %v1936_v58 = vpack.c.bf16 %v1868_v53, %v1867_v45 }
 0x1de   :  { %7604 = vmatmul.mubr.msk.bf16.gmra.mrb[236].mxu0 %vm262_vm1, %v1302_v46  ;;  %7658 = vmatmul.mubr.msk.bf16.gmra.mrb[236].mxu1 %vm262_vm1, %v1935_v25 }
 0x1df   :  { %7607 = vmatprep.mubr.msk.bf16.mxu0 %vm8779_vm2, %v14047_v17  ;;  %7661 = vmatprep.mubr.msk.bf16.mxu1 %vm8779_vm2, %v14047_v17 }
 0x1e1   :  { %v1042_v29 = vpop.f32.mrb[132].mxu1  ;;  %v1520_v11 = vpop.f32.mrb[132].mxu0 }
 0x1e2   :  { %v10250_v12 = vadd.f32 %v1042_v29, %v9894_v62  ;;  %v10253_v4 = vadd.f32 %v1520_v11, %v9897_v36  ;;  %v7395_v15 = vpop.f32.mrb[133].mxu1  ;;  %v7501_v32 = vpop.f32.mrb[133].mxu0  ;;  %v1262_v62 = vld [vmem:[%s14012_s0 + $0x232] sm:$0xff]  ;;  %v1263_v36 = vld [vmem:[%s14012_s0 + $0x23a] sm:$0xff] }
 0x1e3   :  { %v1045_v46 = vpop.f32.mrb[134].mxu1  ;;  %v1523_v25 = vpop.f32.mrb[134].mxu0  ;;  %v1304_v15 = vpack.c.bf16 %v1263_v36, %v1262_v62 }
 0x1e4   :  { %v10256_v13 = vadd.f32 %v1045_v46, %v9899_v24  ;;  %v10259_v47 = vadd.f32 %v1523_v25, %v9902_v7  ;;  %v7502_v61 = vpop.f32.mrb[135].mxu0  ;;  %v7396_v26 = vpop.f32.mrb[135].mxu1  ;;  %v1869_v24 = vld [vmem:[%s14012_s0 + $0xa2] sm:$0xff]  ;;  %v1870_v7 = vld [vmem:[%s14012_s0 + $0xaa] sm:$0xff] }
 0x1e5   :  { %v1937_v32 = vpack.c.bf16 %v1870_v7, %v1869_v24  ;;  %v14057_v25 = vld [vmem:[#allocation30_spill] sm:$0xff] }
 0x1e6   :  { %14055 = vst [vmem:[#allocation37_spill] sm:$0xff] %v10259_v47  ;;  %7608 = vmatmul.mubr.msk.bf16.gmra.mrb[240].mxu0 %vm262_vm1, %v1303_v0  ;;  %7662 = vmatmul.mubr.msk.bf16.gmra.mrb[240].mxu1 %vm262_vm1, %v1936_v58 }
 0x1e7   :  { %7611 = vmatprep.mubr.msk.bf16.mxu0 %vm8779_vm2, %v14047_v17  ;;  %7665 = vmatprep.mubr.msk.bf16.mxu1 %vm8779_vm2, %v14047_v17 }
 0x1e9   :  { %v1050_v43 = vpop.f32.mrb[136].mxu1  ;;  %v1528_v55 = vpop.f32.mrb[136].mxu0 }
 0x1ea   :  { %v10280_v45 = vadd.f32 %v1050_v43, %v9922_v23  ;;  %v10283_v53 = vadd.f32 %v1528_v55, %v9925_v22  ;;  %v7399_v29 = vpop.f32.mrb[137].mxu1  ;;  %v7505_v11 = vpop.f32.mrb[137].mxu0  ;;  %v1264_v23 = vld [vmem:[%s14012_s0 + $0x242] sm:$0xff]  ;;  %v1265_v22 = vld [vmem:[%s14012_s0 + $0x24a] sm:$0xff] }
 0x1eb   :  { %v1053_v0 = vpop.f32.mrb[138].mxu1  ;;  %v1531_v58 = vpop.f32.mrb[138].mxu0  ;;  %v1305_v29 = vpack.c.bf16 %v1265_v22, %v1264_v23 }
 0x1ec   :  { %14056 = vst [vmem:[#allocation38_spill] sm:$0xff] %v10283_v53  ;;  %v10286_v46 = vadd.f32 %v1053_v0, %v9927_v63  ;;  %v10289_v61 = vadd.f32 %v1531_v58, %v14057_v25  ;;  %v7506_v26 = vpop.f32.mrb[139].mxu0  ;;  %v7400_v47 = vpop.f32.mrb[139].mxu1  ;;  %v1871_v63 = vld [vmem:[%s14012_s0 + $0xb2] sm:$0xff]  ;;  %v14060_v25 = vld [vmem:[#allocation32_spill] sm:$0xff] }
 0x1ed   :  { %v1872_v47 = vld [vmem:[%s14012_s0 + $0xba] sm:$0xff]  ;;  %v14059_v0 = vld [vmem:[#allocation31_spill] sm:$0xff] }
 0x1ee   :  { %14058 = vst [vmem:[#allocation30_spill] sm:$0xff] %v10289_v61  ;;  %7612 = vmatmul.mubr.msk.bf16.gmra.mrb[244].mxu0 %vm262_vm1, %v1304_v15  ;;  %7666 = vmatmul.mubr.msk.bf16.gmra.mrb[244].mxu1 %vm262_vm1, %v1937_v32  ;;  %v1938_v11 = vpack.c.bf16 %v1872_v47, %v1871_v63 }
 0x1ef   :  { %7615 = vmatprep.mubr.msk.bf16.mxu0 %vm8779_vm2, %v14047_v17  ;;  %7669 = vmatprep.mubr.msk.bf16.mxu1 %vm8779_vm2, %v14047_v17 }
 0x1f1   :  { %v1058_v62 = vpop.f32.mrb[140].mxu1  ;;  %v1536_v36 = vpop.f32.mrb[140].mxu0 }
 0x1f2   :  { %v10310_v24 = vadd.f32 %v1058_v62, %v9950_v42  ;;  %v10313_v7 = vadd.f32 %v1536_v36, %v9953_v8  ;;  %v7403_v43 = vpop.f32.mrb[141].mxu1  ;;  %v7509_v55 = vpop.f32.mrb[141].mxu0  ;;  %v1266_v42 = vld [vmem:[%s14012_s0 + $0x252] sm:$0xff]  ;;  %v1267_v8 = vld [vmem:[%s14012_s0 + $0x25a] sm:$0xff] }
 0x1f3   :  { %v1061_v15 = vpop.f32.mrb[142].mxu1  ;;  %v1539_v32 = vpop.f32.mrb[142].mxu0  ;;  %v1306_v43 = vpack.c.bf16 %v1267_v8, %v1266_v42 }
 0x1f4   :  { %v10316_v58 = vadd.f32 %v1061_v15, %v14059_v0  ;;  %v10319_v26 = vadd.f32 %v1539_v32, %v14060_v25  ;;  %v7510_v61 = vpop.f32.mrb[143].mxu0  ;;  %v7404_v53 = vpop.f32.mrb[143].mxu1  ;;  %v14062_v32 = vld [vmem:[#allocation33_spill] sm:$0xff] }
 0x1f5   :  { %v1873_v53 = vld [vmem:[%s14012_s0 + $0xc2] sm:$0xff]  ;;  %v1874_v61 = vld [vmem:[%s14012_s0 + $0xca] sm:$0xff] }
 0x1f6   :  { %14061 = vst [vmem:[#allocation31_spill] sm:$0xff] %v10319_v26  ;;  %7616 = vmatmul.mubr.msk.bf16.gmra.mrb[248].mxu0 %vm262_vm1, %v1305_v29  ;;  %7670 = vmatmul.mubr.msk.bf16.gmra.mrb[248].mxu1 %vm262_vm1, %v1938_v11  ;;  %v1939_v55 = vpack.c.bf16 %v1874_v61, %v1873_v53 }
 0x1f7   :  { %7619 = vmatprep.mubr.msk.bf16.mxu0 %vm8779_vm2, %v14047_v17  ;;  %7673 = vmatprep.mubr.msk.bf16.mxu1 %vm8779_vm2, %v14047_v17 }
 0x1f9   :  { %v1066_v23 = vpop.f32.mrb[144].mxu1  ;;  %v1544_v22 = vpop.f32.mrb[144].mxu0 }
 0x1fa   :  { %v10340_v63 = vadd.f32 %v1066_v23, %v9978_v9  ;;  %v10343_v47 = vadd.f32 %v1544_v22, %v9981_v54  ;;  %v7407_v62 = vpop.f32.mrb[145].mxu1  ;;  %v7513_v36 = vpop.f32.mrb[145].mxu0  ;;  %v1268_v9 = vld [vmem:[%s14012_s0 + $0x262] sm:$0x3f]  ;;  %v1875_v54 = vld [vmem:[%s14012_s0 + $0xd2] sm:$0xff] }
 0x1fb   :  { %v1069_v29 = vpop.f32.mrb[146].mxu1  ;;  %v1547_v11 = vpop.f32.mrb[146].mxu0  ;;  %v1307_v22 = vpack.c.bf16 %v1268_v9, %v1268_v9 }
 0x1fc   :  { %v10346_v15 = vadd.f32 %v1069_v29, %v9983_v30  ;;  %v10349_v0 = vadd.f32 %v1547_v11, %v14062_v32  ;;  %v7514_v25 = vpop.f32.mrb[147].mxu0  ;;  %v7408_v26 = vpop.f32.mrb[147].mxu1  ;;  %v1876_v30 = vld [vmem:[%s14012_s0 + $0xda] sm:$0xff] }
 0x1fd   :  { %v1940_v62 = vpack.c.bf16 %v1876_v30, %v1875_v54  ;;  %v14066_v30 = vld [vmem:[#allocation34_spill] sm:$0xff] }
 0x1fe   :  { %14063 = vst [vmem:[#allocation32_spill] sm:$0xff] %v10349_v0  ;;  %7620 = vmatmul.mubr.msk.bf16.gmra.mrb[252].mxu0 %vm262_vm1, %v1306_v43  ;;  %7674 = vmatmul.mubr.msk.bf16.gmra.mrb[252].mxu1 %vm262_vm1, %v1939_v55 }
 0x1ff   :  { %7623 = vmatprep.mubr.msk.bf16.mxu0 %vm8779_vm2, %v14047_v17  ;;  %7677 = vmatprep.mubr.msk.bf16.mxu1 %vm8779_vm2, %v14047_v17 }
 0x201   :  { %v1074_v26 = vpop.f32.mrb[148].mxu1  ;;  %v1552_v42 = vpop.f32.mrb[148].mxu0 }
 0x202   :  { %v10367_v8 = vadd.f32 %v1074_v26, %v10003_v35  ;;  %v10370_v53 = vadd.f32 %v1552_v42, %v10006_v56  ;;  %v7411_v61 = vpop.f32.mrb[149].mxu1  ;;  %v7517_v23 = vpop.f32.mrb[149].mxu0  ;;  %v1877_v35 = vld [vmem:[%s14012_s0 + $0xe2] sm:$0xff]  ;;  %v1878_v56 = vld [vmem:[%s14012_s0 + $0xea] sm:$0xff] }
 0x203   :  { %v1077_v36 = vpop.f32.mrb[150].mxu1  ;;  %v1555_v43 = vpop.f32.mrb[150].mxu0  ;;  %v1941_v23 = vpack.c.bf16 %v1878_v56, %v1877_v35  ;;  %v1880_v35 = vld [vmem:[%s14012_s0 + $0xfa] sm:$0xff] }
 0x204   :  { %14064 = vst [vmem:[#allocation33_spill] sm:$0xff] %v10370_v53  ;;  %v10373_v55 = vadd.f32 %v1077_v36, %v10008_v57  ;;  %v10376_v29 = vadd.f32 %v1555_v43, %v10011_v31  ;;  %v7518_v11 = vpop.f32.mrb[151].mxu0  ;;  %v7412_v32 = vpop.f32.mrb[151].mxu1  ;;  %v2510_v57 = vld [vmem:[%s14012_s0 + $0x13] sm:$0xff]  ;;  %v2511_v31 = vld [vmem:[%s14012_s0 + $0x1b] sm:$0xff] }
 0x205   :  { %v14068_v43 = vld [vmem:[#allocation35_spill] sm:$0xff]  ;;  %v14069_v32 = vld [vmem:[#allocation36_spill] sm:$0xff] }
 0x206   :  { %14065 = vst [vmem:[#allocation39_spill] sm:$0xff] %v10376_v29  ;;  %7624 = vmatmul.mubr.msk.bf16.gmra.mrb[0].mxu0 %vm262_vm1, %v1307_v22  ;;  %7678 = vmatmul.mubr.msk.bf16.gmra.mrb[0].mxu1 %vm262_vm1, %v1940_v62  ;;  %v2587_v22 = vpack.c.bf16 %v2511_v31, %v2510_v57  ;;  %v14071_v31 = vld [vmem:[#allocation5_spill] sm:$0xff] }
 0x207   :  { %7681 = vmatprep.mubr.msk.bf16.mxu1 %vm8779_vm2, %v14047_v17  ;;  %7787 = vmatprep.mubr.msk.bf16.mxu0 %vm8779_vm2, %v14047_v17 }
 0x209   :  { %v1082_v25 = vpop.f32.mrb[152].mxu1  ;;  %v1560_v9 = vpop.f32.mrb[152].mxu0 }
 0x20a   :  { %v10397_v54 = vadd.f32 %v1082_v25, %v10025_v14  ;;  %v10400_v26 = vadd.f32 %v1560_v9, %v14066_v30  ;;  %v7415_v42 = vpop.f32.mrb[153].mxu1  ;;  %v7521_v61 = vpop.f32.mrb[153].mxu0  ;;  %v1879_v14 = vld [vmem:[%s14012_s0 + $0xf2] sm:$0xff] }
 0x20b   :  { %v1085_v62 = vpop.f32.mrb[154].mxu1  ;;  %v1563_v36 = vpop.f32.mrb[154].mxu0  ;;  %v1942_v61 = vpack.c.bf16 %v1880_v35, %v1879_v14  ;;  %v6567_v14 = vld [vmem:[%s14013_s1 + $0xc] sm:$0x3] }
 0x20c   :  { %14067 = vst [vmem:[#allocation34_spill] sm:$0xff] %v10400_v26  ;;  %v10403_v11 = vadd.f32 %v1085_v62, %v14068_v43  ;;  %v10406_v29 = vadd.f32 %v1563_v36, %v14069_v32  ;;  %v7522_v53 = vpop.f32.mrb[155].mxu0  ;;  %v7416_v0 = vpop.f32.mrb[155].mxu1  ;;  %v14073_v32 = vld [vmem:[#allocation6_spill] sm:$0xff]  ;;  %v4064_v35 = vsel %vm380_vm0, %v6567_v14, 0  ;;  %v14077_v14 = vld [vmem:[#allocation8_spill] sm:$0xff] }
 0x20d   :  { %v2512_v0 = vld [vmem:[%s14012_s0 + $0x23] sm:$0xff]  ;;  %v2513_v53 = vld [vmem:[%s14012_s0 + $0x2b] sm:$0xff] }
 0x20e   :  { %14070 = vst [vmem:[#allocation35_spill] sm:$0xff] %v10406_v29  ;;  %7682 = vmatmul.mubr.msk.bf16.gmra.mrb[4].mxu1 %vm262_vm1, %v1941_v23  ;;  %7788 = vmatmul.mubr.msk.bf16.vlgmr.msra.gmra.mrb[4].mxu0 %vm262_vm1, %v2587_v22  ;;  %v2588_v23 = vpack.c.bf16 %v2513_v53, %v2512_v0  ;;  %v6527_v22 = vld [vmem:[%s14013_s1 + $0xa] sm:$0x3]  ;;  %v2514_v53 = vld [vmem:[%s14012_s0 + $0x33] sm:$0xff] }
 0x20f   :  { %7685 = vmatprep.mubr.msk.bf16.mxu1 %vm8779_vm2, %v14047_v17  ;;  %7791 = vmatprep.mubr.msk.bf16.mxu0 %vm8779_vm2, %v14047_v17  ;;  %v3405_v43 = vsel %vm380_vm0, %v6527_v22, 0  ;;  %v1882_v0 = vld [vmem:[%s14012_s0 + $0x10a] sm:$0xff] }
 0x210   :  { %7944 = vmatpush3.bf16.msra.mxu1 %v3405_v43  ;;  %8102 = vmatpush3.bf16.msra.mxu0 %v4064_v35 }
 0x211   :  { %v1090_v56 = vpop.f32.mrb[156].mxu1  ;;  %v1568_v57 = vpop.f32.mrb[156].mxu0  ;;  %8259 = vmatprep.subr.bf16.mxu1 %v14047_v17  ;;  %8417 = vmatprep.subr.bf16.mxu0 %v14047_v17 }
 0x212   :  { %v10427_v25 = vadd.f32 %v1090_v56, %v14071_v31  ;;  %v10430_v9 = vadd.f32 %v1568_v57, %v10049_v52  ;;  %v7419_v30 = vpop.f32.mrb[157].mxu1  ;;  %v7525_v42 = vpop.f32.mrb[157].mxu0  ;;  %v2515_v31 = vld [vmem:[%s14012_s0 + $0x3b] sm:$0xff] }
 0x213   :  { %v1093_v62 = vpop.f32.mrb[158].mxu1  ;;  %v1571_v36 = vpop.f32.mrb[158].mxu0 }
 0x214   :  { %14072 = vst [vmem:[#allocation36_spill] sm:$0xff] %v10430_v9  ;;  %v10437_v29 = vadd.f32 %v1093_v62, %v14073_v32  ;;  %v10440_v56 = vadd.f32 %v1571_v36, %v10055_v10  ;;  %v7526_v52 = vpop.f32.mrb[159].mxu0  ;;  %v7420_v57 = vpop.f32.mrb[159].mxu1  ;;  %v1881_v10 = vld [vmem:[%s14012_s0 + $0x102] sm:$0xff]  ;;  %v2589_v32 = vpack.c.bf16 %v2515_v31, %v2514_v53 }
 0x215   :  { %v1943_v43 = vpack.c.bf16 %v1882_v0, %v1881_v10  ;;  %v14079_v53 = vld [vmem:[#allocation9_spill] sm:$0xff] }
 0x216   :  { %14074 = vst [vmem:[#allocation5_spill] sm:$0xff] %v10440_v56  ;;  %7686 = vmatmul.mubr.msk.bf16.gmra.mrb[8].mxu1 %vm262_vm1, %v1942_v61  ;;  %7792 = vmatmul.mubr.msk.bf16.gmra.mrb[8].mxu0 %vm262_vm1, %v2588_v23  ;;  %v14075_v61 = vld [vmem:[#allocation7_spill] sm:$0xff] }
 0x217   :  { %7689 = vmatprep.mubr.msk.bf16.mxu1 %vm8779_vm2, %v14047_v17  ;;  %7795 = vmatprep.mubr.msk.bf16.mxu0 %vm8779_vm2, %v14047_v17 }
 0x219   :  { %v1098_v30 = vpop.f32.mrb[160].mxu1  ;;  %v1576_v42 = vpop.f32.mrb[160].mxu0 }
 0x21a   :  { %v10467_v23 = vadd.f32 %v1098_v30, %v14075_v61  ;;  %v10470_v22 = vadd.f32 %v1576_v42, %v10074_v34  ;;  %v7423_v62 = vpop.f32.mrb[161].mxu1  ;;  %v7529_v36 = vpop.f32.mrb[161].mxu0  ;;  %v1883_v34 = vld [vmem:[%s14012_s0 + $0x112] sm:$0xff] }
 0x21b   :  { %v1101_v52 = vpop.f32.mrb[162].mxu1  ;;  %v1579_v57 = vpop.f32.mrb[162].mxu0 }
 0x21c   :  { %14076 = vst [vmem:[#allocation6_spill] sm:$0xff] %v10470_v22  ;;  %v10473_v56 = vadd.f32 %v1101_v52, %v14077_v14  ;;  %v10476_v35 = vadd.f32 %v1579_v57, %v10080_v44  ;;  %v7530_v9 = vpop.f32.mrb[163].mxu0  ;;  %v7424_v26 = vpop.f32.mrb[163].mxu1  ;;  %v1884_v44 = vld [vmem:[%s14012_s0 + $0x11a] sm:$0xff]  ;;  %v14081_v52 = vld [vmem:[#allocation10_spill] sm:$0xff] }
 0x21d   :  { %v2516_v26 = vld [vmem:[%s14012_s0 + $0x43] sm:$0xff]  ;;  %v2517_v9 = vld [vmem:[%s14012_s0 + $0x4b] sm:$0xff]  ;;  %v1944_v62 = vpack.c.bf16 %v1884_v44, %v1883_v34 }
 0x21e   :  { %14078 = vst [vmem:[#allocation7_spill] sm:$0xff] %v10476_v35  ;;  %7690 = vmatmul.mubr.msk.bf16.gmra.mrb[12].mxu1 %vm262_vm1, %v1943_v43  ;;  %7796 = vmatmul.mubr.msk.bf16.gmra.mrb[12].mxu0 %vm262_vm1, %v2589_v32  ;;  %v2590_v36 = vpack.c.bf16 %v2517_v9, %v2516_v26  ;;  %v14083_v26 = vld [vmem:[#allocation11_spill] sm:$0xff] }
 0x21f   :  { %7693 = vmatprep.mubr.msk.bf16.mxu1 %vm8779_vm2, %v14047_v17  ;;  %7799 = vmatprep.mubr.msk.bf16.mxu0 %vm8779_vm2, %v14047_v17 }
 0x221   :  { %v1106_v10 = vpop.f32.mrb[164].mxu1  ;;  %v1584_v0 = vpop.f32.mrb[164].mxu0 }
 0x222   :  { %v10497_v31 = vadd.f32 %v1106_v10, %v14079_v53  ;;  %v10500_v30 = vadd.f32 %v1584_v0, %v10099_v16  ;;  %v7427_v42 = vpop.f32.mrb[165].mxu1  ;;  %v7533_v61 = vpop.f32.mrb[165].mxu0  ;;  %v1885_v16 = vld [vmem:[%s14012_s0 + $0x122] sm:$0xff] }
 0x223   :  { %v1109_v43 = vpop.f32.mrb[166].mxu1  ;;  %v1587_v32 = vpop.f32.mrb[166].mxu0 }
 0x224   :  { %14080 = vst [vmem:[#allocation8_spill] sm:$0xff] %v10500_v30  ;;  %v10503_v57 = vadd.f32 %v1109_v43, %v14081_v52  ;;  %v10506_v14 = vadd.f32 %v1587_v32, %v10105_v60  ;;  %v7534_v35 = vpop.f32.mrb[167].mxu0  ;;  %v7428_v22 = vpop.f32.mrb[167].mxu1  ;;  %v1886_v60 = vld [vmem:[%s14012_s0 + $0x12a] sm:$0xff]  ;;  %v14085_v43 = vld [vmem:[#allocation12_spill] sm:$0xff] }
 0x225   :  { %v2518_v22 = vld [vmem:[%s14012_s0 + $0x53] sm:$0xff]  ;;  %v2519_v35 = vld [vmem:[%s14012_s0 + $0x5b] sm:$0xff]  ;;  %v1945_v42 = vpack.c.bf16 %v1886_v60, %v1885_v16 }
 0x226   :  { %14082 = vst [vmem:[#allocation9_spill] sm:$0xff] %v10506_v14  ;;  %7694 = vmatmul.mubr.msk.bf16.gmra.mrb[16].mxu1 %vm262_vm1, %v1944_v62  ;;  %7800 = vmatmul.mubr.msk.bf16.gmra.mrb[16].mxu0 %vm262_vm1, %v2590_v36  ;;  %v2591_v61 = vpack.c.bf16 %v2519_v35, %v2518_v22  ;;  %v14087_v22 = vld [vmem:[#allocation13_spill] sm:$0xff] }
 0x227   :  { %7697 = vmatprep.mubr.msk.bf16.mxu1 %vm8779_vm2, %v14047_v17  ;;  %7803 = vmatprep.mubr.msk.bf16.mxu0 %vm8779_vm2, %v14047_v17 }
 0x229   :  { %v1114_v34 = vpop.f32.mrb[168].mxu1  ;;  %v1592_v44 = vpop.f32.mrb[168].mxu0 }
 0x22a   :  { %v10527_v9 = vadd.f32 %v1114_v34, %v14083_v26  ;;  %v10530_v10 = vadd.f32 %v1592_v44, %v10130_v20  ;;  %v7431_v0 = vpop.f32.mrb[169].mxu1  ;;  %v7537_v53 = vpop.f32.mrb[169].mxu0  ;;  %v1887_v20 = vld [vmem:[%s14012_s0 + $0x132] sm:$0xff] }
 0x22b   :  { %v1117_v62 = vpop.f32.mrb[170].mxu1  ;;  %v1595_v36 = vpop.f32.mrb[170].mxu0 }
 0x22c   :  { %14084 = vst [vmem:[#allocation10_spill] sm:$0xff] %v10530_v10  ;;  %v10533_v32 = vadd.f32 %v1117_v62, %v14085_v43  ;;  %v10536_v52 = vadd.f32 %v1595_v36, %v10136_v28  ;;  %v7538_v14 = vpop.f32.mrb[171].mxu0  ;;  %v7432_v30 = vpop.f32.mrb[171].mxu1  ;;  %v1888_v28 = vld [vmem:[%s14012_s0 + $0x13a] sm:$0xff]  ;;  %v14089_v62 = vld [vmem:[#allocation14_spill] sm:$0xff] }
 0x22d   :  { %v2520_v30 = vld [vmem:[%s14012_s0 + $0x63] sm:$0xff]  ;;  %v2521_v14 = vld [vmem:[%s14012_s0 + $0x6b] sm:$0xff]  ;;  %v1946_v0 = vpack.c.bf16 %v1888_v28, %v1887_v20 }
 0x22e   :  { %14086 = vst [vmem:[#allocation11_spill] sm:$0xff] %v10536_v52  ;;  %7698 = vmatmul.mubr.msk.bf16.gmra.mrb[20].mxu1 %vm262_vm1, %v1945_v42  ;;  %7804 = vmatmul.mubr.msk.bf16.gmra.mrb[20].mxu0 %vm262_vm1, %v2591_v61  ;;  %v2592_v53 = vpack.c.bf16 %v2521_v14, %v2520_v30  ;;  %v14091_v30 = vld [vmem:[#allocation15_spill] sm:$0xff] }
 0x22f   :  { %7701 = vmatprep.mubr.msk.bf16.mxu1 %vm8779_vm2, %v14047_v17  ;;  %7807 = vmatprep.mubr.msk.bf16.mxu0 %vm8779_vm2, %v14047_v17 }
 0x231   :  { %v1122_v16 = vpop.f32.mrb[172].mxu1  ;;  %v1600_v60 = vpop.f32.mrb[172].mxu0 }
 0x232   :  { %v10557_v35 = vadd.f32 %v1122_v16, %v14087_v22  ;;  %v10560_v34 = vadd.f32 %v1600_v60, %v10160_v48  ;;  %v7435_v44 = vpop.f32.mrb[173].mxu1  ;;  %v7541_v26 = vpop.f32.mrb[173].mxu0  ;;  %v1889_v48 = vld [vmem:[%s14012_s0 + $0x142] sm:$0xff] }
 0x233   :  { %v1125_v42 = vpop.f32.mrb[174].mxu1  ;;  %v1603_v61 = vpop.f32.mrb[174].mxu0 }
 0x234   :  { %14088 = vst [vmem:[#allocation12_spill] sm:$0xff] %v10560_v34  ;;  %v10563_v36 = vadd.f32 %v1125_v42, %v14089_v62  ;;  %v10566_v43 = vadd.f32 %v1603_v61, %v10166_v59  ;;  %v7542_v52 = vpop.f32.mrb[175].mxu0  ;;  %v7436_v10 = vpop.f32.mrb[175].mxu1  ;;  %v1890_v59 = vld [vmem:[%s14012_s0 + $0x14a] sm:$0xff]  ;;  %v14093_v42 = vld [vmem:[#allocation16_spill] sm:$0xff] }
 0x235   :  { %v2522_v10 = vld [vmem:[%s14012_s0 + $0x73] sm:$0xff]  ;;  %v2523_v52 = vld [vmem:[%s14012_s0 + $0x7b] sm:$0xff]  ;;  %v1947_v44 = vpack.c.bf16 %v1890_v59, %v1889_v48 }
 0x236   :  { %14090 = vst [vmem:[#allocation13_spill] sm:$0xff] %v10566_v43  ;;  %7702 = vmatmul.mubr.msk.bf16.gmra.mrb[24].mxu1 %vm262_vm1, %v1946_v0  ;;  %7808 = vmatmul.mubr.msk.bf16.gmra.mrb[24].mxu0 %vm262_vm1, %v2592_v53  ;;  %v2593_v26 = vpack.c.bf16 %v2523_v52, %v2522_v10  ;;  %v14095_v10 = vld [vmem:[#allocation17_spill] sm:$0xff] }
 0x237   :  { %7705 = vmatprep.mubr.msk.bf16.mxu1 %vm8779_vm2, %v14047_v17  ;;  %7811 = vmatprep.mubr.msk.bf16.mxu0 %vm8779_vm2, %v14047_v17 }
 0x239   :  { %v1130_v20 = vpop.f32.mrb[176].mxu1  ;;  %v1608_v28 = vpop.f32.mrb[176].mxu0 }
 0x23a   :  { %v10587_v14 = vadd.f32 %v1130_v20, %v14091_v30  ;;  %v10590_v16 = vadd.f32 %v1608_v28, %v10190_v3  ;;  %v7439_v60 = vpop.f32.mrb[177].mxu1  ;;  %v7545_v22 = vpop.f32.mrb[177].mxu0  ;;  %v1891_v3 = vld [vmem:[%s14012_s0 + $0x152] sm:$0xff] }
 0x23b   :  { %v1133_v0 = vpop.f32.mrb[178].mxu1  ;;  %v1611_v53 = vpop.f32.mrb[178].mxu0 }
 0x23c   :  { %14092 = vst [vmem:[#allocation14_spill] sm:$0xff] %v10590_v16  ;;  %v10593_v61 = vadd.f32 %v1133_v0, %v14093_v42  ;;  %v10596_v62 = vadd.f32 %v1611_v53, %v10196_v18  ;;  %v7546_v43 = vpop.f32.mrb[179].mxu0  ;;  %v7440_v34 = vpop.f32.mrb[179].mxu1  ;;  %v1892_v18 = vld [vmem:[%s14012_s0 + $0x15a] sm:$0xff]  ;;  %v14097_v0 = vld [vmem:[#allocation18_spill] sm:$0xff] }
 0x23d   :  { %v2524_v34 = vld [vmem:[%s14012_s0 + $0x83] sm:$0xff]  ;;  %v2525_v43 = vld [vmem:[%s14012_s0 + $0x8b] sm:$0xff]  ;;  %v1948_v60 = vpack.c.bf16 %v1892_v18, %v1891_v3 }
 0x23e   :  { %14094 = vst [vmem:[#allocation15_spill] sm:$0xff] %v10596_v62  ;;  %7706 = vmatmul.mubr.msk.bf16.gmra.mrb[28].mxu1 %vm262_vm1, %v1947_v44  ;;  %7812 = vmatmul.mubr.msk.bf16.gmra.mrb[28].mxu0 %vm262_vm1, %v2593_v26  ;;  %v2594_v22 = vpack.c.bf16 %v2525_v43, %v2524_v34  ;;  %v14099_v34 = vld [vmem:[#allocation19_spill] sm:$0xff] }
 0x23f   :  { %7709 = vmatprep.mubr.msk.bf16.mxu1 %vm8779_vm2, %v14047_v17  ;;  %7815 = vmatprep.mubr.msk.bf16.mxu0 %vm8779_vm2, %v14047_v17 }
 0x241   :  { %v1138_v48 = vpop.f32.mrb[180].mxu1  ;;  %v1616_v59 = vpop.f32.mrb[180].mxu0 }
 0x242   :  { %v10617_v52 = vadd.f32 %v1138_v48, %v14095_v10  ;;  %v10620_v20 = vadd.f32 %v1616_v59, %v10220_v40  ;;  %v7443_v28 = vpop.f32.mrb[181].mxu1  ;;  %v7549_v30 = vpop.f32.mrb[181].mxu0  ;;  %v1893_v40 = vld [vmem:[%s14012_s0 + $0x162] sm:$0xff] }
 0x243   :  { %v1141_v44 = vpop.f32.mrb[182].mxu1  ;;  %v1619_v26 = vpop.f32.mrb[182].mxu0 }
 0x244   :  { %14096 = vst [vmem:[#allocation16_spill] sm:$0xff] %v10620_v20  ;;  %v10623_v53 = vadd.f32 %v1141_v44, %v14097_v0  ;;  %v10626_v42 = vadd.f32 %v1619_v26, %v10226_v2  ;;  %v7550_v62 = vpop.f32.mrb[183].mxu0  ;;  %v7444_v16 = vpop.f32.mrb[183].mxu1  ;;  %v1894_v2 = vld [vmem:[%s14012_s0 + $0x16a] sm:$0xff]  ;;  %v14101_v44 = vld [vmem:[#allocation20_spill] sm:$0xff] }
 0x245   :  { %v2526_v16 = vld [vmem:[%s14012_s0 + $0x93] sm:$0xff]  ;;  %v2527_v62 = vld [vmem:[%s14012_s0 + $0x9b] sm:$0xff]  ;;  %v1949_v28 = vpack.c.bf16 %v1894_v2, %v1893_v40 }
 0x246   :  { %14098 = vst [vmem:[#allocation17_spill] sm:$0xff] %v10626_v42  ;;  %7710 = vmatmul.mubr.msk.bf16.gmra.mrb[32].mxu1 %vm262_vm1, %v1948_v60  ;;  %7816 = vmatmul.mubr.msk.bf16.gmra.mrb[32].mxu0 %vm262_vm1, %v2594_v22  ;;  %v2595_v30 = vpack.c.bf16 %v2527_v62, %v2526_v16  ;;  %v14103_v16 = vld [vmem:[#allocation21_spill] sm:$0xff] }
 0x247   :  { %7713 = vmatprep.mubr.msk.bf16.mxu1 %vm8779_vm2, %v14047_v17  ;;  %7819 = vmatprep.mubr.msk.bf16.mxu0 %vm8779_vm2, %v14047_v17 }
 0x249   :  { %v1146_v3 = vpop.f32.mrb[184].mxu1  ;;  %v1624_v18 = vpop.f32.mrb[184].mxu0 }
 0x24a   :  { %v10647_v43 = vadd.f32 %v1146_v3, %v14099_v34  ;;  %v10650_v48 = vadd.f32 %v1624_v18, %v10250_v12  ;;  %v7447_v59 = vpop.f32.mrb[185].mxu1  ;;  %v7553_v10 = vpop.f32.mrb[185].mxu0  ;;  %v1895_v12 = vld [vmem:[%s14012_s0 + $0x172] sm:$0xff] }
 0x24b   :  { %v1149_v60 = vpop.f32.mrb[186].mxu1  ;;  %v1627_v22 = vpop.f32.mrb[186].mxu0 }
 0x24c   :  { %14100 = vst [vmem:[#allocation18_spill] sm:$0xff] %v10650_v48  ;;  %v10653_v26 = vadd.f32 %v1149_v60, %v14101_v44  ;;  %v10656_v0 = vadd.f32 %v1627_v22, %v10256_v13  ;;  %v7554_v42 = vpop.f32.mrb[187].mxu0  ;;  %v7448_v20 = vpop.f32.mrb[187].mxu1  ;;  %v1896_v13 = vld [vmem:[%s14012_s0 + $0x17a] sm:$0xff]  ;;  %v14105_v60 = vld [vmem:[#allocation22_spill] sm:$0xff] }
 0x24d   :  { %v2528_v20 = vld [vmem:[%s14012_s0 + $0xa3] sm:$0xff]  ;;  %v2529_v42 = vld [vmem:[%s14012_s0 + $0xab] sm:$0xff]  ;;  %v1950_v59 = vpack.c.bf16 %v1896_v13, %v1895_v12 }
 0x24e   :  { %14102 = vst [vmem:[#allocation19_spill] sm:$0xff] %v10656_v0  ;;  %7714 = vmatmul.mubr.msk.bf16.gmra.mrb[36].mxu1 %vm262_vm1, %v1949_v28  ;;  %7820 = vmatmul.mubr.msk.bf16.gmra.mrb[36].mxu0 %vm262_vm1, %v2595_v30  ;;  %v2596_v10 = vpack.c.bf16 %v2529_v42, %v2528_v20  ;;  %v14107_v20 = vld [vmem:[#allocation23_spill] sm:$0xff] }
 0x24f   :  { %7717 = vmatprep.mubr.msk.bf16.mxu1 %vm8779_vm2, %v14047_v17  ;;  %7823 = vmatprep.mubr.msk.bf16.mxu0 %vm8779_vm2, %v14047_v17 }
 0x251   :  { %v1154_v40 = vpop.f32.mrb[188].mxu1  ;;  %v1632_v2 = vpop.f32.mrb[188].mxu0 }
 0x252   :  { %v10677_v62 = vadd.f32 %v1154_v40, %v14103_v16  ;;  %v10680_v3 = vadd.f32 %v1632_v2, %v10280_v45  ;;  %v7451_v18 = vpop.f32.mrb[189].mxu1  ;;  %v7557_v34 = vpop.f32.mrb[189].mxu0  ;;  %v1897_v45 = vld [vmem:[%s14012_s0 + $0x182] sm:$0xff] }
 0x253   :  { %v1157_v28 = vpop.f32.mrb[190].mxu1  ;;  %v1635_v30 = vpop.f32.mrb[190].mxu0 }
 0x254   :  { %14104 = vst [vmem:[#allocation20_spill] sm:$0xff] %v10680_v3  ;;  %v10683_v22 = vadd.f32 %v1157_v28, %v14105_v60  ;;  %v10686_v44 = vadd.f32 %v1635_v30, %v10286_v46  ;;  %v7558_v0 = vpop.f32.mrb[191].mxu0  ;;  %v7452_v48 = vpop.f32.mrb[191].mxu1  ;;  %v1898_v46 = vld [vmem:[%s14012_s0 + $0x18a] sm:$0xff]  ;;  %v14109_v28 = vld [vmem:[#allocation24_spill] sm:$0xff] }
 0x255   :  { %v2530_v48 = vld [vmem:[%s14012_s0 + $0xb3] sm:$0xff]  ;;  %v2531_v0 = vld [vmem:[%s14012_s0 + $0xbb] sm:$0xff]  ;;  %v1951_v18 = vpack.c.bf16 %v1898_v46, %v1897_v45 }
 0x256   :  { %14106 = vst [vmem:[#allocation21_spill] sm:$0xff] %v10686_v44  ;;  %7718 = vmatmul.mubr.msk.bf16.gmra.mrb[40].mxu1 %vm262_vm1, %v1950_v59  ;;  %7824 = vmatmul.mubr.msk.bf16.gmra.mrb[40].mxu0 %vm262_vm1, %v2596_v10  ;;  %v2597_v34 = vpack.c.bf16 %v2531_v0, %v2530_v48  ;;  %v14111_v48 = vld [vmem:[#allocation25_spill] sm:$0xff] }
 0x257   :  { %7721 = vmatprep.mubr.msk.bf16.mxu1 %vm8779_vm2, %v14047_v17  ;;  %7827 = vmatprep.mubr.msk.bf16.mxu0 %vm8779_vm2, %v14047_v17 }
 0x259   :  { %v1162_v12 = vpop.f32.mrb[192].mxu1  ;;  %v1640_v13 = vpop.f32.mrb[192].mxu0 }
 0x25a   :  { %v10707_v42 = vadd.f32 %v1162_v12, %v14107_v20  ;;  %v10710_v40 = vadd.f32 %v1640_v13, %v10310_v24  ;;  %v7455_v2 = vpop.f32.mrb[193].mxu1  ;;  %v7561_v16 = vpop.f32.mrb[193].mxu0  ;;  %v1899_v24 = vld [vmem:[%s14012_s0 + $0x192] sm:$0xff] }
 0x25b   :  { %v1165_v59 = vpop.f32.mrb[194].mxu1  ;;  %v1643_v10 = vpop.f32.mrb[194].mxu0 }
 0x25c   :  { %14108 = vst [vmem:[#allocation22_spill] sm:$0xff] %v10710_v40  ;;  %v10713_v30 = vadd.f32 %v1165_v59, %v14109_v28  ;;  %v10716_v60 = vadd.f32 %v1643_v10, %v10316_v58  ;;  %v7562_v44 = vpop.f32.mrb[195].mxu0  ;;  %v7456_v3 = vpop.f32.mrb[195].mxu1  ;;  %v1900_v58 = vld [vmem:[%s14012_s0 + $0x19a] sm:$0xff]  ;;  %v14113_v59 = vld [vmem:[#allocation26_spill] sm:$0xff] }
 0x25d   :  { %v2532_v3 = vld [vmem:[%s14012_s0 + $0xc3] sm:$0xff]  ;;  %v2533_v44 = vld [vmem:[%s14012_s0 + $0xcb] sm:$0xff]  ;;  %v1952_v2 = vpack.c.bf16 %v1900_v58, %v1899_v24 }
 0x25e   :  { %14110 = vst [vmem:[#allocation23_spill] sm:$0xff] %v10716_v60  ;;  %7722 = vmatmul.mubr.msk.bf16.gmra.mrb[44].mxu1 %vm262_vm1, %v1951_v18  ;;  %7828 = vmatmul.mubr.msk.bf16.gmra.mrb[44].mxu0 %vm262_vm1, %v2597_v34  ;;  %v2598_v16 = vpack.c.bf16 %v2533_v44, %v2532_v3  ;;  %v14115_v3 = vld [vmem:[#allocation27_spill] sm:$0xff] }
 0x25f   :  { %7725 = vmatprep.mubr.msk.bf16.mxu1 %vm8779_vm2, %v14047_v17  ;;  %7831 = vmatprep.mubr.msk.bf16.mxu0 %vm8779_vm2, %v14047_v17 }
 0x261   :  { %v1170_v45 = vpop.f32.mrb[196].mxu1  ;;  %v1648_v46 = vpop.f32.mrb[196].mxu0 }
 0x262   :  { %v10737_v0 = vadd.f32 %v1170_v45, %v14111_v48  ;;  %v10740_v12 = vadd.f32 %v1648_v46, %v10340_v63  ;;  %v7459_v13 = vpop.f32.mrb[197].mxu1  ;;  %v7565_v20 = vpop.f32.mrb[197].mxu0  ;;  %v1901_v63 = vld [vmem:[%s14012_s0 + $0x1a2] sm:$0xff] }
 0x263   :  { %v1173_v18 = vpop.f32.mrb[198].mxu1  ;;  %v1651_v34 = vpop.f32.mrb[198].mxu0 }
 0x264   :  { %14112 = vst [vmem:[#allocation24_spill] sm:$0xff] %v10740_v12  ;;  %v10743_v10 = vadd.f32 %v1173_v18, %v14113_v59  ;;  %v10746_v28 = vadd.f32 %v1651_v34, %v10346_v15  ;;  %v7566_v60 = vpop.f32.mrb[199].mxu0  ;;  %v7460_v40 = vpop.f32.mrb[199].mxu1  ;;  %v1902_v15 = vld [vmem:[%s14012_s0 + $0x1aa] sm:$0xff]  ;;  %v14116_v18 = vld [vmem:[#allocation28_spill] sm:$0xff] }
 0x265   :  { %v2534_v40 = vld [vmem:[%s14012_s0 + $0xd3] sm:$0xff]  ;;  %v2535_v60 = vld [vmem:[%s14012_s0 + $0xdb] sm:$0xff]  ;;  %v1953_v13 = vpack.c.bf16 %v1902_v15, %v1901_v63 }
 0x266   :  { %14114 = vst [vmem:[#allocation25_spill] sm:$0xff] %v10746_v28  ;;  %7726 = vmatmul.mubr.msk.bf16.gmra.mrb[48].mxu1 %vm262_vm1, %v1952_v2  ;;  %7832 = vmatmul.mubr.msk.bf16.gmra.mrb[48].mxu0 %vm262_vm1, %v2598_v16  ;;  %v2599_v20 = vpack.c.bf16 %v2535_v60, %v2534_v40  ;;  %v14117_v40 = vld [vmem:[#allocation29_spill] sm:$0xff] }
 0x267   :  { %7729 = vmatprep.mubr.msk.bf16.mxu1 %vm8779_vm2, %v14047_v17  ;;  %7835 = vmatprep.mubr.msk.bf16.mxu0 %vm8779_vm2, %v14047_v17 }
 0x269   :  { %v1178_v24 = vpop.f32.mrb[200].mxu1  ;;  %v1656_v58 = vpop.f32.mrb[200].mxu0 }
 0x26a   :  { %v10767_v44 = vadd.f32 %v1178_v24, %v14115_v3  ;;  %v10770_v45 = vadd.f32 %v1656_v58, %v10367_v8  ;;  %v7463_v46 = vpop.f32.mrb[201].mxu1  ;;  %v7569_v48 = vpop.f32.mrb[201].mxu0  ;;  %v1903_v8 = vld [vmem:[%s14012_s0 + $0x1b2] sm:$0xff] }
 0x26b   :  { %v1181_v2 = vpop.f32.mrb[202].mxu1  ;;  %v1659_v16 = vpop.f32.mrb[202].mxu0 }
 0x26c   :  { %v10773_v34 = vadd.f32 %v1181_v2, %v14116_v18  ;;  %v10776_v59 = vadd.f32 %v1659_v16, %v10373_v55  ;;  %v7570_v28 = vpop.f32.mrb[203].mxu0  ;;  %v7464_v12 = vpop.f32.mrb[203].mxu1  ;;  %v1904_v55 = vld [vmem:[%s14012_s0 + $0x1ba] sm:$0xff] }
 0x26d   :  { %v2536_v12 = vld [vmem:[%s14012_s0 + $0xe3] sm:$0xff]  ;;  %v2537_v28 = vld [vmem:[%s14012_s0 + $0xeb] sm:$0xff]  ;;  %v1954_v46 = vpack.c.bf16 %v1904_v55, %v1903_v8  ;;  %v2538_v8 = vld [vmem:[%s14012_s0 + $0xf3] sm:$0xff] }
 0x26e   :  { %7730 = vmatmul.mubr.msk.bf16.gmra.mrb[52].mxu1 %vm262_vm1, %v1953_v13  ;;  %7836 = vmatmul.mubr.msk.bf16.gmra.mrb[52].mxu0 %vm262_vm1, %v2599_v20  ;;  %v2600_v48 = vpack.c.bf16 %v2537_v28, %v2536_v12  ;;  %v2539_v55 = vld [vmem:[%s14012_s0 + $0xfb] sm:$0xff] }
 0x26f   :  { %7733 = vmatprep.mubr.msk.bf16.mxu1 %vm8779_vm2, %v14047_v17  ;;  %7839 = vmatprep.mubr.msk.bf16.mxu0 %vm8779_vm2, %v14047_v17 }
 0x271   :  { %v1186_v63 = vpop.f32.mrb[204].mxu1  ;;  %v1664_v15 = vpop.f32.mrb[204].mxu0 }
 0x272   :  { %v10797_v60 = vadd.f32 %v1186_v63, %v14117_v40  ;;  %v10800_v24 = vadd.f32 %v1664_v15, %v10397_v54  ;;  %v7573_v58 = vpop.f32.mrb[205].mxu0  ;;  %v7467_v3 = vpop.f32.mrb[205].mxu1  ;;  %v1905_v54 = vld [vmem:[%s14012_s0 + $0x1c2] sm:$0xff] }
 0x273   :  { %v1667_v13 = vpop.f32.mrb[206].mxu0  ;;  %v1189_v20 = vpop.f32.mrb[206].mxu1 }
 0x274   :  { %v10803_v2 = vadd.f32 %v1667_v13, %v10403_v11  ;;  %v7574_v16 = vpop.f32.mrb[207].mxu0  ;;  %v7468_v18 = vpop.f32.mrb[207].mxu1  ;;  %v1906_v11 = vld [vmem:[%s14012_s0 + $0x1ca] sm:$0xff] }
 0x275   :  { %v1955_v3 = vpack.c.bf16 %v1906_v11, %v1905_v54 }
 0x276   :  { %14118 = vst [vmem:[#allocation26_spill] sm:$0xff] %v10803_v2  ;;  %7734 = vmatmul.mubr.msk.bf16.gmra.mrb[56].mxu1 %vm262_vm1, %v1954_v46  ;;  %7840 = vmatmul.mubr.msk.bf16.gmra.mrb[56].mxu0 %vm262_vm1, %v2600_v48  ;;  %v2601_v46 = vpack.c.bf16 %v2539_v55, %v2538_v8 }
 0x277   :  { %7737 = vmatprep.mubr.msk.bf16.mxu1 %vm8779_vm2, %v14047_v17  ;;  %7843 = vmatprep.mubr.msk.bf16.mxu0 %vm8779_vm2, %v14047_v17 }
 0x279   :  { %v1672_v12 = vpop.f32.mrb[208].mxu0  ;;  %v2123_v28 = vpop.f32.mrb[208].mxu1 }
 0x27a   :  { %v10824_v63 = vadd.f32 %v1672_v12, %v10427_v25  ;;  %v10827_v15 = vadd.f32 %v2123_v28, %v10052_v50  ;;  %v7577_v40 = vpop.f32.mrb[209].mxu0  ;;  %v7631_v58 = vpop.f32.mrb[209].mxu1  ;;  %v1907_v50 = vld [vmem:[%s14012_s0 + $0x1d2] sm:$0xff] }
 0x27b   :  { %v1675_v48 = vpop.f32.mrb[210].mxu0  ;;  %v2126_v13 = vpop.f32.mrb[210].mxu1  ;;  %v2541_v25 = vld [vmem:[%s14012_s0 + $0x10b] sm:$0xff] }
 0x27c   :  { %v10830_v20 = vadd.f32 %v1675_v48, %v10437_v29  ;;  %v10833_v16 = vadd.f32 %v2126_v13, %v10058_v1  ;;  %v7578_v18 = vpop.f32.mrb[211].mxu0  ;;  %v7632_v2 = vpop.f32.mrb[211].mxu1  ;;  %v1908_v1 = vld [vmem:[%s14012_s0 + $0x1da] sm:$0xff]  ;;  %v2540_v29 = vld [vmem:[%s14012_s0 + $0x103] sm:$0xff] }
 0x27d   :  { %v1956_v28 = vpack.c.bf16 %v1908_v1, %v1907_v50  ;;  %v2602_v40 = vpack.c.bf16 %v2541_v25, %v2540_v29 }
 0x27e   :  { %7738 = vmatmul.mubr.msk.bf16.gmra.mrb[60].mxu1 %vm262_vm1, %v1955_v3  ;;  %7844 = vmatmul.mubr.msk.bf16.gmra.mrb[60].mxu0 %vm262_vm1, %v2601_v46 }
 0x27f   :  { %7741 = vmatprep.mubr.msk.bf16.mxu1 %vm8779_vm2, %v14047_v17  ;;  %7847 = vmatprep.mubr.msk.bf16.mxu0 %vm8779_vm2, %v14047_v17 }
 0x281   :  { %v1680_v2 = vpop.f32.mrb[212].mxu0  ;;  %v2131_v54 = vpop.f32.mrb[212].mxu1 }
 0x282   :  { %v10854_v11 = vadd.f32 %v1680_v2, %v10467_v23  ;;  %v10857_v8 = vadd.f32 %v2131_v54, %v10077_v5  ;;  %v7581_v55 = vpop.f32.mrb[213].mxu0  ;;  %v7635_v12 = vpop.f32.mrb[213].mxu1  ;;  %v1909_v5 = vld [vmem:[%s14012_s0 + $0x1e2] sm:$0xff] }
 0x283   :  { %v1683_v58 = vpop.f32.mrb[214].mxu0  ;;  %v2134_v3 = vpop.f32.mrb[214].mxu1  ;;  %v2543_v23 = vld [vmem:[%s14012_s0 + $0x11b] sm:$0xff] }
 0x284   :  { %v10860_v46 = vadd.f32 %v1683_v58, %v10473_v56  ;;  %v10863_v48 = vadd.f32 %v2134_v3, %v10083_v39  ;;  %v7582_v13 = vpop.f32.mrb[215].mxu0  ;;  %v7636_v18 = vpop.f32.mrb[215].mxu1  ;;  %v1910_v39 = vld [vmem:[%s14012_s0 + $0x1ea] sm:$0xff]  ;;  %v2542_v56 = vld [vmem:[%s14012_s0 + $0x113] sm:$0xff] }
 0x285   :  { %v1957_v55 = vpack.c.bf16 %v1910_v39, %v1909_v5  ;;  %v2603_v12 = vpack.c.bf16 %v2543_v23, %v2542_v56 }
 0x286   :  { %7742 = vmatmul.mubr.msk.bf16.gmra.mrb[64].mxu1 %vm262_vm1, %v1956_v28  ;;  %7848 = vmatmul.mubr.msk.bf16.gmra.mrb[64].mxu0 %vm262_vm1, %v2602_v40 }
 0x287   :  { %7745 = vmatprep.mubr.msk.bf16.mxu1 %vm8779_vm2, %v14047_v17  ;;  %7851 = vmatprep.mubr.msk.bf16.mxu0 %vm8779_vm2, %v14047_v17 }
 0x289   :  { %v1688_v50 = vpop.f32.mrb[216].mxu0  ;;  %v2139_v1 = vpop.f32.mrb[216].mxu1 }
 0x28a   :  { %v10884_v29 = vadd.f32 %v1688_v50, %v10497_v31  ;;  %v10887_v25 = vadd.f32 %v2139_v1, %v10102_v19  ;;  %v7585_v2 = vpop.f32.mrb[217].mxu0  ;;  %v7639_v54 = vpop.f32.mrb[217].mxu1  ;;  %v1911_v19 = vld [vmem:[%s14012_s0 + $0x1f2] sm:$0xff]  ;;  %v2544_v31 = vld [vmem:[%s14012_s0 + $0x123] sm:$0xff] }
 0x28b   :  { %v1691_v28 = vpop.f32.mrb[218].mxu0  ;;  %v2142_v40 = vpop.f32.mrb[218].mxu1 }
 0x28c   :  { %v10890_v58 = vadd.f32 %v1691_v28, %v10503_v57  ;;  %v10893_v3 = vadd.f32 %v2142_v40, %v10108_v38  ;;  %v7586_v13 = vpop.f32.mrb[219].mxu0  ;;  %v7640_v18 = vpop.f32.mrb[219].mxu1  ;;  %v1912_v38 = vld [vmem:[%s14012_s0 + $0x1fa] sm:$0xff]  ;;  %v2545_v57 = vld [vmem:[%s14012_s0 + $0x12b] sm:$0xff] }
 0x28d   :  { %v1958_v2 = vpack.c.bf16 %v1912_v38, %v1911_v19  ;;  %v2604_v54 = vpack.c.bf16 %v2545_v57, %v2544_v31 }
 0x28e   :  { %7746 = vmatmul.mubr.msk.bf16.gmra.mrb[68].mxu1 %vm262_vm1, %v1957_v55  ;;  %7852 = vmatmul.mubr.msk.bf16.gmra.mrb[68].mxu0 %vm262_vm1, %v2603_v12 }
 0x28f   :  { %7749 = vmatprep.mubr.msk.bf16.mxu1 %vm8779_vm2, %v14047_v17  ;;  %7855 = vmatprep.mubr.msk.bf16.mxu0 %vm8779_vm2, %v14047_v17 }
 0x291   :  { %v1696_v5 = vpop.f32.mrb[220].mxu0  ;;  %v2147_v39 = vpop.f32.mrb[220].mxu1 }
 0x292   :  { %v10914_v56 = vadd.f32 %v1696_v5, %v10527_v9  ;;  %v10917_v23 = vadd.f32 %v2147_v39, %v10133_v37  ;;  %v7589_v50 = vpop.f32.mrb[221].mxu0  ;;  %v7643_v1 = vpop.f32.mrb[221].mxu1  ;;  %v1913_v37 = vld [vmem:[%s14012_s0 + $0x202] sm:$0xff]  ;;  %v2546_v9 = vld [vmem:[%s14012_s0 + $0x133] sm:$0xff] }
 0x293   :  { %v1699_v55 = vpop.f32.mrb[222].mxu0  ;;  %v2150_v12 = vpop.f32.mrb[222].mxu1 }
 0x294   :  { %v10920_v28 = vadd.f32 %v1699_v55, %v10533_v32  ;;  %v10923_v40 = vadd.f32 %v2150_v12, %v10139_v21  ;;  %v7590_v13 = vpop.f32.mrb[223].mxu0  ;;  %v7644_v18 = vpop.f32.mrb[223].mxu1  ;;  %v1914_v21 = vld [vmem:[%s14012_s0 + $0x20a] sm:$0xff]  ;;  %v2547_v32 = vld [vmem:[%s14012_s0 + $0x13b] sm:$0xff] }
 0x295   :  { %v1959_v50 = vpack.c.bf16 %v1914_v21, %v1913_v37  ;;  %v2605_v1 = vpack.c.bf16 %v2547_v32, %v2546_v9 }
 0x296   :  { %7750 = vmatmul.mubr.msk.bf16.gmra.mrb[72].mxu1 %vm262_vm1, %v1958_v2  ;;  %7856 = vmatmul.mubr.msk.bf16.gmra.mrb[72].mxu0 %vm262_vm1, %v2604_v54 }
 0x297   :  { %7753 = vmatprep.mubr.msk.bf16.mxu1 %vm8779_vm2, %v14047_v17  ;;  %7859 = vmatprep.mubr.msk.bf16.mxu0 %vm8779_vm2, %v14047_v17 }
 0x299   :  { %v1704_v19 = vpop.f32.mrb[224].mxu0  ;;  %v2155_v38 = vpop.f32.mrb[224].mxu1 }
 0x29a   :  { %v10944_v31 = vadd.f32 %v1704_v19, %v10557_v35  ;;  %v10947_v57 = vadd.f32 %v2155_v38, %v10163_v33  ;;  %v7593_v5 = vpop.f32.mrb[225].mxu0  ;;  %v7647_v39 = vpop.f32.mrb[225].mxu1  ;;  %v1915_v33 = vld [vmem:[%s14012_s0 + $0x212] sm:$0xff]  ;;  %v2548_v35 = vld [vmem:[%s14012_s0 + $0x143] sm:$0xff] }
 0x29b   :  { %v1707_v2 = vpop.f32.mrb[226].mxu0  ;;  %v2158_v54 = vpop.f32.mrb[226].mxu1 }
 0x29c   :  { %v10950_v55 = vadd.f32 %v1707_v2, %v10563_v36  ;;  %v10953_v12 = vadd.f32 %v2158_v54, %v10169_v49  ;;  %v7594_v13 = vpop.f32.mrb[227].mxu0  ;;  %v7648_v18 = vpop.f32.mrb[227].mxu1  ;;  %v1916_v49 = vld [vmem:[%s14012_s0 + $0x21a] sm:$0xff]  ;;  %v2549_v36 = vld [vmem:[%s14012_s0 + $0x14b] sm:$0xff] }
 0x29d   :  { %v1960_v5 = vpack.c.bf16 %v1916_v49, %v1915_v33  ;;  %v2606_v39 = vpack.c.bf16 %v2549_v36, %v2548_v35 }
 0x29e   :  { %7754 = vmatmul.mubr.msk.bf16.gmra.mrb[76].mxu1 %vm262_vm1, %v1959_v50  ;;  %7860 = vmatmul.mubr.msk.bf16.gmra.mrb[76].mxu0 %vm262_vm1, %v2605_v1 }
 0x29f   :  { %7757 = vmatprep.mubr.msk.bf16.mxu1 %vm8779_vm2, %v14047_v17  ;;  %7863 = vmatprep.mubr.msk.bf16.mxu0 %vm8779_vm2, %v14047_v17 }
 0x2a1   :  { %v1712_v37 = vpop.f32.mrb[228].mxu0  ;;  %v2163_v21 = vpop.f32.mrb[228].mxu1 }
 0x2a2   :  { %v10974_v9 = vadd.f32 %v1712_v37, %v10587_v14  ;;  %v10977_v32 = vadd.f32 %v2163_v21, %v10193_v51  ;;  %v7597_v19 = vpop.f32.mrb[229].mxu0  ;;  %v7651_v38 = vpop.f32.mrb[229].mxu1  ;;  %v1917_v51 = vld [vmem:[%s14012_s0 + $0x222] sm:$0xff]  ;;  %v2550_v14 = vld [vmem:[%s14012_s0 + $0x153] sm:$0xff] }
 0x2a3   :  { %v1715_v50 = vpop.f32.mrb[230].mxu0  ;;  %v2166_v1 = vpop.f32.mrb[230].mxu1 }
 0x2a4   :  { %14119 = vst [vmem:[#allocation27_spill] sm:$0xff] %v10974_v9  ;;  %v10980_v2 = vadd.f32 %v1715_v50, %v10593_v61  ;;  %v10983_v54 = vadd.f32 %v2166_v1, %v10199_v41  ;;  %v7598_v13 = vpop.f32.mrb[231].mxu0  ;;  %v7652_v18 = vpop.f32.mrb[231].mxu1  ;;  %v1918_v41 = vld [vmem:[%s14012_s0 + $0x22a] sm:$0xff]  ;;  %v2551_v61 = vld [vmem:[%s14012_s0 + $0x15b] sm:$0xff] }
 0x2a5   :  { %v1961_v19 = vpack.c.bf16 %v1918_v41, %v1917_v51  ;;  %v2607_v38 = vpack.c.bf16 %v2551_v61, %v2550_v14 }
 0x2a6   :  { %14120 = vst [vmem:[#allocation28_spill] sm:$0xff] %v10980_v2  ;;  %7758 = vmatmul.mubr.msk.bf16.gmra.mrb[80].mxu1 %vm262_vm1, %v1960_v5  ;;  %7864 = vmatmul.mubr.msk.bf16.gmra.mrb[80].mxu0 %vm262_vm1, %v2606_v39 }
 0x2a7   :  { %7761 = vmatprep.mubr.msk.bf16.mxu1 %vm8779_vm2, %v14047_v17  ;;  %7867 = vmatprep.mubr.msk.bf16.mxu0 %vm8779_vm2, %v14047_v17 }
 0x2a9   :  { %v1720_v33 = vpop.f32.mrb[232].mxu0  ;;  %v2171_v49 = vpop.f32.mrb[232].mxu1 }
 0x2aa   :  { %v11004_v35 = vadd.f32 %v1720_v33, %v10617_v52  ;;  %v11007_v36 = vadd.f32 %v2171_v49, %v10223_v27  ;;  %v7601_v37 = vpop.f32.mrb[233].mxu0  ;;  %v7655_v21 = vpop.f32.mrb[233].mxu1  ;;  %v1919_v27 = vld [vmem:[%s14012_s0 + $0x232] sm:$0xff]  ;;  %v2552_v52 = vld [vmem:[%s14012_s0 + $0x163] sm:$0xff] }
 0x2ab   :  { %v1723_v5 = vpop.f32.mrb[234].mxu0  ;;  %v2174_v39 = vpop.f32.mrb[234].mxu1 }
 0x2ac   :  { %14121 = vst [vmem:[#allocation29_spill] sm:$0xff] %v11004_v35  ;;  %v11010_v50 = vadd.f32 %v1723_v5, %v10623_v53  ;;  %v11013_v1 = vadd.f32 %v2174_v39, %v10229_v6  ;;  %v7602_v13 = vpop.f32.mrb[235].mxu0  ;;  %v7656_v18 = vpop.f32.mrb[235].mxu1  ;;  %v1920_v6 = vld [vmem:[%s14012_s0 + $0x23a] sm:$0xff]  ;;  %v2553_v53 = vld [vmem:[%s14012_s0 + $0x16b] sm:$0xff]  ;;  %v14125_v39 = vld [vmem:[#allocation37_spill] sm:$0xff] }
 0x2ad   :  { %v1962_v37 = vpack.c.bf16 %v1920_v6, %v1919_v27  ;;  %v2608_v21 = vpack.c.bf16 %v2553_v53, %v2552_v52  ;;  %v14127_v53 = vld [vmem:[#allocation38_spill] sm:$0xff] }
 0x2ae   :  { %14122 = vst [vmem:[#allocation40_spill] sm:$0xff] %v11010_v50  ;;  %7762 = vmatmul.mubr.msk.bf16.gmra.mrb[84].mxu1 %vm262_vm1, %v1961_v19  ;;  %7868 = vmatmul.mubr.msk.bf16.gmra.mrb[84].mxu0 %vm262_vm1, %v2607_v38 }
 0x2af   :  { %7765 = vmatprep.mubr.msk.bf16.mxu1 %vm8779_vm2, %v14047_v17  ;;  %7871 = vmatprep.mubr.msk.bf16.mxu0 %vm8779_vm2, %v14047_v17 }
 0x2b1   :  { %v1728_v51 = vpop.f32.mrb[236].mxu0  ;;  %v2179_v41 = vpop.f32.mrb[236].mxu1 }
 0x2b2   :  { %v11034_v14 = vadd.f32 %v1728_v51, %v10647_v43  ;;  %v11037_v61 = vadd.f32 %v2179_v41, %v10253_v4  ;;  %v7605_v33 = vpop.f32.mrb[237].mxu0  ;;  %v7659_v49 = vpop.f32.mrb[237].mxu1  ;;  %v1921_v4 = vld [vmem:[%s14012_s0 + $0x242] sm:$0xff]  ;;  %v1922_v43 = vld [vmem:[%s14012_s0 + $0x24a] sm:$0xff] }
 0x2b3   :  { %v1731_v19 = vpop.f32.mrb[238].mxu0  ;;  %v2182_v38 = vpop.f32.mrb[238].mxu1  ;;  %v1963_v49 = vpack.c.bf16 %v1922_v43, %v1921_v4 }
 0x2b4   :  { %14123 = vst [vmem:[#allocation41_spill] sm:$0xff] %v11034_v14  ;;  %v11040_v5 = vadd.f32 %v1731_v19, %v10653_v26  ;;  %v11043_v13 = vadd.f32 %v2182_v38, %v14125_v39  ;;  %v7606_v18 = vpop.f32.mrb[239].mxu0  ;;  %v7660_v50 = vpop.f32.mrb[239].mxu1  ;;  %v2554_v26 = vld [vmem:[%s14012_s0 + $0x173] sm:$0xff]  ;;  %v14129_v39 = vld [vmem:[#allocation30_spill] sm:$0xff] }
 0x2b5   :  { %v2555_v50 = vld [vmem:[%s14012_s0 + $0x17b] sm:$0xff] }
 0x2b6   :  { %14124 = vst [vmem:[#allocation42_spill] sm:$0xff] %v11040_v5  ;;  %7766 = vmatmul.mubr.msk.bf16.gmra.mrb[88].mxu1 %vm262_vm1, %v1962_v37  ;;  %7872 = vmatmul.mubr.msk.bf16.gmra.mrb[88].mxu0 %vm262_vm1, %v2608_v21  ;;  %v2609_v37 = vpack.c.bf16 %v2555_v50, %v2554_v26 }
 0x2b7   :  { %7769 = vmatprep.mubr.msk.bf16.mxu1 %vm8779_vm2, %v14047_v17  ;;  %7875 = vmatprep.mubr.msk.bf16.mxu0 %vm8779_vm2, %v14047_v17 }
 0x2b9   :  { %v1736_v27 = vpop.f32.mrb[240].mxu0  ;;  %v2187_v6 = vpop.f32.mrb[240].mxu1 }
 0x2ba   :  { %v11064_v52 = vadd.f32 %v1736_v27, %v10677_v62  ;;  %v11067_v51 = vadd.f32 %v2187_v6, %v14127_v53  ;;  %v7609_v41 = vpop.f32.mrb[241].mxu0  ;;  %v7663_v33 = vpop.f32.mrb[241].mxu1  ;;  %v1923_v62 = vld [vmem:[%s14012_s0 + $0x252] sm:$0xff] }
 0x2bb   :  { %v1739_v21 = vpop.f32.mrb[242].mxu0  ;;  %v2190_v19 = vpop.f32.mrb[242].mxu1 }
 0x2bc   :  { %14126 = vst [vmem:[#allocation37_spill] sm:$0xff] %v11064_v52  ;;  %v11070_v38 = vadd.f32 %v1739_v21, %v10683_v22  ;;  %v11073_v18 = vadd.f32 %v2190_v19, %v14129_v39  ;;  %v7610_v5 = vpop.f32.mrb[243].mxu0  ;;  %v7664_v14 = vpop.f32.mrb[243].mxu1  ;;  %v1924_v22 = vld [vmem:[%s14012_s0 + $0x25a] sm:$0xff]  ;;  %v14132_v21 = vld [vmem:[#allocation31_spill] sm:$0xff] }
 0x2bd   :  { %v2556_v14 = vld [vmem:[%s14012_s0 + $0x183] sm:$0xff]  ;;  %v2557_v5 = vld [vmem:[%s14012_s0 + $0x18b] sm:$0xff]  ;;  %v1964_v53 = vpack.c.bf16 %v1924_v22, %v1923_v62 }
 0x2be   :  { %14128 = vst [vmem:[#allocation38_spill] sm:$0xff] %v11070_v38  ;;  %7770 = vmatmul.mubr.msk.bf16.gmra.mrb[92].mxu1 %vm262_vm1, %v1963_v49  ;;  %7876 = vmatmul.mubr.msk.bf16.gmra.mrb[92].mxu0 %vm262_vm1, %v2609_v37  ;;  %v2610_v41 = vpack.c.bf16 %v2557_v5, %v2556_v14 }
 0x2bf   :  { %7773 = vmatprep.mubr.msk.bf16.mxu1 %vm8779_vm2, %v14047_v17  ;;  %7879 = vmatprep.mubr.msk.bf16.mxu0 %vm8779_vm2, %v14047_v17 }
 0x2c1   :  { %v1744_v4 = vpop.f32.mrb[244].mxu0  ;;  %v2195_v43 = vpop.f32.mrb[244].mxu1 }
 0x2c2   :  { %v11094_v26 = vadd.f32 %v1744_v4, %v10707_v42  ;;  %v11097_v50 = vadd.f32 %v2195_v43, %v10313_v7  ;;  %v7613_v27 = vpop.f32.mrb[245].mxu0  ;;  %v7667_v6 = vpop.f32.mrb[245].mxu1  ;;  %v1925_v7 = vld [vmem:[%s14012_s0 + $0x262] sm:$0xff]  ;;  %v1926_v42 = vld [vmem:[%s14012_s0 + $0x26a] sm:$0xff] }
 0x2c3   :  { %v1747_v33 = vpop.f32.mrb[246].mxu0  ;;  %v2198_v49 = vpop.f32.mrb[246].mxu1  ;;  %v1965_v27 = vpack.c.bf16 %v1926_v42, %v1925_v7 }
 0x2c4   :  { %14130 = vst [vmem:[#allocation30_spill] sm:$0xff] %v11094_v26  ;;  %v11100_v37 = vadd.f32 %v1747_v33, %v10713_v30  ;;  %v11103_v19 = vadd.f32 %v2198_v49, %v14132_v21  ;;  %v7614_v39 = vpop.f32.mrb[247].mxu0  ;;  %v7668_v38 = vpop.f32.mrb[247].mxu1  ;;  %v2558_v30 = vld [vmem:[%s14012_s0 + $0x193] sm:$0xff] }
 0x2c5   :  { %v2559_v38 = vld [vmem:[%s14012_s0 + $0x19b] sm:$0xff] }
 0x2c6   :  { %14131 = vst [vmem:[#allocation43_spill] sm:$0xff] %v11100_v37  ;;  %7774 = vmatmul.mubr.msk.bf16.gmra.mrb[96].mxu1 %vm262_vm1, %v1964_v53  ;;  %7880 = vmatmul.mubr.msk.bf16.gmra.mrb[96].mxu0 %vm262_vm1, %v2610_v41  ;;  %v2611_v6 = vpack.c.bf16 %v2559_v38, %v2558_v30  ;;  %v14135_v49 = vld [vmem:[#allocation32_spill] sm:$0xff]  ;;  %v14137_v30 = vld [vmem:[#allocation33_spill] sm:$0xff] }
 0x2c7   :  { %7777 = vmatprep.mubr.msk.bf16.mxu1 %vm8779_vm2, %v14047_v17  ;;  %7883 = vmatprep.mubr.msk.bf16.mxu0 %vm8779_vm2, %v14047_v17 }
 0x2c9   :  { %v1752_v62 = vpop.f32.mrb[248].mxu0  ;;  %v2203_v22 = vpop.f32.mrb[248].mxu1 }
 0x2ca   :  { %v11124_v14 = vadd.f32 %v1752_v62, %v10737_v0  ;;  %v11127_v5 = vadd.f32 %v2203_v22, %v10343_v47  ;;  %v7617_v4 = vpop.f32.mrb[249].mxu0  ;;  %v7671_v43 = vpop.f32.mrb[249].mxu1  ;;  %v1927_v47 = vld [vmem:[%s14012_s0 + $0x272] sm:$0x3f]  ;;  %v2560_v0 = vld [vmem:[%s14012_s0 + $0x1a3] sm:$0xff] }
 0x2cb   :  { %v1755_v53 = vpop.f32.mrb[250].mxu0  ;;  %v2206_v41 = vpop.f32.mrb[250].mxu1  ;;  %v1966_v4 = vpack.c.bf16 %v1927_v47, %v1927_v47  ;;  %v3170_v47 = vld [vmem:[%s14012_s0 + $0x1c] sm:$0xff] }
 0x2cc   :  { %14133 = vst [vmem:[#allocation31_spill] sm:$0xff] %v11124_v14  ;;  %v11130_v33 = vadd.f32 %v1755_v53, %v10743_v10  ;;  %v11133_v21 = vadd.f32 %v2206_v41, %v14135_v49  ;;  %v7618_v39 = vpop.f32.mrb[251].mxu0  ;;  %v7672_v37 = vpop.f32.mrb[251].mxu1  ;;  %v2561_v10 = vld [vmem:[%s14012_s0 + $0x1ab] sm:$0xff] }
 0x2cd   :  { %v2612_v43 = vpack.c.bf16 %v2561_v10, %v2560_v0  ;;  %v14139_v41 = vld [vmem:[#allocation39_spill] sm:$0xff] }
 0x2ce   :  { %14134 = vst [vmem:[#allocation44_spill] sm:$0xff] %v11130_v33  ;;  %7778 = vmatmul.mubr.msk.bf16.gmra.mrb[100].mxu1 %vm262_vm1, %v1965_v27  ;;  %7884 = vmatmul.mubr.msk.bf16.gmra.mrb[100].mxu0 %vm262_vm1, %v2611_v6 }
 0x2cf   :  { %7781 = vmatprep.mubr.msk.bf16.mxu1 %vm8779_vm2, %v14047_v17  ;;  %7887 = vmatprep.mubr.msk.bf16.mxu0 %vm8779_vm2, %v14047_v17 }
 0x2d1   :  { %v1760_v37 = vpop.f32.mrb[252].mxu0  ;;  %v2211_v7 = vpop.f32.mrb[252].mxu1 }
 0x2d2   :  { %v11151_v42 = vadd.f32 %v1760_v37, %v10767_v44  ;;  %v11154_v38 = vadd.f32 %v2211_v7, %v14137_v30  ;;  %v7621_v62 = vpop.f32.mrb[253].mxu0  ;;  %v7675_v22 = vpop.f32.mrb[253].mxu1  ;;  %v2562_v44 = vld [vmem:[%s14012_s0 + $0x1b3] sm:$0xff]  ;;  %v14141_v7 = vld [vmem:[#allocation34_spill] sm:$0xff] }
 0x2d3   :  { %v1763_v27 = vpop.f32.mrb[254].mxu0  ;;  %v2214_v6 = vpop.f32.mrb[254].mxu1 }
 0x2d4   :  { %14136 = vst [vmem:[#allocation32_spill] sm:$0xff] %v11151_v42  ;;  %v11157_v53 = vadd.f32 %v1763_v27, %v10773_v34  ;;  %v11160_v49 = vadd.f32 %v2214_v6, %v14139_v41  ;;  %v7622_v39 = vpop.f32.mrb[255].mxu0  ;;  %v7676_v33 = vpop.f32.mrb[255].mxu1  ;;  %v2563_v34 = vld [vmem:[%s14012_s0 + $0x1bb] sm:$0xff]  ;;  %v14142_v41 = vld [vmem:[#allocation35_spill] sm:$0xff] }
 0x2d5   :  { %v3169_v33 = vld [vmem:[%s14012_s0 + $0x14] sm:$0xff] }
 0x2d6   :  { %14138 = vst [vmem:[#allocation33_spill] sm:$0xff] %v11157_v53  ;;  %7782 = vmatmul.mubr.msk.bf16.gmra.mrb[104].mxu1 %vm262_vm1, %v1966_v4  ;;  %7888 = vmatmul.mubr.msk.bf16.gmra.mrb[104].mxu0 %vm262_vm1, %v2612_v43  ;;  %v2613_v4 = vpack.c.bf16 %v2563_v34, %v2562_v44  ;;  %v3246_v43 = vpack.c.bf16 %v3170_v47, %v3169_v33  ;;  %v2565_v44 = vld [vmem:[%s14012_s0 + $0x1cb] sm:$0xff]  ;;  %v14143_v47 = vld [vmem:[#allocation36_spill] sm:$0xff] }
 0x2d7   :  { %7891 = vmatprep.mubr.msk.bf16.mxu0 %vm8779_vm2, %v14047_v17  ;;  %7945 = vmatprep.mubr.msk.bf16.mxu1 %vm8779_vm2, %v14047_v17 }
 0x2d9   :  { %v1768_v0 = vpop.f32.mrb[0].mxu0  ;;  %v2219_v10 = vpop.f32.mrb[0].mxu1 }
 0x2da   :  { %v11181_v37 = vadd.f32 %v1768_v0, %v10797_v60  ;;  %v11184_v30 = vadd.f32 %v2219_v10, %v14141_v7  ;;  %v7625_v62 = vpop.f32.mrb[1].mxu0  ;;  %v7679_v22 = vpop.f32.mrb[1].mxu1  ;;  %v2564_v60 = vld [vmem:[%s14012_s0 + $0x1c3] sm:$0xff] }
 0x2db   :  { %v1771_v27 = vpop.f32.mrb[2].mxu0  ;;  %v2222_v6 = vpop.f32.mrb[2].mxu1  ;;  %v2614_v22 = vpack.c.bf16 %v2565_v44, %v2564_v60 }
 0x2dc   :  { %14140 = vst [vmem:[#allocation39_spill] sm:$0xff] %v11181_v37  ;;  %v11187_v39 = vadd.f32 %v2222_v6, %v14142_v41  ;;  %v7626_v53 = vpop.f32.mrb[3].mxu0  ;;  %v7680_v42 = vpop.f32.mrb[3].mxu1  ;;  %v14145_v6 = vld [vmem:[#allocation5_spill] sm:$0xff] }
 0x2dd   :  { %v3171_v42 = vld [vmem:[%s14012_s0 + $0x24] sm:$0xff]  ;;  %v3172_v53 = vld [vmem:[%s14012_s0 + $0x2c] sm:$0xff] }
 0x2de   :  { %7892 = vmatmul.mubr.msk.bf16.gmra.mrb[108].mxu0 %vm262_vm1, %v2613_v4  ;;  %7946 = vmatmul.mubr.msk.bf16.vlgmr.msra.gmra.mrb[108].mxu1 %vm262_vm1, %v3246_v43  ;;  %v11213_v4 = vpack.c.bf16 %v3172_v53, %v3171_v42  ;;  %v14147_v42 = vld [vmem:[#allocation6_spill] sm:$0xff] }
 0x2df   :  { %7895 = vmatprep.mubr.msk.bf16.mxu0 %vm8779_vm2, %v14047_v17  ;;  %7949 = vmatprep.mubr.msk.bf16.mxu1 %vm8779_vm2, %v14047_v17 }
 0x2e1   :  { %v2227_v34 = vpop.f32.mrb[4].mxu1  ;;  %v2782_v33 = vpop.f32.mrb[4].mxu0 }
 0x2e2   :  { %v11208_v0 = vadd.f32 %v2227_v34, %v14143_v47  ;;  %v11211_v10 = vadd.f32 %v2782_v33, %v10827_v15  ;;  %v7683_v7 = vpop.f32.mrb[5].mxu1  ;;  %v7789_v62 = vpop.f32.mrb[5].mxu0  ;;  %v2566_v15 = vld [vmem:[%s14012_s0 + $0x1d3] sm:$0xff] }
 0x2e3   :  { %v2230_v43 = vpop.f32.mrb[6].mxu1  ;;  %v2785_v27 = vpop.f32.mrb[6].mxu0 }
 0x2e4   :  { %14144 = vst [vmem:[#allocation34_spill] sm:$0xff] %v11211_v10  ;;  %v11216_v41 = vadd.f32 %v2230_v43, %v14145_v6  ;;  %v11219_v37 = vadd.f32 %v2785_v27, %v10833_v16  ;;  %v7790_v14 = vpop.f32.mrb[7].mxu0  ;;  %v7684_v26 = vpop.f32.mrb[7].mxu1  ;;  %v2567_v16 = vld [vmem:[%s14012_s0 + $0x1db] sm:$0xff]  ;;  %v14149_v27 = vld [vmem:[#allocation7_spill] sm:$0xff] }
 0x2e5   :  { %v3173_v26 = vld [vmem:[%s14012_s0 + $0x34] sm:$0xff]  ;;  %v3174_v14 = vld [vmem:[%s14012_s0 + $0x3c] sm:$0xff]  ;;  %v2615_v7 = vpack.c.bf16 %v2567_v16, %v2566_v15 }
 0x2e6   :  { %14146 = vst [vmem:[#allocation35_spill] sm:$0xff] %v11219_v37  ;;  %7896 = vmatmul.mubr.msk.bf16.gmra.mrb[112].mxu0 %vm262_vm1, %v2614_v22  ;;  %7950 = vmatmul.mubr.msk.bf16.gmra.mrb[112].mxu1 %vm262_vm1, %v11213_v4  ;;  %v11246_v62 = vpack.c.bf16 %v3174_v14, %v3173_v26  ;;  %v14151_v26 = vld [vmem:[#allocation8_spill] sm:$0xff] }
 0x2e7   :  { %7899 = vmatprep.mubr.msk.bf16.mxu0 %vm8779_vm2, %v14047_v17  ;;  %7953 = vmatprep.mubr.msk.bf16.mxu1 %vm8779_vm2, %v14047_v17 }
 0x2e9   :  { %v2235_v60 = vpop.f32.mrb[8].mxu1  ;;  %v2790_v44 = vpop.f32.mrb[8].mxu0 }
 0x2ea   :  { %v11241_v53 = vadd.f32 %v2235_v60, %v14147_v42  ;;  %v11244_v34 = vadd.f32 %v2790_v44, %v10857_v8  ;;  %v7687_v33 = vpop.f32.mrb[9].mxu1  ;;  %v7793_v47 = vpop.f32.mrb[9].mxu0  ;;  %v2568_v8 = vld [vmem:[%s14012_s0 + $0x1e3] sm:$0xff] }
 0x2eb   :  { %v2238_v22 = vpop.f32.mrb[10].mxu1  ;;  %v2793_v43 = vpop.f32.mrb[10].mxu0 }
 0x2ec   :  { %14148 = vst [vmem:[#allocation36_spill] sm:$0xff] %v11244_v34  ;;  %v11249_v6 = vadd.f32 %v2238_v22, %v14149_v27  ;;  %v11252_v37 = vadd.f32 %v2793_v43, %v10863_v48  ;;  %v7794_v10 = vpop.f32.mrb[11].mxu0  ;;  %v7688_v52 = vpop.f32.mrb[11].mxu1  ;;  %v2569_v48 = vld [vmem:[%s14012_s0 + $0x1eb] sm:$0xff]  ;;  %v14153_v43 = vld [vmem:[#allocation9_spill] sm:$0xff] }
 0x2ed   :  { %v3175_v52 = vld [vmem:[%s14012_s0 + $0x44] sm:$0xff]  ;;  %v3176_v10 = vld [vmem:[%s14012_s0 + $0x4c] sm:$0xff]  ;;  %v2616_v33 = vpack.c.bf16 %v2569_v48, %v2568_v8 }
 0x2ee   :  { %14150 = vst [vmem:[#allocation5_spill] sm:$0xff] %v11252_v37  ;;  %7900 = vmatmul.mubr.msk.bf16.gmra.mrb[116].mxu0 %vm262_vm1, %v2615_v7  ;;  %7954 = vmatmul.mubr.msk.bf16.gmra.mrb[116].mxu1 %vm262_vm1, %v11246_v62  ;;  %v11279_v47 = vpack.c.bf16 %v3176_v10, %v3175_v52  ;;  %v14155_v52 = vld [vmem:[#allocation10_spill] sm:$0xff] }
 0x2ef   :  { %7903 = vmatprep.mubr.msk.bf16.mxu0 %vm8779_vm2, %v14047_v17  ;;  %7957 = vmatprep.mubr.msk.bf16.mxu1 %vm8779_vm2, %v14047_v17 }
 0x2f1   :  { %v2243_v15 = vpop.f32.mrb[12].mxu1  ;;  %v2798_v16 = vpop.f32.mrb[12].mxu0 }
 0x2f2   :  { %v11274_v14 = vadd.f32 %v2243_v15, %v14151_v26  ;;  %v11277_v60 = vadd.f32 %v2798_v16, %v10887_v25  ;;  %v7691_v44 = vpop.f32.mrb[13].mxu1  ;;  %v7797_v42 = vpop.f32.mrb[13].mxu0  ;;  %v2570_v25 = vld [vmem:[%s14012_s0 + $0x1f3] sm:$0xff] }
 0x2f3   :  { %v2246_v7 = vpop.f32.mrb[14].mxu1  ;;  %v2801_v22 = vpop.f32.mrb[14].mxu0 }
 0x2f4   :  { %14152 = vst [vmem:[#allocation6_spill] sm:$0xff] %v11277_v60  ;;  %v11282_v27 = vadd.f32 %v2246_v7, %v14153_v43  ;;  %v11285_v37 = vadd.f32 %v2801_v22, %v10893_v3  ;;  %v7798_v34 = vpop.f32.mrb[15].mxu0  ;;  %v7692_v35 = vpop.f32.mrb[15].mxu1  ;;  %v2571_v3 = vld [vmem:[%s14012_s0 + $0x1fb] sm:$0xff]  ;;  %v14157_v22 = vld [vmem:[#allocation11_spill] sm:$0xff] }
 0x2f5   :  { %v3177_v35 = vld [vmem:[%s14012_s0 + $0x54] sm:$0xff]  ;;  %v3178_v34 = vld [vmem:[%s14012_s0 + $0x5c] sm:$0xff]  ;;  %v2617_v44 = vpack.c.bf16 %v2571_v3, %v2570_v25 }
 0x2f6   :  { %14154 = vst [vmem:[#allocation7_spill] sm:$0xff] %v11285_v37  ;;  %7904 = vmatmul.mubr.msk.bf16.gmra.mrb[120].mxu0 %vm262_vm1, %v2616_v33  ;;  %7958 = vmatmul.mubr.msk.bf16.gmra.mrb[120].mxu1 %vm262_vm1, %v11279_v47  ;;  %v11312_v42 = vpack.c.bf16 %v3178_v34, %v3177_v35  ;;  %v14159_v35 = vld [vmem:[#allocation12_spill] sm:$0xff] }
 0x2f7   :  { %7907 = vmatprep.mubr.msk.bf16.mxu0 %vm8779_vm2, %v14047_v17  ;;  %7961 = vmatprep.mubr.msk.bf16.mxu1 %vm8779_vm2, %v14047_v17 }
 0x2f9   :  { %v2251_v8 = vpop.f32.mrb[16].mxu1  ;;  %v2806_v48 = vpop.f32.mrb[16].mxu0 }
 0x2fa   :  { %v11307_v10 = vadd.f32 %v2251_v8, %v14155_v52  ;;  %v11310_v15 = vadd.f32 %v2806_v48, %v10917_v23  ;;  %v7695_v16 = vpop.f32.mrb[17].mxu1  ;;  %v7801_v26 = vpop.f32.mrb[17].mxu0  ;;  %v2572_v23 = vld [vmem:[%s14012_s0 + $0x203] sm:$0xff] }
 0x2fb   :  { %v2254_v33 = vpop.f32.mrb[18].mxu1  ;;  %v2809_v7 = vpop.f32.mrb[18].mxu0 }
 0x2fc   :  { %14156 = vst [vmem:[#allocation8_spill] sm:$0xff] %v11310_v15  ;;  %v11315_v43 = vadd.f32 %v2254_v33, %v14157_v22  ;;  %v11318_v37 = vadd.f32 %v2809_v7, %v10923_v40  ;;  %v7802_v60 = vpop.f32.mrb[19].mxu0  ;;  %v7696_v2 = vpop.f32.mrb[19].mxu1  ;;  %v2573_v40 = vld [vmem:[%s14012_s0 + $0x20b] sm:$0xff]  ;;  %v14161_v7 = vld [vmem:[#allocation13_spill] sm:$0xff] }
 0x2fd   :  { %v3179_v2 = vld [vmem:[%s14012_s0 + $0x64] sm:$0xff]  ;;  %v3180_v60 = vld [vmem:[%s14012_s0 + $0x6c] sm:$0xff]  ;;  %v2618_v16 = vpack.c.bf16 %v2573_v40, %v2572_v23 }
 0x2fe   :  { %14158 = vst [vmem:[#allocation9_spill] sm:$0xff] %v11318_v37  ;;  %7908 = vmatmul.mubr.msk.bf16.gmra.mrb[124].mxu0 %vm262_vm1, %v2617_v44  ;;  %7962 = vmatmul.mubr.msk.bf16.gmra.mrb[124].mxu1 %vm262_vm1, %v11312_v42  ;;  %v11345_v26 = vpack.c.bf16 %v3180_v60, %v3179_v2  ;;  %v14164_v2 = vld [vmem:[#allocation14_spill] sm:$0xff] }
 0x2ff   :  { %7911 = vmatprep.mubr.msk.bf16.mxu0 %vm8779_vm2, %v14047_v17  ;;  %7965 = vmatprep.mubr.msk.bf16.mxu1 %vm8779_vm2, %v14047_v17 }
 0x301   :  { %v2259_v25 = vpop.f32.mrb[20].mxu1  ;;  %v2814_v3 = vpop.f32.mrb[20].mxu0 }
 0x302   :  { %v11340_v34 = vadd.f32 %v2259_v25, %v14159_v35  ;;  %v11343_v8 = vadd.f32 %v2814_v3, %v10947_v57  ;;  %v7699_v48 = vpop.f32.mrb[21].mxu1  ;;  %v7805_v52 = vpop.f32.mrb[21].mxu0  ;;  %v2574_v57 = vld [vmem:[%s14012_s0 + $0x213] sm:$0xff] }
 0x303   :  { %v2262_v44 = vpop.f32.mrb[22].mxu1  ;;  %v2817_v33 = vpop.f32.mrb[22].mxu0 }
 0x304   :  { %14160 = vst [vmem:[#allocation10_spill] sm:$0xff] %v11343_v8  ;;  %v11348_v22 = vadd.f32 %v2262_v44, %v14161_v7  ;;  %v11351_v37 = vadd.f32 %v2817_v33, %v10953_v12  ;;  %v7806_v15 = vpop.f32.mrb[23].mxu0  ;;  %v7700_v9 = vpop.f32.mrb[23].mxu1  ;;  %v2575_v12 = vld [vmem:[%s14012_s0 + $0x21b] sm:$0xff]  ;;  %v14166_v33 = vld [vmem:[#allocation15_spill] sm:$0xff] }
 0x305   :  { %v3181_v9 = vld [vmem:[%s14012_s0 + $0x74] sm:$0xff]  ;;  %v3182_v15 = vld [vmem:[%s14012_s0 + $0x7c] sm:$0xff]  ;;  %v2619_v48 = vpack.c.bf16 %v2575_v12, %v2574_v57 }
 0x306   :  { %14162 = vst [vmem:[#allocation11_spill] sm:$0xff] %v11348_v22  ;;  %14163 = vst [vmem:[#allocation12_spill] sm:$0xff] %v11351_v37  ;;  %7912 = vmatmul.mubr.msk.bf16.gmra.mrb[128].mxu0 %vm262_vm1, %v2618_v16  ;;  %7966 = vmatmul.mubr.msk.bf16.gmra.mrb[128].mxu1 %vm262_vm1, %v11345_v26  ;;  %v11378_v52 = vpack.c.bf16 %v3182_v15, %v3181_v9  ;;  %v14169_v9 = vld [vmem:[#allocation16_spill] sm:$0xff] }
 0x307   :  { %7915 = vmatprep.mubr.msk.bf16.mxu0 %vm8779_vm2, %v14047_v17  ;;  %7969 = vmatprep.mubr.msk.bf16.mxu1 %vm8779_vm2, %v14047_v17 }
 0x309   :  { %v2267_v23 = vpop.f32.mrb[24].mxu1  ;;  %v2822_v40 = vpop.f32.mrb[24].mxu0 }
 0x30a   :  { %v11373_v60 = vadd.f32 %v2267_v23, %v14164_v2  ;;  %v11376_v25 = vadd.f32 %v2822_v40, %v10977_v32  ;;  %v7703_v3 = vpop.f32.mrb[25].mxu1  ;;  %v7809_v35 = vpop.f32.mrb[25].mxu0  ;;  %v2576_v32 = vld [vmem:[%s14012_s0 + $0x223] sm:$0xff] }
 0x30b   :  { %v2270_v16 = vpop.f32.mrb[26].mxu1  ;;  %v2825_v44 = vpop.f32.mrb[26].mxu0 }
 0x30c   :  { %14165 = vst [vmem:[#allocation13_spill] sm:$0xff] %v11376_v25  ;;  %v11381_v7 = vadd.f32 %v2270_v16, %v14166_v33  ;;  %v11384_v37 = vadd.f32 %v2825_v44, %v10983_v54  ;;  %v7810_v8 = vpop.f32.mrb[27].mxu0  ;;  %v7704_v22 = vpop.f32.mrb[27].mxu1  ;;  %v2577_v54 = vld [vmem:[%s14012_s0 + $0x22b] sm:$0xff]  ;;  %v14171_v44 = vld [vmem:[#allocation17_spill] sm:$0xff] }
 0x30d   :  { %v3183_v8 = vld [vmem:[%s14012_s0 + $0x84] sm:$0xff]  ;;  %v3184_v22 = vld [vmem:[%s14012_s0 + $0x8c] sm:$0xff]  ;;  %v2620_v3 = vpack.c.bf16 %v2577_v54, %v2576_v32 }
 0x30e   :  { %14167 = vst [vmem:[#allocation14_spill] sm:$0xff] %v11381_v7  ;;  %14168 = vst [vmem:[#allocation15_spill] sm:$0xff] %v11384_v37  ;;  %7916 = vmatmul.mubr.msk.bf16.gmra.mrb[132].mxu0 %vm262_vm1, %v2619_v48  ;;  %7970 = vmatmul.mubr.msk.bf16.gmra.mrb[132].mxu1 %vm262_vm1, %v11378_v52  ;;  %v11411_v35 = vpack.c.bf16 %v3184_v22, %v3183_v8  ;;  %v14174_v8 = vld [vmem:[#allocation18_spill] sm:$0xff] }
 0x30f   :  { %7919 = vmatprep.mubr.msk.bf16.mxu0 %vm8779_vm2, %v14047_v17  ;;  %7973 = vmatprep.mubr.msk.bf16.mxu1 %vm8779_vm2, %v14047_v17 }
 0x311   :  { %v2275_v57 = vpop.f32.mrb[28].mxu1  ;;  %v2830_v12 = vpop.f32.mrb[28].mxu0 }
 0x312   :  { %v11406_v15 = vadd.f32 %v2275_v57, %v14169_v9  ;;  %v11409_v23 = vadd.f32 %v2830_v12, %v11007_v36  ;;  %v7707_v40 = vpop.f32.mrb[29].mxu1  ;;  %v7813_v2 = vpop.f32.mrb[29].mxu0  ;;  %v2578_v36 = vld [vmem:[%s14012_s0 + $0x233] sm:$0xff] }
 0x313   :  { %v2278_v48 = vpop.f32.mrb[30].mxu1  ;;  %v2833_v16 = vpop.f32.mrb[30].mxu0 }
 0x314   :  { %14170 = vst [vmem:[#allocation16_spill] sm:$0xff] %v11409_v23  ;;  %v11414_v33 = vadd.f32 %v2278_v48, %v14171_v44  ;;  %v11417_v37 = vadd.f32 %v2833_v16, %v11013_v1  ;;  %v7814_v25 = vpop.f32.mrb[31].mxu0  ;;  %v7708_v7 = vpop.f32.mrb[31].mxu1  ;;  %v2579_v1 = vld [vmem:[%s14012_s0 + $0x23b] sm:$0xff]  ;;  %v14176_v16 = vld [vmem:[#allocation19_spill] sm:$0xff] }
 0x315   :  { %v3185_v25 = vld [vmem:[%s14012_s0 + $0x94] sm:$0xff]  ;;  %v3186_v7 = vld [vmem:[%s14012_s0 + $0x9c] sm:$0xff]  ;;  %v2621_v40 = vpack.c.bf16 %v2579_v1, %v2578_v36 }
 0x316   :  { %14172 = vst [vmem:[#allocation17_spill] sm:$0xff] %v11414_v33  ;;  %14173 = vst [vmem:[#allocation45_spill] sm:$0xff] %v11417_v37  ;;  %7920 = vmatmul.mubr.msk.bf16.gmra.mrb[136].mxu0 %vm262_vm1, %v2620_v3  ;;  %7974 = vmatmul.mubr.msk.bf16.gmra.mrb[136].mxu1 %vm262_vm1, %v11411_v35  ;;  %v11444_v2 = vpack.c.bf16 %v3186_v7, %v3185_v25  ;;  %v14179_v25 = vld [vmem:[#allocation20_spill] sm:$0xff] }
 0x317   :  { %7923 = vmatprep.mubr.msk.bf16.mxu0 %vm8779_vm2, %v14047_v17  ;;  %7977 = vmatprep.mubr.msk.bf16.mxu1 %vm8779_vm2, %v14047_v17 }
 0x319   :  { %v2283_v32 = vpop.f32.mrb[32].mxu1  ;;  %v2838_v54 = vpop.f32.mrb[32].mxu0 }
 0x31a   :  { %v11439_v22 = vadd.f32 %v2283_v32, %v14174_v8  ;;  %v11442_v57 = vadd.f32 %v2838_v54, %v11037_v61  ;;  %v7711_v12 = vpop.f32.mrb[33].mxu1  ;;  %v7817_v9 = vpop.f32.mrb[33].mxu0  ;;  %v2580_v61 = vld [vmem:[%s14012_s0 + $0x243] sm:$0xff] }
 0x31b   :  { %v2286_v3 = vpop.f32.mrb[34].mxu1  ;;  %v2841_v48 = vpop.f32.mrb[34].mxu0 }
 0x31c   :  { %14175 = vst [vmem:[#allocation18_spill] sm:$0xff] %v11442_v57  ;;  %v11447_v44 = vadd.f32 %v2286_v3, %v14176_v16  ;;  %v11450_v37 = vadd.f32 %v2841_v48, %v11043_v13  ;;  %v7818_v23 = vpop.f32.mrb[35].mxu0  ;;  %v7712_v33 = vpop.f32.mrb[35].mxu1  ;;  %v2581_v13 = vld [vmem:[%s14012_s0 + $0x24b] sm:$0xff]  ;;  %v14181_v48 = vld [vmem:[#allocation21_spill] sm:$0xff] }
 0x31d   :  { %v3187_v23 = vld [vmem:[%s14012_s0 + $0xa4] sm:$0xff]  ;;  %v3188_v33 = vld [vmem:[%s14012_s0 + $0xac] sm:$0xff]  ;;  %v2622_v12 = vpack.c.bf16 %v2581_v13, %v2580_v61 }
 0x31e   :  { %14177 = vst [vmem:[#allocation19_spill] sm:$0xff] %v11447_v44  ;;  %14178 = vst [vmem:[#allocation46_spill] sm:$0xff] %v11450_v37  ;;  %7924 = vmatmul.mubr.msk.bf16.gmra.mrb[140].mxu0 %vm262_vm1, %v2621_v40  ;;  %7978 = vmatmul.mubr.msk.bf16.gmra.mrb[140].mxu1 %vm262_vm1, %v11444_v2  ;;  %v11477_v9 = vpack.c.bf16 %v3188_v33, %v3187_v23  ;;  %v14184_v23 = vld [vmem:[#allocation22_spill] sm:$0xff] }
 0x31f   :  { %7927 = vmatprep.mubr.msk.bf16.mxu0 %vm8779_vm2, %v14047_v17  ;;  %7981 = vmatprep.mubr.msk.bf16.mxu1 %vm8779_vm2, %v14047_v17 }
 0x321   :  { %v2291_v36 = vpop.f32.mrb[36].mxu1  ;;  %v2846_v1 = vpop.f32.mrb[36].mxu0 }
 0x322   :  { %v11472_v7 = vadd.f32 %v2291_v36, %v14179_v25  ;;  %v11475_v32 = vadd.f32 %v2846_v1, %v11067_v51  ;;  %v7715_v54 = vpop.f32.mrb[37].mxu1  ;;  %v7821_v8 = vpop.f32.mrb[37].mxu0  ;;  %v2582_v51 = vld [vmem:[%s14012_s0 + $0x253] sm:$0xff] }
 0x323   :  { %v2294_v40 = vpop.f32.mrb[38].mxu1  ;;  %v2849_v3 = vpop.f32.mrb[38].mxu0 }
 0x324   :  { %14180 = vst [vmem:[#allocation20_spill] sm:$0xff] %v11475_v32  ;;  %v11480_v16 = vadd.f32 %v2294_v40, %v14181_v48  ;;  %v11483_v37 = vadd.f32 %v2849_v3, %v11073_v18  ;;  %v7822_v57 = vpop.f32.mrb[39].mxu0  ;;  %v7716_v44 = vpop.f32.mrb[39].mxu1  ;;  %v2583_v18 = vld [vmem:[%s14012_s0 + $0x25b] sm:$0xff]  ;;  %v14186_v3 = vld [vmem:[#allocation23_spill] sm:$0xff] }
 0x325   :  { %v3189_v57 = vld [vmem:[%s14012_s0 + $0xb4] sm:$0xff]  ;;  %v3190_v44 = vld [vmem:[%s14012_s0 + $0xbc] sm:$0xff]  ;;  %v2623_v54 = vpack.c.bf16 %v2583_v18, %v2582_v51 }
 0x326   :  { %14182 = vst [vmem:[#allocation21_spill] sm:$0xff] %v11480_v16  ;;  %14183 = vst [vmem:[#allocation47_spill] sm:$0xff] %v11483_v37  ;;  %7928 = vmatmul.mubr.msk.bf16.gmra.mrb[144].mxu0 %vm262_vm1, %v2622_v12  ;;  %7982 = vmatmul.mubr.msk.bf16.gmra.mrb[144].mxu1 %vm262_vm1, %v11477_v9  ;;  %v11510_v8 = vpack.c.bf16 %v3190_v44, %v3189_v57  ;;  %v14189_v57 = vld [vmem:[#allocation24_spill] sm:$0xff] }
 0x327   :  { %7931 = vmatprep.mubr.msk.bf16.mxu0 %vm8779_vm2, %v14047_v17  ;;  %7985 = vmatprep.mubr.msk.bf16.mxu1 %vm8779_vm2, %v14047_v17 }
 0x329   :  { %v2299_v61 = vpop.f32.mrb[40].mxu1  ;;  %v2854_v13 = vpop.f32.mrb[40].mxu0 }
 0x32a   :  { %v11505_v33 = vadd.f32 %v2299_v61, %v14184_v23  ;;  %v11508_v36 = vadd.f32 %v2854_v13, %v11097_v50  ;;  %v7719_v1 = vpop.f32.mrb[41].mxu1  ;;  %v7825_v25 = vpop.f32.mrb[41].mxu0  ;;  %v2584_v50 = vld [vmem:[%s14012_s0 + $0x263] sm:$0xff] }
 0x32b   :  { %v2302_v12 = vpop.f32.mrb[42].mxu1  ;;  %v2857_v40 = vpop.f32.mrb[42].mxu0 }
 0x32c   :  { %14185 = vst [vmem:[#allocation22_spill] sm:$0xff] %v11508_v36  ;;  %v11513_v48 = vadd.f32 %v2302_v12, %v14186_v3  ;;  %v11516_v37 = vadd.f32 %v2857_v40, %v11103_v19  ;;  %v7826_v32 = vpop.f32.mrb[43].mxu0  ;;  %v7720_v16 = vpop.f32.mrb[43].mxu1  ;;  %v2585_v19 = vld [vmem:[%s14012_s0 + $0x26b] sm:$0xff]  ;;  %v14190_v40 = vld [vmem:[#allocation25_spill] sm:$0xff] }
 0x32d   :  { %v3191_v32 = vld [vmem:[%s14012_s0 + $0xc4] sm:$0xff]  ;;  %v3192_v16 = vld [vmem:[%s14012_s0 + $0xcc] sm:$0xff]  ;;  %v2624_v1 = vpack.c.bf16 %v2585_v19, %v2584_v50 }
 0x32e   :  { %14187 = vst [vmem:[#allocation23_spill] sm:$0xff] %v11513_v48  ;;  %14188 = vst [vmem:[#allocation48_spill] sm:$0xff] %v11516_v37  ;;  %7932 = vmatmul.mubr.msk.bf16.gmra.mrb[148].mxu0 %vm262_vm1, %v2623_v54  ;;  %7986 = vmatmul.mubr.msk.bf16.gmra.mrb[148].mxu1 %vm262_vm1, %v11510_v8  ;;  %v11543_v25 = vpack.c.bf16 %v3192_v16, %v3191_v32 }
 0x32f   :  { %7935 = vmatprep.mubr.msk.bf16.mxu0 %vm8779_vm2, %v14047_v17  ;;  %7989 = vmatprep.mubr.msk.bf16.mxu1 %vm8779_vm2, %v14047_v17 }
 0x331   :  { %v2307_v51 = vpop.f32.mrb[44].mxu1  ;;  %v2862_v18 = vpop.f32.mrb[44].mxu0 }
 0x332   :  { %v11538_v44 = vadd.f32 %v2307_v51, %v14189_v57  ;;  %v11541_v61 = vadd.f32 %v2862_v18, %v11127_v5  ;;  %v7723_v13 = vpop.f32.mrb[45].mxu1  ;;  %v7829_v23 = vpop.f32.mrb[45].mxu0  ;;  %v2586_v5 = vld [vmem:[%s14012_s0 + $0x273] sm:$0x3f] }
 0x333   :  { %v2310_v54 = vpop.f32.mrb[46].mxu1  ;;  %v2865_v12 = vpop.f32.mrb[46].mxu0  ;;  %v2625_v18 = vpack.c.bf16 %v2586_v5, %v2586_v5 }
 0x334   :  { %v11546_v3 = vadd.f32 %v2310_v54, %v14190_v40  ;;  %v11549_v37 = vadd.f32 %v2865_v12, %v11133_v21  ;;  %v7830_v36 = vpop.f32.mrb[47].mxu0  ;;  %v7724_v48 = vpop.f32.mrb[47].mxu1  ;;  %v3193_v21 = vld [vmem:[%s14012_s0 + $0xd4] sm:$0xff] }
 0x335   :  { %v3194_v36 = vld [vmem:[%s14012_s0 + $0xdc] sm:$0xff] }
 0x336   :  { %7936 = vmatmul.mubr.msk.bf16.gmra.mrb[152].mxu0 %vm262_vm1, %v2624_v1  ;;  %7990 = vmatmul.mubr.msk.bf16.gmra.mrb[152].mxu1 %vm262_vm1, %v11543_v25  ;;  %v11573_v57 = vpack.c.bf16 %v3194_v36, %v3193_v21 }
 0x337   :  { %7939 = vmatprep.mubr.msk.bf16.mxu0 %vm8779_vm2, %v14047_v17  ;;  %7993 = vmatprep.mubr.msk.bf16.mxu1 %vm8779_vm2, %v14047_v17 }
 0x339   :  { %v2315_v48 = vpop.f32.mrb[48].mxu1  ;;  %v2870_v50 = vpop.f32.mrb[48].mxu0 }
 0x33a   :  { %v11568_v19 = vadd.f32 %v2315_v48, %v10770_v45  ;;  %v11571_v32 = vadd.f32 %v2870_v50, %v11154_v38  ;;  %v7727_v16 = vpop.f32.mrb[49].mxu1  ;;  %v7833_v51 = vpop.f32.mrb[49].mxu0  ;;  %v3195_v45 = vld [vmem:[%s14012_s0 + $0xe4] sm:$0xff] }
 0x33b   :  { %v2318_v13 = vpop.f32.mrb[50].mxu1  ;;  %v2873_v23 = vpop.f32.mrb[50].mxu0 }
 0x33c   :  { %v11576_v1 = vadd.f32 %v2318_v13, %v10776_v59  ;;  %v11579_v54 = vadd.f32 %v2873_v23, %v11160_v49  ;;  %v7834_v12 = vpop.f32.mrb[51].mxu0  ;;  %v7728_v40 = vpop.f32.mrb[51].mxu1  ;;  %v3196_v59 = vld [vmem:[%s14012_s0 + $0xec] sm:$0xff] }
 0x33d   :  { %v11600_v50 = vpack.c.bf16 %v3196_v59, %v3195_v45 }
 0x33e   :  { %7940 = vmatmul.mubr.msk.bf16.gmra.mrb[156].mxu0 %vm262_vm1, %v2625_v18  ;;  %7994 = vmatmul.mubr.msk.bf16.gmra.mrb[156].mxu1 %vm262_vm1, %v11573_v57  ;;  %v14191_v18 = vld [vmem:[#allocation26_spill] sm:$0xff] }
 0x33f   :  { %7997 = vmatprep.mubr.msk.bf16.mxu1 %vm8779_vm2, %v14047_v17  ;;  %8103 = vmatprep.mubr.msk.bf16.mxu0 %vm8779_vm2, %v14047_v17 }
 0x341   :  { %v2323_v38 = vpop.f32.mrb[52].mxu1  ;;  %v2878_v49 = vpop.f32.mrb[52].mxu0 }
 0x342   :  { %v11595_v5 = vadd.f32 %v2323_v38, %v10800_v24  ;;  %v11598_v21 = vadd.f32 %v2878_v49, %v11184_v30  ;;  %v7731_v36 = vpop.f32.mrb[53].mxu1  ;;  %v7837_v48 = vpop.f32.mrb[53].mxu0  ;;  %v3197_v24 = vld [vmem:[%s14012_s0 + $0xf4] sm:$0xff]  ;;  %v3198_v30 = vld [vmem:[%s14012_s0 + $0xfc] sm:$0xff] }
 0x343   :  { %v2326_v16 = vpop.f32.mrb[54].mxu1  ;;  %v2881_v51 = vpop.f32.mrb[54].mxu0  ;;  %v11628_v36 = vpack.c.bf16 %v3198_v30, %v3197_v24  ;;  %v6607_v48 = vld [vmem:[%s14013_s1 + $0xe] sm:$0x3]  ;;  %v6647_v24 = vld [vmem:[%s14013_s1 + $0x10] sm:$0x3] }
 0x344   :  { %v11603_v13 = vadd.f32 %v2326_v16, %v14191_v18  ;;  %v11606_v23 = vadd.f32 %v2881_v51, %v11187_v39  ;;  %v7838_v12 = vpop.f32.mrb[55].mxu0  ;;  %v7732_v40 = vpop.f32.mrb[55].mxu1  ;;  %v4723_v18 = vsel %vm380_vm0, %v6607_v48, 0  ;;  %v5382_v30 = vsel %vm380_vm0, %v6647_v24, 0 }
 0x345   :  { %8260 = vmatpush3.bf16.msra.mxu1 %v4723_v18 }
 0x346   :  { %7998 = vmatmul.mubr.msk.bf16.gmra.mrb[160].mxu1 %vm262_vm1, %v11600_v50  ;;  %8104 = vmatmul.mubr.msk.bf16.vlgmr.msra.gmra.mrb[160].mxu0 %vm262_vm1, %v11213_v4 }
 0x347   :  { %8001 = vmatprep.mubr.msk.bf16.mxu1 %vm8779_vm2, %v14047_v17  ;;  %8107 = vmatprep.mubr.msk.bf16.mxu0 %vm8779_vm2, %v14047_v17 }
 0x348   :  { %8418 = vmatpush3.bf16.msra.mxu0 %v5382_v30 }
 0x349   :  { %v2331_v39 = vpop.f32.mrb[56].mxu1  ;;  %v2886_v45 = vpop.f32.mrb[56].mxu0 }
 0x34a   :  { %v11623_v59 = vadd.f32 %v2331_v39, %v10824_v63  ;;  %v11626_v4 = vadd.f32 %v2886_v45, %v11208_v0  ;;  %v7735_v38 = vpop.f32.mrb[57].mxu1  ;;  %v7841_v49 = vpop.f32.mrb[57].mxu0 }
 0x34b   :  { %v2334_v16 = vpop.f32.mrb[58].mxu1  ;;  %v2889_v51 = vpop.f32.mrb[58].mxu0 }
 0x34c   :  { %v11635_v12 = vadd.f32 %v2334_v16, %v10830_v20  ;;  %v11638_v63 = vadd.f32 %v2889_v51, %v11216_v41  ;;  %v7842_v0 = vpop.f32.mrb[59].mxu0  ;;  %v7736_v40 = vpop.f32.mrb[59].mxu1  ;;  %v3199_v20 = vld [vmem:[%s14012_s0 + $0x104] sm:$0xff]  ;;  %v3200_v41 = vld [vmem:[%s14012_s0 + $0x10c] sm:$0xff] }
 0x34d   :  { %v11664_v16 = vpack.c.bf16 %v3200_v41, %v3199_v20 }
 0x34e   :  { %8002 = vmatmul.mubr.msk.bf16.gmra.mrb[164].mxu1 %vm262_vm1, %v11628_v36  ;;  %8108 = vmatmul.mubr.msk.bf16.gmra.mrb[164].mxu0 %vm262_vm1, %v11246_v62 }
 0x34f   :  { %8005 = vmatprep.mubr.msk.bf16.mxu1 %vm8779_vm2, %v14047_v17  ;;  %8111 = vmatprep.mubr.msk.bf16.mxu0 %vm8779_vm2, %v14047_v17 }
 0x351   :  { %v2339_v39 = vpop.f32.mrb[60].mxu1  ;;  %v2894_v45 = vpop.f32.mrb[60].mxu0 }
 0x352   :  { %v11659_v38 = vadd.f32 %v2339_v39, %v10854_v11  ;;  %v11662_v62 = vadd.f32 %v2894_v45, %v11241_v53  ;;  %v7739_v49 = vpop.f32.mrb[61].mxu1  ;;  %v7845_v48 = vpop.f32.mrb[61].mxu0  ;;  %v3201_v11 = vld [vmem:[%s14012_s0 + $0x114] sm:$0xff] }
 0x353   :  { %v2342_v51 = vpop.f32.mrb[62].mxu1  ;;  %v2897_v18 = vpop.f32.mrb[62].mxu0 }
 0x354   :  { %14192 = vst [vmem:[#allocation24_spill] sm:$0xff] %v11662_v62  ;;  %v11667_v0 = vadd.f32 %v2342_v51, %v10860_v46  ;;  %v11670_v40 = vadd.f32 %v2897_v18, %v11249_v6  ;;  %v7846_v24 = vpop.f32.mrb[63].mxu0  ;;  %v7740_v30 = vpop.f32.mrb[63].mxu1  ;;  %v3202_v46 = vld [vmem:[%s14012_s0 + $0x11c] sm:$0xff] }
 0x355   :  { %v11692_v45 = vpack.c.bf16 %v3202_v46, %v3201_v11 }
 0x356   :  { %14193 = vst [vmem:[#allocation25_spill] sm:$0xff] %v11670_v40  ;;  %8006 = vmatmul.mubr.msk.bf16.gmra.mrb[168].mxu1 %vm262_vm1, %v11664_v16  ;;  %8112 = vmatmul.mubr.msk.bf16.gmra.mrb[168].mxu0 %vm262_vm1, %v11279_v47 }
 0x357   :  { %8009 = vmatprep.mubr.msk.bf16.mxu1 %vm8779_vm2, %v14047_v17  ;;  %8115 = vmatprep.mubr.msk.bf16.mxu0 %vm8779_vm2, %v14047_v17 }
 0x359   :  { %v2347_v53 = vpop.f32.mrb[64].mxu1  ;;  %v2902_v6 = vpop.f32.mrb[64].mxu0 }
 0x35a   :  { %v11687_v20 = vadd.f32 %v2347_v53, %v10884_v29  ;;  %v11690_v47 = vadd.f32 %v2902_v6, %v11274_v14  ;;  %v7743_v41 = vpop.f32.mrb[65].mxu1  ;;  %v7849_v39 = vpop.f32.mrb[65].mxu0  ;;  %v3203_v29 = vld [vmem:[%s14012_s0 + $0x124] sm:$0xff] }
 0x35b   :  { %v2350_v49 = vpop.f32.mrb[66].mxu1  ;;  %v2905_v48 = vpop.f32.mrb[66].mxu0 }
 0x35c   :  { %14194 = vst [vmem:[#allocation26_spill] sm:$0xff] %v11690_v47  ;;  %v11695_v51 = vadd.f32 %v2350_v49, %v10890_v58  ;;  %v11698_v18 = vadd.f32 %v2905_v48, %v11282_v27  ;;  %v7850_v24 = vpop.f32.mrb[67].mxu0  ;;  %v7744_v30 = vpop.f32.mrb[67].mxu1  ;;  %v3204_v58 = vld [vmem:[%s14012_s0 + $0x12c] sm:$0xff] }
 0x35d   :  { %v11717_v53 = vpack.c.bf16 %v3204_v58, %v3203_v29 }
 0x35e   :  { %14195 = vst [vmem:[#allocation49_spill] sm:$0xff] %v11698_v18  ;;  %8010 = vmatmul.mubr.msk.bf16.gmra.mrb[172].mxu1 %vm262_vm1, %v11692_v45  ;;  %8116 = vmatmul.mubr.msk.bf16.gmra.mrb[172].mxu0 %vm262_vm1, %v11312_v42 }
 0x35f   :  { %8013 = vmatprep.mubr.msk.bf16.mxu1 %vm8779_vm2, %v14047_v17  ;;  %8119 = vmatprep.mubr.msk.bf16.mxu0 %vm8779_vm2, %v14047_v17 }
 0x361   :  { %v2355_v14 = vpop.f32.mrb[68].mxu1  ;;  %v2910_v27 = vpop.f32.mrb[68].mxu0 }
 0x362   :  { %v11715_v11 = vadd.f32 %v2355_v14, %v10914_v56  ;;  %v7747_v42 = vpop.f32.mrb[69].mxu1  ;;  %v7853_v46 = vpop.f32.mrb[69].mxu0  ;;  %v11720_v6 = vadd.f32 %v2910_v27, %v11307_v10  ;;  %v3205_v56 = vld [vmem:[%s14012_s0 + $0x134] sm:$0xff] }
 0x363   :  { %v2358_v41 = vpop.f32.mrb[70].mxu1  ;;  %v2913_v39 = vpop.f32.mrb[70].mxu0 }
 0x364   :  { %14196 = vst [vmem:[#allocation50_spill] sm:$0xff] %v11720_v6  ;;  %v11723_v49 = vadd.f32 %v2358_v41, %v10920_v28  ;;  %v7854_v48 = vpop.f32.mrb[71].mxu0  ;;  %v7748_v24 = vpop.f32.mrb[71].mxu1  ;;  %v11726_v30 = vadd.f32 %v2913_v39, %v11315_v43  ;;  %v3206_v28 = vld [vmem:[%s14012_s0 + $0x13c] sm:$0xff] }
 0x365   :  { %v11745_v14 = vpack.c.bf16 %v3206_v28, %v3205_v56  ;;  %v14199_v24 = vld [vmem:[#allocation11_spill] sm:$0xff] }
 0x366   :  { %14197 = vst [vmem:[#allocation51_spill] sm:$0xff] %v11726_v30  ;;  %8014 = vmatmul.mubr.msk.bf16.gmra.mrb[176].mxu1 %vm262_vm1, %v11717_v53  ;;  %8120 = vmatmul.mubr.msk.bf16.gmra.mrb[176].mxu0 %vm262_vm1, %v11345_v26  ;;  %v14201_v28 = vld [vmem:[#allocation27_spill] sm:$0xff] }
 0x367   :  { %8017 = vmatprep.mubr.msk.bf16.mxu1 %vm8779_vm2, %v14047_v17  ;;  %8123 = vmatprep.mubr.msk.bf16.mxu0 %vm8779_vm2, %v14047_v17 }
 0x369   :  { %v2363_v10 = vpop.f32.mrb[72].mxu1  ;;  %v2918_v43 = vpop.f32.mrb[72].mxu0 }
 0x36a   :  { %v11743_v29 = vadd.f32 %v2363_v10, %v10944_v31  ;;  %v7751_v26 = vpop.f32.mrb[73].mxu1  ;;  %v7857_v58 = vpop.f32.mrb[73].mxu0  ;;  %v11748_v27 = vadd.f32 %v2918_v43, %v11340_v34  ;;  %v3207_v31 = vld [vmem:[%s14012_s0 + $0x144] sm:$0xff] }
 0x36b   :  { %v2366_v42 = vpop.f32.mrb[74].mxu1  ;;  %v2921_v46 = vpop.f32.mrb[74].mxu0 }
 0x36c   :  { %14198 = vst [vmem:[#allocation52_spill] sm:$0xff] %v11748_v27  ;;  %v11751_v41 = vadd.f32 %v2366_v42, %v10950_v55  ;;  %v7858_v39 = vpop.f32.mrb[75].mxu0  ;;  %v7752_v48 = vpop.f32.mrb[75].mxu1  ;;  %v11754_v30 = vadd.f32 %v2921_v46, %v14199_v24  ;;  %v3208_v55 = vld [vmem:[%s14012_s0 + $0x14c] sm:$0xff] }
 0x36d   :  { %v11773_v26 = vpack.c.bf16 %v3208_v55, %v3207_v31  ;;  %v14203_v39 = vld [vmem:[#allocation28_spill] sm:$0xff]  ;;  %v14204_v27 = vld [vmem:[#allocation14_spill] sm:$0xff]  ;;  %v14206_v55 = vld [vmem:[#allocation29_spill] sm:$0xff] }
 0x36e   :  { %14200 = vst [vmem:[#allocation11_spill] sm:$0xff] %v11754_v30  ;;  %8018 = vmatmul.mubr.msk.bf16.gmra.mrb[180].mxu1 %vm262_vm1, %v11745_v14  ;;  %8124 = vmatmul.mubr.msk.bf16.gmra.mrb[180].mxu0 %vm262_vm1, %v11378_v52 }
 0x36f   :  { %8021 = vmatprep.mubr.msk.bf16.mxu1 %vm8779_vm2, %v14047_v17  ;;  %8127 = vmatprep.mubr.msk.bf16.mxu0 %vm8779_vm2, %v14047_v17 }
 0x371   :  { %v2371_v34 = vpop.f32.mrb[76].mxu1  ;;  %v2926_v56 = vpop.f32.mrb[76].mxu0 }
 0x372   :  { %v11771_v10 = vadd.f32 %v2371_v34, %v14201_v28  ;;  %v7755_v52 = vpop.f32.mrb[77].mxu1  ;;  %v7861_v43 = vpop.f32.mrb[77].mxu0  ;;  %v11776_v58 = vadd.f32 %v2926_v56, %v11373_v60  ;;  %v3209_v60 = vld [vmem:[%s14012_s0 + $0x154] sm:$0xff] }
 0x373   :  { %v2374_v42 = vpop.f32.mrb[78].mxu1  ;;  %v2929_v46 = vpop.f32.mrb[78].mxu0 }
 0x374   :  { %14202 = vst [vmem:[#allocation27_spill] sm:$0xff] %v11776_v58  ;;  %v11779_v48 = vadd.f32 %v2374_v42, %v14203_v39  ;;  %v7862_v24 = vpop.f32.mrb[79].mxu0  ;;  %v7756_v30 = vpop.f32.mrb[79].mxu1  ;;  %v11782_v6 = vadd.f32 %v2929_v46, %v14204_v27  ;;  %v14208_v46 = vld [vmem:[#allocation40_spill] sm:$0xff]  ;;  %v14209_v58 = vld [vmem:[#allocation17_spill] sm:$0xff] }
 0x375   :  { %v3210_v30 = vld [vmem:[%s14012_s0 + $0x15c] sm:$0xff] }
 0x376   :  { %14205 = vst [vmem:[#allocation28_spill] sm:$0xff] %v11782_v6  ;;  %8022 = vmatmul.mubr.msk.bf16.gmra.mrb[184].mxu1 %vm262_vm1, %v11773_v26  ;;  %8128 = vmatmul.mubr.msk.bf16.gmra.mrb[184].mxu0 %vm262_vm1, %v11411_v35  ;;  %v11801_v28 = vpack.c.bf16 %v3210_v30, %v3209_v60  ;;  %v14211_v30 = vld [vmem:[#allocation41_spill] sm:$0xff] }
 0x377   :  { %8025 = vmatprep.mubr.msk.bf16.mxu1 %vm8779_vm2, %v14047_v17  ;;  %8131 = vmatprep.mubr.msk.bf16.mxu0 %vm8779_vm2, %v14047_v17 }
 0x379   :  { %v2379_v27 = vpop.f32.mrb[80].mxu1  ;;  %v2934_v31 = vpop.f32.mrb[80].mxu0 }
 0x37a   :  { %v11799_v34 = vadd.f32 %v2379_v27, %v14206_v55  ;;  %v7759_v35 = vpop.f32.mrb[81].mxu1  ;;  %v7865_v56 = vpop.f32.mrb[81].mxu0  ;;  %v11804_v52 = vadd.f32 %v2934_v31, %v11406_v15  ;;  %v3211_v15 = vld [vmem:[%s14012_s0 + $0x164] sm:$0xff] }
 0x37b   :  { %v2382_v43 = vpop.f32.mrb[82].mxu1  ;;  %v2937_v42 = vpop.f32.mrb[82].mxu0 }
 0x37c   :  { %14207 = vst [vmem:[#allocation14_spill] sm:$0xff] %v11804_v52  ;;  %v11807_v39 = vadd.f32 %v2382_v43, %v14208_v46  ;;  %v7866_v24 = vpop.f32.mrb[83].mxu0  ;;  %v7760_v6 = vpop.f32.mrb[83].mxu1  ;;  %v11810_v18 = vadd.f32 %v2937_v42, %v14209_v58  ;;  %v14213_v42 = vld [vmem:[#allocation42_spill] sm:$0xff]  ;;  %v14214_v52 = vld [vmem:[#allocation19_spill] sm:$0xff] }
 0x37d   :  { %v3212_v6 = vld [vmem:[%s14012_s0 + $0x16c] sm:$0xff] }
 0x37e   :  { %14210 = vst [vmem:[#allocation29_spill] sm:$0xff] %v11810_v18  ;;  %8026 = vmatmul.mubr.msk.bf16.gmra.mrb[188].mxu1 %vm262_vm1, %v11801_v28  ;;  %8132 = vmatmul.mubr.msk.bf16.gmra.mrb[188].mxu0 %vm262_vm1, %v11444_v2  ;;  %v11829_v55 = vpack.c.bf16 %v3212_v6, %v3211_v15  ;;  %v14216_v6 = vld [vmem:[#allocation37_spill] sm:$0xff] }
 0x37f   :  { %8029 = vmatprep.mubr.msk.bf16.mxu1 %vm8779_vm2, %v14047_v17  ;;  %8135 = vmatprep.mubr.msk.bf16.mxu0 %vm8779_vm2, %v14047_v17 }
 0x381   :  { %v2387_v58 = vpop.f32.mrb[84].mxu1  ;;  %v2942_v60 = vpop.f32.mrb[84].mxu0 }
 0x382   :  { %v11827_v27 = vadd.f32 %v2387_v58, %v14211_v30  ;;  %v7763_v2 = vpop.f32.mrb[85].mxu1  ;;  %v7869_v31 = vpop.f32.mrb[85].mxu0  ;;  %v11832_v35 = vadd.f32 %v2942_v60, %v11439_v22  ;;  %v3213_v22 = vld [vmem:[%s14012_s0 + $0x174] sm:$0xff] }
 0x383   :  { %v2390_v56 = vpop.f32.mrb[86].mxu1  ;;  %v2945_v43 = vpop.f32.mrb[86].mxu0 }
 0x384   :  { %14212 = vst [vmem:[#allocation40_spill] sm:$0xff] %v11832_v35  ;;  %v11835_v46 = vadd.f32 %v2390_v56, %v14213_v42  ;;  %v7870_v24 = vpop.f32.mrb[87].mxu0  ;;  %v7764_v18 = vpop.f32.mrb[87].mxu1  ;;  %v11838_v47 = vadd.f32 %v2945_v43, %v14214_v52  ;;  %v14218_v43 = vld [vmem:[#allocation38_spill] sm:$0xff]  ;;  %v14219_v35 = vld [vmem:[#allocation21_spill] sm:$0xff] }
 0x385   :  { %v3214_v18 = vld [vmem:[%s14012_s0 + $0x17c] sm:$0xff] }
 0x386   :  { %14215 = vst [vmem:[#allocation17_spill] sm:$0xff] %v11838_v47  ;;  %8030 = vmatmul.mubr.msk.bf16.gmra.mrb[192].mxu1 %vm262_vm1, %v11829_v55  ;;  %8136 = vmatmul.mubr.msk.bf16.gmra.mrb[192].mxu0 %vm262_vm1, %v11477_v9  ;;  %v11857_v30 = vpack.c.bf16 %v3214_v18, %v3213_v22  ;;  %v14221_v18 = vld [vmem:[#allocation30_spill] sm:$0xff] }
 0x387   :  { %8033 = vmatprep.mubr.msk.bf16.mxu1 %vm8779_vm2, %v14047_v17  ;;  %8139 = vmatprep.mubr.msk.bf16.mxu0 %vm8779_vm2, %v14047_v17 }
 0x389   :  { %v2395_v52 = vpop.f32.mrb[88].mxu1  ;;  %v2950_v15 = vpop.f32.mrb[88].mxu0 }
 0x38a   :  { %v11855_v58 = vadd.f32 %v2395_v52, %v14216_v6  ;;  %v7767_v9 = vpop.f32.mrb[89].mxu1  ;;  %v7873_v60 = vpop.f32.mrb[89].mxu0  ;;  %v11860_v2 = vadd.f32 %v2950_v15, %v11472_v7  ;;  %v3215_v7 = vld [vmem:[%s14012_s0 + $0x184] sm:$0xff] }
 0x38b   :  { %v2398_v31 = vpop.f32.mrb[90].mxu1  ;;  %v2953_v56 = vpop.f32.mrb[90].mxu0 }
 0x38c   :  { %14217 = vst [vmem:[#allocation41_spill] sm:$0xff] %v11860_v2  ;;  %v11863_v42 = vadd.f32 %v2398_v31, %v14218_v43  ;;  %v7874_v24 = vpop.f32.mrb[91].mxu0  ;;  %v7768_v47 = vpop.f32.mrb[91].mxu1  ;;  %v11866_v40 = vadd.f32 %v2953_v56, %v14219_v35  ;;  %v14223_v56 = vld [vmem:[#allocation43_spill] sm:$0xff] }
 0x38d   :  { %v3216_v47 = vld [vmem:[%s14012_s0 + $0x18c] sm:$0xff] }
 0x38e   :  { %14220 = vst [vmem:[#allocation42_spill] sm:$0xff] %v11866_v40  ;;  %8034 = vmatmul.mubr.msk.bf16.gmra.mrb[196].mxu1 %vm262_vm1, %v11857_v30  ;;  %8140 = vmatmul.mubr.msk.bf16.gmra.mrb[196].mxu0 %vm262_vm1, %v11510_v8  ;;  %v11885_v6 = vpack.c.bf16 %v3216_v47, %v3215_v7  ;;  %v14224_v2 = vld [vmem:[#allocation23_spill] sm:$0xff] }
 0x38f   :  { %8037 = vmatprep.mubr.msk.bf16.mxu1 %vm8779_vm2, %v14047_v17  ;;  %8143 = vmatprep.mubr.msk.bf16.mxu0 %vm8779_vm2, %v14047_v17  ;;  %v14226_v47 = vld [vmem:[#allocation31_spill] sm:$0xff] }
 0x391   :  { %v2403_v35 = vpop.f32.mrb[92].mxu1  ;;  %v2958_v22 = vpop.f32.mrb[92].mxu0 }
 0x392   :  { %v11883_v52 = vadd.f32 %v2403_v35, %v14221_v18  ;;  %v7771_v8 = vpop.f32.mrb[93].mxu1  ;;  %v7877_v15 = vpop.f32.mrb[93].mxu0  ;;  %v11888_v9 = vadd.f32 %v2958_v22, %v11505_v33  ;;  %v3217_v33 = vld [vmem:[%s14012_s0 + $0x194] sm:$0xff] }
 0x393   :  { %v2406_v60 = vpop.f32.mrb[94].mxu1  ;;  %v2961_v31 = vpop.f32.mrb[94].mxu0 }
 0x394   :  { %14222 = vst [vmem:[#allocation19_spill] sm:$0xff] %v11888_v9  ;;  %v11891_v43 = vadd.f32 %v2406_v60, %v14223_v56  ;;  %v7878_v24 = vpop.f32.mrb[95].mxu0  ;;  %v7772_v40 = vpop.f32.mrb[95].mxu1  ;;  %v11894_v62 = vadd.f32 %v2961_v31, %v14224_v2  ;;  %v14228_v31 = vld [vmem:[#allocation44_spill] sm:$0xff] }
 0x395   :  { %v3218_v40 = vld [vmem:[%s14012_s0 + $0x19c] sm:$0xff] }
 0x396   :  { %14225 = vst [vmem:[#allocation37_spill] sm:$0xff] %v11894_v62  ;;  %8038 = vmatmul.mubr.msk.bf16.gmra.mrb[200].mxu1 %vm262_vm1, %v11885_v6  ;;  %8144 = vmatmul.mubr.msk.bf16.gmra.mrb[200].mxu0 %vm262_vm1, %v11543_v25  ;;  %v11913_v18 = vpack.c.bf16 %v3218_v40, %v3217_v33  ;;  %v14230_v40 = vld [vmem:[#allocation32_spill] sm:$0xff] }
 0x397   :  { %8041 = vmatprep.mubr.msk.bf16.mxu1 %vm8779_vm2, %v14047_v17  ;;  %8147 = vmatprep.mubr.msk.bf16.mxu0 %vm8779_vm2, %v14047_v17 }
 0x399   :  { %v2411_v2 = vpop.f32.mrb[96].mxu1  ;;  %v2966_v7 = vpop.f32.mrb[96].mxu0 }
 0x39a   :  { %v11911_v35 = vadd.f32 %v2411_v2, %v14226_v47  ;;  %v7775_v25 = vpop.f32.mrb[97].mxu1  ;;  %v7881_v22 = vpop.f32.mrb[97].mxu0  ;;  %v11916_v8 = vadd.f32 %v2966_v7, %v11538_v44  ;;  %v3219_v44 = vld [vmem:[%s14012_s0 + $0x1a4] sm:$0xff] }
 0x39b   :  { %v2414_v15 = vpop.f32.mrb[98].mxu1  ;;  %v2969_v60 = vpop.f32.mrb[98].mxu0 }
 0x39c   :  { %14227 = vst [vmem:[#allocation38_spill] sm:$0xff] %v11916_v8  ;;  %v11919_v56 = vadd.f32 %v2414_v15, %v14228_v31  ;;  %v7882_v24 = vpop.f32.mrb[99].mxu0  ;;  %v7776_v62 = vpop.f32.mrb[99].mxu1  ;;  %v11922_v9 = vadd.f32 %v2969_v60, %v11546_v3  ;;  %v3220_v3 = vld [vmem:[%s14012_s0 + $0x1ac] sm:$0xff]  ;;  %v14231_v60 = vld [vmem:[#allocation33_spill] sm:$0xff] }
 0x39d   :  { %v11941_v47 = vpack.c.bf16 %v3220_v3, %v3219_v44  ;;  %v14233_v3 = vld [vmem:[#allocation39_spill] sm:$0xff] }
 0x39e   :  { %14229 = vst [vmem:[#allocation21_spill] sm:$0xff] %v11922_v9  ;;  %8042 = vmatmul.mubr.msk.bf16.gmra.mrb[204].mxu1 %vm262_vm1, %v11913_v18  ;;  %8148 = vmatmul.mubr.msk.bf16.gmra.mrb[204].mxu0 %vm262_vm1, %v11573_v57 }
 0x39f   :  { %8045 = vmatprep.mubr.msk.bf16.mxu1 %vm8779_vm2, %v14047_v17  ;;  %8151 = vmatprep.mubr.msk.bf16.mxu0 %vm8779_vm2, %v14047_v17 }
 0x3a1   :  { %v2419_v62 = vpop.f32.mrb[100].mxu1  ;;  %v2974_v33 = vpop.f32.mrb[100].mxu0 }
 0x3a2   :  { %v11939_v2 = vadd.f32 %v2419_v62, %v14230_v40  ;;  %v7779_v57 = vpop.f32.mrb[101].mxu1  ;;  %v7885_v7 = vpop.f32.mrb[101].mxu0  ;;  %v11944_v25 = vadd.f32 %v2974_v33, %v11568_v19  ;;  %v3221_v19 = vld [vmem:[%s14012_s0 + $0x1b4] sm:$0xff] }
 0x3a3   :  { %v2422_v22 = vpop.f32.mrb[102].mxu1  ;;  %v2977_v15 = vpop.f32.mrb[102].mxu0 }
 0x3a4   :  { %v11947_v31 = vadd.f32 %v2422_v22, %v14231_v60  ;;  %v7886_v24 = vpop.f32.mrb[103].mxu0  ;;  %v7780_v9 = vpop.f32.mrb[103].mxu1  ;;  %v11950_v8 = vadd.f32 %v2977_v15, %v11576_v1  ;;  %v3222_v1 = vld [vmem:[%s14012_s0 + $0x1bc] sm:$0xff] }
 0x3a5   :  { %v11969_v40 = vpack.c.bf16 %v3222_v1, %v3221_v19 }
 0x3a6   :  { %14232 = vst [vmem:[#allocation30_spill] sm:$0xff] %v11950_v8  ;;  %8046 = vmatmul.mubr.msk.bf16.gmra.mrb[208].mxu1 %vm262_vm1, %v11941_v47  ;;  %8152 = vmatmul.mubr.msk.bf16.gmra.mrb[208].mxu0 %vm262_vm1, %v11600_v50 }
 0x3a7   :  { %8049 = vmatprep.mubr.msk.bf16.mxu1 %vm8779_vm2, %v14047_v17  ;;  %8155 = vmatprep.mubr.msk.bf16.mxu0 %vm8779_vm2, %v14047_v17 }
 0x3a9   :  { %v2427_v9 = vpop.f32.mrb[104].mxu1  ;;  %v2982_v44 = vpop.f32.mrb[104].mxu0 }
 0x3aa   :  { %v11967_v62 = vadd.f32 %v2427_v9, %v14233_v3  ;;  %v7889_v50 = vpop.f32.mrb[105].mxu0  ;;  %v7783_v33 = vpop.f32.mrb[105].mxu1  ;;  %v11972_v57 = vadd.f32 %v2982_v44, %v11595_v5  ;;  %v3223_v5 = vld [vmem:[%s14012_s0 + $0x1c4] sm:$0xff] }
 0x3ab   :  { %v2985_v7 = vpop.f32.mrb[106].mxu0  ;;  %v2430_v22 = vpop.f32.mrb[106].mxu1  ;;  %v14236_v9 = vld [vmem:[#allocation34_spill] sm:$0xff] }
 0x3ac   :  { %14234 = vst [vmem:[#allocation43_spill] sm:$0xff] %v11972_v57  ;;  %v7890_v15 = vpop.f32.mrb[107].mxu0  ;;  %v7784_v60 = vpop.f32.mrb[107].mxu1  ;;  %v11975_v24 = vadd.f32 %v2985_v7, %v11603_v13  ;;  %v3224_v13 = vld [vmem:[%s14012_s0 + $0x1cc] sm:$0xff] }
 0x3ad   :  { %v11994_v50 = vpack.c.bf16 %v3224_v13, %v3223_v5  ;;  %v14238_v15 = vld [vmem:[#allocation35_spill] sm:$0xff]  ;;  %v14240_v5 = vld [vmem:[#allocation36_spill] sm:$0xff] }
 0x3ae   :  { %14235 = vst [vmem:[#allocation23_spill] sm:$0xff] %v11975_v24  ;;  %8050 = vmatmul.mubr.msk.bf16.gmra.mrb[212].mxu1 %vm262_vm1, %v11969_v40  ;;  %8156 = vmatmul.mubr.msk.bf16.gmra.mrb[212].mxu0 %vm262_vm1, %v11628_v36 }
 0x3af   :  { %8053 = vmatprep.mubr.msk.bf16.mxu1 %vm8779_vm2, %v14047_v17  ;;  %8159 = vmatprep.mubr.msk.bf16.mxu0 %vm8779_vm2, %v14047_v17 }
 0x3b1   :  { %v2990_v19 = vpop.f32.mrb[108].mxu0  ;;  %v3441_v1 = vpop.f32.mrb[108].mxu1 }
 0x3b2   :  { %v11992_v44 = vadd.f32 %v3441_v1, %v14236_v9  ;;  %v7893_v36 = vpop.f32.mrb[109].mxu0  ;;  %v7947_v3 = vpop.f32.mrb[109].mxu1  ;;  %v11997_v33 = vadd.f32 %v2990_v19, %v11623_v59  ;;  %v3225_v59 = vld [vmem:[%s14012_s0 + $0x1d4] sm:$0xff] }
 0x3b3   :  { %v2993_v7 = vpop.f32.mrb[110].mxu0  ;;  %v3444_v22 = vpop.f32.mrb[110].mxu1 }
 0x3b4   :  { %14237 = vst [vmem:[#allocation31_spill] sm:$0xff] %v11997_v33  ;;  %v12000_v60 = vadd.f32 %v3444_v22, %v14238_v15  ;;  %v7894_v24 = vpop.f32.mrb[111].mxu0  ;;  %v7948_v57 = vpop.f32.mrb[111].mxu1  ;;  %v12003_v8 = vadd.f32 %v2993_v7, %v11635_v12  ;;  %v3226_v12 = vld [vmem:[%s14012_s0 + $0x1dc] sm:$0xff] }
 0x3b5   :  { %v12022_v1 = vpack.c.bf16 %v3226_v12, %v3225_v59  ;;  %v14242_v7 = vld [vmem:[#allocation5_spill] sm:$0xff]  ;;  %v14244_v12 = vld [vmem:[#allocation6_spill] sm:$0xff] }
 0x3b6   :  { %14239 = vst [vmem:[#allocation44_spill] sm:$0xff] %v12003_v8  ;;  %8054 = vmatmul.mubr.msk.bf16.gmra.mrb[216].mxu1 %vm262_vm1, %v11994_v50  ;;  %8160 = vmatmul.mubr.msk.bf16.gmra.mrb[216].mxu0 %vm262_vm1, %v11664_v16 }
 0x3b7   :  { %8057 = vmatprep.mubr.msk.bf16.mxu1 %vm8779_vm2, %v14047_v17  ;;  %8163 = vmatprep.mubr.msk.bf16.mxu0 %vm8779_vm2, %v14047_v17 }
 0x3b9   :  { %v2998_v57 = vpop.f32.mrb[112].mxu0  ;;  %v3449_v24 = vpop.f32.mrb[112].mxu1 }
 0x3ba   :  { %v12020_v13 = vadd.f32 %v3449_v24, %v14240_v5  ;;  %v7897_v16 = vpop.f32.mrb[113].mxu0  ;;  %v7951_v19 = vpop.f32.mrb[113].mxu1  ;;  %v12025_v9 = vadd.f32 %v2998_v57, %v11659_v38  ;;  %v3227_v38 = vld [vmem:[%s14012_s0 + $0x1e4] sm:$0xff] }
 0x3bb   :  { %v3001_v36 = vpop.f32.mrb[114].mxu0  ;;  %v3452_v3 = vpop.f32.mrb[114].mxu1 }
 0x3bc   :  { %14241 = vst [vmem:[#allocation32_spill] sm:$0xff] %v12025_v9  ;;  %v12028_v22 = vadd.f32 %v3452_v3, %v14242_v7  ;;  %v7898_v15 = vpop.f32.mrb[115].mxu0  ;;  %v7952_v8 = vpop.f32.mrb[115].mxu1  ;;  %v12031_v33 = vadd.f32 %v3001_v36, %v11667_v0  ;;  %v3228_v0 = vld [vmem:[%s14012_s0 + $0x1ec] sm:$0xff] }
 0x3bd   :  { %v12050_v5 = vpack.c.bf16 %v3228_v0, %v3227_v38  ;;  %v14246_v3 = vld [vmem:[#allocation7_spill] sm:$0xff]  ;;  %v14248_v0 = vld [vmem:[#allocation8_spill] sm:$0xff] }
 0x3be   :  { %14243 = vst [vmem:[#allocation33_spill] sm:$0xff] %v12031_v33  ;;  %8058 = vmatmul.mubr.msk.bf16.gmra.mrb[220].mxu1 %vm262_vm1, %v12022_v1  ;;  %8164 = vmatmul.mubr.msk.bf16.gmra.mrb[220].mxu0 %vm262_vm1, %v11692_v45 }
 0x3bf   :  { %8061 = vmatprep.mubr.msk.bf16.mxu1 %vm8779_vm2, %v14047_v17  ;;  %8167 = vmatprep.mubr.msk.bf16.mxu0 %vm8779_vm2, %v14047_v17 }
 0x3c1   :  { %v3006_v8 = vpop.f32.mrb[116].mxu0  ;;  %v3457_v59 = vpop.f32.mrb[116].mxu1 }
 0x3c2   :  { %v12048_v57 = vadd.f32 %v3457_v59, %v14244_v12  ;;  %v7901_v45 = vpop.f32.mrb[117].mxu0  ;;  %v7955_v24 = vpop.f32.mrb[117].mxu1  ;;  %v12053_v16 = vadd.f32 %v3006_v8, %v11687_v20  ;;  %v3229_v20 = vld [vmem:[%s14012_s0 + $0x1f4] sm:$0xff] }
 0x3c3   :  { %v3009_v19 = vpop.f32.mrb[118].mxu0  ;;  %v3460_v36 = vpop.f32.mrb[118].mxu1 }
 0x3c4   :  { %14245 = vst [vmem:[#allocation39_spill] sm:$0xff] %v12053_v16  ;;  %v12056_v7 = vadd.f32 %v3460_v36, %v14246_v3  ;;  %v7902_v15 = vpop.f32.mrb[119].mxu0  ;;  %v7956_v33 = vpop.f32.mrb[119].mxu1  ;;  %v12059_v9 = vadd.f32 %v3009_v19, %v11695_v51  ;;  %v3230_v51 = vld [vmem:[%s14012_s0 + $0x1fc] sm:$0xff] }
 0x3c5   :  { %v12078_v12 = vpack.c.bf16 %v3230_v51, %v3229_v20  ;;  %v14250_v36 = vld [vmem:[#allocation9_spill] sm:$0xff]  ;;  %v14252_v51 = vld [vmem:[#allocation10_spill] sm:$0xff] }
 0x3c6   :  { %14247 = vst [vmem:[#allocation34_spill] sm:$0xff] %v12059_v9  ;;  %8062 = vmatmul.mubr.msk.bf16.gmra.mrb[224].mxu1 %vm262_vm1, %v12050_v5  ;;  %8168 = vmatmul.mubr.msk.bf16.gmra.mrb[224].mxu0 %vm262_vm1, %v11717_v53 }
 0x3c7   :  { %8065 = vmatprep.mubr.msk.bf16.mxu1 %vm8779_vm2, %v14047_v17  ;;  %8171 = vmatprep.mubr.msk.bf16.mxu0 %vm8779_vm2, %v14047_v17 }
 0x3c9   :  { %v3014_v33 = vpop.f32.mrb[120].mxu0  ;;  %v3465_v38 = vpop.f32.mrb[120].mxu1 }
 0x3ca   :  { %v12076_v8 = vadd.f32 %v3465_v38, %v14248_v0  ;;  %v7905_v53 = vpop.f32.mrb[121].mxu0  ;;  %v7959_v59 = vpop.f32.mrb[121].mxu1  ;;  %v12081_v45 = vadd.f32 %v3014_v33, %v11715_v11  ;;  %v3231_v11 = vld [vmem:[%s14012_s0 + $0x204] sm:$0xff] }
 0x3cb   :  { %v3017_v24 = vpop.f32.mrb[122].mxu0  ;;  %v3468_v19 = vpop.f32.mrb[122].mxu1 }
 0x3cc   :  { %14249 = vst [vmem:[#allocation35_spill] sm:$0xff] %v12081_v45  ;;  %v12084_v3 = vadd.f32 %v3468_v19, %v14250_v36  ;;  %v7906_v15 = vpop.f32.mrb[123].mxu0  ;;  %v7960_v9 = vpop.f32.mrb[123].mxu1  ;;  %v12087_v16 = vadd.f32 %v3017_v24, %v11723_v49  ;;  %v3232_v49 = vld [vmem:[%s14012_s0 + $0x20c] sm:$0xff]  ;;  %v14254_v19 = vld [vmem:[#allocation12_spill] sm:$0xff] }
 0x3cd   :  { %v12106_v0 = vpack.c.bf16 %v3232_v49, %v3231_v11  ;;  %v14256_v49 = vld [vmem:[#allocation13_spill] sm:$0xff] }
 0x3ce   :  { %14251 = vst [vmem:[#allocation36_spill] sm:$0xff] %v12087_v16  ;;  %8066 = vmatmul.mubr.msk.bf16.gmra.mrb[228].mxu1 %vm262_vm1, %v12078_v12  ;;  %8172 = vmatmul.mubr.msk.bf16.gmra.mrb[228].mxu0 %vm262_vm1, %v11745_v14 }
 0x3cf   :  { %8069 = vmatprep.mubr.msk.bf16.mxu1 %vm8779_vm2, %v14047_v17  ;;  %8175 = vmatprep.mubr.msk.bf16.mxu0 %vm8779_vm2, %v14047_v17 }
 0x3d1   :  { %v3022_v9 = vpop.f32.mrb[124].mxu0  ;;  %v3473_v20 = vpop.f32.mrb[124].mxu1 }
 0x3d2   :  { %v12104_v33 = vadd.f32 %v3473_v20, %v14252_v51  ;;  %v7909_v14 = vpop.f32.mrb[125].mxu0  ;;  %v7963_v38 = vpop.f32.mrb[125].mxu1  ;;  %v12109_v53 = vadd.f32 %v3022_v9, %v11743_v29  ;;  %v3233_v29 = vld [vmem:[%s14012_s0 + $0x214] sm:$0xff] }
 0x3d3   :  { %v3025_v59 = vpop.f32.mrb[126].mxu0  ;;  %v3476_v24 = vpop.f32.mrb[126].mxu1 }
 0x3d4   :  { %14253 = vst [vmem:[#allocation5_spill] sm:$0xff] %v12109_v53  ;;  %v12112_v36 = vadd.f32 %v3476_v24, %v14254_v19  ;;  %v7910_v15 = vpop.f32.mrb[127].mxu0  ;;  %v7964_v16 = vpop.f32.mrb[127].mxu1  ;;  %v12115_v45 = vadd.f32 %v3025_v59, %v11751_v41  ;;  %v3234_v41 = vld [vmem:[%s14012_s0 + $0x21c] sm:$0xff]  ;;  %v14258_v24 = vld [vmem:[#allocation15_spill] sm:$0xff] }
 0x3d5   :  { %v12134_v51 = vpack.c.bf16 %v3234_v41, %v3233_v29  ;;  %v14260_v41 = vld [vmem:[#allocation16_spill] sm:$0xff] }
 0x3d6   :  { %14255 = vst [vmem:[#allocation6_spill] sm:$0xff] %v12115_v45  ;;  %8070 = vmatmul.mubr.msk.bf16.gmra.mrb[232].mxu1 %vm262_vm1, %v12106_v0  ;;  %8176 = vmatmul.mubr.msk.bf16.gmra.mrb[232].mxu0 %vm262_vm1, %v11773_v26 }
 0x3d7   :  { %8073 = vmatprep.mubr.msk.bf16.mxu1 %vm8779_vm2, %v14047_v17  ;;  %8179 = vmatprep.mubr.msk.bf16.mxu0 %vm8779_vm2, %v14047_v17 }
 0x3d9   :  { %v3030_v16 = vpop.f32.mrb[128].mxu0  ;;  %v3481_v11 = vpop.f32.mrb[128].mxu1 }
 0x3da   :  { %v12132_v9 = vadd.f32 %v3481_v11, %v14256_v49  ;;  %v7913_v26 = vpop.f32.mrb[129].mxu0  ;;  %v7967_v20 = vpop.f32.mrb[129].mxu1  ;;  %v12137_v14 = vadd.f32 %v3030_v16, %v11771_v10  ;;  %v3235_v10 = vld [vmem:[%s14012_s0 + $0x224] sm:$0xff] }
 0x3db   :  { %v3033_v38 = vpop.f32.mrb[130].mxu0  ;;  %v3484_v59 = vpop.f32.mrb[130].mxu1 }
 0x3dc   :  { %14257 = vst [vmem:[#allocation7_spill] sm:$0xff] %v12137_v14  ;;  %v12140_v19 = vadd.f32 %v3484_v59, %v14258_v24  ;;  %v7914_v15 = vpop.f32.mrb[131].mxu0  ;;  %v7968_v45 = vpop.f32.mrb[131].mxu1  ;;  %v12143_v53 = vadd.f32 %v3033_v38, %v11779_v48  ;;  %v3236_v48 = vld [vmem:[%s14012_s0 + $0x22c] sm:$0xff]  ;;  %v14262_v59 = vld [vmem:[#allocation45_spill] sm:$0xff] }
 0x3dd   :  { %v12162_v49 = vpack.c.bf16 %v3236_v48, %v3235_v10  ;;  %v14264_v48 = vld [vmem:[#allocation18_spill] sm:$0xff] }
 0x3de   :  { %14259 = vst [vmem:[#allocation8_spill] sm:$0xff] %v12143_v53  ;;  %8074 = vmatmul.mubr.msk.bf16.gmra.mrb[236].mxu1 %vm262_vm1, %v12134_v51  ;;  %8180 = vmatmul.mubr.msk.bf16.gmra.mrb[236].mxu0 %vm262_vm1, %v11801_v28 }
 0x3df   :  { %8077 = vmatprep.mubr.msk.bf16.mxu1 %vm8779_vm2, %v14047_v17  ;;  %8183 = vmatprep.mubr.msk.bf16.mxu0 %vm8779_vm2, %v14047_v17 }
 0x3e1   :  { %v3038_v45 = vpop.f32.mrb[132].mxu0  ;;  %v3489_v29 = vpop.f32.mrb[132].mxu1 }
 0x3e2   :  { %v12160_v16 = vadd.f32 %v3489_v29, %v14260_v41  ;;  %v7917_v28 = vpop.f32.mrb[133].mxu0  ;;  %v7971_v11 = vpop.f32.mrb[133].mxu1  ;;  %v12165_v26 = vadd.f32 %v3038_v45, %v11799_v34  ;;  %v3237_v34 = vld [vmem:[%s14012_s0 + $0x234] sm:$0xff] }
 0x3e3   :  { %v3041_v20 = vpop.f32.mrb[134].mxu0  ;;  %v3492_v38 = vpop.f32.mrb[134].mxu1 }
 0x3e4   :  { %14261 = vst [vmem:[#allocation9_spill] sm:$0xff] %v12165_v26  ;;  %v12168_v24 = vadd.f32 %v3492_v38, %v14262_v59  ;;  %v7918_v15 = vpop.f32.mrb[135].mxu0  ;;  %v7972_v53 = vpop.f32.mrb[135].mxu1  ;;  %v12171_v14 = vadd.f32 %v3041_v20, %v11807_v39  ;;  %v3238_v39 = vld [vmem:[%s14012_s0 + $0x23c] sm:$0xff]  ;;  %v14266_v38 = vld [vmem:[#allocation46_spill] sm:$0xff] }
 0x3e5   :  { %v12190_v41 = vpack.c.bf16 %v3238_v39, %v3237_v34  ;;  %v14268_v39 = vld [vmem:[#allocation20_spill] sm:$0xff] }
 0x3e6   :  { %14263 = vst [vmem:[#allocation10_spill] sm:$0xff] %v12171_v14  ;;  %8078 = vmatmul.mubr.msk.bf16.gmra.mrb[240].mxu1 %vm262_vm1, %v12162_v49  ;;  %8184 = vmatmul.mubr.msk.bf16.gmra.mrb[240].mxu0 %vm262_vm1, %v11829_v55 }
 0x3e7   :  { %8081 = vmatprep.mubr.msk.bf16.mxu1 %vm8779_vm2, %v14047_v17  ;;  %8187 = vmatprep.mubr.msk.bf16.mxu0 %vm8779_vm2, %v14047_v17 }
 0x3e9   :  { %v3046_v53 = vpop.f32.mrb[136].mxu0  ;;  %v3497_v10 = vpop.f32.mrb[136].mxu1 }
 0x3ea   :  { %v12188_v45 = vadd.f32 %v3497_v10, %v14264_v48  ;;  %v7921_v55 = vpop.f32.mrb[137].mxu0  ;;  %v7975_v29 = vpop.f32.mrb[137].mxu1  ;;  %v12193_v28 = vadd.f32 %v3046_v53, %v11827_v27  ;;  %v3239_v27 = vld [vmem:[%s14012_s0 + $0x244] sm:$0xff] }
 0x3eb   :  { %v3049_v11 = vpop.f32.mrb[138].mxu0  ;;  %v3500_v20 = vpop.f32.mrb[138].mxu1 }
 0x3ec   :  { %14265 = vst [vmem:[#allocation12_spill] sm:$0xff] %v12193_v28  ;;  %v12196_v59 = vadd.f32 %v3500_v20, %v14266_v38  ;;  %v7922_v15 = vpop.f32.mrb[139].mxu0  ;;  %v7976_v14 = vpop.f32.mrb[139].mxu1  ;;  %v12199_v26 = vadd.f32 %v3049_v11, %v11835_v46  ;;  %v3240_v46 = vld [vmem:[%s14012_s0 + $0x24c] sm:$0xff] }
 0x3ed   :  { %v12218_v48 = vpack.c.bf16 %v3240_v46, %v3239_v27  ;;  %v14270_v20 = vld [vmem:[#allocation47_spill] sm:$0xff]  ;;  %v14272_v46 = vld [vmem:[#allocation22_spill] sm:$0xff] }
 0x3ee   :  { %14267 = vst [vmem:[#allocation13_spill] sm:$0xff] %v12199_v26  ;;  %8082 = vmatmul.mubr.msk.bf16.gmra.mrb[244].mxu1 %vm262_vm1, %v12190_v41  ;;  %8188 = vmatmul.mubr.msk.bf16.gmra.mrb[244].mxu0 %vm262_vm1, %v11857_v30 }
 0x3ef   :  { %8085 = vmatprep.mubr.msk.bf16.mxu1 %vm8779_vm2, %v14047_v17  ;;  %8191 = vmatprep.mubr.msk.bf16.mxu0 %vm8779_vm2, %v14047_v17 }
 0x3f1   :  { %v3054_v14 = vpop.f32.mrb[140].mxu0  ;;  %v3505_v34 = vpop.f32.mrb[140].mxu1 }
 0x3f2   :  { %v12216_v53 = vadd.f32 %v3505_v34, %v14268_v39  ;;  %v7925_v30 = vpop.f32.mrb[141].mxu0  ;;  %v7979_v10 = vpop.f32.mrb[141].mxu1  ;;  %v12221_v55 = vadd.f32 %v3054_v14, %v11855_v58  ;;  %v3241_v58 = vld [vmem:[%s14012_s0 + $0x254] sm:$0xff] }
 0x3f3   :  { %v3057_v29 = vpop.f32.mrb[142].mxu0  ;;  %v3508_v11 = vpop.f32.mrb[142].mxu1 }
 0x3f4   :  { %14269 = vst [vmem:[#allocation15_spill] sm:$0xff] %v12221_v55  ;;  %v12224_v38 = vadd.f32 %v3508_v11, %v14270_v20  ;;  %v7926_v15 = vpop.f32.mrb[143].mxu0  ;;  %v7980_v26 = vpop.f32.mrb[143].mxu1  ;;  %v12227_v28 = vadd.f32 %v3057_v29, %v11863_v42  ;;  %v3242_v42 = vld [vmem:[%s14012_s0 + $0x25c] sm:$0xff] }
 0x3f5   :  { %v12246_v39 = vpack.c.bf16 %v3242_v42, %v3241_v58  ;;  %v14273_v11 = vld [vmem:[#allocation48_spill] sm:$0xff] }
 0x3f6   :  { %14271 = vst [vmem:[#allocation16_spill] sm:$0xff] %v12227_v28  ;;  %8086 = vmatmul.mubr.msk.bf16.gmra.mrb[248].mxu1 %vm262_vm1, %v12218_v48  ;;  %8192 = vmatmul.mubr.msk.bf16.gmra.mrb[248].mxu0 %vm262_vm1, %v11885_v6 }
 0x3f7   :  { %8089 = vmatprep.mubr.msk.bf16.mxu1 %vm8779_vm2, %v14047_v17  ;;  %8195 = vmatprep.mubr.msk.bf16.mxu0 %vm8779_vm2, %v14047_v17 }
 0x3f9   :  { %v3062_v26 = vpop.f32.mrb[144].mxu0  ;;  %v3513_v27 = vpop.f32.mrb[144].mxu1 }
 0x3fa   :  { %v12244_v14 = vadd.f32 %v3513_v27, %v14272_v46  ;;  %v7929_v6 = vpop.f32.mrb[145].mxu0  ;;  %v7983_v34 = vpop.f32.mrb[145].mxu1  ;;  %v12249_v30 = vadd.f32 %v3062_v26, %v11883_v52  ;;  %v3243_v52 = vld [vmem:[%s14012_s0 + $0x264] sm:$0xff] }
 0x3fb   :  { %v3065_v10 = vpop.f32.mrb[146].mxu0  ;;  %v3516_v29 = vpop.f32.mrb[146].mxu1 }
 0x3fc   :  { %v12252_v20 = vadd.f32 %v3516_v29, %v14273_v11  ;;  %v7930_v15 = vpop.f32.mrb[147].mxu0  ;;  %v7984_v28 = vpop.f32.mrb[147].mxu1  ;;  %v12255_v55 = vadd.f32 %v3065_v10, %v11891_v43  ;;  %v3244_v43 = vld [vmem:[%s14012_s0 + $0x26c] sm:$0xff] }
 0x3fd   :  { %v12274_v27 = vpack.c.bf16 %v3244_v43, %v3243_v52 }
 0x3fe   :  { %8090 = vmatmul.mubr.msk.bf16.gmra.mrb[252].mxu1 %vm262_vm1, %v12246_v39  ;;  %8196 = vmatmul.mubr.msk.bf16.gmra.mrb[252].mxu0 %vm262_vm1, %v11913_v18 }
 0x3ff   :  { %8093 = vmatprep.mubr.msk.bf16.mxu1 %vm8779_vm2, %v14047_v17  ;;  %8199 = vmatprep.mubr.msk.bf16.mxu0 %vm8779_vm2, %v14047_v17 }
 0x401   :  { %v3070_v28 = vpop.f32.mrb[148].mxu0  ;;  %v3521_v58 = vpop.f32.mrb[148].mxu1 }
 0x402   :  { %v12272_v42 = vadd.f32 %v3521_v58, %v11541_v61  ;;  %v7933_v18 = vpop.f32.mrb[149].mxu0  ;;  %v7987_v26 = vpop.f32.mrb[149].mxu1  ;;  %v12277_v46 = vadd.f32 %v3070_v28, %v11911_v35 }
 0x403   :  { %v3073_v6 = vpop.f32.mrb[150].mxu0  ;;  %v3524_v34 = vpop.f32.mrb[150].mxu1 }
 0x404   :  { %v12280_v10 = vadd.f32 %v3524_v34, %v11549_v37  ;;  %v7934_v29 = vpop.f32.mrb[151].mxu0  ;;  %v7988_v11 = vpop.f32.mrb[151].mxu1  ;;  %v12283_v15 = vadd.f32 %v3073_v6, %v11919_v56  ;;  %v3245_v37 = vld [vmem:[%s14012_s0 + $0x274] sm:$0x3f] }
 0x405   :  { %v3284_v28 = vpack.c.bf16 %v3245_v37, %v3245_v37 }
 0x406   :  { %8094 = vmatmul.mubr.msk.bf16.gmra.mrb[0].mxu1 %vm262_vm1, %v12274_v27  ;;  %8200 = vmatmul.mubr.msk.bf16.gmra.mrb[0].mxu0 %vm262_vm1, %v11941_v47 }
 0x407   :  { %8097 = vmatprep.mubr.msk.bf16.mxu1 %vm8779_vm2, %v14047_v17  ;;  %8203 = vmatprep.mubr.msk.bf16.mxu0 %vm8779_vm2, %v14047_v17 }
 0x409   :  { %v3078_v61 = vpop.f32.mrb[152].mxu0  ;;  %v3529_v35 = vpop.f32.mrb[152].mxu1 }
 0x40a   :  { %v12297_v56 = vadd.f32 %v3529_v35, %v11571_v32  ;;  %v7937_v52 = vpop.f32.mrb[153].mxu0  ;;  %v7991_v43 = vpop.f32.mrb[153].mxu1  ;;  %v12300_v47 = vadd.f32 %v3078_v61, %v11939_v2  ;;  %v4487_v32 = vld [vmem:[%s14012_s0 + $0x25] sm:$0xff] }
 0x40b   :  { %v3081_v58 = vpop.f32.mrb[154].mxu0  ;;  %v3532_v18 = vpop.f32.mrb[154].mxu1 }
 0x40c   :  { %v12303_v26 = vadd.f32 %v3532_v18, %v11579_v54  ;;  %v7938_v6 = vpop.f32.mrb[155].mxu0  ;;  %v7992_v34 = vpop.f32.mrb[155].mxu1  ;;  %v12306_v29 = vadd.f32 %v3081_v58, %v11947_v31  ;;  %v4488_v54 = vld [vmem:[%s14012_s0 + $0x2d] sm:$0xff] }
 0x40d   :  { %v4564_v61 = vpack.c.bf16 %v4488_v54, %v4487_v32 }
 0x40e   :  { %8098 = vmatmul.mubr.msk.bf16.gmra.mrb[4].mxu1 %vm262_vm1, %v3284_v28  ;;  %8204 = vmatmul.mubr.msk.bf16.gmra.mrb[4].mxu0 %vm262_vm1, %v11969_v40 }
 0x40f   :  { %8207 = vmatprep.mubr.msk.bf16.mxu0 %vm8779_vm2, %v14047_v17  ;;  %8261 = vmatprep.mubr.msk.bf16.mxu1 %vm8779_vm2, %v14047_v17 }
 0x411   :  { %v3086_v2 = vpop.f32.mrb[156].mxu0  ;;  %v3537_v31 = vpop.f32.mrb[156].mxu1 }
 0x412   :  { %v12322_v11 = vadd.f32 %v3537_v31, %v11598_v21  ;;  %v7941_v40 = vpop.f32.mrb[157].mxu0  ;;  %v7995_v37 = vpop.f32.mrb[157].mxu1  ;;  %v12325_v35 = vadd.f32 %v3086_v2, %v11967_v62  ;;  %v4489_v21 = vld [vmem:[%s14012_s0 + $0x35] sm:$0xff] }
 0x413   :  { %v3089_v52 = vpop.f32.mrb[158].mxu0  ;;  %v3540_v43 = vpop.f32.mrb[158].mxu1 }
 0x414   :  { %v12328_v28 = vadd.f32 %v3540_v43, %v11606_v23  ;;  %v7942_v58 = vpop.f32.mrb[159].mxu0  ;;  %v7996_v18 = vpop.f32.mrb[159].mxu1  ;;  %v4490_v23 = vld [vmem:[%s14012_s0 + $0x3d] sm:$0xff] }
 0x415   :  { %v4565_v54 = vpack.c.bf16 %v4490_v23, %v4489_v21  ;;  %v14274_v21 = vld [vmem:[#allocation24_spill] sm:$0xff] }
 0x416   :  { %8208 = vmatmul.mubr.msk.bf16.gmra.mrb[8].mxu0 %vm262_vm1, %v11994_v50  ;;  %8262 = vmatmul.mubr.msk.bf16.vlgmr.msra.gmra.mrb[8].mxu1 %vm262_vm1, %v4564_v61 }
 0x417   :  { %8211 = vmatprep.mubr.msk.bf16.mxu0 %vm8779_vm2, %v14047_v17  ;;  %8265 = vmatprep.mubr.msk.bf16.mxu1 %vm8779_vm2, %v14047_v17 }
 0x419   :  { %v3545_v62 = vpop.f32.mrb[160].mxu1  ;;  %v4100_v6 = vpop.f32.mrb[160].mxu0 }
 0x41a   :  { %v12344_v50 = vadd.f32 %v3545_v62, %v11626_v4  ;;  %v7999_v34 = vpop.f32.mrb[161].mxu1  ;;  %v8105_v32 = vpop.f32.mrb[161].mxu0  ;;  %v12347_v2 = vadd.f32 %v4100_v6, %v11992_v44  ;;  %v4491_v4 = vld [vmem:[%s14012_s0 + $0x45] sm:$0xff] }
 0x41b   :  { %v3548_v31 = vpop.f32.mrb[162].mxu1  ;;  %v4103_v40 = vpop.f32.mrb[162].mxu0 }
 0x41c   :  { %v12350_v37 = vadd.f32 %v3548_v31, %v11638_v63  ;;  %v8106_v61 = vpop.f32.mrb[163].mxu0  ;;  %v8000_v52 = vpop.f32.mrb[163].mxu1  ;;  %v12353_v43 = vadd.f32 %v4103_v40, %v12000_v60  ;;  %v4492_v63 = vld [vmem:[%s14012_s0 + $0x4d] sm:$0xff]  ;;  %v14275_v31 = vld [vmem:[#allocation25_spill] sm:$0xff] }
 0x41d   :  { %v4566_v18 = vpack.c.bf16 %v4492_v63, %v4491_v4 }
 0x41e   :  { %8212 = vmatmul.mubr.msk.bf16.gmra.mrb[12].mxu0 %vm262_vm1, %v12022_v1  ;;  %8266 = vmatmul.mubr.msk.bf16.gmra.mrb[12].mxu1 %vm262_vm1, %v4565_v54 }
 0x41f   :  { %8215 = vmatprep.mubr.msk.bf16.mxu0 %vm8779_vm2, %v14047_v17  ;;  %8269 = vmatprep.mubr.msk.bf16.mxu1 %vm8779_vm2, %v14047_v17 }
 0x421   :  { %v3553_v44 = vpop.f32.mrb[164].mxu1  ;;  %v4108_v60 = vpop.f32.mrb[164].mxu0 }
 0x422   :  { %v8003_v58 = vpop.f32.mrb[165].mxu1  ;;  %v8109_v1 = vpop.f32.mrb[165].mxu0  ;;  %v12369_v23 = vadd.f32 %v3553_v44, %v14274_v21  ;;  %v12372_v62 = vadd.f32 %v4108_v60, %v12020_v13  ;;  %v4493_v13 = vld [vmem:[%s14012_s0 + $0x55] sm:$0xff]  ;;  %v14276_v60 = vld [vmem:[#allocation26_spill] sm:$0xff] }
 0x423   :  { %v3556_v6 = vpop.f32.mrb[166].mxu1  ;;  %v4111_v34 = vpop.f32.mrb[166].mxu0 }
 0x424   :  { %v8110_v32 = vpop.f32.mrb[167].mxu0  ;;  %v8004_v54 = vpop.f32.mrb[167].mxu1  ;;  %v12375_v40 = vadd.f32 %v3556_v6, %v14275_v31  ;;  %v12378_v61 = vadd.f32 %v4111_v34, %v12028_v22  ;;  %v4494_v22 = vld [vmem:[%s14012_s0 + $0x5d] sm:$0xff] }
 0x425   :  { %v4567_v44 = vpack.c.bf16 %v4494_v22, %v4493_v13  ;;  %v14277_v32 = vld [vmem:[#allocation49_spill] sm:$0xff] }
 0x426   :  { %8216 = vmatmul.mubr.msk.bf16.gmra.mrb[16].mxu0 %vm262_vm1, %v12050_v5  ;;  %8270 = vmatmul.mubr.msk.bf16.gmra.mrb[16].mxu1 %vm262_vm1, %v4566_v18 }
 0x427   :  { %8219 = vmatprep.mubr.msk.bf16.mxu0 %vm8779_vm2, %v14047_v17  ;;  %8273 = vmatprep.mubr.msk.bf16.mxu1 %vm8779_vm2, %v14047_v17 }
 0x429   :  { %v3561_v52 = vpop.f32.mrb[168].mxu1  ;;  %v4116_v4 = vpop.f32.mrb[168].mxu0 }
 0x42a   :  { %v8007_v63 = vpop.f32.mrb[169].mxu1  ;;  %v8113_v5 = vpop.f32.mrb[169].mxu0  ;;  %v12394_v58 = vadd.f32 %v3561_v52, %v14276_v60  ;;  %v12397_v1 = vadd.f32 %v4116_v4, %v12048_v57  ;;  %v4495_v57 = vld [vmem:[%s14012_s0 + $0x65] sm:$0xff] }
 0x42b   :  { %v3564_v18 = vpop.f32.mrb[170].mxu1  ;;  %v4119_v21 = vpop.f32.mrb[170].mxu0  ;;  %v14279_v52 = vld [vmem:[#allocation50_spill] sm:$0xff] }
 0x42c   :  { %v8114_v6 = vpop.f32.mrb[171].mxu0  ;;  %v8008_v34 = vpop.f32.mrb[171].mxu1  ;;  %v12400_v54 = vadd.f32 %v3564_v18, %v14277_v32  ;;  %v12403_v31 = vadd.f32 %v4119_v21, %v12056_v7  ;;  %v4496_v7 = vld [vmem:[%s14012_s0 + $0x6d] sm:$0xff] }
 0x42d   :  { %v4568_v5 = vpack.c.bf16 %v4496_v7, %v4495_v57  ;;  %v14280_v21 = vld [vmem:[#allocation51_spill] sm:$0xff] }
 0x42e   :  { %14278 = vst [vmem:[#allocation45_spill] sm:$0xff] %v12403_v31  ;;  %8220 = vmatmul.mubr.msk.bf16.gmra.mrb[20].mxu0 %vm262_vm1, %v12078_v12  ;;  %8274 = vmatmul.mubr.msk.bf16.gmra.mrb[20].mxu1 %vm262_vm1, %v4567_v44 }
 0x42f   :  { %8223 = vmatprep.mubr.msk.bf16.mxu0 %vm8779_vm2, %v14047_v17  ;;  %8277 = vmatprep.mubr.msk.bf16.mxu1 %vm8779_vm2, %v14047_v17 }
 0x431   :  { %v3569_v13 = vpop.f32.mrb[172].mxu1  ;;  %v4124_v22 = vpop.f32.mrb[172].mxu0 }
 0x432   :  { %v12419_v12 = vadd.f32 %v3569_v13, %v14279_v52  ;;  %v8011_v4 = vpop.f32.mrb[173].mxu1  ;;  %v8117_v63 = vpop.f32.mrb[173].mxu0  ;;  %v12422_v44 = vadd.f32 %v4124_v22, %v12076_v8  ;;  %v4497_v8 = vld [vmem:[%s14012_s0 + $0x75] sm:$0xff] }
 0x433   :  { %v3572_v60 = vpop.f32.mrb[174].mxu1  ;;  %v4127_v18 = vpop.f32.mrb[174].mxu0  ;;  %v14282_v13 = vld [vmem:[#allocation52_spill] sm:$0xff] }
 0x434   :  { %v12425_v6 = vadd.f32 %v3572_v60, %v14280_v21  ;;  %v8118_v34 = vpop.f32.mrb[175].mxu0  ;;  %v8012_v32 = vpop.f32.mrb[175].mxu1  ;;  %v12428_v31 = vadd.f32 %v4127_v18, %v12084_v3  ;;  %v4498_v3 = vld [vmem:[%s14012_s0 + $0x7d] sm:$0xff]  ;;  %v14283_v18 = vld [vmem:[#allocation11_spill] sm:$0xff] }
 0x435   :  { %v4569_v4 = vpack.c.bf16 %v4498_v3, %v4497_v8 }
 0x436   :  { %14281 = vst [vmem:[#allocation18_spill] sm:$0xff] %v12428_v31  ;;  %8224 = vmatmul.mubr.msk.bf16.gmra.mrb[24].mxu0 %vm262_vm1, %v12106_v0  ;;  %8278 = vmatmul.mubr.msk.bf16.gmra.mrb[24].mxu1 %vm262_vm1, %v4568_v5 }
 0x437   :  { %8227 = vmatprep.mubr.msk.bf16.mxu0 %vm8779_vm2, %v14047_v17  ;;  %8281 = vmatprep.mubr.msk.bf16.mxu1 %vm8779_vm2, %v14047_v17 }
 0x439   :  { %v3577_v57 = vpop.f32.mrb[176].mxu1  ;;  %v4132_v7 = vpop.f32.mrb[176].mxu0 }
 0x43a   :  { %v12444_v0 = vadd.f32 %v3577_v57, %v14282_v13  ;;  %v8015_v22 = vpop.f32.mrb[177].mxu1  ;;  %v8121_v52 = vpop.f32.mrb[177].mxu0  ;;  %v12447_v63 = vadd.f32 %v4132_v7, %v12104_v33  ;;  %v4499_v33 = vld [vmem:[%s14012_s0 + $0x85] sm:$0xff]  ;;  %v14285_v57 = vld [vmem:[#allocation27_spill] sm:$0xff] }
 0x43b   :  { %v3580_v5 = vpop.f32.mrb[178].mxu1  ;;  %v4135_v60 = vpop.f32.mrb[178].mxu0 }
 0x43c   :  { %v12450_v21 = vadd.f32 %v3580_v5, %v14283_v18  ;;  %v8122_v34 = vpop.f32.mrb[179].mxu0  ;;  %v8016_v32 = vpop.f32.mrb[179].mxu1  ;;  %v12453_v31 = vadd.f32 %v4135_v60, %v12112_v36  ;;  %v4500_v36 = vld [vmem:[%s14012_s0 + $0x8d] sm:$0xff]  ;;  %v14286_v60 = vld [vmem:[#allocation28_spill] sm:$0xff] }
 0x43d   :  { %v4570_v22 = vpack.c.bf16 %v4500_v36, %v4499_v33 }
 0x43e   :  { %14284 = vst [vmem:[#allocation46_spill] sm:$0xff] %v12453_v31  ;;  %8228 = vmatmul.mubr.msk.bf16.gmra.mrb[28].mxu0 %vm262_vm1, %v12134_v51  ;;  %8282 = vmatmul.mubr.msk.bf16.gmra.mrb[28].mxu1 %vm262_vm1, %v4569_v4 }
 0x43f   :  { %8231 = vmatprep.mubr.msk.bf16.mxu0 %vm8779_vm2, %v14047_v17  ;;  %8285 = vmatprep.mubr.msk.bf16.mxu1 %vm8779_vm2, %v14047_v17 }
 0x441   :  { %v3585_v8 = vpop.f32.mrb[180].mxu1  ;;  %v4140_v3 = vpop.f32.mrb[180].mxu0 }
 0x442   :  { %v12469_v51 = vadd.f32 %v3585_v8, %v14285_v57  ;;  %v8019_v7 = vpop.f32.mrb[181].mxu1  ;;  %v8125_v13 = vpop.f32.mrb[181].mxu0  ;;  %v12472_v52 = vadd.f32 %v4140_v3, %v12132_v9  ;;  %v4501_v9 = vld [vmem:[%s14012_s0 + $0x95] sm:$0xff]  ;;  %v14288_v8 = vld [vmem:[#allocation14_spill] sm:$0xff] }
 0x443   :  { %v3588_v4 = vpop.f32.mrb[182].mxu1  ;;  %v4143_v5 = vpop.f32.mrb[182].mxu0 }
 0x444   :  { %v12475_v18 = vadd.f32 %v3588_v4, %v14286_v60  ;;  %v8126_v34 = vpop.f32.mrb[183].mxu0  ;;  %v8020_v32 = vpop.f32.mrb[183].mxu1  ;;  %v12478_v31 = vadd.f32 %v4143_v5, %v12140_v19  ;;  %v4502_v19 = vld [vmem:[%s14012_s0 + $0x9d] sm:$0xff] }
 0x445   :  { %v4571_v7 = vpack.c.bf16 %v4502_v19, %v4501_v9  ;;  %v14289_v5 = vld [vmem:[#allocation29_spill] sm:$0xff] }
 0x446   :  { %14287 = vst [vmem:[#allocation20_spill] sm:$0xff] %v12478_v31  ;;  %8232 = vmatmul.mubr.msk.bf16.gmra.mrb[32].mxu0 %vm262_vm1, %v12162_v49  ;;  %8286 = vmatmul.mubr.msk.bf16.gmra.mrb[32].mxu1 %vm262_vm1, %v4570_v22 }
 0x447   :  { %8235 = vmatprep.mubr.msk.bf16.mxu0 %vm8779_vm2, %v14047_v17  ;;  %8289 = vmatprep.mubr.msk.bf16.mxu1 %vm8779_vm2, %v14047_v17 }
 0x449   :  { %v3593_v33 = vpop.f32.mrb[184].mxu1  ;;  %v4148_v36 = vpop.f32.mrb[184].mxu0 }
 0x44a   :  { %v12494_v49 = vadd.f32 %v3593_v33, %v14288_v8  ;;  %v8023_v3 = vpop.f32.mrb[185].mxu1  ;;  %v8129_v57 = vpop.f32.mrb[185].mxu0  ;;  %v12497_v13 = vadd.f32 %v4148_v36, %v12160_v16  ;;  %v4503_v16 = vld [vmem:[%s14012_s0 + $0xa5] sm:$0xff]  ;;  %v14291_v33 = vld [vmem:[#allocation40_spill] sm:$0xff] }
 0x44b   :  { %v3596_v22 = vpop.f32.mrb[186].mxu1  ;;  %v4151_v4 = vpop.f32.mrb[186].mxu0 }
 0x44c   :  { %v12500_v60 = vadd.f32 %v3596_v22, %v14289_v5  ;;  %v8130_v34 = vpop.f32.mrb[187].mxu0  ;;  %v8024_v32 = vpop.f32.mrb[187].mxu1  ;;  %v12503_v31 = vadd.f32 %v4151_v4, %v12168_v24  ;;  %v4504_v24 = vld [vmem:[%s14012_s0 + $0xad] sm:$0xff]  ;;  %v14293_v4 = vld [vmem:[#allocation17_spill] sm:$0xff] }
 0x44d   :  { %v4572_v3 = vpack.c.bf16 %v4504_v24, %v4503_v16 }
 0x44e   :  { %14290 = vst [vmem:[#allocation47_spill] sm:$0xff] %v12503_v31  ;;  %8236 = vmatmul.mubr.msk.bf16.gmra.mrb[36].mxu0 %vm262_vm1, %v12190_v41  ;;  %8290 = vmatmul.mubr.msk.bf16.gmra.mrb[36].mxu1 %vm262_vm1, %v4571_v7 }
 0x44f   :  { %8239 = vmatprep.mubr.msk.bf16.mxu0 %vm8779_vm2, %v14047_v17  ;;  %8293 = vmatprep.mubr.msk.bf16.mxu1 %vm8779_vm2, %v14047_v17 }
 0x451   :  { %v3601_v9 = vpop.f32.mrb[188].mxu1  ;;  %v4156_v19 = vpop.f32.mrb[188].mxu0 }
 0x452   :  { %v12519_v41 = vadd.f32 %v3601_v9, %v14291_v33  ;;  %v8027_v36 = vpop.f32.mrb[189].mxu1  ;;  %v8133_v8 = vpop.f32.mrb[189].mxu0  ;;  %v12522_v57 = vadd.f32 %v4156_v19, %v12188_v45  ;;  %v4505_v45 = vld [vmem:[%s14012_s0 + $0xb5] sm:$0xff]  ;;  %v14295_v9 = vld [vmem:[#allocation41_spill] sm:$0xff] }
 0x453   :  { %v3604_v7 = vpop.f32.mrb[190].mxu1  ;;  %v4159_v22 = vpop.f32.mrb[190].mxu0 }
 0x454   :  { %14292 = vst [vmem:[#allocation22_spill] sm:$0xff] %v12522_v57  ;;  %v12525_v5 = vadd.f32 %v3604_v7, %v14293_v4  ;;  %v8134_v34 = vpop.f32.mrb[191].mxu0  ;;  %v8028_v32 = vpop.f32.mrb[191].mxu1  ;;  %v12528_v31 = vadd.f32 %v4159_v22, %v12196_v59  ;;  %v4506_v59 = vld [vmem:[%s14012_s0 + $0xbd] sm:$0xff]  ;;  %v14297_v22 = vld [vmem:[#allocation42_spill] sm:$0xff] }
 0x455   :  { %v4573_v36 = vpack.c.bf16 %v4506_v59, %v4505_v45 }
 0x456   :  { %14294 = vst [vmem:[#allocation48_spill] sm:$0xff] %v12528_v31  ;;  %8240 = vmatmul.mubr.msk.bf16.gmra.mrb[40].mxu0 %vm262_vm1, %v12218_v48  ;;  %8294 = vmatmul.mubr.msk.bf16.gmra.mrb[40].mxu1 %vm262_vm1, %v4572_v3 }
 0x457   :  { %8243 = vmatprep.mubr.msk.bf16.mxu0 %vm8779_vm2, %v14047_v17  ;;  %8297 = vmatprep.mubr.msk.bf16.mxu1 %vm8779_vm2, %v14047_v17 }
 0x459   :  { %v3609_v16 = vpop.f32.mrb[192].mxu1  ;;  %v4164_v24 = vpop.f32.mrb[192].mxu0 }
 0x45a   :  { %v12544_v48 = vadd.f32 %v3609_v16, %v14295_v9  ;;  %v8031_v19 = vpop.f32.mrb[193].mxu1  ;;  %v8137_v33 = vpop.f32.mrb[193].mxu0  ;;  %v12547_v8 = vadd.f32 %v4164_v24, %v12216_v53  ;;  %v4507_v53 = vld [vmem:[%s14012_s0 + $0xc5] sm:$0xff]  ;;  %v14299_v16 = vld [vmem:[#allocation19_spill] sm:$0xff] }
 0x45b   :  { %v3612_v3 = vpop.f32.mrb[194].mxu1  ;;  %v4167_v7 = vpop.f32.mrb[194].mxu0 }
 0x45c   :  { %14296 = vst [vmem:[#allocation24_spill] sm:$0xff] %v12547_v8  ;;  %v12550_v4 = vadd.f32 %v3612_v3, %v14297_v22  ;;  %v8138_v34 = vpop.f32.mrb[195].mxu0  ;;  %v8032_v32 = vpop.f32.mrb[195].mxu1  ;;  %v12553_v31 = vadd.f32 %v4167_v7, %v12224_v38  ;;  %v4508_v38 = vld [vmem:[%s14012_s0 + $0xcd] sm:$0xff]  ;;  %v14301_v7 = vld [vmem:[#allocation37_spill] sm:$0xff] }
 0x45d   :  { %v4574_v19 = vpack.c.bf16 %v4508_v38, %v4507_v53  ;;  %v4510_v53 = vld [vmem:[%s14012_s0 + $0xdd] sm:$0xff] }
 0x45e   :  { %14298 = vst [vmem:[#allocation25_spill] sm:$0xff] %v12553_v31  ;;  %8244 = vmatmul.mubr.msk.bf16.gmra.mrb[44].mxu0 %vm262_vm1, %v12246_v39  ;;  %8298 = vmatmul.mubr.msk.bf16.gmra.mrb[44].mxu1 %vm262_vm1, %v4573_v36 }
 0x45f   :  { %8247 = vmatprep.mubr.msk.bf16.mxu0 %vm8779_vm2, %v14047_v17  ;;  %8301 = vmatprep.mubr.msk.bf16.mxu1 %vm8779_vm2, %v14047_v17 }
 0x461   :  { %v3617_v45 = vpop.f32.mrb[196].mxu1  ;;  %v4172_v59 = vpop.f32.mrb[196].mxu0 }
 0x462   :  { %v12569_v39 = vadd.f32 %v3617_v45, %v14299_v16  ;;  %v8035_v24 = vpop.f32.mrb[197].mxu1  ;;  %v8141_v9 = vpop.f32.mrb[197].mxu0  ;;  %v12572_v33 = vadd.f32 %v4172_v59, %v12244_v14  ;;  %v3902_v14 = vld [vmem:[%s14012_s0 + $0x274] sm:$0xff]  ;;  %v14303_v59 = vld [vmem:[#allocation38_spill] sm:$0xff] }
 0x463   :  { %v3620_v36 = vpop.f32.mrb[198].mxu1  ;;  %v4175_v3 = vpop.f32.mrb[198].mxu0 }
 0x464   :  { %14300 = vst [vmem:[#allocation26_spill] sm:$0xff] %v12572_v33  ;;  %v12575_v22 = vadd.f32 %v3620_v36, %v14301_v7  ;;  %v8142_v34 = vpop.f32.mrb[199].mxu0  ;;  %v8036_v32 = vpop.f32.mrb[199].mxu1  ;;  %v12578_v31 = vadd.f32 %v4175_v3, %v12252_v20  ;;  %v3903_v20 = vld [vmem:[%s14012_s0 + $0x27c] sm:$0xff] }
 0x465   :  { %v14304_v32 = vld [vmem:[#allocation21_spill] sm:$0xff] }
 0x466   :  { %14302 = vst [vmem:[#allocation49_spill] sm:$0xff] %v12578_v31  ;;  %8248 = vmatmul.mubr.msk.bf16.gmra.mrb[48].mxu0 %vm262_vm1, %v12274_v27  ;;  %8302 = vmatmul.mubr.msk.bf16.gmra.mrb[48].mxu1 %vm262_vm1, %v4574_v19  ;;  %v4509_v27 = vld [vmem:[%s14012_s0 + $0xd5] sm:$0xff]  ;;  %v3942_v19 = vpack.c.bf16 %v3903_v20, %v3902_v14 }
 0x467   :  { %8251 = vmatprep.mubr.msk.bf16.mxu0 %vm8779_vm2, %v14047_v17  ;;  %8305 = vmatprep.mubr.msk.bf16.mxu1 %vm8779_vm2, %v14047_v17  ;;  %v4575_v36 = vpack.c.bf16 %v4510_v53, %v4509_v27 }
 0x469   :  { %v3625_v38 = vpop.f32.mrb[200].mxu1  ;;  %v4180_v45 = vpop.f32.mrb[200].mxu0 }
 0x46a   :  { %v12600_v16 = vadd.f32 %v3625_v38, %v14303_v59  ;;  %v8039_v24 = vpop.f32.mrb[201].mxu1  ;;  %v8145_v9 = vpop.f32.mrb[201].mxu0  ;;  %v12603_v3 = vadd.f32 %v4180_v45, %v12272_v42  ;;  %v3904_v42 = vld [vmem:[%s14012_s0 + $0x284] sm:$0x3f] }
 0x46b   :  { %v3628_v7 = vpop.f32.mrb[202].mxu1  ;;  %v4183_v34 = vpop.f32.mrb[202].mxu0  ;;  %v3943_v38 = vpack.c.bf16 %v3904_v42, %v3904_v42  ;;  %v5147_v42 = vld [vmem:[%s14012_s0 + $0x2e] sm:$0xff] }
 0x46c   :  { %v12606_v31 = vadd.f32 %v3628_v7, %v14304_v32  ;;  %v8146_v33 = vpop.f32.mrb[203].mxu0  ;;  %v8040_v8 = vpop.f32.mrb[203].mxu1  ;;  %v12609_v57 = vadd.f32 %v4183_v34, %v12280_v10  ;;  %v4512_v10 = vld [vmem:[%s14012_s0 + $0xed] sm:$0xff] }
 0x46d   :  { %v4511_v8 = vld [vmem:[%s14012_s0 + $0xe5] sm:$0xff] }
 0x46e   :  { %14305 = vst [vmem:[#allocation50_spill] sm:$0xff] %v12609_v57  ;;  %8252 = vmatmul.mubr.msk.bf16.gmra.mrb[52].mxu0 %vm262_vm1, %v3942_v19  ;;  %8306 = vmatmul.mubr.msk.bf16.gmra.mrb[52].mxu1 %vm262_vm1, %v4575_v36  ;;  %v4576_v45 = vpack.c.bf16 %v4512_v10, %v4511_v8  ;;  %v14307_v19 = vld [vmem:[#allocation30_spill] sm:$0xff] }
 0x46f   :  { %8255 = vmatprep.mubr.msk.bf16.mxu0 %vm8779_vm2, %v14047_v17  ;;  %8309 = vmatprep.mubr.msk.bf16.mxu1 %vm8779_vm2, %v14047_v17 }
 0x471   :  { %v3633_v33 = vpop.f32.mrb[204].mxu1  ;;  %v4188_v14 = vpop.f32.mrb[204].mxu0 }
 0x472   :  { %v12627_v20 = vadd.f32 %v3633_v33, %v11944_v25  ;;  %v8043_v27 = vpop.f32.mrb[205].mxu1  ;;  %v8149_v53 = vpop.f32.mrb[205].mxu0  ;;  %v12630_v59 = vadd.f32 %v4188_v14, %v12297_v56  ;;  %v4513_v25 = vld [vmem:[%s14012_s0 + $0xf5] sm:$0xff]  ;;  %v4514_v56 = vld [vmem:[%s14012_s0 + $0xfd] sm:$0xff] }
 0x473   :  { %v3636_v24 = vpop.f32.mrb[206].mxu1  ;;  %v4191_v9 = vpop.f32.mrb[206].mxu0  ;;  %v14309_v33 = vld [vmem:[#allocation43_spill] sm:$0xff] }
 0x474   :  { %14306 = vst [vmem:[#allocation51_spill] sm:$0xff] %v12630_v59  ;;  %v12633_v36 = vadd.f32 %v3636_v24, %v14307_v19  ;;  %v8150_v7 = vpop.f32.mrb[207].mxu0  ;;  %v8044_v34 = vpop.f32.mrb[207].mxu1  ;;  %v12636_v32 = vadd.f32 %v4191_v9, %v12303_v26  ;;  %v5146_v26 = vld [vmem:[%s14012_s0 + $0x26] sm:$0xff] }
 0x475   :  { %v14311_v7 = vld [vmem:[#allocation23_spill] sm:$0xff] }
 0x476   :  { %14308 = vst [vmem:[#allocation52_spill] sm:$0xff] %v12636_v32  ;;  %8256 = vmatmul.mubr.msk.bf16.gmra.mrb[56].mxu0 %vm262_vm1, %v3943_v38  ;;  %8310 = vmatmul.mubr.msk.bf16.gmra.mrb[56].mxu1 %vm262_vm1, %v4576_v45  ;;  %v4577_v38 = vpack.c.bf16 %v4514_v56, %v4513_v25  ;;  %v5223_v45 = vpack.c.bf16 %v5147_v42, %v5146_v26  ;;  %v4515_v25 = vld [vmem:[%s14012_s0 + $0x105] sm:$0xff]  ;;  %v14313_v26 = vld [vmem:[#allocation31_spill] sm:$0xff] }
 0x477   :  { %8313 = vmatprep.mubr.msk.bf16.mxu1 %vm8779_vm2, %v14047_v17  ;;  %8419 = vmatprep.mubr.msk.bf16.mxu0 %vm8779_vm2, %v14047_v17 }
 0x479   :  { %v3641_v8 = vpop.f32.mrb[208].mxu1  ;;  %v4196_v10 = vpop.f32.mrb[208].mxu0 }
 0x47a   :  { %v12657_v14 = vadd.f32 %v3641_v8, %v14309_v33  ;;  %v8047_v27 = vpop.f32.mrb[209].mxu1  ;;  %v8153_v53 = vpop.f32.mrb[209].mxu0  ;;  %v12660_v24 = vadd.f32 %v4196_v10, %v12322_v11  ;;  %v4516_v11 = vld [vmem:[%s14012_s0 + $0x10d] sm:$0xff] }
 0x47b   :  { %v3644_v9 = vpop.f32.mrb[210].mxu1  ;;  %v4199_v19 = vpop.f32.mrb[210].mxu0  ;;  %v4578_v33 = vpack.c.bf16 %v4516_v11, %v4515_v25  ;;  %v4517_v25 = vld [vmem:[%s14012_s0 + $0x115] sm:$0xff] }
 0x47c   :  { %14310 = vst [vmem:[#allocation11_spill] sm:$0xff] %v12660_v24  ;;  %v12663_v34 = vadd.f32 %v3644_v9, %v14311_v7  ;;  %v8154_v32 = vpop.f32.mrb[211].mxu0  ;;  %v8048_v59 = vpop.f32.mrb[211].mxu1  ;;  %v12666_v57 = vadd.f32 %v4199_v19, %v12328_v28  ;;  %v5148_v28 = vld [vmem:[%s14012_s0 + $0x36] sm:$0xff] }
 0x47d   :  { %v5149_v59 = vld [vmem:[%s14012_s0 + $0x3e] sm:$0xff] }
 0x47e   :  { %14312 = vst [vmem:[#allocation27_spill] sm:$0xff] %v12666_v57  ;;  %8314 = vmatmul.mubr.msk.bf16.gmra.mrb[60].mxu1 %vm262_vm1, %v4577_v38  ;;  %8420 = vmatmul.mubr.msk.bf16.vlgmr.msra.gmra.mrb[60].mxu0 %vm262_vm1, %v5223_v45  ;;  %v5224_v27 = vpack.c.bf16 %v5149_v59, %v5148_v28  ;;  %v14315_v9 = vld [vmem:[#allocation44_spill] sm:$0xff] }
 0x47f   :  { %8317 = vmatprep.mubr.msk.bf16.mxu1 %vm8779_vm2, %v14047_v17  ;;  %8423 = vmatprep.mubr.msk.bf16.mxu0 %vm8779_vm2, %v14047_v17  ;;  %v14317_v59 = vld [vmem:[#allocation32_spill] sm:$0xff] }
 0x481   :  { %v3649_v32 = vpop.f32.mrb[212].mxu1  ;;  %v4204_v56 = vpop.f32.mrb[212].mxu0 }
 0x482   :  { %v12687_v42 = vadd.f32 %v3649_v32, %v14313_v26  ;;  %v8051_v8 = vpop.f32.mrb[213].mxu1  ;;  %v8157_v10 = vpop.f32.mrb[213].mxu0  ;;  %v12690_v53 = vadd.f32 %v4204_v56, %v12344_v50  ;;  %v4518_v50 = vld [vmem:[%s14012_s0 + $0x11d] sm:$0xff] }
 0x483   :  { %v3652_v38 = vpop.f32.mrb[214].mxu1  ;;  %v4207_v45 = vpop.f32.mrb[214].mxu0  ;;  %v4579_v10 = vpack.c.bf16 %v4518_v50, %v4517_v25 }
 0x484   :  { %14314 = vst [vmem:[#allocation28_spill] sm:$0xff] %v12690_v53  ;;  %v12693_v19 = vadd.f32 %v3652_v38, %v14315_v9  ;;  %v8158_v7 = vpop.f32.mrb[215].mxu0  ;;  %v8052_v57 = vpop.f32.mrb[215].mxu1  ;;  %v12696_v24 = vadd.f32 %v4207_v45, %v12350_v37  ;;  %v5150_v37 = vld [vmem:[%s14012_s0 + $0x46] sm:$0xff] }
 0x485   :  { %v5151_v57 = vld [vmem:[%s14012_s0 + $0x4e] sm:$0xff]  ;;  %v14319_v45 = vld [vmem:[#allocation33_spill] sm:$0xff] }
 0x486   :  { %14316 = vst [vmem:[#allocation14_spill] sm:$0xff] %v12696_v24  ;;  %8318 = vmatmul.mubr.msk.bf16.gmra.mrb[64].mxu1 %vm262_vm1, %v4578_v33  ;;  %8424 = vmatmul.mubr.msk.bf16.gmra.mrb[64].mxu0 %vm262_vm1, %v5224_v27  ;;  %v5225_v33 = vpack.c.bf16 %v5151_v57, %v5150_v37  ;;  %v14321_v37 = vld [vmem:[#allocation39_spill] sm:$0xff] }
 0x487   :  { %8321 = vmatprep.mubr.msk.bf16.mxu1 %vm8779_vm2, %v14047_v17  ;;  %8427 = vmatprep.mubr.msk.bf16.mxu0 %vm8779_vm2, %v14047_v17 }
 0x489   :  { %v3657_v11 = vpop.f32.mrb[216].mxu1  ;;  %v4212_v28 = vpop.f32.mrb[216].mxu0 }
 0x48a   :  { %v12717_v32 = vadd.f32 %v3657_v11, %v14317_v59  ;;  %v12720_v56 = vadd.f32 %v4212_v28, %v12369_v23  ;;  %v8055_v26 = vpop.f32.mrb[217].mxu1  ;;  %v8161_v8 = vpop.f32.mrb[217].mxu0  ;;  %v4519_v23 = vld [vmem:[%s14012_s0 + $0x125] sm:$0xff] }
 0x48b   :  { %v3660_v27 = vpop.f32.mrb[218].mxu1  ;;  %v4215_v38 = vpop.f32.mrb[218].mxu0 }
 0x48c   :  { %14318 = vst [vmem:[#allocation29_spill] sm:$0xff] %v12720_v56  ;;  %v12723_v9 = vadd.f32 %v3660_v27, %v14319_v45  ;;  %v12726_v7 = vadd.f32 %v4215_v38, %v12375_v40  ;;  %v8162_v24 = vpop.f32.mrb[219].mxu0  ;;  %v8056_v53 = vpop.f32.mrb[219].mxu1  ;;  %v4520_v40 = vld [vmem:[%s14012_s0 + $0x12d] sm:$0xff] }
 0x48d   :  { %v5152_v24 = vld [vmem:[%s14012_s0 + $0x56] sm:$0xff]  ;;  %v5153_v53 = vld [vmem:[%s14012_s0 + $0x5e] sm:$0xff]  ;;  %v4580_v26 = vpack.c.bf16 %v4520_v40, %v4519_v23  ;;  %v14323_v27 = vld [vmem:[#allocation34_spill] sm:$0xff] }
 0x48e   :  { %14320 = vst [vmem:[#allocation40_spill] sm:$0xff] %v12726_v7  ;;  %8322 = vmatmul.mubr.msk.bf16.gmra.mrb[68].mxu1 %vm262_vm1, %v4579_v10  ;;  %8428 = vmatmul.mubr.msk.bf16.gmra.mrb[68].mxu0 %vm262_vm1, %v5225_v33  ;;  %v5226_v8 = vpack.c.bf16 %v5153_v53, %v5152_v24  ;;  %v14325_v24 = vld [vmem:[#allocation35_spill] sm:$0xff] }
 0x48f   :  { %8325 = vmatprep.mubr.msk.bf16.mxu1 %vm8779_vm2, %v14047_v17  ;;  %8431 = vmatprep.mubr.msk.bf16.mxu0 %vm8779_vm2, %v14047_v17 }
 0x491   :  { %v3665_v25 = vpop.f32.mrb[220].mxu1  ;;  %v4220_v50 = vpop.f32.mrb[220].mxu0 }
 0x492   :  { %v12747_v57 = vadd.f32 %v3665_v25, %v14321_v37  ;;  %v12750_v11 = vadd.f32 %v4220_v50, %v12394_v58  ;;  %v8059_v28 = vpop.f32.mrb[221].mxu1  ;;  %v8165_v59 = vpop.f32.mrb[221].mxu0  ;;  %v4521_v58 = vld [vmem:[%s14012_s0 + $0x135] sm:$0xff] }
 0x493   :  { %v3668_v10 = vpop.f32.mrb[222].mxu1  ;;  %v4223_v33 = vpop.f32.mrb[222].mxu0 }
 0x494   :  { %14322 = vst [vmem:[#allocation17_spill] sm:$0xff] %v12750_v11  ;;  %v12753_v38 = vadd.f32 %v3668_v10, %v14323_v27  ;;  %v12756_v45 = vadd.f32 %v4223_v33, %v12400_v54  ;;  %v8166_v7 = vpop.f32.mrb[223].mxu0  ;;  %v8060_v56 = vpop.f32.mrb[223].mxu1  ;;  %v4522_v54 = vld [vmem:[%s14012_s0 + $0x13d] sm:$0xff] }
 0x495   :  { %v5154_v56 = vld [vmem:[%s14012_s0 + $0x66] sm:$0xff]  ;;  %v5155_v7 = vld [vmem:[%s14012_s0 + $0x6e] sm:$0xff]  ;;  %v4581_v28 = vpack.c.bf16 %v4522_v54, %v4521_v58  ;;  %v14327_v10 = vld [vmem:[#allocation36_spill] sm:$0xff] }
 0x496   :  { %14324 = vst [vmem:[#allocation41_spill] sm:$0xff] %v12756_v45  ;;  %8326 = vmatmul.mubr.msk.bf16.gmra.mrb[72].mxu1 %vm262_vm1, %v4580_v26  ;;  %8432 = vmatmul.mubr.msk.bf16.gmra.mrb[72].mxu0 %vm262_vm1, %v5226_v8  ;;  %v5227_v59 = vpack.c.bf16 %v5155_v7, %v5154_v56  ;;  %v14329_v56 = vld [vmem:[#allocation5_spill] sm:$0xff] }
 0x497   :  { %8329 = vmatprep.mubr.msk.bf16.mxu1 %vm8779_vm2, %v14047_v17  ;;  %8435 = vmatprep.mubr.msk.bf16.mxu0 %vm8779_vm2, %v14047_v17 }
 0x499   :  { %v3673_v23 = vpop.f32.mrb[224].mxu1  ;;  %v4228_v40 = vpop.f32.mrb[224].mxu0 }
 0x49a   :  { %v12777_v53 = vadd.f32 %v3673_v23, %v14325_v24  ;;  %v12780_v25 = vadd.f32 %v4228_v40, %v12419_v12  ;;  %v8063_v50 = vpop.f32.mrb[225].mxu1  ;;  %v8169_v37 = vpop.f32.mrb[225].mxu0  ;;  %v4523_v12 = vld [vmem:[%s14012_s0 + $0x145] sm:$0xff] }
 0x49b   :  { %v3676_v26 = vpop.f32.mrb[226].mxu1  ;;  %v4231_v8 = vpop.f32.mrb[226].mxu0 }
 0x49c   :  { %14326 = vst [vmem:[#allocation42_spill] sm:$0xff] %v12780_v25  ;;  %v12783_v33 = vadd.f32 %v3676_v26, %v14327_v10  ;;  %v12786_v27 = vadd.f32 %v4231_v8, %v12425_v6  ;;  %v8170_v45 = vpop.f32.mrb[227].mxu0  ;;  %v8064_v11 = vpop.f32.mrb[227].mxu1  ;;  %v4524_v6 = vld [vmem:[%s14012_s0 + $0x14d] sm:$0xff] }
 0x49d   :  { %v5156_v11 = vld [vmem:[%s14012_s0 + $0x76] sm:$0xff]  ;;  %v5157_v45 = vld [vmem:[%s14012_s0 + $0x7e] sm:$0xff]  ;;  %v4582_v50 = vpack.c.bf16 %v4524_v6, %v4523_v12  ;;  %v14331_v26 = vld [vmem:[#allocation6_spill] sm:$0xff] }
 0x49e   :  { %14328 = vst [vmem:[#allocation19_spill] sm:$0xff] %v12786_v27  ;;  %8330 = vmatmul.mubr.msk.bf16.gmra.mrb[76].mxu1 %vm262_vm1, %v4581_v28  ;;  %8436 = vmatmul.mubr.msk.bf16.gmra.mrb[76].mxu0 %vm262_vm1, %v5227_v59  ;;  %v5228_v37 = vpack.c.bf16 %v5157_v45, %v5156_v11  ;;  %v14333_v11 = vld [vmem:[#allocation7_spill] sm:$0xff] }
 0x49f   :  { %8333 = vmatprep.mubr.msk.bf16.mxu1 %vm8779_vm2, %v14047_v17  ;;  %8439 = vmatprep.mubr.msk.bf16.mxu0 %vm8779_vm2, %v14047_v17 }
 0x4a1   :  { %v3681_v58 = vpop.f32.mrb[228].mxu1  ;;  %v4236_v54 = vpop.f32.mrb[228].mxu0 }
 0x4a2   :  { %v12807_v7 = vadd.f32 %v3681_v58, %v14329_v56  ;;  %v12810_v23 = vadd.f32 %v4236_v54, %v12444_v0  ;;  %v8067_v40 = vpop.f32.mrb[229].mxu1  ;;  %v8173_v24 = vpop.f32.mrb[229].mxu0  ;;  %v4525_v0 = vld [vmem:[%s14012_s0 + $0x155] sm:$0xff] }
 0x4a3   :  { %v3684_v28 = vpop.f32.mrb[230].mxu1  ;;  %v4239_v59 = vpop.f32.mrb[230].mxu0 }
 0x4a4   :  { %14330 = vst [vmem:[#allocation37_spill] sm:$0xff] %v12810_v23  ;;  %v12813_v8 = vadd.f32 %v3684_v28, %v14331_v26  ;;  %v12816_v10 = vadd.f32 %v4239_v59, %v12450_v21  ;;  %v8174_v27 = vpop.f32.mrb[231].mxu0  ;;  %v8068_v25 = vpop.f32.mrb[231].mxu1  ;;  %v4526_v21 = vld [vmem:[%s14012_s0 + $0x15d] sm:$0xff] }
 0x4a5   :  { %v5158_v25 = vld [vmem:[%s14012_s0 + $0x86] sm:$0xff]  ;;  %v5159_v27 = vld [vmem:[%s14012_s0 + $0x8e] sm:$0xff]  ;;  %v4583_v40 = vpack.c.bf16 %v4526_v21, %v4525_v0  ;;  %v14335_v28 = vld [vmem:[#allocation8_spill] sm:$0xff] }
 0x4a6   :  { %14332 = vst [vmem:[#allocation38_spill] sm:$0xff] %v12816_v10  ;;  %8334 = vmatmul.mubr.msk.bf16.gmra.mrb[80].mxu1 %vm262_vm1, %v4582_v50  ;;  %8440 = vmatmul.mubr.msk.bf16.gmra.mrb[80].mxu0 %vm262_vm1, %v5228_v37  ;;  %v5229_v24 = vpack.c.bf16 %v5159_v27, %v5158_v25  ;;  %v14337_v25 = vld [vmem:[#allocation9_spill] sm:$0xff] }
 0x4a7   :  { %8337 = vmatprep.mubr.msk.bf16.mxu1 %vm8779_vm2, %v14047_v17  ;;  %8443 = vmatprep.mubr.msk.bf16.mxu0 %vm8779_vm2, %v14047_v17 }
 0x4a9   :  { %v3689_v12 = vpop.f32.mrb[232].mxu1  ;;  %v4244_v6 = vpop.f32.mrb[232].mxu0 }
 0x4aa   :  { %v12837_v45 = vadd.f32 %v3689_v12, %v14333_v11  ;;  %v12840_v58 = vadd.f32 %v4244_v6, %v12469_v51  ;;  %v8071_v54 = vpop.f32.mrb[233].mxu1  ;;  %v8177_v56 = vpop.f32.mrb[233].mxu0  ;;  %v4527_v51 = vld [vmem:[%s14012_s0 + $0x165] sm:$0xff] }
 0x4ab   :  { %v3692_v50 = vpop.f32.mrb[234].mxu1  ;;  %v4247_v37 = vpop.f32.mrb[234].mxu0 }
 0x4ac   :  { %14334 = vst [vmem:[#allocation21_spill] sm:$0xff] %v12840_v58  ;;  %v12843_v59 = vadd.f32 %v3692_v50, %v14335_v28  ;;  %v12846_v26 = vadd.f32 %v4247_v37, %v12475_v18  ;;  %v8178_v10 = vpop.f32.mrb[235].mxu0  ;;  %v8072_v23 = vpop.f32.mrb[235].mxu1  ;;  %v4528_v18 = vld [vmem:[%s14012_s0 + $0x16d] sm:$0xff] }
 0x4ad   :  { %v5160_v23 = vld [vmem:[%s14012_s0 + $0x96] sm:$0xff]  ;;  %v5161_v10 = vld [vmem:[%s14012_s0 + $0x9e] sm:$0xff]  ;;  %v4584_v54 = vpack.c.bf16 %v4528_v18, %v4527_v51  ;;  %v14339_v50 = vld [vmem:[#allocation10_spill] sm:$0xff] }
 0x4ae   :  { %14336 = vst [vmem:[#allocation30_spill] sm:$0xff] %v12846_v26  ;;  %8338 = vmatmul.mubr.msk.bf16.gmra.mrb[84].mxu1 %vm262_vm1, %v4583_v40  ;;  %8444 = vmatmul.mubr.msk.bf16.gmra.mrb[84].mxu0 %vm262_vm1, %v5229_v24  ;;  %v5230_v56 = vpack.c.bf16 %v5161_v10, %v5160_v23  ;;  %v14341_v23 = vld [vmem:[#allocation12_spill] sm:$0xff] }
 0x4af   :  { %8341 = vmatprep.mubr.msk.bf16.mxu1 %vm8779_vm2, %v14047_v17  ;;  %8447 = vmatprep.mubr.msk.bf16.mxu0 %vm8779_vm2, %v14047_v17 }
 0x4b1   :  { %v3697_v0 = vpop.f32.mrb[236].mxu1  ;;  %v4252_v21 = vpop.f32.mrb[236].mxu0 }
 0x4b2   :  { %v12867_v27 = vadd.f32 %v3697_v0, %v14337_v25  ;;  %v12870_v12 = vadd.f32 %v4252_v21, %v12494_v49  ;;  %v8075_v6 = vpop.f32.mrb[237].mxu1  ;;  %v8181_v11 = vpop.f32.mrb[237].mxu0  ;;  %v4529_v49 = vld [vmem:[%s14012_s0 + $0x175] sm:$0xff] }
 0x4b3   :  { %v3700_v40 = vpop.f32.mrb[238].mxu1  ;;  %v4255_v24 = vpop.f32.mrb[238].mxu0 }
 0x4b4   :  { %14338 = vst [vmem:[#allocation43_spill] sm:$0xff] %v12870_v12  ;;  %v12873_v37 = vadd.f32 %v3700_v40, %v14339_v50  ;;  %v12876_v28 = vadd.f32 %v4255_v24, %v12500_v60  ;;  %v8182_v26 = vpop.f32.mrb[239].mxu0  ;;  %v8076_v58 = vpop.f32.mrb[239].mxu1  ;;  %v4530_v60 = vld [vmem:[%s14012_s0 + $0x17d] sm:$0xff] }
 0x4b5   :  { %v5162_v58 = vld [vmem:[%s14012_s0 + $0xa6] sm:$0xff]  ;;  %v5163_v26 = vld [vmem:[%s14012_s0 + $0xae] sm:$0xff]  ;;  %v4585_v6 = vpack.c.bf16 %v4530_v60, %v4529_v49 }
 0x4b6   :  { %14340 = vst [vmem:[#allocation23_spill] sm:$0xff] %v12876_v28  ;;  %8342 = vmatmul.mubr.msk.bf16.gmra.mrb[88].mxu1 %vm262_vm1, %v4584_v54  ;;  %8448 = vmatmul.mubr.msk.bf16.gmra.mrb[88].mxu0 %vm262_vm1, %v5230_v56  ;;  %v5231_v11 = vpack.c.bf16 %v5163_v26, %v5162_v58  ;;  %v14343_v40 = vld [vmem:[#allocation13_spill] sm:$0xff]  ;;  %v14345_v58 = vld [vmem:[#allocation15_spill] sm:$0xff] }
 0x4b7   :  { %8345 = vmatprep.mubr.msk.bf16.mxu1 %vm8779_vm2, %v14047_v17  ;;  %8451 = vmatprep.mubr.msk.bf16.mxu0 %vm8779_vm2, %v14047_v17 }
 0x4b9   :  { %v3705_v51 = vpop.f32.mrb[240].mxu1  ;;  %v4260_v18 = vpop.f32.mrb[240].mxu0 }
 0x4ba   :  { %v12897_v10 = vadd.f32 %v3705_v51, %v14341_v23  ;;  %v12900_v0 = vadd.f32 %v4260_v18, %v12519_v41  ;;  %v8079_v21 = vpop.f32.mrb[241].mxu1  ;;  %v8185_v25 = vpop.f32.mrb[241].mxu0  ;;  %v4531_v41 = vld [vmem:[%s14012_s0 + $0x185] sm:$0xff] }
 0x4bb   :  { %v3708_v54 = vpop.f32.mrb[242].mxu1  ;;  %v4263_v56 = vpop.f32.mrb[242].mxu0 }
 0x4bc   :  { %14342 = vst [vmem:[#allocation31_spill] sm:$0xff] %v12900_v0  ;;  %v12903_v24 = vadd.f32 %v3708_v54, %v14343_v40  ;;  %v12906_v50 = vadd.f32 %v4263_v56, %v12525_v5  ;;  %v8186_v28 = vpop.f32.mrb[243].mxu0  ;;  %v8080_v12 = vpop.f32.mrb[243].mxu1  ;;  %v4532_v5 = vld [vmem:[%s14012_s0 + $0x18d] sm:$0xff]  ;;  %v14346_v54 = vld [vmem:[#allocation16_spill] sm:$0xff] }
 0x4bd   :  { %v5164_v12 = vld [vmem:[%s14012_s0 + $0xb6] sm:$0xff]  ;;  %v5165_v28 = vld [vmem:[%s14012_s0 + $0xbe] sm:$0xff]  ;;  %v4586_v21 = vpack.c.bf16 %v4532_v5, %v4531_v41 }
 0x4be   :  { %14344 = vst [vmem:[#allocation44_spill] sm:$0xff] %v12906_v50  ;;  %8346 = vmatmul.mubr.msk.bf16.gmra.mrb[92].mxu1 %vm262_vm1, %v4585_v6  ;;  %8452 = vmatmul.mubr.msk.bf16.gmra.mrb[92].mxu0 %vm262_vm1, %v5231_v11  ;;  %v5232_v25 = vpack.c.bf16 %v5165_v28, %v5164_v12 }
 0x4bf   :  { %8349 = vmatprep.mubr.msk.bf16.mxu1 %vm8779_vm2, %v14047_v17  ;;  %8455 = vmatprep.mubr.msk.bf16.mxu0 %vm8779_vm2, %v14047_v17 }
 0x4c1   :  { %v3713_v49 = vpop.f32.mrb[244].mxu1  ;;  %v4268_v60 = vpop.f32.mrb[244].mxu0 }
 0x4c2   :  { %v12927_v26 = vadd.f32 %v3713_v49, %v14345_v58  ;;  %v12930_v51 = vadd.f32 %v4268_v60, %v12544_v48  ;;  %v8083_v18 = vpop.f32.mrb[245].mxu1  ;;  %v8189_v23 = vpop.f32.mrb[245].mxu0  ;;  %v4533_v48 = vld [vmem:[%s14012_s0 + $0x195] sm:$0xff] }
 0x4c3   :  { %v3716_v6 = vpop.f32.mrb[246].mxu1  ;;  %v4271_v11 = vpop.f32.mrb[246].mxu0 }
 0x4c4   :  { %v12933_v56 = vadd.f32 %v3716_v6, %v14346_v54  ;;  %v12936_v40 = vadd.f32 %v4271_v11, %v12550_v4  ;;  %v8190_v50 = vpop.f32.mrb[247].mxu0  ;;  %v8084_v0 = vpop.f32.mrb[247].mxu1  ;;  %v4534_v4 = vld [vmem:[%s14012_s0 + $0x19d] sm:$0xff] }
 0x4c5   :  { %v5166_v0 = vld [vmem:[%s14012_s0 + $0xc6] sm:$0xff]  ;;  %v5167_v50 = vld [vmem:[%s14012_s0 + $0xce] sm:$0xff]  ;;  %v4587_v58 = vpack.c.bf16 %v4534_v4, %v4533_v48 }
 0x4c6   :  { %8350 = vmatmul.mubr.msk.bf16.gmra.mrb[96].mxu1 %vm262_vm1, %v4586_v21  ;;  %8456 = vmatmul.mubr.msk.bf16.gmra.mrb[96].mxu0 %vm262_vm1, %v5232_v25  ;;  %v5233_v18 = vpack.c.bf16 %v5167_v50, %v5166_v0 }
 0x4c7   :  { %8353 = vmatprep.mubr.msk.bf16.mxu1 %vm8779_vm2, %v14047_v17  ;;  %8459 = vmatprep.mubr.msk.bf16.mxu0 %vm8779_vm2, %v14047_v17 }
 0x4c9   :  { %v3721_v41 = vpop.f32.mrb[248].mxu1  ;;  %v4276_v5 = vpop.f32.mrb[248].mxu0 }
 0x4ca   :  { %v12957_v12 = vadd.f32 %v3721_v41, %v12249_v30  ;;  %v12960_v28 = vadd.f32 %v4276_v5, %v12569_v39  ;;  %v8087_v49 = vpop.f32.mrb[249].mxu1  ;;  %v8193_v60 = vpop.f32.mrb[249].mxu0  ;;  %v4535_v30 = vld [vmem:[%s14012_s0 + $0x1a5] sm:$0xff]  ;;  %v5168_v39 = vld [vmem:[%s14012_s0 + $0xd6] sm:$0xff] }
 0x4cb   :  { %v3724_v23 = vpop.f32.mrb[250].mxu1  ;;  %v4279_v21 = vpop.f32.mrb[250].mxu0 }
 0x4cc   :  { %v12963_v25 = vadd.f32 %v3724_v23, %v12255_v55  ;;  %v12966_v6 = vadd.f32 %v4279_v21, %v12575_v22  ;;  %v8194_v11 = vpop.f32.mrb[251].mxu0  ;;  %v8088_v54 = vpop.f32.mrb[251].mxu1  ;;  %v4536_v55 = vld [vmem:[%s14012_s0 + $0x1ad] sm:$0xff]  ;;  %v5169_v22 = vld [vmem:[%s14012_s0 + $0xde] sm:$0xff] }
 0x4cd   :  { %v4588_v49 = vpack.c.bf16 %v4536_v55, %v4535_v30  ;;  %v5234_v60 = vpack.c.bf16 %v5169_v22, %v5168_v39 }
 0x4ce   :  { %8354 = vmatmul.mubr.msk.bf16.gmra.mrb[100].mxu1 %vm262_vm1, %v4587_v58  ;;  %8460 = vmatmul.mubr.msk.bf16.gmra.mrb[100].mxu0 %vm262_vm1, %v5233_v18 }
 0x4cf   :  { %8357 = vmatprep.mubr.msk.bf16.mxu1 %vm8779_vm2, %v14047_v17  ;;  %8463 = vmatprep.mubr.msk.bf16.mxu0 %vm8779_vm2, %v14047_v17 }
 0x4d1   :  { %v3729_v48 = vpop.f32.mrb[252].mxu1  ;;  %v4284_v4 = vpop.f32.mrb[252].mxu0 }
 0x4d2   :  { %v12987_v0 = vadd.f32 %v3729_v48, %v12277_v46  ;;  %v12990_v50 = vadd.f32 %v4284_v4, %v12600_v16  ;;  %v8091_v41 = vpop.f32.mrb[253].mxu1  ;;  %v8197_v5 = vpop.f32.mrb[253].mxu0  ;;  %v4537_v46 = vld [vmem:[%s14012_s0 + $0x1b5] sm:$0xff] }
 0x4d3   :  { %v3732_v58 = vpop.f32.mrb[254].mxu1  ;;  %v4287_v18 = vpop.f32.mrb[254].mxu0  ;;  %v5171_v16 = vld [vmem:[%s14012_s0 + $0xee] sm:$0xff] }
 0x4d4   :  { %v12993_v23 = vadd.f32 %v3732_v58, %v12283_v15  ;;  %v12996_v21 = vadd.f32 %v4287_v18, %v12606_v31  ;;  %v8198_v11 = vpop.f32.mrb[255].mxu0  ;;  %v8092_v54 = vpop.f32.mrb[255].mxu1  ;;  %v4538_v15 = vld [vmem:[%s14012_s0 + $0x1bd] sm:$0xff]  ;;  %v5170_v31 = vld [vmem:[%s14012_s0 + $0xe6] sm:$0xff] }
 0x4d5   :  { %v4589_v41 = vpack.c.bf16 %v4538_v15, %v4537_v46  ;;  %v5235_v5 = vpack.c.bf16 %v5171_v16, %v5170_v31 }
 0x4d6   :  { %8358 = vmatmul.mubr.msk.bf16.gmra.mrb[104].mxu1 %vm262_vm1, %v4588_v49  ;;  %8464 = vmatmul.mubr.msk.bf16.gmra.mrb[104].mxu0 %vm262_vm1, %v5234_v60 }
 0x4d7   :  { %8361 = vmatprep.mubr.msk.bf16.mxu1 %vm8779_vm2, %v14047_v17  ;;  %8467 = vmatprep.mubr.msk.bf16.mxu0 %vm8779_vm2, %v14047_v17 }
 0x4d9   :  { %v3737_v30 = vpop.f32.mrb[0].mxu1  ;;  %v4292_v55 = vpop.f32.mrb[0].mxu0 }
 0x4da   :  { %v13017_v39 = vadd.f32 %v3737_v30, %v12300_v47  ;;  %v13020_v22 = vadd.f32 %v4292_v55, %v12627_v20  ;;  %v8095_v48 = vpop.f32.mrb[1].mxu1  ;;  %v8201_v4 = vpop.f32.mrb[1].mxu0  ;;  %v4539_v47 = vld [vmem:[%s14012_s0 + $0x1c5] sm:$0xff]  ;;  %v5172_v20 = vld [vmem:[%s14012_s0 + $0xf6] sm:$0xff] }
 0x4db   :  { %v3740_v49 = vpop.f32.mrb[2].mxu1  ;;  %v4295_v60 = vpop.f32.mrb[2].mxu0 }
 0x4dc   :  { %v13023_v58 = vadd.f32 %v3740_v49, %v12306_v29  ;;  %v13026_v18 = vadd.f32 %v4295_v60, %v12633_v36  ;;  %v8202_v11 = vpop.f32.mrb[3].mxu0  ;;  %v8096_v54 = vpop.f32.mrb[3].mxu1  ;;  %v4540_v29 = vld [vmem:[%s14012_s0 + $0x1cd] sm:$0xff]  ;;  %v5173_v36 = vld [vmem:[%s14012_s0 + $0xfe] sm:$0xff] }
 0x4dd   :  { %v4590_v48 = vpack.c.bf16 %v4540_v29, %v4539_v47  ;;  %v5236_v4 = vpack.c.bf16 %v5173_v36, %v5172_v20  ;;  %v5175_v54 = vld [vmem:[%s14012_s0 + $0x10e] sm:$0xff] }
 0x4de   :  { %8362 = vmatmul.mubr.msk.bf16.gmra.mrb[108].mxu1 %vm262_vm1, %v4589_v41  ;;  %8468 = vmatmul.mubr.msk.bf16.gmra.mrb[108].mxu0 %vm262_vm1, %v5235_v5 }
 0x4df   :  { %8365 = vmatprep.mubr.msk.bf16.mxu1 %vm8779_vm2, %v14047_v17  ;;  %8471 = vmatprep.mubr.msk.bf16.mxu0 %vm8779_vm2, %v14047_v17 }
 0x4e1   :  { %v3745_v46 = vpop.f32.mrb[4].mxu1  ;;  %v4300_v15 = vpop.f32.mrb[4].mxu0 }
 0x4e2   :  { %v13047_v31 = vadd.f32 %v3745_v46, %v12325_v35  ;;  %v13050_v16 = vadd.f32 %v4300_v15, %v12657_v14  ;;  %v8205_v30 = vpop.f32.mrb[5].mxu0  ;;  %v8099_v55 = vpop.f32.mrb[5].mxu1  ;;  %v4541_v35 = vld [vmem:[%s14012_s0 + $0x1d5] sm:$0xff]  ;;  %v4542_v14 = vld [vmem:[%s14012_s0 + $0x1dd] sm:$0xff] }
 0x4e3   :  { %v4303_v41 = vpop.f32.mrb[6].mxu0  ;;  %v3748_v5 = vpop.f32.mrb[6].mxu1  ;;  %v4591_v30 = vpack.c.bf16 %v4542_v14, %v4541_v35 }
 0x4e4   :  { %v13053_v49 = vadd.f32 %v4303_v41, %v12663_v34  ;;  %v8206_v60 = vpop.f32.mrb[7].mxu0  ;;  %v8100_v11 = vpop.f32.mrb[7].mxu1  ;;  %v5174_v34 = vld [vmem:[%s14012_s0 + $0x106] sm:$0xff] }
 0x4e5   :  { %v5237_v55 = vpack.c.bf16 %v5175_v54, %v5174_v34 }
 0x4e6   :  { %8366 = vmatmul.mubr.msk.bf16.gmra.mrb[112].mxu1 %vm262_vm1, %v4590_v48  ;;  %8472 = vmatmul.mubr.msk.bf16.gmra.mrb[112].mxu0 %vm262_vm1, %v5236_v4 }
 0x4e7   :  { %8369 = vmatprep.mubr.msk.bf16.mxu1 %vm8779_vm2, %v14047_v17  ;;  %8475 = vmatprep.mubr.msk.bf16.mxu0 %vm8779_vm2, %v14047_v17 }
 0x4e9   :  { %v4308_v47 = vpop.f32.mrb[8].mxu0  ;;  %v4759_v29 = vpop.f32.mrb[8].mxu1 }
 0x4ea   :  { %v13074_v20 = vadd.f32 %v4308_v47, %v12687_v42  ;;  %v13077_v36 = vadd.f32 %v4759_v29, %v12347_v2  ;;  %v8209_v46 = vpop.f32.mrb[9].mxu0  ;;  %v8263_v15 = vpop.f32.mrb[9].mxu1  ;;  %v4543_v2 = vld [vmem:[%s14012_s0 + $0x1e5] sm:$0xff]  ;;  %v5176_v42 = vld [vmem:[%s14012_s0 + $0x116] sm:$0xff] }
 0x4eb   :  { %v4311_v48 = vpop.f32.mrb[10].mxu0  ;;  %v4762_v4 = vpop.f32.mrb[10].mxu1 }
 0x4ec   :  { %v13080_v41 = vadd.f32 %v4311_v48, %v12693_v19  ;;  %v13083_v5 = vadd.f32 %v4762_v4, %v12353_v43  ;;  %v8210_v60 = vpop.f32.mrb[11].mxu0  ;;  %v8264_v11 = vpop.f32.mrb[11].mxu1  ;;  %v4544_v43 = vld [vmem:[%s14012_s0 + $0x1ed] sm:$0xff]  ;;  %v5177_v19 = vld [vmem:[%s14012_s0 + $0x11e] sm:$0xff] }
 0x4ed   :  { %v4592_v46 = vpack.c.bf16 %v4544_v43, %v4543_v2  ;;  %v5238_v15 = vpack.c.bf16 %v5177_v19, %v5176_v42 }
 0x4ee   :  { %8370 = vmatmul.mubr.msk.bf16.gmra.mrb[116].mxu1 %vm262_vm1, %v4591_v30  ;;  %8476 = vmatmul.mubr.msk.bf16.gmra.mrb[116].mxu0 %vm262_vm1, %v5237_v55 }
 0x4ef   :  { %8373 = vmatprep.mubr.msk.bf16.mxu1 %vm8779_vm2, %v14047_v17  ;;  %8479 = vmatprep.mubr.msk.bf16.mxu0 %vm8779_vm2, %v14047_v17 }
 0x4f1   :  { %v4316_v35 = vpop.f32.mrb[12].mxu0  ;;  %v4767_v14 = vpop.f32.mrb[12].mxu1 }
 0x4f2   :  { %v13104_v34 = vadd.f32 %v4316_v35, %v12717_v32  ;;  %v13107_v54 = vadd.f32 %v4767_v14, %v12372_v62  ;;  %v8213_v47 = vpop.f32.mrb[13].mxu0  ;;  %v8267_v29 = vpop.f32.mrb[13].mxu1  ;;  %v4545_v62 = vld [vmem:[%s14012_s0 + $0x1f5] sm:$0xff]  ;;  %v5178_v32 = vld [vmem:[%s14012_s0 + $0x126] sm:$0xff] }
 0x4f3   :  { %v4319_v30 = vpop.f32.mrb[14].mxu0  ;;  %v4770_v55 = vpop.f32.mrb[14].mxu1 }
 0x4f4   :  { %v13110_v48 = vadd.f32 %v4319_v30, %v12723_v9  ;;  %v13113_v4 = vadd.f32 %v4770_v55, %v12378_v61  ;;  %v8214_v60 = vpop.f32.mrb[15].mxu0  ;;  %v8268_v11 = vpop.f32.mrb[15].mxu1  ;;  %v4546_v61 = vld [vmem:[%s14012_s0 + $0x1fd] sm:$0xff]  ;;  %v5179_v9 = vld [vmem:[%s14012_s0 + $0x12e] sm:$0xff] }
 0x4f5   :  { %v4593_v47 = vpack.c.bf16 %v4546_v61, %v4545_v62  ;;  %v5239_v29 = vpack.c.bf16 %v5179_v9, %v5178_v32  ;;  %v14349_v55 = vld [vmem:[#allocation45_spill] sm:$0xff] }
 0x4f6   :  { %14347 = vst [vmem:[#allocation32_spill] sm:$0xff] %v13110_v48  ;;  %8374 = vmatmul.mubr.msk.bf16.gmra.mrb[120].mxu1 %vm262_vm1, %v4592_v46  ;;  %8480 = vmatmul.mubr.msk.bf16.gmra.mrb[120].mxu0 %vm262_vm1, %v5238_v15 }
 0x4f7   :  { %8377 = vmatprep.mubr.msk.bf16.mxu1 %vm8779_vm2, %v14047_v17  ;;  %8483 = vmatprep.mubr.msk.bf16.mxu0 %vm8779_vm2, %v14047_v17 }
 0x4f9   :  { %v4324_v2 = vpop.f32.mrb[16].mxu0  ;;  %v4775_v43 = vpop.f32.mrb[16].mxu1 }
 0x4fa   :  { %v13134_v42 = vadd.f32 %v4324_v2, %v12747_v57  ;;  %v13137_v19 = vadd.f32 %v4775_v43, %v12397_v1  ;;  %v8217_v35 = vpop.f32.mrb[17].mxu0  ;;  %v8271_v14 = vpop.f32.mrb[17].mxu1  ;;  %v4547_v1 = vld [vmem:[%s14012_s0 + $0x205] sm:$0xff]  ;;  %v4548_v57 = vld [vmem:[%s14012_s0 + $0x20d] sm:$0xff] }
 0x4fb   :  { %v4327_v46 = vpop.f32.mrb[18].mxu0  ;;  %v4778_v15 = vpop.f32.mrb[18].mxu1  ;;  %v4594_v35 = vpack.c.bf16 %v4548_v57, %v4547_v1 }
 0x4fc   :  { %v13140_v30 = vadd.f32 %v4327_v46, %v12753_v38  ;;  %v13143_v60 = vadd.f32 %v4778_v15, %v14349_v55  ;;  %v8218_v11 = vpop.f32.mrb[19].mxu0  ;;  %v8272_v48 = vpop.f32.mrb[19].mxu1  ;;  %v5180_v38 = vld [vmem:[%s14012_s0 + $0x136] sm:$0xff]  ;;  %v14352_v15 = vld [vmem:[#allocation18_spill] sm:$0xff] }
 0x4fd   :  { %v5181_v48 = vld [vmem:[%s14012_s0 + $0x13e] sm:$0xff] }
 0x4fe   :  { %14348 = vst [vmem:[#allocation33_spill] sm:$0xff] %v13140_v30  ;;  %8378 = vmatmul.mubr.msk.bf16.gmra.mrb[124].mxu1 %vm262_vm1, %v4593_v47  ;;  %8484 = vmatmul.mubr.msk.bf16.gmra.mrb[124].mxu0 %vm262_vm1, %v5239_v29  ;;  %v5240_v14 = vpack.c.bf16 %v5181_v48, %v5180_v38 }
 0x4ff   :  { %8381 = vmatprep.mubr.msk.bf16.mxu1 %vm8779_vm2, %v14047_v17  ;;  %8487 = vmatprep.mubr.msk.bf16.mxu0 %vm8779_vm2, %v14047_v17 }
 0x501   :  { %v4332_v62 = vpop.f32.mrb[20].mxu0  ;;  %v4783_v61 = vpop.f32.mrb[20].mxu1 }
 0x502   :  { %v13164_v32 = vadd.f32 %v4332_v62, %v12777_v53  ;;  %v13167_v9 = vadd.f32 %v4783_v61, %v12422_v44  ;;  %v8221_v2 = vpop.f32.mrb[21].mxu0  ;;  %v8275_v43 = vpop.f32.mrb[21].mxu1  ;;  %v4549_v44 = vld [vmem:[%s14012_s0 + $0x215] sm:$0xff]  ;;  %v4550_v53 = vld [vmem:[%s14012_s0 + $0x21d] sm:$0xff] }
 0x503   :  { %v4335_v47 = vpop.f32.mrb[22].mxu0  ;;  %v4786_v29 = vpop.f32.mrb[22].mxu1  ;;  %v4595_v2 = vpack.c.bf16 %v4550_v53, %v4549_v44 }
 0x504   :  { %14350 = vst [vmem:[#allocation39_spill] sm:$0xff] %v13164_v32  ;;  %v13170_v46 = vadd.f32 %v4335_v47, %v12783_v33  ;;  %v13173_v55 = vadd.f32 %v4786_v29, %v14352_v15  ;;  %v8222_v11 = vpop.f32.mrb[23].mxu0  ;;  %v8276_v30 = vpop.f32.mrb[23].mxu1  ;;  %v5182_v33 = vld [vmem:[%s14012_s0 + $0x146] sm:$0xff] }
 0x505   :  { %v5183_v30 = vld [vmem:[%s14012_s0 + $0x14e] sm:$0xff] }
 0x506   :  { %14351 = vst [vmem:[#allocation34_spill] sm:$0xff] %v13170_v46  ;;  %8382 = vmatmul.mubr.msk.bf16.gmra.mrb[128].mxu1 %vm262_vm1, %v4594_v35  ;;  %8488 = vmatmul.mubr.msk.bf16.gmra.mrb[128].mxu0 %vm262_vm1, %v5240_v14  ;;  %v5241_v43 = vpack.c.bf16 %v5183_v30, %v5182_v33  ;;  %v14355_v29 = vld [vmem:[#allocation46_spill] sm:$0xff] }
 0x507   :  { %8385 = vmatprep.mubr.msk.bf16.mxu1 %vm8779_vm2, %v14047_v17  ;;  %8491 = vmatprep.mubr.msk.bf16.mxu0 %vm8779_vm2, %v14047_v17 }
 0x509   :  { %v4340_v1 = vpop.f32.mrb[24].mxu0  ;;  %v4791_v57 = vpop.f32.mrb[24].mxu1 }
 0x50a   :  { %v13194_v38 = vadd.f32 %v4340_v1, %v12807_v7  ;;  %v13197_v48 = vadd.f32 %v4791_v57, %v12447_v63  ;;  %v8225_v62 = vpop.f32.mrb[25].mxu0  ;;  %v8279_v61 = vpop.f32.mrb[25].mxu1  ;;  %v4551_v63 = vld [vmem:[%s14012_s0 + $0x225] sm:$0xff]  ;;  %v4552_v7 = vld [vmem:[%s14012_s0 + $0x22d] sm:$0xff] }
 0x50b   :  { %v4343_v35 = vpop.f32.mrb[26].mxu0  ;;  %v4794_v14 = vpop.f32.mrb[26].mxu1  ;;  %v4596_v62 = vpack.c.bf16 %v4552_v7, %v4551_v63 }
 0x50c   :  { %14353 = vst [vmem:[#allocation35_spill] sm:$0xff] %v13194_v38  ;;  %v13200_v47 = vadd.f32 %v4343_v35, %v12813_v8  ;;  %v13203_v15 = vadd.f32 %v4794_v14, %v14355_v29  ;;  %v8226_v11 = vpop.f32.mrb[27].mxu0  ;;  %v8280_v46 = vpop.f32.mrb[27].mxu1  ;;  %v5184_v8 = vld [vmem:[%s14012_s0 + $0x156] sm:$0xff] }
 0x50d   :  { %v5185_v46 = vld [vmem:[%s14012_s0 + $0x15e] sm:$0xff] }
 0x50e   :  { %14354 = vst [vmem:[#allocation36_spill] sm:$0xff] %v13200_v47  ;;  %8386 = vmatmul.mubr.msk.bf16.gmra.mrb[132].mxu1 %vm262_vm1, %v4595_v2  ;;  %8492 = vmatmul.mubr.msk.bf16.gmra.mrb[132].mxu0 %vm262_vm1, %v5241_v43  ;;  %v5242_v61 = vpack.c.bf16 %v5185_v46, %v5184_v8  ;;  %v14358_v14 = vld [vmem:[#allocation20_spill] sm:$0xff] }
 0x50f   :  { %8389 = vmatprep.mubr.msk.bf16.mxu1 %vm8779_vm2, %v14047_v17  ;;  %8495 = vmatprep.mubr.msk.bf16.mxu0 %vm8779_vm2, %v14047_v17 }
 0x511   :  { %v4348_v44 = vpop.f32.mrb[28].mxu0  ;;  %v4799_v53 = vpop.f32.mrb[28].mxu1 }
 0x512   :  { %v13224_v33 = vadd.f32 %v4348_v44, %v12837_v45  ;;  %v13227_v30 = vadd.f32 %v4799_v53, %v12472_v52  ;;  %v8229_v1 = vpop.f32.mrb[29].mxu0  ;;  %v8283_v57 = vpop.f32.mrb[29].mxu1  ;;  %v4553_v52 = vld [vmem:[%s14012_s0 + $0x235] sm:$0xff]  ;;  %v4554_v45 = vld [vmem:[%s14012_s0 + $0x23d] sm:$0xff] }
 0x513   :  { %v4351_v2 = vpop.f32.mrb[30].mxu0  ;;  %v4802_v43 = vpop.f32.mrb[30].mxu1  ;;  %v4597_v1 = vpack.c.bf16 %v4554_v45, %v4553_v52 }
 0x514   :  { %14356 = vst [vmem:[#allocation5_spill] sm:$0xff] %v13224_v33  ;;  %v13230_v35 = vadd.f32 %v4351_v2, %v12843_v59  ;;  %v13233_v29 = vadd.f32 %v4802_v43, %v14358_v14  ;;  %v8230_v11 = vpop.f32.mrb[31].mxu0  ;;  %v8284_v47 = vpop.f32.mrb[31].mxu1  ;;  %v5186_v59 = vld [vmem:[%s14012_s0 + $0x166] sm:$0xff]  ;;  %v14361_v43 = vld [vmem:[#allocation47_spill] sm:$0xff] }
 0x515   :  { %v5187_v47 = vld [vmem:[%s14012_s0 + $0x16e] sm:$0xff] }
 0x516   :  { %14357 = vst [vmem:[#allocation6_spill] sm:$0xff] %v13230_v35  ;;  %8390 = vmatmul.mubr.msk.bf16.gmra.mrb[136].mxu1 %vm262_vm1, %v4596_v62  ;;  %8496 = vmatmul.mubr.msk.bf16.gmra.mrb[136].mxu0 %vm262_vm1, %v5242_v61  ;;  %v5243_v57 = vpack.c.bf16 %v5187_v47, %v5186_v59  ;;  %v14363_v47 = vld [vmem:[#allocation22_spill] sm:$0xff] }
 0x517   :  { %8393 = vmatprep.mubr.msk.bf16.mxu1 %vm8779_vm2, %v14047_v17  ;;  %8499 = vmatprep.mubr.msk.bf16.mxu0 %vm8779_vm2, %v14047_v17 }
 0x519   :  { %v4356_v63 = vpop.f32.mrb[32].mxu0  ;;  %v4807_v7 = vpop.f32.mrb[32].mxu1 }
 0x51a   :  { %v13254_v8 = vadd.f32 %v4356_v63, %v12867_v27  ;;  %v13257_v46 = vadd.f32 %v4807_v7, %v12497_v13  ;;  %v8233_v44 = vpop.f32.mrb[33].mxu0  ;;  %v8287_v53 = vpop.f32.mrb[33].mxu1  ;;  %v4555_v13 = vld [vmem:[%s14012_s0 + $0x245] sm:$0xff]  ;;  %v4556_v27 = vld [vmem:[%s14012_s0 + $0x24d] sm:$0xff] }
 0x51b   :  { %v4359_v62 = vpop.f32.mrb[34].mxu0  ;;  %v4810_v61 = vpop.f32.mrb[34].mxu1  ;;  %v4598_v53 = vpack.c.bf16 %v4556_v27, %v4555_v13 }
 0x51c   :  { %14359 = vst [vmem:[#allocation7_spill] sm:$0xff] %v13254_v8  ;;  %v13260_v2 = vadd.f32 %v4359_v62, %v12873_v37  ;;  %v13263_v14 = vadd.f32 %v4810_v61, %v14361_v43  ;;  %v8234_v11 = vpop.f32.mrb[35].mxu0  ;;  %v8288_v35 = vpop.f32.mrb[35].mxu1  ;;  %v5188_v37 = vld [vmem:[%s14012_s0 + $0x176] sm:$0xff] }
 0x51d   :  { %v5189_v35 = vld [vmem:[%s14012_s0 + $0x17e] sm:$0xff] }
 0x51e   :  { %14360 = vst [vmem:[#allocation8_spill] sm:$0xff] %v13260_v2  ;;  %8394 = vmatmul.mubr.msk.bf16.gmra.mrb[140].mxu1 %vm262_vm1, %v4597_v1  ;;  %8500 = vmatmul.mubr.msk.bf16.gmra.mrb[140].mxu0 %vm262_vm1, %v5243_v57  ;;  %v5244_v1 = vpack.c.bf16 %v5189_v35, %v5188_v37  ;;  %v14365_v43 = vld [vmem:[#allocation48_spill] sm:$0xff] }
 0x51f   :  { %8397 = vmatprep.mubr.msk.bf16.mxu1 %vm8779_vm2, %v14047_v17  ;;  %8503 = vmatprep.mubr.msk.bf16.mxu0 %vm8779_vm2, %v14047_v17  ;;  %v14367_v35 = vld [vmem:[#allocation24_spill] sm:$0xff] }
 0x521   :  { %v4364_v52 = vpop.f32.mrb[36].mxu0  ;;  %v4815_v45 = vpop.f32.mrb[36].mxu1 }
 0x522   :  { %v13284_v59 = vadd.f32 %v4364_v52, %v12897_v10  ;;  %v13287_v63 = vadd.f32 %v4815_v45, %v14363_v47  ;;  %v8237_v7 = vpop.f32.mrb[37].mxu0  ;;  %v8291_v44 = vpop.f32.mrb[37].mxu1  ;;  %v4557_v10 = vld [vmem:[%s14012_s0 + $0x255] sm:$0xff] }
 0x523   :  { %v4367_v57 = vpop.f32.mrb[38].mxu0  ;;  %v4818_v62 = vpop.f32.mrb[38].mxu1 }
 0x524   :  { %14362 = vst [vmem:[#allocation9_spill] sm:$0xff] %v13284_v59  ;;  %v13290_v61 = vadd.f32 %v4367_v57, %v12903_v24  ;;  %v13293_v11 = vadd.f32 %v4818_v62, %v14365_v43  ;;  %v8238_v2 = vpop.f32.mrb[39].mxu0  ;;  %v8292_v8 = vpop.f32.mrb[39].mxu1  ;;  %v4558_v24 = vld [vmem:[%s14012_s0 + $0x25d] sm:$0xff] }
 0x525   :  { %v5190_v8 = vld [vmem:[%s14012_s0 + $0x186] sm:$0xff]  ;;  %v5191_v2 = vld [vmem:[%s14012_s0 + $0x18e] sm:$0xff]  ;;  %v4599_v7 = vpack.c.bf16 %v4558_v24, %v4557_v10 }
 0x526   :  { %14364 = vst [vmem:[#allocation10_spill] sm:$0xff] %v13290_v61  ;;  %8398 = vmatmul.mubr.msk.bf16.gmra.mrb[144].mxu1 %vm262_vm1, %v4598_v53  ;;  %8504 = vmatmul.mubr.msk.bf16.gmra.mrb[144].mxu0 %vm262_vm1, %v5244_v1  ;;  %v5245_v44 = vpack.c.bf16 %v5191_v2, %v5190_v8  ;;  %v14369_v62 = vld [vmem:[#allocation25_spill] sm:$0xff]  ;;  %v14371_v2 = vld [vmem:[#allocation26_spill] sm:$0xff] }
 0x527   :  { %8401 = vmatprep.mubr.msk.bf16.mxu1 %vm8779_vm2, %v14047_v17  ;;  %8507 = vmatprep.mubr.msk.bf16.mxu0 %vm8779_vm2, %v14047_v17 }
 0x529   :  { %v4372_v13 = vpop.f32.mrb[40].mxu0  ;;  %v4823_v27 = vpop.f32.mrb[40].mxu1 }
 0x52a   :  { %v13314_v37 = vadd.f32 %v4372_v13, %v12927_v26  ;;  %v13317_v52 = vadd.f32 %v4823_v27, %v14367_v35  ;;  %v8241_v45 = vpop.f32.mrb[41].mxu0  ;;  %v8295_v47 = vpop.f32.mrb[41].mxu1  ;;  %v4559_v26 = vld [vmem:[%s14012_s0 + $0x265] sm:$0xff] }
 0x52b   :  { %v4375_v53 = vpop.f32.mrb[42].mxu0  ;;  %v4826_v1 = vpop.f32.mrb[42].mxu1 }
 0x52c   :  { %14366 = vst [vmem:[#allocation12_spill] sm:$0xff] %v13314_v37  ;;  %v13320_v57 = vadd.f32 %v4375_v53, %v12933_v56  ;;  %v13323_v43 = vadd.f32 %v4826_v1, %v14369_v62  ;;  %v8242_v61 = vpop.f32.mrb[43].mxu0  ;;  %v8296_v59 = vpop.f32.mrb[43].mxu1  ;;  %v4560_v56 = vld [vmem:[%s14012_s0 + $0x26d] sm:$0xff]  ;;  %v14373_v1 = vld [vmem:[#allocation49_spill] sm:$0xff] }
 0x52d   :  { %v5192_v59 = vld [vmem:[%s14012_s0 + $0x196] sm:$0xff]  ;;  %v5193_v61 = vld [vmem:[%s14012_s0 + $0x19e] sm:$0xff]  ;;  %v4600_v45 = vpack.c.bf16 %v4560_v56, %v4559_v26 }
 0x52e   :  { %14368 = vst [vmem:[#allocation13_spill] sm:$0xff] %v13320_v57  ;;  %8402 = vmatmul.mubr.msk.bf16.gmra.mrb[148].mxu1 %vm262_vm1, %v4599_v7  ;;  %8508 = vmatmul.mubr.msk.bf16.gmra.mrb[148].mxu0 %vm262_vm1, %v5245_v44  ;;  %v5246_v47 = vpack.c.bf16 %v5193_v61, %v5192_v59 }
 0x52f   :  { %8405 = vmatprep.mubr.msk.bf16.mxu1 %vm8779_vm2, %v14047_v17  ;;  %8511 = vmatprep.mubr.msk.bf16.mxu0 %vm8779_vm2, %v14047_v17 }
 0x531   :  { %v4380_v10 = vpop.f32.mrb[44].mxu0  ;;  %v4831_v24 = vpop.f32.mrb[44].mxu1 }
 0x532   :  { %v13344_v8 = vadd.f32 %v4380_v10, %v12957_v12  ;;  %v13347_v13 = vadd.f32 %v4831_v24, %v14371_v2  ;;  %v8245_v27 = vpop.f32.mrb[45].mxu0  ;;  %v8299_v35 = vpop.f32.mrb[45].mxu1  ;;  %v4561_v12 = vld [vmem:[%s14012_s0 + $0x275] sm:$0xff] }
 0x533   :  { %v4383_v7 = vpop.f32.mrb[46].mxu0  ;;  %v4834_v44 = vpop.f32.mrb[46].mxu1 }
 0x534   :  { %14370 = vst [vmem:[#allocation15_spill] sm:$0xff] %v13344_v8  ;;  %v13350_v53 = vadd.f32 %v4383_v7, %v12963_v25  ;;  %v13353_v62 = vadd.f32 %v4834_v44, %v14373_v1  ;;  %v8246_v57 = vpop.f32.mrb[47].mxu0  ;;  %v8300_v37 = vpop.f32.mrb[47].mxu1  ;;  %v4562_v25 = vld [vmem:[%s14012_s0 + $0x27d] sm:$0xff]  ;;  %v14376_v7 = vld [vmem:[#allocation50_spill] sm:$0xff] }
 0x535   :  { %v5194_v37 = vld [vmem:[%s14012_s0 + $0x1a6] sm:$0xff]  ;;  %v5195_v57 = vld [vmem:[%s14012_s0 + $0x1ae] sm:$0xff]  ;;  %v4601_v2 = vpack.c.bf16 %v4562_v25, %v4561_v12 }
 0x536   :  { %14372 = vst [vmem:[#allocation16_spill] sm:$0xff] %v13350_v53  ;;  %8406 = vmatmul.mubr.msk.bf16.gmra.mrb[152].mxu1 %vm262_vm1, %v4600_v45  ;;  %8512 = vmatmul.mubr.msk.bf16.gmra.mrb[152].mxu0 %vm262_vm1, %v5246_v47  ;;  %v5247_v27 = vpack.c.bf16 %v5195_v57, %v5194_v37  ;;  %v14378_v37 = vld [vmem:[#allocation51_spill] sm:$0xff] }
 0x537   :  { %8409 = vmatprep.mubr.msk.bf16.mxu1 %vm8779_vm2, %v14047_v17  ;;  %8515 = vmatprep.mubr.msk.bf16.mxu0 %vm8779_vm2, %v14047_v17 }
 0x539   :  { %v4388_v26 = vpop.f32.mrb[48].mxu0  ;;  %v4839_v56 = vpop.f32.mrb[48].mxu1 }
 0x53a   :  { %v13374_v59 = vadd.f32 %v4388_v26, %v12987_v0  ;;  %v13377_v61 = vadd.f32 %v4839_v56, %v12603_v3  ;;  %v8249_v10 = vpop.f32.mrb[49].mxu0  ;;  %v8303_v24 = vpop.f32.mrb[49].mxu1  ;;  %v4563_v3 = vld [vmem:[%s14012_s0 + $0x285] sm:$0x3f]  ;;  %v5196_v0 = vld [vmem:[%s14012_s0 + $0x1b6] sm:$0xff] }
 0x53b   :  { %v4391_v35 = vpop.f32.mrb[50].mxu0  ;;  %v4842_v45 = vpop.f32.mrb[50].mxu1  ;;  %v4602_v10 = vpack.c.bf16 %v4563_v3, %v4563_v3 }
 0x53c   :  { %14374 = vst [vmem:[#allocation45_spill] sm:$0xff] %v13374_v59  ;;  %v13380_v47 = vadd.f32 %v4391_v35, %v12993_v23  ;;  %v13383_v44 = vadd.f32 %v4842_v45, %v14376_v7  ;;  %v8250_v1 = vpop.f32.mrb[51].mxu0  ;;  %v8304_v53 = vpop.f32.mrb[51].mxu1  ;;  %v5197_v23 = vld [vmem:[%s14012_s0 + $0x1be] sm:$0xff] }
 0x53d   :  { %v5248_v24 = vpack.c.bf16 %v5197_v23, %v5196_v0  ;;  %v14380_v45 = vld [vmem:[#allocation52_spill] sm:$0xff] }
 0x53e   :  { %14375 = vst [vmem:[#allocation18_spill] sm:$0xff] %v13380_v47  ;;  %8410 = vmatmul.mubr.msk.bf16.gmra.mrb[156].mxu1 %vm262_vm1, %v4601_v2  ;;  %8516 = vmatmul.mubr.msk.bf16.gmra.mrb[156].mxu0 %vm262_vm1, %v5247_v27 }
 0x53f   :  { %8413 = vmatprep.mubr.msk.bf16.mxu1 %vm8779_vm2, %v14047_v17  ;;  %8519 = vmatprep.mubr.msk.bf16.mxu0 %vm8779_vm2, %v14047_v17 }
 0x541   :  { %v4396_v53 = vpop.f32.mrb[52].mxu0  ;;  %v4847_v12 = vpop.f32.mrb[52].mxu1 }
 0x542   :  { %v13401_v25 = vadd.f32 %v4396_v53, %v13017_v39  ;;  %v13404_v57 = vadd.f32 %v4847_v12, %v14378_v37  ;;  %v8253_v26 = vpop.f32.mrb[53].mxu0  ;;  %v8307_v56 = vpop.f32.mrb[53].mxu1  ;;  %v5198_v39 = vld [vmem:[%s14012_s0 + $0x1c6] sm:$0xff] }
 0x543   :  { %v4399_v2 = vpop.f32.mrb[54].mxu0  ;;  %v4850_v27 = vpop.f32.mrb[54].mxu1 }
 0x544   :  { %14377 = vst [vmem:[#allocation46_spill] sm:$0xff] %v13401_v25  ;;  %v13407_v35 = vadd.f32 %v4399_v2, %v13023_v58  ;;  %v13410_v7 = vadd.f32 %v4850_v27, %v14380_v45  ;;  %v8254_v1 = vpop.f32.mrb[55].mxu0  ;;  %v8308_v47 = vpop.f32.mrb[55].mxu1  ;;  %v5199_v58 = vld [vmem:[%s14012_s0 + $0x1ce] sm:$0xff] }
 0x545   :  { %v14382_v47 = vld [vmem:[#allocation11_spill] sm:$0xff]  ;;  %v5249_v26 = vpack.c.bf16 %v5199_v58, %v5198_v39  ;;  %v5201_v1 = vld [vmem:[%s14012_s0 + $0x1de] sm:$0xff] }
 0x546   :  { %14379 = vst [vmem:[#allocation20_spill] sm:$0xff] %v13407_v35  ;;  %8414 = vmatmul.mubr.msk.bf16.gmra.mrb[160].mxu1 %vm262_vm1, %v4602_v10  ;;  %8520 = vmatmul.mubr.msk.bf16.gmra.mrb[160].mxu0 %vm262_vm1, %v5248_v24  ;;  %v14383_v24 = vld [vmem:[#allocation27_spill] sm:$0xff] }
 0x547   :  { %8523 = vmatprep.mubr.msk.bf16.mxu0 %vm8779_vm2, %v14047_v17 }
 0x549   :  { %v4404_v3 = vpop.f32.mrb[56].mxu0  ;;  %v4855_v0 = vpop.f32.mrb[56].mxu1 }
 0x54a   :  { %v13423_v23 = vadd.f32 %v4404_v3, %v13047_v31  ;;  %v13426_v53 = vadd.f32 %v4855_v0, %v14382_v47  ;;  %v8257_v12 = vpop.f32.mrb[57].mxu0  ;;  %v8311_v37 = vpop.f32.mrb[57].mxu1  ;;  %v5200_v31 = vld [vmem:[%s14012_s0 + $0x1d6] sm:$0xff]  ;;  %v13443_v3 = vld [vmem:[%s14014_s2] ss:$0 sm:$0xff] }
 0x54b   :  { %v4407_v56 = vpop.f32.mrb[58].mxu0  ;;  %v4858_v10 = vpop.f32.mrb[58].mxu1  ;;  %v14384_v0 = vld [vmem:[#allocation28_spill] sm:$0xff] }
 0x54c   :  { %14381 = vst [vmem:[#allocation47_spill] sm:$0xff] %v13423_v23  ;;  %v13429_v2 = vadd.f32 %v4858_v10, %v14383_v24  ;;  %v8258_v27 = vpop.f32.mrb[59].mxu0  ;;  %v8312_v45 = vpop.f32.mrb[59].mxu1  ;;  %v5250_v56 = vpack.c.bf16 %v5201_v1, %v5200_v31  ;;  %v5203_v31 = vld [vmem:[%s14012_s0 + $0x1ee] sm:$0xff] }
 0x54d   :  { %v14385_v45 = vld [vmem:[#allocation14_spill] sm:$0xff] }
 0x54e   :  { %8524 = vmatmul.mubr.msk.bf16.gmra.mrb[164].mxu0 %vm262_vm1, %v5249_v26 }
 0x54f   :  { %8527 = vmatprep.mubr.msk.bf16.mxu0 %vm8779_vm2, %v14047_v17 }
 0x551   :  { %v4863_v39 = vpop.f32.mrb[60].mxu1  ;;  %v5418_v58 = vpop.f32.mrb[60].mxu0 }
 0x552   :  { %v13446_v47 = vadd.f32 %v4863_v39, %v14384_v0  ;;  %v5728_v12 = vadd.f32 %v5418_v58, %v13077_v36  ;;  %v8315_v37 = vpop.f32.mrb[61].mxu1  ;;  %v8421_v26 = vpop.f32.mrb[61].mxu0  ;;  %v5202_v36 = vld [vmem:[%s14012_s0 + $0x1e6] sm:$0xff] }
 0x553   :  { %v4866_v10 = vpop.f32.mrb[62].mxu1  ;;  %v5421_v24 = vpop.f32.mrb[62].mxu0  ;;  %v5251_v26 = vpack.c.bf16 %v5203_v31, %v5202_v36  ;;  %v5205_v36 = vld [vmem:[%s14012_s0 + $0x1fe] sm:$0xff] }
 0x554   :  { %v5812_v27 = vadd.f32 %v13443_v3, %v5728_v12  ;;  %v13451_v23 = vadd.f32 %v4866_v10, %v14385_v45  ;;  %v5729_v35 = vadd.f32 %v5421_v24, %v13083_v5  ;;  %v8422_v25 = vpop.f32.mrb[63].mxu0  ;;  %v8316_v59 = vpop.f32.mrb[63].mxu1  ;;  %v14387_v45 = vld [vmem:[#allocation40_spill] sm:$0xff] }
 0x556   :  { %v5813_v8 = vadd.f32 %v13443_v3, %v5729_v35  ;;  %8528 = vmatmul.mubr.msk.bf16.gmra.mrb[168].mxu0 %vm262_vm1, %v5250_v56  ;;  %v5889_v1 = vmax.f32 %v5812_v27, 0.0  ;;  %v14386_v35 = vld [vmem:[#allocation29_spill] sm:$0xff] }
 0x557   :  { %8531 = vmatprep.mubr.msk.bf16.mxu0 %vm8779_vm2, %v14047_v17 }
 0x558   :  { %v5890_v39 = vmax.f32 %v5813_v8, 0.0 }
 0x559   :  { %v4871_v5 = vpop.f32.mrb[64].mxu1  ;;  %v5426_v25 = vpop.f32.mrb[64].mxu0 }
 0x55a   :  { %v13464_v59 = vpack.c.bf16 %v5890_v39, %v5889_v1  ;;  %v13467_v58 = vadd.f32 %v4871_v5, %v14386_v35  ;;  %v5730_v0 = vadd.f32 %v5426_v25, %v13107_v54  ;;  %v8319_v12 = vpop.f32.mrb[65].mxu1  ;;  %v8425_v37 = vpop.f32.mrb[65].mxu0  ;;  %v5204_v54 = vld [vmem:[%s14012_s0 + $0x1f6] sm:$0xff] }
 0x55b   :  { %v4874_v56 = vpop.f32.mrb[66].mxu1  ;;  %v5429_v10 = vpop.f32.mrb[66].mxu0 }
 0x55c   :  { %v5814_v24 = vadd.f32 %v13443_v3, %v5730_v0  ;;  %v13472_v33 = vadd.f32 %v4874_v56, %v14387_v45  ;;  %v5731_v8 = vadd.f32 %v5429_v10, %v13113_v4  ;;  %v8426_v27 = vpop.f32.mrb[67].mxu0  ;;  %v8320_v1 = vpop.f32.mrb[67].mxu1  ;;  %v14388_v0 = vld [vmem:[#allocation17_spill] sm:$0xff]  ;;  %v5252_v10 = vpack.c.bf16 %v5205_v36, %v5204_v54  ;;  %v5207_v54 = vld [vmem:[%s14012_s0 + $0x20e] sm:$0xff] }
 0x55d   :  { %v14389_v1 = vld [vmem:[#allocation41_spill] sm:$0xff] }
 0x55e   :  { %v5815_v39 = vadd.f32 %v13443_v3, %v5731_v8  ;;  %8532 = vmatmul.mubr.msk.bf16.gmra.mrb[172].mxu0 %vm262_vm1, %v5251_v26  ;;  %v5891_v31 = vmax.f32 %v5814_v24, 0.0 }
 0x55f   :  { %8535 = vmatprep.mubr.msk.bf16.mxu0 %vm8779_vm2, %v14047_v17 }
 0x560   :  { %v5892_v5 = vmax.f32 %v5815_v39, 0.0 }
 0x561   :  { %v4879_v4 = vpop.f32.mrb[68].mxu1  ;;  %v5434_v25 = vpop.f32.mrb[68].mxu0 }
 0x562   :  { %v13485_v35 = vpack.c.bf16 %v5892_v5, %v5891_v31  ;;  %v13488_v12 = vadd.f32 %v4879_v4, %v14388_v0  ;;  %v5732_v37 = vadd.f32 %v5434_v25, %v13137_v19  ;;  %v8323_v26 = vpop.f32.mrb[69].mxu1  ;;  %v8429_v56 = vpop.f32.mrb[69].mxu0  ;;  %v5206_v19 = vld [vmem:[%s14012_s0 + $0x206] sm:$0xff] }
 0x563   :  { %v4882_v45 = vpop.f32.mrb[70].mxu1  ;;  %v5437_v8 = vpop.f32.mrb[70].mxu0 }
 0x564   :  { %v5816_v27 = vadd.f32 %v13443_v3, %v5732_v37  ;;  %v13493_v38 = vadd.f32 %v4882_v45, %v14389_v1  ;;  %v5733_v24 = vadd.f32 %v5437_v8, %v13143_v60  ;;  %v8430_v39 = vpop.f32.mrb[71].mxu0  ;;  %v8324_v31 = vpop.f32.mrb[71].mxu1  ;;  %v14390_v37 = vld [vmem:[#allocation42_spill] sm:$0xff]  ;;  %v5253_v8 = vpack.c.bf16 %v5207_v54, %v5206_v19  ;;  %v5209_v19 = vld [vmem:[%s14012_s0 + $0x21e] sm:$0xff] }
 0x565   :  { %v14391_v31 = vld [vmem:[#allocation19_spill] sm:$0xff] }
 0x566   :  { %v5817_v5 = vadd.f32 %v13443_v3, %v5733_v24  ;;  %8536 = vmatmul.mubr.msk.bf16.gmra.mrb[176].mxu0 %vm262_vm1, %v5252_v10  ;;  %v5893_v36 = vmax.f32 %v5816_v27, 0.0 }
 0x567   :  { %8539 = vmatprep.mubr.msk.bf16.mxu0 %vm8779_vm2, %v14047_v17 }
 0x568   :  { %v5894_v4 = vmax.f32 %v5817_v5, 0.0 }
 0x569   :  { %v4887_v60 = vpop.f32.mrb[72].mxu1  ;;  %v5442_v25 = vpop.f32.mrb[72].mxu0 }
 0x56a   :  { %v13506_v0 = vpack.c.bf16 %v5894_v4, %v5893_v36  ;;  %v13509_v26 = vadd.f32 %v4887_v60, %v14390_v37  ;;  %v5734_v56 = vadd.f32 %v5442_v25, %v13167_v9  ;;  %v8327_v10 = vpop.f32.mrb[73].mxu1  ;;  %v8433_v45 = vpop.f32.mrb[73].mxu0  ;;  %v5208_v9 = vld [vmem:[%s14012_s0 + $0x216] sm:$0xff] }
 0x56b   :  { %v4890_v1 = vpop.f32.mrb[74].mxu1  ;;  %v5445_v24 = vpop.f32.mrb[74].mxu0 }
 0x56c   :  { %v5818_v39 = vadd.f32 %v13443_v3, %v5734_v56  ;;  %v13514_v32 = vadd.f32 %v4890_v1, %v14391_v31  ;;  %v5735_v27 = vadd.f32 %v5445_v24, %v13173_v55  ;;  %v8434_v5 = vpop.f32.mrb[75].mxu0  ;;  %v8328_v36 = vpop.f32.mrb[75].mxu1  ;;  %v14393_v56 = vld [vmem:[#allocation37_spill] sm:$0xff]  ;;  %v5254_v24 = vpack.c.bf16 %v5209_v19, %v5208_v9  ;;  %v5211_v9 = vld [vmem:[%s14012_s0 + $0x22e] sm:$0xff] }
 0x56d   :  { %v14394_v36 = vld [vmem:[#allocation38_spill] sm:$0xff] }
 0x56e   :  { %14392 = vst [vmem:[#allocation22_spill] sm:$0xff] %v13514_v32  ;;  %v5819_v4 = vadd.f32 %v13443_v3, %v5735_v27  ;;  %8540 = vmatmul.mubr.msk.bf16.gmra.mrb[180].mxu0 %vm262_vm1, %v5253_v8  ;;  %v5895_v54 = vmax.f32 %v5818_v39, 0.0 }
 0x56f   :  { %8543 = vmatprep.mubr.msk.bf16.mxu0 %vm8779_vm2, %v14047_v17 }
 0x570   :  { %v5896_v60 = vmax.f32 %v5819_v4, 0.0 }
 0x571   :  { %v4895_v55 = vpop.f32.mrb[76].mxu1  ;;  %v5450_v25 = vpop.f32.mrb[76].mxu0 }
 0x572   :  { %v13527_v37 = vpack.c.bf16 %v5896_v60, %v5895_v54  ;;  %v13530_v10 = vadd.f32 %v4895_v55, %v14393_v56  ;;  %v5736_v45 = vadd.f32 %v5450_v25, %v13197_v48  ;;  %v8331_v8 = vpop.f32.mrb[77].mxu1  ;;  %v8437_v1 = vpop.f32.mrb[77].mxu0  ;;  %v5210_v48 = vld [vmem:[%s14012_s0 + $0x226] sm:$0xff] }
 0x573   :  { %v4898_v31 = vpop.f32.mrb[78].mxu1  ;;  %v5453_v27 = vpop.f32.mrb[78].mxu0 }
 0x574   :  { %v5820_v5 = vadd.f32 %v13443_v3, %v5736_v45  ;;  %v13535_v32 = vadd.f32 %v4898_v31, %v14394_v36  ;;  %v5737_v39 = vadd.f32 %v5453_v27, %v13203_v15  ;;  %v8438_v4 = vpop.f32.mrb[79].mxu0  ;;  %v8332_v54 = vpop.f32.mrb[79].mxu1  ;;  %v14396_v45 = vld [vmem:[#allocation21_spill] sm:$0xff]  ;;  %v5255_v27 = vpack.c.bf16 %v5211_v9, %v5210_v48 }
 0x575   :  { %v14397_v54 = vld [vmem:[#allocation30_spill] sm:$0xff]  ;;  %v5213_v48 = vld [vmem:[%s14012_s0 + $0x23e] sm:$0xff] }
 0x576   :  { %14395 = vst [vmem:[#allocation48_spill] sm:$0xff] %v13535_v32  ;;  %v5821_v60 = vadd.f32 %v13443_v3, %v5737_v39  ;;  %8544 = vmatmul.mubr.msk.bf16.gmra.mrb[184].mxu0 %vm262_vm1, %v5254_v24  ;;  %v5897_v19 = vmax.f32 %v5820_v5, 0.0 }
 0x577   :  { %8547 = vmatprep.mubr.msk.bf16.mxu0 %vm8779_vm2, %v14047_v17 }
 0x578   :  { %v5898_v55 = vmax.f32 %v5821_v60, 0.0 }
 0x579   :  { %v4903_v15 = vpop.f32.mrb[80].mxu1  ;;  %v5458_v25 = vpop.f32.mrb[80].mxu0 }
 0x57a   :  { %v13548_v56 = vpack.c.bf16 %v5898_v55, %v5897_v19  ;;  %v13551_v8 = vadd.f32 %v4903_v15, %v14396_v45  ;;  %v5738_v1 = vadd.f32 %v5458_v25, %v13227_v30  ;;  %v8335_v24 = vpop.f32.mrb[81].mxu1  ;;  %v8441_v31 = vpop.f32.mrb[81].mxu0  ;;  %v5212_v30 = vld [vmem:[%s14012_s0 + $0x236] sm:$0xff] }
 0x57b   :  { %v4906_v36 = vpop.f32.mrb[82].mxu1  ;;  %v5461_v39 = vpop.f32.mrb[82].mxu0 }
 0x57c   :  { %v5822_v4 = vadd.f32 %v13443_v3, %v5738_v1  ;;  %v13556_v32 = vadd.f32 %v4906_v36, %v14397_v54  ;;  %v5739_v5 = vadd.f32 %v5461_v39, %v13233_v29  ;;  %v8442_v60 = vpop.f32.mrb[83].mxu0  ;;  %v8336_v19 = vpop.f32.mrb[83].mxu1  ;;  %v14399_v1 = vld [vmem:[#allocation43_spill] sm:$0xff]  ;;  %v5256_v39 = vpack.c.bf16 %v5213_v48, %v5212_v30 }
 0x57d   :  { %v14400_v19 = vld [vmem:[#allocation23_spill] sm:$0xff] }
 0x57e   :  { %14398 = vst [vmem:[#allocation24_spill] sm:$0xff] %v13556_v32  ;;  %v5823_v55 = vadd.f32 %v13443_v3, %v5739_v5  ;;  %8548 = vmatmul.mubr.msk.bf16.gmra.mrb[188].mxu0 %vm262_vm1, %v5255_v27  ;;  %v5899_v9 = vmax.f32 %v5822_v4, 0.0  ;;  %v5215_v30 = vld [vmem:[%s14012_s0 + $0x24e] sm:$0xff] }
 0x57f   :  { %8551 = vmatprep.mubr.msk.bf16.mxu0 %vm8779_vm2, %v14047_v17 }
 0x580   :  { %v5900_v15 = vmax.f32 %v5823_v55, 0.0 }
 0x581   :  { %v4911_v29 = vpop.f32.mrb[84].mxu1  ;;  %v5466_v25 = vpop.f32.mrb[84].mxu0 }
 0x582   :  { %v13569_v45 = vpack.c.bf16 %v5900_v15, %v5899_v9  ;;  %v13572_v24 = vadd.f32 %v4911_v29, %v14399_v1  ;;  %v5740_v31 = vadd.f32 %v5466_v25, %v13257_v46  ;;  %v8339_v27 = vpop.f32.mrb[85].mxu1  ;;  %v8445_v36 = vpop.f32.mrb[85].mxu0  ;;  %v5214_v46 = vld [vmem:[%s14012_s0 + $0x246] sm:$0xff] }
 0x583   :  { %v4914_v54 = vpop.f32.mrb[86].mxu1  ;;  %v5469_v5 = vpop.f32.mrb[86].mxu0 }
 0x584   :  { %v5824_v60 = vadd.f32 %v13443_v3, %v5740_v31  ;;  %v13577_v32 = vadd.f32 %v4914_v54, %v14400_v19  ;;  %v5741_v4 = vadd.f32 %v5469_v5, %v13263_v14  ;;  %v8446_v55 = vpop.f32.mrb[87].mxu0  ;;  %v8340_v9 = vpop.f32.mrb[87].mxu1  ;;  %v14402_v31 = vld [vmem:[#allocation31_spill] sm:$0xff]  ;;  %v5257_v5 = vpack.c.bf16 %v5215_v30, %v5214_v46  ;;  %v5217_v46 = vld [vmem:[%s14012_s0 + $0x25e] sm:$0xff] }
 0x585   :  { %v14403_v9 = vld [vmem:[#allocation44_spill] sm:$0xff] }
 0x586   :  { %14401 = vst [vmem:[#allocation25_spill] sm:$0xff] %v13577_v32  ;;  %v5825_v15 = vadd.f32 %v13443_v3, %v5741_v4  ;;  %8552 = vmatmul.mubr.msk.bf16.gmra.mrb[192].mxu0 %vm262_vm1, %v5256_v39  ;;  %v5901_v48 = vmax.f32 %v5824_v60, 0.0 }
 0x587   :  { %8555 = vmatprep.mubr.msk.bf16.mxu0 %vm8779_vm2, %v14047_v17 }
 0x588   :  { %v5902_v29 = vmax.f32 %v5825_v15, 0.0 }
 0x589   :  { %v4919_v14 = vpop.f32.mrb[88].mxu1  ;;  %v5474_v25 = vpop.f32.mrb[88].mxu0 }
 0x58a   :  { %v13590_v1 = vpack.c.bf16 %v5902_v29, %v5901_v48  ;;  %v13593_v27 = vadd.f32 %v4919_v14, %v14402_v31  ;;  %v5742_v36 = vadd.f32 %v5474_v25, %v13287_v63  ;;  %v8343_v39 = vpop.f32.mrb[89].mxu1  ;;  %v8449_v54 = vpop.f32.mrb[89].mxu0  ;;  %v5216_v63 = vld [vmem:[%s14012_s0 + $0x256] sm:$0xff] }
 0x58b   :  { %v4922_v19 = vpop.f32.mrb[90].mxu1  ;;  %v5477_v4 = vpop.f32.mrb[90].mxu0  ;;  %v5258_v31 = vpack.c.bf16 %v5217_v46, %v5216_v63 }
 0x58c   :  { %v5826_v55 = vadd.f32 %v13443_v3, %v5742_v36  ;;  %v13598_v32 = vadd.f32 %v4922_v19, %v14403_v9  ;;  %v5743_v60 = vadd.f32 %v5477_v4, %v13293_v11  ;;  %v8450_v15 = vpop.f32.mrb[91].mxu0  ;;  %v8344_v48 = vpop.f32.mrb[91].mxu1  ;;  %v8780_v4 = vmov 1983009808  }
 0x58d   :  { %v5972_v9 = vunpack.c.l.s4 %v8780_v4  ;;  %v5974_v48 = vlaneseq }
 0x58e   :  { %v5827_v29 = vadd.f32 %v13443_v3, %v5743_v60  ;;  %8556 = vmatmul.mubr.msk.bf16.gmra.mrb[196].mxu0 %vm262_vm1, %v5257_v5  ;;  %v5903_v30 = vmax.f32 %v5826_v55, 0.0 }
 0x58f   :  { %8559 = vmatprep.mubr.msk.bf16.mxu0 %vm8779_vm2, %v14047_v17 }
 0x590   :  { %v5904_v14 = vmax.f32 %v5827_v29, 0.0 }
 0x591   :  { %v4927_v11 = vpop.f32.mrb[92].mxu1  ;;  %v5482_v25 = vpop.f32.mrb[92].mxu0 }
 0x592   :  { %v13611_v36 = vpack.c.bf16 %v5904_v14, %v5903_v30  ;;  %v13614_v39 = vadd.f32 %v4927_v11, %v12930_v51  ;;  %v5744_v54 = vadd.f32 %v5482_v25, %v13317_v52  ;;  %v8347_v5 = vpop.f32.mrb[93].mxu1  ;;  %v8453_v19 = vpop.f32.mrb[93].mxu0  ;;  %v5973_v51 = vunpack.c.0.s8 %v5972_v9  ;;  %v5218_v11 = vld [vmem:[%s14012_s0 + $0x266] sm:$0xff] }
 0x593   :  { %v4930_v60 = vpop.f32.mrb[94].mxu1  ;;  %v5485_v15 = vpop.f32.mrb[94].mxu0  ;;  %v5975_v14 = vshrl.u32 %v5974_v48, 7 }
 0x594   :  { %v5828_v55 = vadd.f32 %v13443_v3, %v5744_v54  ;;  %v13619_v29 = vadd.f32 %v4930_v60, %v12936_v40  ;;  %v5745_v63 = vadd.f32 %v5485_v15, %v13323_v43  ;;  %v8454_v46 = vpop.f32.mrb[95].mxu0  ;;  %v8348_v30 = vpop.f32.mrb[95].mxu1  ;;  %v5219_v40 = vld [vmem:[%s14012_s0 + $0x26e] sm:$0xff]  ;;  %v13635_v43 = vld [vmem:[%s14015_s3] sm:$0xff] }
 0x595   :  { %v13637_v25 = vsub.s32 %v5973_v51, %v5975_v14  ;;  %v5259_v46 = vpack.c.bf16 %v5219_v40, %v5218_v11 }
 0x596   :  { %14404 = vst [vmem:[#allocation26_spill] sm:$0xff] %v13619_v29  ;;  %v5829_v52 = vadd.f32 %v13443_v3, %v5745_v63  ;;  %8560 = vmatmul.mubr.msk.bf16.gmra.mrb[200].mxu0 %vm262_vm1, %v5258_v31  ;;  %v5905_v54 = vmax.f32 %v5828_v55, 0.0 }
 0x597   :  { %8563 = vmatprep.mubr.msk.bf16.mxu0 %vm8779_vm2, %v14047_v17  ;;  %v13641_v4 = vrot.slane %v13635_v43, %v13637_v25 }
 0x598   :  { %v5906_v31 = vmax.f32 %v5829_v52, 0.0 }
 0x599   :  { %v4935_v5 = vpop.f32.mrb[96].mxu1  ;;  %v5490_v19 = vpop.f32.mrb[96].mxu0  ;;  %v5985_v55 = vcombine.high %v13641_v4, %v13641_v4 }
 0x59a   :  { %v13644_v9 = vadd.f32 %v4935_v5, %v12960_v28  ;;  %v5746_v60 = vadd.f32 %v5490_v19, %v13347_v13  ;;  %v8351_v15 = vpop.f32.mrb[97].mxu1  ;;  %v8457_v48 = vpop.f32.mrb[97].mxu0  ;;  %v8639_v63 = vpack.c.bf16 %v5906_v31, %v5905_v54 }
 0x59b   :  { %v4938_v30 = vpop.f32.mrb[98].mxu1  ;;  %v5493_v51 = vpop.f32.mrb[98].mxu0  ;;  %6069 = vmatprep.mubr.f32.mxu1 %v5985_v55 }
 0x59c   :  { %v5830_v14 = vadd.f32 %v13443_v3, %v5746_v60  ;;  %v13651_v52 = vadd.f32 %v4938_v30, %v12966_v6  ;;  %v5747_v29 = vadd.f32 %v5493_v51, %v13353_v62  ;;  %8640 = vmatprep.subr.bf16.mxu1 %v8639_v63  ;;  %v8352_v28 = vpop.f32.mrb[99].mxu1  ;;  %v8458_v5 = vpop.f32.mrb[99].mxu0  ;;  %v5220_v6 = vld [vmem:[%s14012_s0 + $0x276] sm:$0xff]  ;;  %v5221_v62 = vld [vmem:[%s14012_s0 + $0x27e] sm:$0xff] }
 0x59d   :  { %8642 = vmatpush3.bf16.msra.mxu1 %v13464_v59  ;;  %v5260_v48 = vpack.c.bf16 %v5221_v62, %v5220_v6 }
 0x59e   :  { %v5831_v13 = vadd.f32 %v13443_v3, %v5747_v29  ;;  %8564 = vmatmul.mubr.msk.bf16.gmra.mrb[204].mxu0 %vm262_vm1, %v5259_v46  ;;  %v5907_v11 = vmax.f32 %v5830_v14, 0.0 }
 0x59f   :  { %8567 = vmatprep.mubr.msk.bf16.mxu0 %vm8779_vm2, %v14047_v17 }
 0x5a0   :  { %v5908_v40 = vmax.f32 %v5831_v13, 0.0 }
 0x5a1   :  { %v4943_v54 = vpop.f32.mrb[100].mxu1  ;;  %v5498_v59 = vpop.f32.mrb[100].mxu0 }
 0x5a2   :  { %v13666_v31 = vadd.f32 %v4943_v54, %v12990_v50  ;;  %v5748_v29 = vadd.f32 %v5498_v59, %v13377_v61  ;;  %v8355_v19 = vpop.f32.mrb[101].mxu1  ;;  %v8461_v60 = vpop.f32.mrb[101].mxu0  ;;  %v8643_v15 = vpack.c.bf16 %v5908_v40, %v5907_v11  ;;  %v5222_v61 = vld [vmem:[%s14012_s0 + $0x286] sm:$0x3f] }
 0x5a3   :  { %v4946_v63 = vpop.f32.mrb[102].mxu1  ;;  %v5501_v46 = vpop.f32.mrb[102].mxu0  ;;  %v5261_v54 = vpack.c.bf16 %v5222_v61, %v5222_v61 }
 0x5a4   :  { %v5832_v30 = vadd.f32 %v13443_v3, %v5748_v29  ;;  %v13671_v51 = vadd.f32 %v4946_v63, %v12996_v21  ;;  %v5749_v55 = vadd.f32 %v5501_v46, %v13383_v44  ;;  %8644 = vmatprep.subr.bf16.mxu1 %v8643_v15  ;;  %v8356_v14 = vpop.f32.mrb[103].mxu1  ;;  %v8462_v28 = vpop.f32.mrb[103].mxu0 }
 0x5a5   :  { %8646 = vmatpush3.bf16.msra.mxu1 %v13485_v35 }
 0x5a6   :  { %v5833_v50 = vadd.f32 %v13443_v3, %v5749_v55  ;;  %8568 = vmatmul.mubr.msk.bf16.gmra.mrb[208].mxu0 %vm262_vm1, %v5260_v48  ;;  %v5909_v21 = vmax.f32 %v5832_v30, 0.0 }
 0x5a7   :  { %8571 = vmatprep.mubr.msk.bf16.mxu0 %vm8779_vm2, %v14047_v17 }
 0x5a8   :  { %v5910_v5 = vmax.f32 %v5833_v50, 0.0 }
 0x5a9   :  { %v4951_v13 = vpop.f32.mrb[104].mxu1  ;;  %v5506_v44 = vpop.f32.mrb[104].mxu0 }
 0x5aa   :  { %v13683_v6 = vadd.f32 %v4951_v13, %v13020_v22  ;;  %v5750_v35 = vadd.f32 %v5506_v44, %v13404_v57  ;;  %v8359_v62 = vpop.f32.mrb[105].mxu1  ;;  %v8465_v11 = vpop.f32.mrb[105].mxu0  ;;  %v8647_v40 = vpack.c.bf16 %v5910_v5, %v5909_v21 }
 0x5ab   :  { %v4954_v59 = vpop.f32.mrb[106].mxu1  ;;  %v5509_v29 = vpop.f32.mrb[106].mxu0 }
 0x5ac   :  { %v5834_v19 = vadd.f32 %v13443_v3, %v5750_v35  ;;  %v13688_v60 = vadd.f32 %v4954_v59, %v13026_v18  ;;  %v5751_v15 = vadd.f32 %v5509_v29, %v13410_v7  ;;  %8648 = vmatprep.subr.bf16.mxu1 %v8647_v40  ;;  %v8360_v48 = vpop.f32.mrb[107].mxu1  ;;  %v8466_v63 = vpop.f32.mrb[107].mxu0 }
 0x5ad   :  { %8650 = vmatpush3.bf16.msra.mxu1 %v13506_v0 }
 0x5ae   :  { %v5835_v22 = vadd.f32 %v13443_v3, %v5751_v15  ;;  %8572 = vmatmul.mubr.msk.bf16.gmra.mrb[212].mxu0 %vm262_vm1, %v5261_v54  ;;  %v5911_v57 = vmax.f32 %v5834_v19, 0.0 }
 0x5b0   :  { %v5912_v46 = vmax.f32 %v5835_v22, 0.0 }
 0x5b1   :  { %v4959_v30 = vpop.f32.mrb[108].mxu1  ;;  %v5514_v55 = vpop.f32.mrb[108].mxu0 }
 0x5b2   :  { %v13695_v14 = vadd.f32 %v4959_v30, %v13050_v16  ;;  %v5752_v18 = vadd.f32 %v5514_v55, %v13426_v53  ;;  %v8363_v28 = vpop.f32.mrb[109].mxu1  ;;  %v8469_v7 = vpop.f32.mrb[109].mxu0  ;;  %v8651_v50 = vpack.c.bf16 %v5912_v46, %v5911_v57 }
 0x5b3   :  { %v4962_v61 = vpop.f32.mrb[110].mxu1  ;;  %v5517_v21 = vpop.f32.mrb[110].mxu0 }
 0x5b4   :  { %v5836_v0 = vadd.f32 %v13443_v3, %v5752_v18  ;;  %v13700_v5 = vadd.f32 %v4962_v61, %v13053_v49  ;;  %v5753_v13 = vadd.f32 %v5517_v21, %v13429_v2  ;;  %8652 = vmatprep.subr.bf16.mxu1 %v8651_v50  ;;  %v8364_v44 = vpop.f32.mrb[111].mxu1  ;;  %v8470_v35 = vpop.f32.mrb[111].mxu0 }
 0x5b5   :  { %8654 = vmatpush3.bf16.msra.mxu1 %v13527_v37 }
 0x5b6   :  { %v5837_v16 = vadd.f32 %v13443_v3, %v5753_v13  ;;  %v5913_v53 = vmax.f32 %v5836_v0, 0.0  ;;  %v14405_v0 = vld [vmem:[#allocation32_spill] sm:$0xff] }
 0x5b8   :  { %v5914_v62 = vmax.f32 %v5837_v16, 0.0 }
 0x5b9   :  { %v4967_v11 = vpop.f32.mrb[112].mxu1  ;;  %v5522_v40 = vpop.f32.mrb[112].mxu0 }
 0x5ba   :  { %v13706_v54 = vadd.f32 %v4967_v11, %v13074_v20  ;;  %v5754_v59 = vadd.f32 %v5522_v40, %v13446_v47  ;;  %v8367_v49 = vpop.f32.mrb[113].mxu1  ;;  %v8473_v29 = vpop.f32.mrb[113].mxu0  ;;  %v8655_v19 = vpack.c.bf16 %v5914_v62, %v5913_v53 }
 0x5bb   :  { %v4970_v2 = vpop.f32.mrb[114].mxu1  ;;  %v5525_v15 = vpop.f32.mrb[114].mxu0 }
 0x5bc   :  { %v5838_v48 = vadd.f32 %v13443_v3, %v5754_v59  ;;  %v13711_v37 = vadd.f32 %v4970_v2, %v13080_v41  ;;  %v5755_v63 = vadd.f32 %v5525_v15, %v13451_v23  ;;  %8656 = vmatprep.subr.bf16.mxu1 %v8655_v19  ;;  %v8368_v22 = vpop.f32.mrb[115].mxu1  ;;  %v8474_v57 = vpop.f32.mrb[115].mxu0  ;;  %v14406_v15 = vld [vmem:[#allocation33_spill] sm:$0xff] }
 0x5bd   :  { %8658 = vmatpush3.bf16.msra.mxu1 %v13548_v56 }
 0x5be   :  { %v5839_v20 = vadd.f32 %v13443_v3, %v5755_v63  ;;  %v5915_v47 = vmax.f32 %v5838_v48, 0.0 }
 0x5c0   :  { %v5916_v46 = vmax.f32 %v5839_v20, 0.0 }
 0x5c1   :  { %v4975_v30 = vpop.f32.mrb[116].mxu1  ;;  %v5530_v55 = vpop.f32.mrb[116].mxu0 }
 0x5c2   :  { %v13717_v18 = vadd.f32 %v4975_v30, %v13104_v34  ;;  %v5756_v28 = vadd.f32 %v5530_v55, %v13467_v58  ;;  %v8371_v41 = vpop.f32.mrb[117].mxu1  ;;  %v8477_v7 = vpop.f32.mrb[117].mxu0  ;;  %v8659_v50 = vpack.c.bf16 %v5916_v46, %v5915_v47  ;;  %v5970_v46 = vcombine.high %v13635_v43, %v13635_v43  ;;  %v14407_v30 = vld [vmem:[#allocation39_spill] sm:$0xff] }
 0x5c3   :  { %v4978_v23 = vpop.f32.mrb[118].mxu1  ;;  %v5533_v61 = vpop.f32.mrb[118].mxu0 }
 0x5c4   :  { %v5840_v21 = vadd.f32 %v13443_v3, %v5756_v28  ;;  %v13722_v56 = vadd.f32 %v4978_v23, %v14405_v0  ;;  %v5757_v13 = vadd.f32 %v5533_v61, %v13472_v33  ;;  %8660 = vmatprep.subr.bf16.mxu1 %v8659_v50  ;;  %v8372_v44 = vpop.f32.mrb[119].mxu1  ;;  %v8478_v35 = vpop.f32.mrb[119].mxu0 }
 0x5c5   :  { %8662 = vmatpush3.bf16.msra.mxu1 %v13569_v45 }
 0x5c6   :  { %v5841_v34 = vadd.f32 %v13443_v3, %v5757_v13  ;;  %v5917_v58 = vmax.f32 %v5840_v21, 0.0  ;;  %v14408_v21 = vld [vmem:[#allocation34_spill] sm:$0xff] }
 0x5c7   :  { %v14409_v13 = vld [vmem:[#allocation22_spill] sm:$0xff] }
 0x5c8   :  { %v5918_v16 = vmax.f32 %v5841_v34, 0.0 }
 0x5c9   :  { %v4983_v53 = vpop.f32.mrb[120].mxu1  ;;  %v5538_v62 = vpop.f32.mrb[120].mxu0 }
 0x5ca   :  { %v13728_v11 = vadd.f32 %v4983_v53, %v13134_v42  ;;  %v5758_v40 = vadd.f32 %v5538_v62, %v13488_v12  ;;  %v8375_v59 = vpop.f32.mrb[121].mxu1  ;;  %v8481_v49 = vpop.f32.mrb[121].mxu0  ;;  %v8663_v29 = vpack.c.bf16 %v5918_v16, %v5917_v58 }
 0x5cb   :  { %v4986_v33 = vpop.f32.mrb[122].mxu1  ;;  %v5541_v19 = vpop.f32.mrb[122].mxu0 }
 0x5cc   :  { %v5842_v2 = vadd.f32 %v13443_v3, %v5758_v40  ;;  %v13733_v45 = vadd.f32 %v4986_v33, %v14406_v15  ;;  %v5759_v48 = vadd.f32 %v5541_v19, %v13493_v38  ;;  %8664 = vmatprep.subr.bf16.mxu1 %v8663_v29  ;;  %v8376_v63 = vpop.f32.mrb[123].mxu1  ;;  %v8482_v22 = vpop.f32.mrb[123].mxu0  ;;  %v14410_v40 = vld [vmem:[#allocation35_spill] sm:$0xff]  ;;  %v14411_v15 = vld [vmem:[#allocation36_spill] sm:$0xff] }
 0x5cd   :  { %8666 = vmatpush3.bf16.msra.mxu1 %v13590_v1  ;;  %v13745_v1 = vrot.slane %v5970_v46, %v13637_v25 }
 0x5ce   :  { %v5843_v42 = vadd.f32 %v13443_v3, %v5759_v48  ;;  %v5919_v12 = vmax.f32 %v5842_v2, 0.0 }
 0x5d0   :  { %v5920_v57 = vmax.f32 %v5843_v42, 0.0 }
 0x5d1   :  { %v4991_v20 = vpop.f32.mrb[124].mxu1  ;;  %v5546_v47 = vpop.f32.mrb[124].mxu0 }
 0x5d2   :  { %v13741_v55 = vadd.f32 %v4991_v20, %v14407_v30  ;;  %v5760_v28 = vadd.f32 %v5546_v47, %v13509_v26  ;;  %v8379_v38 = vpop.f32.mrb[125].mxu1  ;;  %v8485_v41 = vpop.f32.mrb[125].mxu0  ;;  %v8667_v7 = vpack.c.bf16 %v5920_v57, %v5919_v12  ;;  %v5986_v26 = vcombine.high %v13745_v1, %v13745_v1  ;;  %v14413_v30 = vld [vmem:[#allocation5_spill] sm:$0xff] }
 0x5d3   :  { %v4994_v50 = vpop.f32.mrb[126].mxu1  ;;  %v5549_v23 = vpop.f32.mrb[126].mxu0 }
 0x5d4   :  { %v5844_v61 = vadd.f32 %v13443_v3, %v5760_v28  ;;  %v13749_v0 = vadd.f32 %v4994_v50, %v14408_v21  ;;  %v5761_v43 = vadd.f32 %v5549_v23, %v14409_v13  ;;  %8668 = vmatprep.subr.bf16.mxu1 %v8667_v7  ;;  %v8380_v44 = vpop.f32.mrb[127].mxu1  ;;  %v8486_v35 = vpop.f32.mrb[127].mxu0  ;;  %v14414_v21 = vld [vmem:[#allocation6_spill] sm:$0xff] }
 0x5d5   :  { %8670 = vmatpush3.bf16.msra.mxu1 %v13611_v36 }
 0x5d6   :  { %v5845_v34 = vadd.f32 %v13443_v3, %v5761_v43  ;;  %v5921_v58 = vmax.f32 %v5844_v61, 0.0  ;;  %v14415_v43 = vld [vmem:[#allocation24_spill] sm:$0xff] }
 0x5d8   :  { %v5922_v25 = vmax.f32 %v5845_v34, 0.0  ;;  %6070 = vmatmul.mubr.f32.vlgmr.msra.gmra.mrb[164].mxu1 %v13641_v4  ;;  %v14412_v4 = vld [vmem:[#allocation48_spill] sm:$0xff] }
 0x5d9   :  { %v4999_v16 = vpop.f32.mrb[128].mxu1  ;;  %v5554_v53 = vpop.f32.mrb[128].mxu0  ;;  %6139 = vmatprep.mubr.f32.mxu1 %v5986_v26 }
 0x5da   :  { %v13757_v62 = vpack.c.bf16 %v5922_v25, %v5921_v58  ;;  %v13760_v59 = vadd.f32 %v4999_v16, %v14410_v40  ;;  %v5762_v49 = vadd.f32 %v5554_v53, %v13530_v10  ;;  %v8383_v36 = vpop.f32.mrb[129].mxu1  ;;  %v8489_v29 = vpop.f32.mrb[129].mxu0  ;;  %v14416_v40 = vld [vmem:[#allocation7_spill] sm:$0xff] }
 0x5db   :  { %v5002_v33 = vpop.f32.mrb[130].mxu1  ;;  %v5557_v19 = vpop.f32.mrb[130].mxu0 }
 0x5dc   :  { %v5846_v2 = vadd.f32 %v13443_v3, %v5762_v49  ;;  %v13765_v48 = vadd.f32 %v5002_v33, %v14411_v15  ;;  %v5763_v63 = vadd.f32 %v5557_v19, %v14412_v4  ;;  %v8384_v22 = vpop.f32.mrb[131].mxu1  ;;  %v8490_v42 = vpop.f32.mrb[131].mxu0  ;;  %v14417_v4 = vld [vmem:[#allocation8_spill] sm:$0xff] }
 0x5dd   :  { %v14418_v22 = vld [vmem:[#allocation25_spill] sm:$0xff] }
 0x5de   :  { %v5847_v12 = vadd.f32 %v13443_v3, %v5763_v63  ;;  %v5923_v57 = vmax.f32 %v5846_v2, 0.0 }
 0x5e0   :  { %v5924_v20 = vmax.f32 %v5847_v12, 0.0 }
 0x5e1   :  { %v5007_v47 = vpop.f32.mrb[132].mxu1  ;;  %v5562_v46 = vpop.f32.mrb[132].mxu0 }
 0x5e2   :  { %v13769_v10 = vpack.c.bf16 %v5924_v20, %v5923_v57  ;;  %v13772_v28 = vadd.f32 %v5007_v47, %v14413_v30  ;;  %v5764_v38 = vadd.f32 %v5562_v46, %v13551_v8  ;;  %v8387_v41 = vpop.f32.mrb[133].mxu1  ;;  %v8493_v7 = vpop.f32.mrb[133].mxu0 }
 0x5e3   :  { %v5010_v50 = vpop.f32.mrb[134].mxu1  ;;  %v5565_v23 = vpop.f32.mrb[134].mxu0  ;;  %v14419_v41 = vld [vmem:[#allocation9_spill] sm:$0xff] }
 0x5e4   :  { %v5848_v61 = vadd.f32 %v13443_v3, %v5764_v38  ;;  %v13777_v13 = vadd.f32 %v5010_v50, %v14414_v21  ;;  %v5765_v44 = vadd.f32 %v5565_v23, %v14415_v43  ;;  %v8388_v35 = vpop.f32.mrb[135].mxu1  ;;  %v8494_v26 = vpop.f32.mrb[135].mxu0 }
 0x5e5   :  { %v14420_v35 = vld [vmem:[#allocation10_spill] sm:$0xff] }
 0x5e6   :  { %v5849_v34 = vadd.f32 %v13443_v3, %v5765_v44  ;;  %v5925_v58 = vmax.f32 %v5848_v61, 0.0 }
 0x5e8   :  { %v5926_v25 = vmax.f32 %v5849_v34, 0.0 }
 0x5e9   :  { %v5015_v16 = vpop.f32.mrb[136].mxu1  ;;  %v5570_v53 = vpop.f32.mrb[136].mxu0 }
 0x5ea   :  { %v13781_v8 = vpack.c.bf16 %v5926_v25, %v5925_v58  ;;  %v13784_v49 = vadd.f32 %v5015_v16, %v14416_v40  ;;  %v5766_v36 = vadd.f32 %v5570_v53, %v13572_v24  ;;  %v8391_v29 = vpop.f32.mrb[137].mxu1  ;;  %v8497_v33 = vpop.f32.mrb[137].mxu0 }
 0x5eb   :  { %v5018_v19 = vpop.f32.mrb[138].mxu1  ;;  %v5573_v2 = vpop.f32.mrb[138].mxu0  ;;  %v14421_v33 = vld [vmem:[#allocation12_spill] sm:$0xff] }
 0x5ec   :  { %v5850_v15 = vadd.f32 %v13443_v3, %v5766_v36  ;;  %v13789_v63 = vadd.f32 %v5018_v19, %v14417_v4  ;;  %v5767_v42 = vadd.f32 %v5573_v2, %v14418_v22  ;;  %v8392_v12 = vpop.f32.mrb[139].mxu1  ;;  %v8498_v57 = vpop.f32.mrb[139].mxu0 }
 0x5ed   :  { %v14422_v12 = vld [vmem:[#allocation13_spill] sm:$0xff] }
 0x5ee   :  { %v5851_v20 = vadd.f32 %v13443_v3, %v5767_v42  ;;  %v5927_v47 = vmax.f32 %v5850_v15, 0.0 }
 0x5f0   :  { %v5928_v46 = vmax.f32 %v5851_v20, 0.0  ;;  %v14423_v20 = vld [vmem:[#allocation26_spill] sm:$0xff] }
 0x5f1   :  { %v5023_v30 = vpop.f32.mrb[140].mxu1  ;;  %v5578_v38 = vpop.f32.mrb[140].mxu0 }
 0x5f2   :  { %v13793_v24 = vpack.c.bf16 %v5928_v46, %v5927_v47  ;;  %v13796_v7 = vadd.f32 %v5023_v30, %v14419_v41  ;;  %v5768_v50 = vadd.f32 %v5578_v38, %v13593_v27  ;;  %v8395_v23 = vpop.f32.mrb[141].mxu1  ;;  %v8501_v61 = vpop.f32.mrb[141].mxu0 }
 0x5f3   :  { %v5026_v21 = vpop.f32.mrb[142].mxu1  ;;  %v5581_v43 = vpop.f32.mrb[142].mxu0 }
 0x5f4   :  { %v5852_v44 = vadd.f32 %v13443_v3, %v5768_v50  ;;  %v13801_v26 = vadd.f32 %v5026_v21, %v14420_v35  ;;  %v5769_v34 = vadd.f32 %v5581_v43, %v13598_v32  ;;  %v8396_v58 = vpop.f32.mrb[143].mxu1  ;;  %v8502_v25 = vpop.f32.mrb[143].mxu0  ;;  %v14424_v21 = vld [vmem:[#allocation15_spill] sm:$0xff] }
 0x5f6   :  { %v5853_v16 = vadd.f32 %v13443_v3, %v5769_v34  ;;  %v5929_v53 = vmax.f32 %v5852_v44, 0.0 }
 0x5f8   :  { %v5930_v40 = vmax.f32 %v5853_v16, 0.0 }
 0x5f9   :  { %v5031_v36 = vpop.f32.mrb[144].mxu1  ;;  %v5586_v29 = vpop.f32.mrb[144].mxu0 }
 0x5fa   :  { %v13805_v27 = vpack.c.bf16 %v5930_v40, %v5929_v53  ;;  %v13808_v19 = vadd.f32 %v5031_v36, %v14421_v33  ;;  %v5770_v2 = vadd.f32 %v5586_v29, %v13614_v39  ;;  %v8399_v15 = vpop.f32.mrb[145].mxu1  ;;  %v8505_v4 = vpop.f32.mrb[145].mxu0  ;;  %v14425_v53 = vld [vmem:[#allocation16_spill] sm:$0xff] }
 0x5fb   :  { %v5034_v22 = vpop.f32.mrb[146].mxu1  ;;  %v5589_v42 = vpop.f32.mrb[146].mxu0 }
 0x5fc   :  { %v5854_v32 = vadd.f32 %v13443_v3, %v5770_v2  ;;  %v13813_v57 = vadd.f32 %v5034_v22, %v14422_v12  ;;  %v5771_v47 = vadd.f32 %v5589_v42, %v14423_v20  ;;  %v8400_v46 = vpop.f32.mrb[147].mxu1  ;;  %v8506_v30 = vpop.f32.mrb[147].mxu0 }
 0x5fe   :  { %v5855_v38 = vadd.f32 %v13443_v3, %v5771_v47  ;;  %v5931_v41 = vmax.f32 %v5854_v32, 0.0  ;;  %v14426_v32 = vld [vmem:[#allocation45_spill] sm:$0xff] }
 0x600   :  { %v5932_v50 = vmax.f32 %v5855_v38, 0.0 }
 0x601   :  { %v5039_v23 = vpop.f32.mrb[148].mxu1  ;;  %v5594_v61 = vpop.f32.mrb[148].mxu0 }
 0x602   :  { %v13817_v39 = vpack.c.bf16 %v5932_v50, %v5931_v41  ;;  %v13820_v43 = vadd.f32 %v5039_v23, %v14424_v21  ;;  %v5772_v44 = vadd.f32 %v5594_v61, %v13644_v9  ;;  %v8403_v35 = vpop.f32.mrb[149].mxu1  ;;  %v8509_v34 = vpop.f32.mrb[149].mxu0  ;;  %v14427_v41 = vld [vmem:[#allocation18_spill] sm:$0xff] }
 0x603   :  { %v5042_v58 = vpop.f32.mrb[150].mxu1  ;;  %v5597_v25 = vpop.f32.mrb[150].mxu0 }
 0x604   :  { %v5856_v16 = vadd.f32 %v13443_v3, %v5772_v44  ;;  %v13825_v40 = vadd.f32 %v5042_v58, %v14425_v53  ;;  %v5773_v36 = vadd.f32 %v5597_v25, %v13651_v52  ;;  %v8404_v29 = vpop.f32.mrb[151].mxu1  ;;  %v8510_v33 = vpop.f32.mrb[151].mxu0 }
 0x606   :  { %v5857_v2 = vadd.f32 %v13443_v3, %v5773_v36  ;;  %v5933_v15 = vmax.f32 %v5856_v16, 0.0  ;;  %v14428_v16 = vld [vmem:[#allocation46_spill] sm:$0xff] }
 0x608   :  { %v5934_v4 = vmax.f32 %v5857_v2, 0.0 }
 0x609   :  { %v5047_v22 = vpop.f32.mrb[152].mxu1  ;;  %v5602_v42 = vpop.f32.mrb[152].mxu0 }
 0x60a   :  { %v13829_v9 = vpack.c.bf16 %v5934_v4, %v5933_v15  ;;  %v13832_v12 = vadd.f32 %v5047_v22, %v14426_v32  ;;  %v5774_v20 = vadd.f32 %v5602_v42, %v13666_v31  ;;  %v8407_v47 = vpop.f32.mrb[153].mxu1  ;;  %v8513_v46 = vpop.f32.mrb[153].mxu0  ;;  %v14429_v4 = vld [vmem:[#allocation20_spill] sm:$0xff] }
 0x60b   :  { %v5050_v30 = vpop.f32.mrb[154].mxu1  ;;  %v5605_v38 = vpop.f32.mrb[154].mxu0 }
 0x60c   :  { %v5858_v52 = vadd.f32 %v13443_v3, %v5774_v20  ;;  %v13837_v50 = vadd.f32 %v5050_v30, %v14427_v41  ;;  %v5775_v23 = vadd.f32 %v5605_v38, %v13671_v51  ;;  %v8408_v61 = vpop.f32.mrb[155].mxu1  ;;  %v8514_v21 = vpop.f32.mrb[155].mxu0 }
 0x60e   :  { %v5859_v44 = vadd.f32 %v13443_v3, %v5775_v23  ;;  %v5935_v35 = vmax.f32 %v5858_v52, 0.0 }
 0x610   :  { %v5936_v34 = vmax.f32 %v5859_v44, 0.0 }
 0x611   :  { %v5055_v58 = vpop.f32.mrb[156].mxu1  ;;  %v5610_v25 = vpop.f32.mrb[156].mxu0 }
 0x612   :  { %v13841_v31 = vpack.c.bf16 %v5936_v34, %v5935_v35  ;;  %v13844_v53 = vadd.f32 %v5055_v58, %v14428_v16  ;;  %v5776_v36 = vadd.f32 %v5610_v25, %v13683_v6  ;;  %v8411_v29 = vpop.f32.mrb[157].mxu1  ;;  %v8517_v33 = vpop.f32.mrb[157].mxu0  ;;  %v14430_v6 = vld [vmem:[#allocation47_spill] sm:$0xff] }
 0x613   :  { %v5058_v2 = vpop.f32.mrb[158].mxu1  ;;  %v5613_v15 = vpop.f32.mrb[158].mxu0 }
 0x614   :  { %v5860_v51 = vadd.f32 %v13443_v3, %v5776_v36  ;;  %v13849_v22 = vadd.f32 %v5058_v2, %v14429_v4  ;;  %v5777_v42 = vadd.f32 %v5613_v15, %v13688_v60  ;;  %v8412_v32 = vpop.f32.mrb[159].mxu1  ;;  %v8518_v20 = vpop.f32.mrb[159].mxu0  ;;  %v13860_v60 = vld [vmem:[%s14014_s2] ss:$0 sm:$0xff] }
 0x616   :  { %v5861_v47 = vadd.f32 %v13443_v3, %v5777_v42  ;;  %v5937_v46 = vmax.f32 %v5860_v51, 0.0 }
 0x618   :  { %v5938_v30 = vmax.f32 %v5861_v47, 0.0 }
 0x619   :  { %v5063_v38 = vpop.f32.mrb[160].mxu1  ;;  %v5618_v52 = vpop.f32.mrb[160].mxu0 }
 0x61a   :  { %v13854_v41 = vadd.f32 %v5063_v38, %v14430_v6  ;;  %v5778_v23 = vadd.f32 %v5618_v52, %v13695_v14  ;;  %v8521_v61 = vpop.f32.mrb[161].mxu0  ;;  %v8671_v21 = vpack.c.bf16 %v5938_v30, %v5937_v46  ;;  %v8415_v44 = vpop.f32.mrb[161].mxu1 }
 0x61b   :  { %v5621_v35 = vpop.f32.mrb[162].mxu0  ;;  %v5066_v34 = vpop.f32.mrb[162].mxu1 }
 0x61c   :  { %v5862_v3 = vadd.f32 %v13860_v60, %v5778_v23  ;;  %v5779_v58 = vadd.f32 %v5621_v35, %v13700_v5  ;;  %8672 = vmatprep.subr.bf16.mxu1 %v8671_v21  ;;  %v8522_v25 = vpop.f32.mrb[163].mxu0  ;;  %v8416_v16 = vpop.f32.mrb[163].mxu1 }
 0x61d   :  { %8674 = vmatpush3.bf16.msra.mxu1 %v13757_v62 }
 0x61e   :  { %v5863_v14 = vadd.f32 %v13860_v60, %v5779_v58  ;;  %v5939_v36 = vmax.f32 %v5862_v3, 0.0 }
 0x620   :  { %v5940_v29 = vmax.f32 %v5863_v14, 0.0 }
 0x621   :  { %v5626_v33 = vpop.f32.mrb[164].mxu0 }
 0x622   :  { %v5780_v2 = vadd.f32 %v5626_v33, %v13706_v54  ;;  %v8525_v15 = vpop.f32.mrb[165].mxu0  ;;  %v8675_v51 = vpack.c.bf16 %v5940_v29, %v5939_v36 }
 0x623   :  { %v5629_v4 = vpop.f32.mrb[166].mxu0 }
 0x624   :  { %v5864_v42 = vadd.f32 %v13860_v60, %v5780_v2  ;;  %v5781_v32 = vadd.f32 %v5629_v4, %v13711_v37  ;;  %8676 = vmatprep.subr.bf16.mxu1 %v8675_v51  ;;  %v8526_v5 = vpop.f32.mrb[167].mxu0 }
 0x625   :  { %8678 = vmatpush3.bf16.msra.mxu1 %v13769_v10 }
 0x626   :  { %v5865_v62 = vadd.f32 %v13860_v60, %v5781_v32  ;;  %v5941_v20 = vmax.f32 %v5864_v42, 0.0 }
 0x628   :  { %v5942_v47 = vmax.f32 %v5865_v62, 0.0 }
 0x629   :  { %v5634_v46 = vpop.f32.mrb[168].mxu0 }
 0x62a   :  { %v5782_v30 = vadd.f32 %v5634_v46, %v13717_v18  ;;  %v8529_v38 = vpop.f32.mrb[169].mxu0  ;;  %v8679_v54 = vpack.c.bf16 %v5942_v47, %v5941_v20 }
 0x62b   :  { %v5637_v52 = vpop.f32.mrb[170].mxu0 }
 0x62c   :  { %v5866_v6 = vadd.f32 %v13860_v60, %v5782_v30  ;;  %v5783_v23 = vadd.f32 %v5637_v52, %v13722_v56  ;;  %8680 = vmatprep.subr.bf16.mxu1 %v8679_v54  ;;  %v8530_v37 = vpop.f32.mrb[171].mxu0 }
 0x62d   :  { %8682 = vmatpush3.bf16.msra.mxu1 %v13781_v8 }
 0x62e   :  { %v5867_v10 = vadd.f32 %v13860_v60, %v5783_v23  ;;  %v5943_v61 = vmax.f32 %v5866_v6, 0.0 }
 0x630   :  { %v5944_v21 = vmax.f32 %v5867_v10, 0.0 }
 0x631   :  { %v5642_v44 = vpop.f32.mrb[172].mxu0 }
 0x632   :  { %v5784_v35 = vadd.f32 %v5642_v44, %v13728_v11  ;;  %v8533_v34 = vpop.f32.mrb[173].mxu0  ;;  %v8683_v18 = vpack.c.bf16 %v5944_v21, %v5943_v61 }
 0x633   :  { %v5645_v3 = vpop.f32.mrb[174].mxu0 }
 0x634   :  { %v5868_v58 = vadd.f32 %v13860_v60, %v5784_v35  ;;  %v5785_v25 = vadd.f32 %v5645_v3, %v13733_v45  ;;  %8684 = vmatprep.subr.bf16.mxu1 %v8683_v18  ;;  %v8534_v56 = vpop.f32.mrb[175].mxu0 }
 0x635   :  { %8686 = vmatpush3.bf16.msra.mxu1 %v13793_v24 }
 0x636   :  { %v5869_v8 = vadd.f32 %v13860_v60, %v5785_v25  ;;  %v5945_v16 = vmax.f32 %v5868_v58, 0.0  ;;  %v8781_v25 = vmov 0.0|0.0  }
 0x638   :  { %v5946_v14 = vmax.f32 %v5869_v8, 0.0 }
 0x639   :  { %v5650_v36 = vpop.f32.mrb[176].mxu0 }
 0x63a   :  { %v5786_v29 = vadd.f32 %v5650_v36, %v13741_v55  ;;  %v8537_v33 = vpop.f32.mrb[177].mxu0  ;;  %v8687_v11 = vpack.c.bf16 %v5946_v14, %v5945_v16 }
 0x63b   :  { %v5653_v2 = vpop.f32.mrb[178].mxu0 }
 0x63c   :  { %v5870_v15 = vadd.f32 %v13860_v60, %v5786_v29  ;;  %v5787_v51 = vadd.f32 %v5653_v2, %v13749_v0  ;;  %8688 = vmatprep.subr.bf16.mxu1 %v8687_v11  ;;  %v8538_v45 = vpop.f32.mrb[179].mxu0 }
 0x63d   :  { %8690 = vmatpush3.bf16.msra.mxu1 %v13805_v27 }
 0x63e   :  { %v5871_v24 = vadd.f32 %v13860_v60, %v5787_v51  ;;  %v5947_v4 = vmax.f32 %v5870_v15, 0.0 }
 0x640   :  { %v5948_v42 = vmax.f32 %v5871_v24, 0.0 }
 0x641   :  { %v5658_v32 = vpop.f32.mrb[180].mxu0 }
 0x642   :  { %v5788_v5 = vadd.f32 %v5658_v32, %v13760_v59  ;;  %v8541_v62 = vpop.f32.mrb[181].mxu0  ;;  %v8691_v55 = vpack.c.bf16 %v5948_v42, %v5947_v4 }
 0x643   :  { %v5661_v20 = vpop.f32.mrb[182].mxu0 }
 0x644   :  { %v5872_v47 = vadd.f32 %v13860_v60, %v5788_v5  ;;  %v5789_v46 = vadd.f32 %v5661_v20, %v13765_v48  ;;  %8692 = vmatprep.subr.bf16.mxu1 %v8691_v55  ;;  %v8542_v0 = vpop.f32.mrb[183].mxu0 }
 0x645   :  { %8694 = vmatpush3.bf16.msra.mxu1 %v13817_v39 }
 0x646   :  { %v5873_v27 = vadd.f32 %v13860_v60, %v5789_v46  ;;  %v5949_v30 = vmax.f32 %v5872_v47, 0.0 }
 0x648   :  { %v5950_v38 = vmax.f32 %v5873_v27, 0.0 }
 0x649   :  { %v5666_v54 = vpop.f32.mrb[184].mxu0 }
 0x64a   :  { %v5790_v52 = vadd.f32 %v5666_v54, %v13772_v28  ;;  %v8545_v6 = vpop.f32.mrb[185].mxu0  ;;  %v8695_v59 = vpack.c.bf16 %v5950_v38, %v5949_v30 }
 0x64b   :  { %v5669_v23 = vpop.f32.mrb[186].mxu0 }
 0x64c   :  { %v5874_v37 = vadd.f32 %v13860_v60, %v5790_v52  ;;  %v5791_v10 = vadd.f32 %v5669_v23, %v13777_v13  ;;  %8696 = vmatprep.subr.bf16.mxu1 %v8695_v59  ;;  %v8546_v48 = vpop.f32.mrb[187].mxu0 }
 0x64d   :  { %8698 = vmatpush3.bf16.msra.mxu1 %v13829_v9 }
 0x64e   :  { %v5875_v39 = vadd.f32 %v13860_v60, %v5791_v10  ;;  %v5951_v61 = vmax.f32 %v5874_v37, 0.0 }
 0x650   :  { %v5952_v21 = vmax.f32 %v5875_v39, 0.0 }
 0x651   :  { %v5674_v44 = vpop.f32.mrb[188].mxu0 }
 0x652   :  { %v5792_v35 = vadd.f32 %v5674_v44, %v13784_v49  ;;  %v8549_v34 = vpop.f32.mrb[189].mxu0  ;;  %v8699_v28 = vpack.c.bf16 %v5952_v21, %v5951_v61 }
 0x653   :  { %v5677_v18 = vpop.f32.mrb[190].mxu0 }
 0x654   :  { %v5876_v3 = vadd.f32 %v13860_v60, %v5792_v35  ;;  %v5793_v58 = vadd.f32 %v5677_v18, %v13789_v63  ;;  %8700 = vmatprep.subr.bf16.mxu1 %v8699_v28  ;;  %v8550_v13 = vpop.f32.mrb[191].mxu0 }
 0x655   :  { %8702 = vmatpush3.bf16.msra.mxu1 %v13841_v31 }
 0x656   :  { %v5877_v9 = vadd.f32 %v13860_v60, %v5793_v58  ;;  %8703 = vmatprep.subr.bf16.mxu1 %v8781_v25  ;;  %v5953_v56 = vmax.f32 %v5876_v3, 0.0 }
 0x658   :  { %v5954_v8 = vmax.f32 %v5877_v9, 0.0  ;;  %6140 = vmatmul.mubr.f32.vlgmr.msra.gmra.mrb[166].mxu1 %v13745_v1 }
 0x659   :  { %v5682_v49 = vpop.f32.mrb[192].mxu0  ;;  %8601 = vmatprep.mubr.msk.f32.mxu1 %vm8779_vm2, %v14047_v17 }
 0x65a   :  { %v8704_v16 = vpack.c.bf16 %v5954_v8, %v5953_v56  ;;  %v5794_v63 = vadd.f32 %v5682_v49, %v13796_v7  ;;  %v8553_v14 = vpop.f32.mrb[193].mxu0 }
 0x65b   :  { %v5685_v36 = vpop.f32.mrb[194].mxu0 }
 0x65c   :  { %v5878_v31 = vadd.f32 %v13860_v60, %v5794_v63  ;;  %v5795_v29 = vadd.f32 %v5685_v36, %v13801_v26  ;;  %8705 = vmatpush3.bf16.msra.mxu1 %v8704_v16  ;;  %v8554_v33 = vpop.f32.mrb[195].mxu0  ;;  %v6216_v16 = vld [vmem:[%s14016_s4] sm:$0xff] }
 0x65d   :  { %8706 = vmatprep.subr.bf16.mxu1 %v8781_v25 }
 0x65e   :  { %v5879_v11 = vadd.f32 %v13860_v60, %v5795_v29  ;;  %v5955_v1 = vmax.f32 %v5878_v31, 0.0  ;;  %v6218_v29 = vld [vmem:[%s14016_s4 + $0x10] sm:$0xff] }
 0x660   :  { %v5956_v2 = vmax.f32 %v5879_v11, 0.0  ;;  %v6220_v11 = vld [vmem:[%s14016_s4 + $0x20] sm:$0xff] }
 0x661   :  { %v5690_v15 = vpop.f32.mrb[196].mxu0 }
 0x662   :  { %v8707_v51 = vpack.c.bf16 %v5956_v2, %v5955_v1  ;;  %v5796_v45 = vadd.f32 %v5690_v15, %v13808_v19  ;;  %v8557_v24 = vpop.f32.mrb[197].mxu0  ;;  %v6221_v1 = vld [vmem:[%s14016_s4 + $0x28] sm:$0xff]  ;;  %v6222_v15 = vld [vmem:[%s14016_s4 + $0x30] sm:$0xff] }
 0x663   :  { %v5693_v7 = vpop.f32.mrb[198].mxu0  ;;  %v8728_v2 = vpack.c.bf16 %v6221_v1, %v6220_v11  ;;  %v6225_v24 = vld [vmem:[%s14016_s4 + $0x48] sm:$0xff] }
 0x664   :  { %v5880_v4 = vadd.f32 %v13860_v60, %v5796_v45  ;;  %v5797_v42 = vadd.f32 %v5693_v7, %v13813_v57  ;;  %8708 = vmatpush3.bf16.msra.mxu1 %v8707_v51  ;;  %v8558_v26 = vpop.f32.mrb[199].mxu0  ;;  %v6224_v45 = vld [vmem:[%s14016_s4 + $0x40] sm:$0xff] }
 0x665   :  { %8709 = vmatprep.subr.bf16.mxu1 %v8781_v25  ;;  %v8734_v7 = vpack.c.bf16 %v6225_v24, %v6224_v45 }
 0x666   :  { %v5881_v32 = vadd.f32 %v13860_v60, %v5797_v42  ;;  %v5957_v5 = vmax.f32 %v5880_v4, 0.0  ;;  %v6226_v4 = vld [vmem:[%s14016_s4 + $0x50] sm:$0xff]  ;;  %v6227_v42 = vld [vmem:[%s14016_s4 + $0x58] sm:$0xff] }
 0x667   :  { %v8737_v26 = vpack.c.bf16 %v6227_v42, %v6226_v4 }
 0x668   :  { %v5958_v62 = vmax.f32 %v5881_v32, 0.0 }
 0x669   :  { %v5698_v55 = vpop.f32.mrb[200].mxu0 }
 0x66a   :  { %v8710_v20 = vpack.c.bf16 %v5958_v62, %v5957_v5  ;;  %v5798_v47 = vadd.f32 %v5698_v55, %v13820_v43  ;;  %v8561_v46 = vpop.f32.mrb[201].mxu0  ;;  %v6228_v55 = vld [vmem:[%s14016_s4 + $0x60] sm:$0xff] }
 0x66b   :  { %v5701_v19 = vpop.f32.mrb[202].mxu0  ;;  %v6230_v46 = vld [vmem:[%s14016_s4 + $0x70] sm:$0xff] }
 0x66c   :  { %v5882_v0 = vadd.f32 %v13860_v60, %v5798_v47  ;;  %v5799_v27 = vadd.f32 %v5701_v19, %v13825_v40  ;;  %8711 = vmatpush3.bf16.msra.mxu1 %v8710_v20  ;;  %v8562_v57 = vpop.f32.mrb[203].mxu0  ;;  %v6229_v20 = vld [vmem:[%s14016_s4 + $0x68] sm:$0xff]  ;;  %v6231_v19 = vld [vmem:[%s14016_s4 + $0x78] sm:$0xff] }
 0x66d   :  { %8712 = vmatprep.subr.bf16.mxu1 %v8781_v25  ;;  %v8740_v47 = vpack.c.bf16 %v6229_v20, %v6228_v55 }
 0x66e   :  { %v5883_v30 = vadd.f32 %v13860_v60, %v5799_v27  ;;  %v5959_v38 = vmax.f32 %v5882_v0, 0.0  ;;  %v8743_v0 = vpack.c.bf16 %v6231_v19, %v6230_v46 }
 0x670   :  { %v5960_v54 = vmax.f32 %v5883_v30, 0.0 }
 0x671   :  { %v5706_v52 = vpop.f32.mrb[204].mxu0 }
 0x672   :  { %v8713_v6 = vpack.c.bf16 %v5960_v54, %v5959_v38  ;;  %v5800_v59 = vadd.f32 %v5706_v52, %v13832_v12  ;;  %v8565_v23 = vpop.f32.mrb[205].mxu0 }
 0x673   :  { %v5709_v43 = vpop.f32.mrb[206].mxu0 }
 0x674   :  { %v5884_v37 = vadd.f32 %v13860_v60, %v5800_v59  ;;  %v5801_v10 = vadd.f32 %v5709_v43, %v13837_v50  ;;  %8714 = vmatpush3.bf16.msra.mxu1 %v8713_v6  ;;  %v8566_v40 = vpop.f32.mrb[207].mxu0 }
 0x675   :  { %8715 = vmatprep.subr.bf16.mxu1 %v8781_v25 }
 0x676   :  { %v5885_v48 = vadd.f32 %v13860_v60, %v5801_v10  ;;  %v5961_v39 = vmax.f32 %v5884_v37, 0.0 }
 0x678   :  { %v5962_v61 = vmax.f32 %v5885_v48, 0.0 }
 0x679   :  { %v5714_v21 = vpop.f32.mrb[208].mxu0 }
 0x67a   :  { %v8716_v44 = vpack.c.bf16 %v5962_v61, %v5961_v39  ;;  %v5802_v35 = vadd.f32 %v5714_v21, %v13844_v53  ;;  %v8569_v34 = vpop.f32.mrb[209].mxu0 }
 0x67b   :  { %v5717_v12 = vpop.f32.mrb[210].mxu0 }
 0x67c   :  { %v5886_v28 = vadd.f32 %v13860_v60, %v5802_v35  ;;  %v5803_v18 = vadd.f32 %v5717_v12, %v13849_v22  ;;  %8717 = vmatpush3.bf16.msra.mxu1 %v8716_v44  ;;  %v8570_v50 = vpop.f32.mrb[211].mxu0  ;;  %v6217_v22 = vld [vmem:[%s14016_s4 + $0x8] sm:$0xff] }
 0x67d   :  { %8718 = vmatprep.subr.bf16.mxu1 %v8781_v25  ;;  %v8722_v31 = vpack.c.bf16 %v6217_v22, %v6216_v16 }
 0x67e   :  { %v5887_v3 = vadd.f32 %v13860_v60, %v5803_v18  ;;  %v5963_v58 = vmax.f32 %v5886_v28, 0.0 }
 0x680   :  { %v5964_v13 = vmax.f32 %v5887_v3, 0.0 }
 0x681   :  { %v5722_v9 = vpop.f32.mrb[212].mxu0 }
 0x682   :  { %v8719_v56 = vpack.c.bf16 %v5964_v13, %v5963_v58  ;;  %v5804_v8 = vadd.f32 %v5722_v9, %v13854_v41  ;;  %v8573_v49 = vpop.f32.mrb[213].mxu0  ;;  %v6688_v41 = vld.sshfl [vmem:[%s14015_s3 + $0x8] sm:$0x3 pattern:$0x76325410] }
 0x683   :  { %v5725_v53 = vpop.f32.mrb[214].mxu0 }
 0x684   :  { %v5888_v63 = vadd.f32 %v13860_v60, %v5804_v8  ;;  %8720 = vmatpush3.bf16.msra.mxu1 %v8719_v56  ;;  %v8574_v14 = vpop.f32.mrb[215].mxu0  ;;  %v6219_v60 = vld [vmem:[%s14016_s4 + $0x18] sm:$0xff] }
 0x685   :  { %8599 = vmatprep.subr.mxu1 %v14047_v17  ;;  %v8725_v33 = vpack.c.bf16 %v6219_v60, %v6218_v29 }
 0x686   :  { %v5965_v36 = vmax.f32 %v5888_v63, 0.0 }
 0x688   :  { %8600 = vmatpush3.msk.msra.mxu1 %vm6001_vm3, %v5965_v36 }
 0x689   :  { %8602 = vmatmul.mubr.msk.f32.vlgmr.msra.gmra.mrb[168].mxu1 %vm5998_vm4, %v6688_v41  ;;  %8721 = vmatprep.subr.bf16.mxu1 %v8781_v25 }
 0x68a   :  { %8723 = vmatpush3.bf16.msra.mxu1 %v8722_v31  ;;  %8636 = vmatprep.mubr.msk.f32.mxu1 %vm8779_vm2, %v14047_v17  ;;  %v6223_v17 = vld [vmem:[%s14016_s4 + $0x38] sm:$0xff] }
 0x68b   :  { %8724 = vmatprep.subr.bf16.mxu1 %v8781_v25  ;;  %v8731_v51 = vpack.c.bf16 %v6223_v17, %v6222_v15 }
 0x68e   :  { %8726 = vmatpush3.bf16.msra.mxu1 %v8725_v33 }
 0x68f   :  { %8727 = vmatprep.subr.bf16.mxu1 %v8781_v25 }
 0x692   :  { %8729 = vmatpush3.bf16.msra.mxu1 %v8728_v2 }
 0x693   :  { %8730 = vmatprep.subr.bf16.mxu1 %v8781_v25 }
 0x696   :  { %8732 = vmatpush3.bf16.msra.mxu1 %v8731_v51 }
 0x697   :  { %8733 = vmatprep.subr.bf16.mxu1 %v8781_v25 }
 0x69a   :  { %8735 = vmatpush3.bf16.msra.mxu1 %v8734_v7 }
 0x69b   :  { %8736 = vmatprep.subr.bf16.mxu1 %v8781_v25 }
 0x69e   :  { %8738 = vmatpush3.bf16.msra.mxu1 %v8737_v26 }
 0x69f   :  { %8739 = vmatprep.subr.bf16.mxu1 %v8781_v25 }
 0x6a2   :  { %8741 = vmatpush3.bf16.msra.mxu1 %v8740_v47 }
 0x6a3   :  { %8742 = vmatprep.subr.bf16.mxu1 %v8781_v25 }
 0x6a6   :  { %8744 = vmatpush3.bf16.msra.mxu1 %v8743_v0 }
 0x6ab   :  { %v7084_v32 = vpop.f32.mrb[164].mxu1 }
 0x6ac   :  { %v7085_v5 = vpop.f32.mrb[165].mxu1 }
 0x6ad   :  { %v7086_v62 = vadd.f32 %v7085_v5, %v7084_v32 }
 0x72b   :  { %v7119_v27 = vpop.f32.mrb[166].mxu1 }
 0x72c   :  { %v7120_v57 = vpop.f32.mrb[167].mxu1 }
 0x72d   :  { %v7121_v30 = vadd.f32 %v7120_v57, %v7119_v27 }
 0x72f   :  { %v6142_v38 = vadd.f32 %v7121_v30, %v7086_v62 }
 0x75c   :  { %v6211_v54 = vpop.f32.mrb[168].mxu1 }
 0x75d   :  { %v6212_v52 = vadd.f32 %v6211_v54, %v6142_v38  ;;  %v8603_v6 = vpop.f32.mrb[169].mxu1 }
 0x75f   :  { %6215 = vst [vmem:[#allocation2] sm:$0x3] %v6212_v52  ;;  %8637 = vmatmul.mubr.f32.vlgmr.msra.gmra.mrb[170].mxu1 %v6212_v52 }
 0x760   :  { %8765 = shalt.err (!%p8762_p4)
}
 0x761   :  { %s8766_s18 = scalar_lea.hbm %s14019_s7, 32 }
 0x762   :  { %p8767_p5 = scmp.ne.s32.totalorder %s14019_s7, %s8766_s18  ;;  %p8770_p6 = scmp.lt.u32.totalorder %s8766_s18, %s14019_s7 }
 0x764   :  { %p8772_p7 = pnand %p8770_p6, %p8767_p5 }
 0x766   :  { %8775 = shalt.err (!%p8772_p7)
}
 0x767   :  { %6321 = dma.vmem_to_hbm [thread:$0]  %s6319_s16, 32, %s14019_s7, [#allocation3]   ;;  %v6691_v25 = vld [vmem:[%s14017_s5] ss:$0 sm:$0xff] }
 0x832   :  { %v6305_v59 = vpop.f32.mrb[170].mxu1 }
 0x833   :  { %v6306_v23 = vadd.f32 %v6691_v25, %v6305_v59  ;;  %v8638_v43 = vpop.f32.mrb[171].mxu1 }
 0x835   :  { %6309 = vst [vmem:[%s14018_s6] sm:$0x3] %v6306_v23 }
 0x836   :  { %8776 = dma.done.wait [#allocation3], 32  }
 0x837   :  { %8777 = vsyncadd [#allocation3], 4294967264 }
 0x838   :  { %6327 = vsyncpa [#allocation3], 1 }

</bundles_post_ra>
